<compile_context>
chip_gen: v6e
topology: v6e:2x2x1
jax: 0.10.0
libtpu: 0.0.40
codegen_flags: <defaults>
</compile_context>

<pallas_src>
import functools

import jax
import jax.numpy as jnp
from jax.experimental import pallas as pl
from jax.experimental.pallas import tpu as pltpu

LANE = 128


def _round_up(x, m):
    return ((x + m - 1) // m) * m


def _im2col_3x3(x_nchw):
    """3x3 / pad=1 im2col: (B,C,H,W) -> (B, H*W, 9*C), K ordered tap-major, channel-minor."""
    B, C, H, W = x_nchw.shape
    x = jnp.transpose(x_nchw, (0, 2, 3, 1))                       # NHWC
    xp = jnp.pad(x, ((0, 0), (1, 1), (1, 1), (0, 0)))
    patches = [xp[:, di:di + H, dj:dj + W, :] for di in range(3) for dj in range(3)]
    return jnp.concatenate(patches, axis=-1).reshape(B, H * W, 9 * C)


# --------------------------------------------------------------------------
# Kernel 1: Conv3x3(pad=1) + ReLU + global average pool (row-tiled, fused).
# --------------------------------------------------------------------------
def _conv_gap_kernel(x_ref, w_ref, b_ref, o_ref, *, HW, TL):
    """x_ref: (1, TL, Kp) bf16 im2col row tile; w_ref: (Kp, F) bf16; b_ref: (1, F) f32
       o_ref: (1, 1, F) f32 pooled accumulator for this batch element."""
    l = pl.program_id(1)

    @pl.when(l == 0)
    def _():
        o_ref[...] = jnp.zeros_like(o_ref)

    # one aligned MXU matmul per row tile (no shifted-slice re-layouts)
    y = jnp.dot(x_ref[0], w_ref[...], preferred_element_type=jnp.float32)   # (TL, F)
    y = jnp.maximum(y + b_ref[...], 0.0)                                    # f32 epilogue

    # mask zero-padded im2col rows (they would otherwise contribute relu(bias))
    rows = jax.lax.broadcasted_iota(jnp.int32, (TL, 1), 0) + l * TL
    y = jnp.where(rows < HW, y, 0.0)

    # partial global-average-pool accumulation into the resident output block
    o_ref[0] += jnp.sum(y, axis=0, keepdims=True) * (1.0 / HW)


def conv3x3_gap(x_nchw, conv_w, conv_b, *, row_tile=128):
    """x: (B, C, H, W) f32 -> pooled features (B, F_pad) f32."""
    B, C, H, W = x_nchw.shape
    Kp, F = conv_w.shape
    HW = H * W

    x_col = _im2col_3x3(x_nchw)                                   # (B, HW, 9*C) f32
    tl = min(row_tile, _round_up(HW, 8))
    l_pad = _round_up(HW, tl)
    x_col = jnp.pad(x_col, ((0, 0), (0, l_pad - HW), (0, Kp - 9 * C)))
    x_col = x_col.astype(jnp.bfloat16)       # halve per-sample streamed DMA bytes

    out = pl.pallas_call(
        functools.partial(_conv_gap_kernel, HW=HW, TL=tl),
        out_shape=jax.ShapeDtypeStruct((B, 1, F), jnp.float32),
        grid=(B, l_pad // tl),
        in_specs=[
            pl.BlockSpec((1, tl, Kp), lambda b, l: (b, l, 0)),
            pl.BlockSpec((Kp, F), lambda b, l: (0, 0)),
            pl.BlockSpec((1, F), lambda b, l: (0, 0)),
        ],
        out_specs=pl.BlockSpec((1, 1, F), lambda b, l: (b, 0, 0)),
        compiler_params=pltpu.CompilerParams(
            dimension_semantics=("parallel", "arbitrary")),  # batch across TCs, rows reduced
    )(x_col, conv_w, conv_b)
    return out.reshape(B, F)


# --------------------------------------------------------------------------
# Kernel 2: Attr_Net + concat + Linear(576,2048)+ReLU + fc1-half + fc2-partial,
#           2-way "parallel" grid over fc1's output columns / fc2's K rows.
# --------------------------------------------------------------------------
def _head_kernel(x1f_ref, x2_ref,
                 a0w_ref, a0b_ref, a1w_ref, a1b_ref,
                 lwi_ref, lwa_ref, lb_ref,
                 f1w_ref, f1b_ref, f2w_ref,
                 o_ref):
    bf16, f32 = jnp.bfloat16, jnp.float32

    # Attr_Net: Linear -> Dropout(identity at eval) -> ReLU, twice.
    a = jnp.dot(x2_ref[...].astype(bf16), a0w_ref[...], preferred_element_type=f32)
    a = jnp.maximum(a + a0b_ref[...], 0.0)
    a = jnp.dot(a.astype(bf16), a1w_ref[...], preferred_element_type=f32)
    a = jnp.maximum(a + a1b_ref[...], 0.0)

    # concat(x1f, a) @ lin_w  ==  x1f @ W_img + a @ W_attr  (no concat needed)
    h = jnp.dot(x1f_ref[...].astype(bf16), lwi_ref[...], preferred_element_type=f32)
    h = h + jnp.dot(a.astype(bf16), lwa_ref[...], preferred_element_type=f32)
    h = jnp.maximum(h + lb_ref[...], 0.0)

    # this grid step's half of fc1's output columns, then fc2's matching K rows
    u = jnp.dot(h.astype(bf16), f1w_ref[...], preferred_element_type=f32)
    u = jnp.maximum(u + f1b_ref[...], 0.0)
    y = jnp.dot(u.astype(bf16), f2w_ref[...], preferred_element_type=f32)

    o_ref[0] = y.astype(o_ref.dtype)          # partial logits for this split


def head_fused(x1f, x2p, q, *, n_split=2):
    B, f_pad = x1f.shape
    a_in = x2p.shape[1]
    a_mid, a_out = q["attr1_w"].shape
    lin_n = q["lin_b"].shape[1]
    fc1_k, fc1_n = q["fc1_w"].shape
    nc_pad = q["fc2_w"].shape[1]
    assert fc1_n % n_split == 0
    fn = fc1_n // n_split

    partials = pl.pallas_call(
        _head_kernel,
        out_shape=jax.ShapeDtypeStruct((n_split, B, nc_pad), jnp.float32),
        grid=(n_split,),
        in_specs=[
            pl.BlockSpec((B, f_pad), lambda j: (0, 0)),
            pl.BlockSpec((B, a_in), lambda j: (0, 0)),
            pl.BlockSpec((a_in, a_mid), lambda j: (0, 0)),
            pl.BlockSpec((1, a_mid), lambda j: (0, 0)),
            pl.BlockSpec((a_mid, a_out), lambda j: (0, 0)),
            pl.BlockSpec((1, a_out), lambda j: (0, 0)),
            pl.BlockSpec((f_pad, lin_n), lambda j: (0, 0)),
            pl.BlockSpec((a_out, lin_n), lambda j: (0, 0)),
            pl.BlockSpec((1, lin_n), lambda j: (0, 0)),
            pl.BlockSpec((fc1_k, fn), lambda j: (0, j)),     # fc1 column half (dominant DMA)
            pl.BlockSpec((1, fn), lambda j: (0, j)),
            pl.BlockSpec((fn, nc_pad), lambda j: (j, 0)),    # fc2 matching row half
        ],
        out_specs=pl.BlockSpec((1, B, nc_pad), lambda j: (j, 0, 0)),
        compiler_params=pltpu.CompilerParams(
            dimension_semantics=("parallel",),               # v7x: both TCs take one half
            vmem_limit_bytes=32 * 1024 * 1024),
    )(x1f, x2p,
      q["attr0_w"], q["attr0_b"], q["attr1_w"], q["attr1_b"],
      q["lin_w_img"], q["lin_w_attr"], q["lin_b"],
      q["fc1_w"], q["fc1_b"], q["fc2_w"])
    return partials                                           # (n_split, B, nc_pad)


# --------------------------------------------------------------------------
# Parameter init (PyTorch nn.Linear default) and kernel-ready packing.
# --------------------------------------------------------------------------
def _linear_init(key, fan_in, fan_out):
    kw, kb = jax.random.split(key)
    bound = 1.0 / jnp.sqrt(jnp.float32(fan_in))
    w = jax.random.uniform(kw, (fan_in, fan_out), jnp.float32, -bound, bound)
    b = jax.random.uniform(kb, (fan_out,), jnp.float32, -bound, bound)
    return w, b


def init_params(key, in_ch=3, feat_ch=64, attr_filters=(40, 128, 512), num_classes=5):
    ks = jax.random.split(key, 6)
    p = {}
    # synthetic backbone stand-in: Conv3x3 in_ch->feat_ch, K rows tap-major/channel-minor
    p["conv_w"], p["conv_b"] = _linear_init(ks[0], 9 * in_ch, feat_ch)
    p["attr0_w"], p["attr0_b"] = _linear_init(ks[1], attr_filters[0], attr_filters[1])
    p["attr1_w"], p["attr1_b"] = _linear_init(ks[2], attr_filters[1], attr_filters[2])
    p["lin_w"], p["lin_b"] = _linear_init(ks[3], feat_ch + attr_filters[-1], 2048)
    p["fc1_w"], p["fc1_b"] = _linear_init(ks[4], 2048, 1024)
    p["fc2_w"], p["fc2_b"] = _linear_init(ks[5], 1024, num_classes)
    return p


def _pad_axis(a, axis, size):
    pad = [(0, 0)] * a.ndim
    pad[axis] = (0, size - a.shape[axis])
    return jnp.pad(a, pad)


def pack_params(p, *, in_ch, feat_ch, attr_in, num_classes):
    """Lane/sublane-pad + bf16-cast weights once; biases stay f32 (zero in padded lanes)."""
    feat_pad = _round_up(feat_ch, LANE)        # 64  -> 128
    attr_pad = _round_up(attr_in, LANE)        # 40  -> 128
    nc_pad = _round_up(num_classes, LANE)      # 5   -> 128
    k_pad = _round_up(9 * in_ch, 8)            # 27  -> 32 (im2col contraction dim)
    q = {}
    q["conv_w"] = _pad_axis(_pad_axis(p["conv_w"], 0, k_pad), 1, feat_pad).astype(jnp.bfloat16)
    q["conv_b"] = _pad_axis(p["conv_b"].reshape(1, feat_ch), 1, feat_pad)
    # Attr_Net
    q["attr0_w"] = _pad_axis(p["attr0_w"], 0, attr_pad).astype(jnp.bfloat16)
    q["attr0_b"] = p["attr0_b"].reshape(1, -1)
    q["attr1_w"] = p["attr1_w"].astype(jnp.bfloat16)
    q["attr1_b"] = p["attr1_b"].reshape(1, -1)
    # head: split lin_w into image-feature rows (lane-padded) and attr rows
    q["lin_w_img"] = _pad_axis(p["lin_w"][:feat_ch], 0, feat_pad).astype(jnp.bfloat16)
    q["lin_w_attr"] = p["lin_w"][feat_ch:].astype(jnp.bfloat16)
    q["lin_b"] = p["lin_b"].reshape(1, -1)
    q["fc1_w"] = p["fc1_w"].astype(jnp.bfloat16)
    q["fc1_b"] = p["fc1_b"].reshape(1, -1)
    q["fc2_w"] = _pad_axis(p["fc2_w"], 1, nc_pad).astype(jnp.bfloat16)
    q["fc2_b"] = _pad_axis(p["fc2_b"].reshape(1, num_classes), 1, nc_pad)
    return q


# --------------------------------------------------------------------------
# Forward pass (matches DenseNet_Two.forward at eval time).
# --------------------------------------------------------------------------
@functools.partial(jax.jit, static_argnames=("num_classes",))
def densenet_two_forward(packed, x1, x2, num_classes=5):
    """x1: (B, C_in, H, W) NCHW f32; x2: (B, 40) f32 -> (B, num_classes)."""
    # model.features (synthetic Conv3x3+ReLU) + AdaptiveAvgPool2d(1) + flatten
    x1f = conv3x3_gap(x1, packed["conv_w"], packed["conv_b"])        # (B, 128)
    # attr input lane-padded (zeros; matching padded weight rows are zero)
    k_pad = packed["attr0_w"].shape[0]
    x2p = jnp.pad(x2, ((0, 0), (0, k_pad - x2.shape[1])))
    # Attr_Net + concat + Linear/ReLU/fc1/ReLU/fc2-partials (one launch, split grid)
    partials = head_fused(x1f, x2p, packed)                          # (2, B, 128)
    logits_pad = partials.sum(axis=0) + packed["fc2_b"]              # combine halves + bias
    return logits_pad[:, :num_classes]


# --------------------------------------------------------------------------
# Pure-JAX f32 reference (same synthetic backbone), for a loose parity check.
# --------------------------------------------------------------------------
def reference_forward(p, x1, x2):
    B = x1.shape[0]
    x_col = _im2col_3x3(x1)
    feat = jnp.maximum(jnp.einsum("blk,kf->blf", x_col, p["conv_w"]) + p["conv_b"], 0.0)
    x1f = feat.mean(axis=1)
    a = jnp.maximum(x2 @ p["attr0_w"] + p["attr0_b"], 0.0)
    a = jnp.maximum(a @ p["attr1_w"] + p["attr1_b"], 0.0)
    x = jnp.concatenate([x1f, a], axis=1)
    h = jnp.maximum(x @ p["lin_w"] + p["lin_b"], 0.0)
    u = jnp.maximum(h @ p["fc1_w"] + p["fc1_b"], 0.0)
    return u @ p["fc2_w"] + p["fc2_b"]


# ---------------------------------- main -----------------------------------
if __name__ == "__main__":
    key = jax.random.PRNGKey(0)
    kp, k1, k2 = jax.random.split(key, 3)

    B, C_in, H, W = 2, 3, 16, 16
    feat_ch = 64
    attr_filters = (40, 128, 512)
    num_classes = 5

    params = init_params(kp, in_ch=C_in, feat_ch=feat_ch,
                         attr_filters=attr_filters, num_classes=num_classes)
    packed = pack_params(params, in_ch=C_in, feat_ch=feat_ch,
                         attr_in=attr_filters[0], num_classes=num_classes)

    x1 = jax.random.normal(k1, (B, C_in, H, W), jnp.float32)
    x2 = jax.random.normal(k2, (B, attr_filters[0]), jnp.float32)

    out = densenet_two_forward(packed, x1, x2, num_classes=num_classes)
    out = jax.block_until_ready(out)
    assert out.shape == (B, num_classes), out.shape
    assert bool(jnp.all(jnp.isfinite(out)))

    ref = reference_forward(params, x1, x2)
    assert bool(jnp.allclose(out, ref, rtol=5e-2, atol=1e-2)), (out, ref)

    print("KERNEL_OK")
</pallas_src>

<mosaic_0001>
module attributes {stable_mosaic.version = 11 : i64} {
  func.func @_head_kernel(%arg0: i32, %arg1: memref<2x128xf32, #tpu.memory_space<vmem>>, %arg2: memref<2x128xf32, #tpu.memory_space<vmem>>, %arg3: memref<128x128xbf16, #tpu.memory_space<vmem>>, %arg4: memref<1x128xf32, #tpu.memory_space<vmem>>, %arg5: memref<128x512xbf16, #tpu.memory_space<vmem>>, %arg6: memref<1x512xf32, #tpu.memory_space<vmem>>, %arg7: memref<128x2048xbf16, #tpu.memory_space<vmem>>, %arg8: memref<512x2048xbf16, #tpu.memory_space<vmem>>, %arg9: memref<1x2048xf32, #tpu.memory_space<vmem>>, %arg10: memref<2048x512xbf16, #tpu.memory_space<vmem>>, %arg11: memref<1x512xf32, #tpu.memory_space<vmem>>, %arg12: memref<512x128xbf16, #tpu.memory_space<vmem>>, %arg13: memref<1x2x128xf32, #tpu.memory_space<vmem>>) attributes {dimension_semantics = [#tpu.dimension_semantics<parallel>], iteration_bounds = array<i64: 2>, scalar_prefetch = 0 : i64, scratch_operands = 0 : i64, tpu.core_type = #tpu.core_type<tc>, window_params = [{pipeline_mode = #tpu.pipeline_mode<synchronous>, transform_indices = @transform_0, window_bounds = array<i64: 2, 128>}, {pipeline_mode = #tpu.pipeline_mode<synchronous>, transform_indices = @transform_1, window_bounds = array<i64: 2, 128>}, {pipeline_mode = #tpu.pipeline_mode<synchronous>, transform_indices = @transform_2, window_bounds = array<i64: 128, 128>}, {pipeline_mode = #tpu.pipeline_mode<synchronous>, transform_indices = @transform_3, window_bounds = array<i64: 1, 128>}, {pipeline_mode = #tpu.pipeline_mode<synchronous>, transform_indices = @transform_4, window_bounds = array<i64: 128, 512>}, {pipeline_mode = #tpu.pipeline_mode<synchronous>, transform_indices = @transform_5, window_bounds = array<i64: 1, 512>}, {pipeline_mode = #tpu.pipeline_mode<synchronous>, transform_indices = @transform_6, window_bounds = array<i64: 128, 2048>}, {pipeline_mode = #tpu.pipeline_mode<synchronous>, transform_indices = @transform_7, window_bounds = array<i64: 512, 2048>}, {pipeline_mode = #tpu.pipeline_mode<synchronous>, transform_indices = @transform_8, window_bounds = array<i64: 1, 2048>}, {transform_indices = @transform_9, window_bounds = array<i64: 2048, 512>}, {transform_indices = @transform_10, window_bounds = array<i64: 1, 512>}, {transform_indices = @transform_11, window_bounds = array<i64: 512, 128>}, {transform_indices = @transform_12, window_bounds = array<i64: 1, 2, 128>}]} {
    %c0 = arith.constant 0 : index
    %c0_0 = arith.constant 0 : index
    %0 = vector.load %arg2[%c0, %c0_0] : memref<2x128xf32, #tpu.memory_space<vmem>>, vector<2x128xf32>
    %1 = arith.truncf %0 : vector<2x128xf32> to vector<2x128xbf16>
    %c0_1 = arith.constant 0 : index
    %c0_2 = arith.constant 0 : index
    %2 = vector.load %arg3[%c0_1, %c0_2] : memref<128x128xbf16, #tpu.memory_space<vmem>>, vector<128x128xbf16>
    %cst = arith.constant dense<0.000000e+00> : vector<2x128xf32>
    %3 = tpu.matmul %1, %2, %cst {dimension_numbers = #tpu.dot_dimension_numbers<[1], [0], [0], [1], [0, 0, 1, 1], [], []>} : vector<2x128xbf16>, vector<128x128xbf16>, vector<2x128xf32> -> vector<2x128xf32>
    %c0_3 = arith.constant 0 : index
    %c0_4 = arith.constant 0 : index
    %4 = vector.load %arg4[%c0_3, %c0_4] : memref<1x128xf32, #tpu.memory_space<vmem>>, vector<1x128xf32>
    %5 = vector.broadcast %4 : vector<1x128xf32> to vector<2x128xf32>
    %6 = arith.addf %3, %5 : vector<2x128xf32>
    %cst_5 = arith.constant 0.000000e+00 : f32
    %7 = vector.broadcast %cst_5 : f32 to vector<2x128xf32>
    %8 = arith.maximumf %6, %7 : vector<2x128xf32>
    %9 = arith.truncf %8 : vector<2x128xf32> to vector<2x128xbf16>
    %c0_6 = arith.constant 0 : index
    %c0_7 = arith.constant 0 : index
    %10 = vector.load %arg5[%c0_6, %c0_7] : memref<128x512xbf16, #tpu.memory_space<vmem>>, vector<128x512xbf16>
    %cst_8 = arith.constant dense<0.000000e+00> : vector<2x512xf32>
    %11 = tpu.matmul %9, %10, %cst_8 {dimension_numbers = #tpu.dot_dimension_numbers<[1], [0], [0], [1], [0, 0, 1, 1], [], []>} : vector<2x128xbf16>, vector<128x512xbf16>, vector<2x512xf32> -> vector<2x512xf32>
    %c0_9 = arith.constant 0 : index
    %c0_10 = arith.constant 0 : index
    %12 = vector.load %arg6[%c0_9, %c0_10] : memref<1x512xf32, #tpu.memory_space<vmem>>, vector<1x512xf32>
    %13 = vector.broadcast %12 : vector<1x512xf32> to vector<2x512xf32>
    %14 = arith.addf %11, %13 : vector<2x512xf32>
    %cst_11 = arith.constant 0.000000e+00 : f32
    %15 = vector.broadcast %cst_11 : f32 to vector<2x512xf32>
    %16 = arith.maximumf %14, %15 : vector<2x512xf32>
    %c0_12 = arith.constant 0 : index
    %c0_13 = arith.constant 0 : index
    %17 = vector.load %arg1[%c0_12, %c0_13] : memref<2x128xf32, #tpu.memory_space<vmem>>, vector<2x128xf32>
    %18 = arith.truncf %17 : vector<2x128xf32> to vector<2x128xbf16>
    %c0_14 = arith.constant 0 : index
    %c0_15 = arith.constant 0 : index
    %19 = vector.load %arg7[%c0_14, %c0_15] : memref<128x2048xbf16, #tpu.memory_space<vmem>>, vector<128x2048xbf16>
    %cst_16 = arith.constant dense<0.000000e+00> : vector<2x2048xf32>
    %20 = tpu.matmul %18, %19, %cst_16 {dimension_numbers = #tpu.dot_dimension_numbers<[1], [0], [0], [1], [0, 0, 1, 1], [], []>} : vector<2x128xbf16>, vector<128x2048xbf16>, vector<2x2048xf32> -> vector<2x2048xf32>
    %21 = arith.truncf %16 : vector<2x512xf32> to vector<2x512xbf16>
    %c0_17 = arith.constant 0 : index
    %c0_18 = arith.constant 0 : index
    %22 = vector.load %arg8[%c0_17, %c0_18] : memref<512x2048xbf16, #tpu.memory_space<vmem>>, vector<512x2048xbf16>
    %cst_19 = arith.constant dense<0.000000e+00> : vector<2x2048xf32>
    %23 = tpu.matmul %21, %22, %cst_19 {dimension_numbers = #tpu.dot_dimension_numbers<[1], [0], [0], [1], [0, 0, 1, 1], [], []>} : vector<2x512xbf16>, vector<512x2048xbf16>, vector<2x2048xf32> -> vector<2x2048xf32>
    %24 = arith.addf %20, %23 : vector<2x2048xf32>
    %c0_20 = arith.constant 0 : index
    %c0_21 = arith.constant 0 : index
    %25 = vector.load %arg9[%c0_20, %c0_21] : memref<1x2048xf32, #tpu.memory_space<vmem>>, vector<1x2048xf32>
    %26 = vector.broadcast %25 : vector<1x2048xf32> to vector<2x2048xf32>
    %27 = arith.addf %24, %26 : vector<2x2048xf32>
    %cst_22 = arith.constant 0.000000e+00 : f32
    %28 = vector.broadcast %cst_22 : f32 to vector<2x2048xf32>
    %29 = arith.maximumf %27, %28 : vector<2x2048xf32>
    %30 = arith.truncf %29 : vector<2x2048xf32> to vector<2x2048xbf16>
    %c0_23 = arith.constant 0 : index
    %c0_24 = arith.constant 0 : index
    %31 = vector.load %arg10[%c0_23, %c0_24] : memref<2048x512xbf16, #tpu.memory_space<vmem>>, vector<2048x512xbf16>
    %cst_25 = arith.constant dense<0.000000e+00> : vector<2x512xf32>
    %32 = tpu.matmul %30, %31, %cst_25 {dimension_numbers = #tpu.dot_dimension_numbers<[1], [0], [0], [1], [0, 0, 1, 1], [], []>} : vector<2x2048xbf16>, vector<2048x512xbf16>, vector<2x512xf32> -> vector<2x512xf32>
    %c0_26 = arith.constant 0 : index
    %c0_27 = arith.constant 0 : index
    %33 = vector.load %arg11[%c0_26, %c0_27] : memref<1x512xf32, #tpu.memory_space<vmem>>, vector<1x512xf32>
    %34 = vector.broadcast %33 : vector<1x512xf32> to vector<2x512xf32>
    %35 = arith.addf %32, %34 : vector<2x512xf32>
    %cst_28 = arith.constant 0.000000e+00 : f32
    %36 = vector.broadcast %cst_28 : f32 to vector<2x512xf32>
    %37 = arith.maximumf %35, %36 : vector<2x512xf32>
    %38 = arith.truncf %37 : vector<2x512xf32> to vector<2x512xbf16>
    %c0_29 = arith.constant 0 : index
    %c0_30 = arith.constant 0 : index
    %39 = vector.load %arg12[%c0_29, %c0_30] : memref<512x128xbf16, #tpu.memory_space<vmem>>, vector<512x128xbf16>
    %cst_31 = arith.constant dense<0.000000e+00> : vector<2x128xf32>
    %40 = tpu.matmul %38, %39, %cst_31 {dimension_numbers = #tpu.dot_dimension_numbers<[1], [0], [0], [1], [0, 0, 1, 1], [], []>} : vector<2x512xbf16>, vector<512x128xbf16>, vector<2x128xf32> -> vector<2x128xf32>
    %c0_32 = arith.constant 0 : index
    %c0_33 = arith.constant 0 : index
    %c0_34 = arith.constant 0 : index
    %41 = vector.load %arg13[%c0_32, %c0_33, %c0_34] : memref<1x2x128xf32, #tpu.memory_space<vmem>>, vector<1x2x128xf32>
    %42 = vector.shape_cast %41 : vector<1x2x128xf32> to vector<2x128xf32>
    %43 = vector.shape_cast %40 : vector<2x128xf32> to vector<1x2x128xf32>
    tpu.vector_store %arg13[%c0_32, %c0_33, %c0_34], %43 {strides = array<i32>} : memref<1x2x128xf32, #tpu.memory_space<vmem>>, vector<1x2x128xf32>,
    return
  }
  func.func @transform_0(%arg0: i32) -> (i32, i32) {
    %c0_i32 = arith.constant 0 : i32
    %c0_i32_0 = arith.constant 0 : i32
    %c0_i32_1 = arith.constant 0 : i32
    return %c0_i32, %c0_i32_0 : i32, i32
  }
  func.func @transform_1(%arg0: i32) -> (i32, i32) {
    %c0_i32 = arith.constant 0 : i32
    %c0_i32_0 = arith.constant 0 : i32
    %c0_i32_1 = arith.constant 0 : i32
    return %c0_i32, %c0_i32_0 : i32, i32
  }
  func.func @transform_2(%arg0: i32) -> (i32, i32) {
    %c0_i32 = arith.constant 0 : i32
    %c0_i32_0 = arith.constant 0 : i32
    %c0_i32_1 = arith.constant 0 : i32
    return %c0_i32, %c0_i32_0 : i32, i32
  }
  func.func @transform_3(%arg0: i32) -> (i32, i32) {
    %c0_i32 = arith.constant 0 : i32
    %c0_i32_0 = arith.constant 0 : i32
    %c0_i32_1 = arith.constant 0 : i32
    return %c0_i32, %c0_i32_0 : i32, i32
  }
  func.func @transform_4(%arg0: i32) -> (i32, i32) {
    %c0_i32 = arith.constant 0 : i32
    %c0_i32_0 = arith.constant 0 : i32
    %c0_i32_1 = arith.constant 0 : i32
    return %c0_i32, %c0_i32_0 : i32, i32
  }
  func.func @transform_5(%arg0: i32) -> (i32, i32) {
    %c0_i32 = arith.constant 0 : i32
    %c0_i32_0 = arith.constant 0 : i32
    %c0_i32_1 = arith.constant 0 : i32
    return %c0_i32, %c0_i32_0 : i32, i32
  }
  func.func @transform_6(%arg0: i32) -> (i32, i32) {
    %c0_i32 = arith.constant 0 : i32
    %c0_i32_0 = arith.constant 0 : i32
    %c0_i32_1 = arith.constant 0 : i32
    return %c0_i32, %c0_i32_0 : i32, i32
  }
  func.func @transform_7(%arg0: i32) -> (i32, i32) {
    %c0_i32 = arith.constant 0 : i32
    %c0_i32_0 = arith.constant 0 : i32
    %c0_i32_1 = arith.constant 0 : i32
    return %c0_i32, %c0_i32_0 : i32, i32
  }
  func.func @transform_8(%arg0: i32) -> (i32, i32) {
    %c0_i32 = arith.constant 0 : i32
    %c0_i32_0 = arith.constant 0 : i32
    %c0_i32_1 = arith.constant 0 : i32
    return %c0_i32, %c0_i32_0 : i32, i32
  }
  func.func @transform_9(%arg0: i32) -> (i32, i32) {
    %c0_i32 = arith.constant 0 : i32
    %c0_i32_0 = arith.constant 0 : i32
    return %c0_i32, %arg0 : i32, i32
  }
  func.func @transform_10(%arg0: i32) -> (i32, i32) {
    %c0_i32 = arith.constant 0 : i32
    %c0_i32_0 = arith.constant 0 : i32
    return %c0_i32, %arg0 : i32, i32
  }
  func.func @transform_11(%arg0: i32) -> (i32, i32) {
    %c0_i32 = arith.constant 0 : i32
    %c0_i32_0 = arith.constant 0 : i32
    return %arg0, %c0_i32 : i32, i32
  }
  func.func @transform_12(%arg0: i32) -> (i32, i32, i32) {
    %c0_i32 = arith.constant 0 : i32
    %c0_i32_0 = arith.constant 0 : i32
    %c0_i32_1 = arith.constant 0 : i32
    return %arg0, %c0_i32, %c0_i32_0 : i32, i32, i32
  }
}

module attributes {stable_mosaic.version = 11 : i64} {
  func.func @_conv_gap_kernel(%arg0: i32, %arg1: i32, %arg2: memref<1x128x32xbf16, #tpu.memory_space<vmem>>, %arg3: memref<32x128xbf16, #tpu.memory_space<vmem>>, %arg4: memref<1x128xf32, #tpu.memory_space<vmem>>, %arg5: memref<1x1x128xf32, #tpu.memory_space<vmem>>) attributes {dimension_semantics = [#tpu.dimension_semantics<parallel>, #tpu.dimension_semantics<arbitrary>], iteration_bounds = array<i64: 2, 2>, scalar_prefetch = 0 : i64, scratch_operands = 0 : i64, tpu.core_type = #tpu.core_type<tc>, window_params = [{transform_indices = @transform_0, window_bounds = array<i64: 1, 128, 32>}, {pipeline_mode = #tpu.pipeline_mode<synchronous>, transform_indices = @transform_1, window_bounds = array<i64: 32, 128>}, {pipeline_mode = #tpu.pipeline_mode<synchronous>, transform_indices = @transform_2, window_bounds = array<i64: 1, 128>}, {transform_indices = @transform_3, window_bounds = array<i64: 1, 1, 128>}]} {
    %c0_i32 = arith.constant 0 : i32
    %0 = arith.cmpi eq, %arg1, %c0_i32 : i32
    %1 = arith.extui %0 : i1 to i32
    %c0_i32_0 = arith.constant 0 : i32
    %2 = arith.cmpi ne, %1, %c0_i32_0 : i32
    scf.if %2 {
      %cst_17 = arith.constant 0.000000e+00 : f32
      %32 = vector.broadcast %cst_17 : f32 to vector<1x1x128xf32>
      %c0_18 = arith.constant 0 : index
      %c0_19 = arith.constant 0 : index
      %c0_20 = arith.constant 0 : index
      %33 = vector.load %arg5[%c0_18, %c0_19, %c0_20] : memref<1x1x128xf32, #tpu.memory_space<vmem>>, vector<1x1x128xf32>
      tpu.vector_store %arg5[%c0_18, %c0_19, %c0_20], %32 {strides = array<i32>} : memref<1x1x128xf32, #tpu.memory_space<vmem>>, vector<1x1x128xf32>,
    } else {
    }
    %c0 = arith.constant 0 : index
    %c0_1 = arith.constant 0 : index
    %c0_2 = arith.constant 0 : index
    %3 = vector.load %arg2[%c0, %c0_1, %c0_2] : memref<1x128x32xbf16, #tpu.memory_space<vmem>>, vector<1x128x32xbf16>
    %4 = vector.shape_cast %3 : vector<1x128x32xbf16> to vector<128x32xbf16>
    %c0_3 = arith.constant 0 : index
    %c0_4 = arith.constant 0 : index
    %5 = vector.load %arg3[%c0_3, %c0_4] : memref<32x128xbf16, #tpu.memory_space<vmem>>, vector<32x128xbf16>
    %cst = arith.constant dense<0.000000e+00> : vector<128x128xf32>
    %6 = tpu.matmul %4, %5, %cst {dimension_numbers = #tpu.dot_dimension_numbers<[1], [0], [0], [1], [0, 0, 1, 1], [], []>} : vector<128x32xbf16>, vector<32x128xbf16>, vector<128x128xf32> -> vector<128x128xf32>
    %c0_5 = arith.constant 0 : index
    %c0_6 = arith.constant 0 : index
    %7 = vector.load %arg4[%c0_5, %c0_6] : memref<1x128xf32, #tpu.memory_space<vmem>>, vector<1x128xf32>
    %8 = vector.broadcast %7 : vector<1x128xf32> to vector<128x128xf32>
    %9 = arith.addf %6, %8 : vector<128x128xf32>
    %cst_7 = arith.constant 0.000000e+00 : f32
    %10 = vector.broadcast %cst_7 : f32 to vector<128x128xf32>
    %11 = arith.maximumf %9, %10 : vector<128x128xf32>
    %12 = tpu.iota {dimensions = array<i32: 0>} : vector<128x1xi32>
    %c128_i32 = arith.constant 128 : i32
    %13 = arith.muli %arg1, %c128_i32 : i32
    %14 = vector.broadcast %13 : i32 to vector<128x1xi32>
    %15 = arith.addi %12, %14 : vector<128x1xi32>
    %c256_i32 = arith.constant 256 : i32
    %16 = vector.broadcast %c256_i32 : i32 to vector<128x1xi32>
    %17 = arith.cmpi slt, %15, %16 : vector<128x1xi32>
    %cst_8 = arith.constant 0.000000e+00 : f32
    %18 = vector.shape_cast %17 : vector<128x1xi1> to vector<128x1xi1>
    %19 = vector.broadcast %18 : vector<128x1xi1> to vector<128x128xi1>
    %20 = vector.broadcast %cst_8 : f32 to vector<128x128xf32>
    %21 = arith.select %19, %11, %20 : vector<128x128xi1>, vector<128x128xf32>
    %c0_9 = arith.constant 0 : index
    %c0_10 = arith.constant 0 : index
    %c0_11 = arith.constant 0 : index
    %22 = vector.load %arg5[%c0_9, %c0_10, %c0_11] : memref<1x1x128xf32, #tpu.memory_space<vmem>>, vector<1x1x128xf32>
    %23 = vector.shape_cast %22 : vector<1x1x128xf32> to vector<1x128xf32>
    %cst_12 = arith.constant dense<0.000000e+00> : vector<128xf32>
    %24 = vector.multi_reduction <add>, %21, %cst_12 [0] : vector<128x128xf32> to vector<128xf32>
    %25 = vector.shape_cast %24 : vector<128xf32> to vector<1x128xf32>
    %cst_13 = arith.constant 3.906250e-03 : f32
    %26 = vector.broadcast %cst_13 : f32 to vector<1x128xf32>
    %27 = arith.mulf %25, %26 : vector<1x128xf32>
    %28 = arith.addf %23, %27 : vector<1x128xf32>
    %c0_14 = arith.constant 0 : index
    %c0_15 = arith.constant 0 : index
    %c0_16 = arith.constant 0 : index
    %29 = vector.load %arg5[%c0_14, %c0_15, %c0_16] : memref<1x1x128xf32, #tpu.memory_space<vmem>>, vector<1x1x128xf32>
    %30 = vector.shape_cast %29 : vector<1x1x128xf32> to vector<1x128xf32>
    %31 = vector.shape_cast %28 : vector<1x128xf32> to vector<1x1x128xf32>
    tpu.vector_store %arg5[%c0_14, %c0_15, %c0_16], %31 {strides = array<i32>} : memref<1x1x128xf32, #tpu.memory_space<vmem>>, vector<1x1x128xf32>,
    return
  }
  func.func @transform_0(%arg0: i32, %arg1: i32) -> (i32, i32, i32) {
    %c0_i32 = arith.constant 0 : i32
    %c0_i32_0 = arith.constant 0 : i32
    return %arg0, %arg1, %c0_i32 : i32, i32, i32
  }
  func.func @transform_1(%arg0: i32, %arg1: i32) -> (i32, i32) {
    %c0_i32 = arith.constant 0 : i32
    %c0_i32_0 = arith.constant 0 : i32
    %c0_i32_1 = arith.constant 0 : i32
    return %c0_i32, %c0_i32_0 : i32, i32
  }
  func.func @transform_2(%arg0: i32, %arg1: i32) -> (i32, i32) {
    %c0_i32 = arith.constant 0 : i32
    %c0_i32_0 = arith.constant 0 : i32
    %c0_i32_1 = arith.constant 0 : i32
    return %c0_i32, %c0_i32_0 : i32, i32
  }
  func.func @transform_3(%arg0: i32, %arg1: i32) -> (i32, i32, i32) {
    %c0_i32 = arith.constant 0 : i32
    %c0_i32_0 = arith.constant 0 : i32
    %c0_i32_1 = arith.constant 0 : i32
    return %arg0, %c0_i32, %c0_i32_0 : i32, i32, i32
  }
}

</mosaic_0001>

<bundles_post_ra>
// kernel: densenet_two_forward.2
= control target key start
LH: loop header
LB: loop body
LE: loop exit
PB: predicated region body
PF: predicated region fallthrough
CT: control target
= control target key end

     0   :  { %8 = vsyncpa [#allocation3], 0  ;;  %s1106_s0 = inlined_call_operand.vmem [shape: bf16[2,256,32], index: 0, kind: input, shape index: {}]   ;;  %s1107_s1 = inlined_call_operand.hbm [shape: bf16[32,128], index: 1, kind: input, shape index: {}]   ;;  %s1108_s2 = inlined_call_operand.hbm [shape: f32[1,128], index: 2, kind: input, shape index: {}]   ;;  %s1109_s3 = inlined_call_operand.vmem [shape: f32[2,1,128], index: 3, kind: output, shape index: {}]  }
   0x1   :  { %9 = vsyncpa [#allocation5], 0  ;;  %s925_s12 = smov 0   ;;  %s927_s13 = smov 0  }
   0x2   :  { %s929_s14 = smov 0   ;;  %s931_s15 = smov 0  }
   0x3   :  { %s933_s16 = smov 0  }
   0x4 LB: > { %s657_s17 = sadd.s32 4294967295, %s898_s16   ;;  %s24_s18 = sadd.s32 1, %s890_s14  ;;  %s898_s16 = sphi %s933_s16, %s15_s16   ;;  %s894_s15 = sphi %s931_s15, %s1116_s15   ;;  %s890_s14 = sphi %s929_s14, %s1115_s14   ;;  %s886_s13 = sphi %s927_s13, %s1114_s13   ;;  %s882_s12 = sphi %s925_s12, %s1113_s12  }
   0x5   : > { %p25_p0 = scmp.ge.s32.totalorder %s24_s18, 2  ;;  %s27_s19 = sadd.s32 1, %s894_s15 }
   0x6   : > { %p659_p1 = scmp.ge.s32.totalorder %s898_s16, 1  ;;  %p128_p2 = scmp.lt.s32.totalorder %s898_s16, 5 }
   0x7   : > { %s1118_s18 = smov (%p25_p0, %s24_s18), 0  ;;  %s1120_s19 = smov (!%p25_p0, %s27_s19), %s894_s15 }
   0x8   : > { %p958_p3 = pnand %p659_p1, %p128_p2  ;;  %p29_p4 = scmp.ge.s32.totalorder %s1120_s19, 2 }
   0x9   : > { %p962_p5 = scmp.eq.s32.totalorder %s657_s17, 0  ;;  %s900_s22 = smov [#allocation2]  }
   0xa   : > { %p734_p6 = pneg %p958_p3  ;;  %s1122_s19 = smov (%p29_p4, %s1120_s19), 0 }
   0xb   : > { %s140_s23 = sshll.u32 %s900_s22, 4  ;;  %s141_s23 = int_to_ptr.vmem [resolvable:$true] %s140_s23 }
   0xc   : > { %p972_p7 = pnand %p962_p5, %p734_p6  ;;  %s811_s25 = scalar_lea.vmem %s141_s23, 256 }
   0xd   : > { %p812_p9 = scmp.ne.s32.totalorder %s141_s23, %s811_s25  ;;  %p819_p12 = scmp.lt.s32.totalorder %s141_s23, %s141_s23 }
   0xe   : > { %p802_p8 = pneg %p972_p7  ;;  %p820_p13 = scmp.lt.s32.totalorder %s811_s25, %s811_s25 }
  0x10   : > { %p814_p10 = pnand %p812_p9, %p802_p8  ;;  %p821_p0 = por %p820_p13, %p819_p12 }
  0x12   : > { %p815_p11 = pneg %p814_p10 }
  0x14   : > { %p822_p1 = pnand %p821_p0, %p815_p11 }
  0x16   : > { %825 = shalt.err (!%p822_p1)
}
  0x17   : > { %s901_s26 = smov 64   ;;  %s902_s27 = smov 4  }
  0x18   : > { %737 = dma.hbm_to_vmem [thread:$0]  (!%p972_p7), %s1107_s1, 256, %s141_s23, [#allocation3], %s901_s26, %s901_s26, %s902_s27  }
  0x19   : > { %s903_s30 = smov [#allocation4]  }
  0x1a   : > { %s154_s4 = sshll.u32 %s903_s30, 4  ;;  %s155_s4 = int_to_ptr.vmem [resolvable:$true] %s154_s4 }
  0x1b   : > { %s837_s5 = scalar_lea.vmem %s155_s4, 16  ;;  %s844_s6 = scalar_lea.vmem %s155_s4, 32 }
  0x1c   : > { %p838_p2 = scmp.ne.s32.totalorder %s155_s4, %s837_s5  ;;  %p845_p9 = scmp.lt.s32.totalorder %s155_s4, %s155_s4 }
  0x1d   : > { %p846_p10 = scmp.lt.s32.totalorder %s844_s6, %s837_s5 }
  0x1e   : > { %p840_p4 = pnand %p838_p2, %p802_p8 }
  0x1f   : > { %p847_p11 = por %p846_p10, %p845_p9 }
  0x20   : > { %p841_p6 = pneg %p840_p4 }
  0x22   : > { %p848_p12 = pnand %p847_p11, %p841_p6 }
  0x24   : > { %851 = shalt.err (!%p848_p12)
}
  0x25   : > { %740 = dma.hbm_to_vmem [thread:$0]  (!%p972_p7), %s1108_s2, 16, %s155_s4, [#allocation5]  }
  0x26   : > { %180 = sbr.rel (%p958_p3) target bundleno = 318 (0x13e), region = 32 }
  0x2b   : > { %873 = dma.done.wait (%p962_p5), [#allocation3], 256  }
  0x2c   : > { %875 = vsyncadd (%p962_p5), [#allocation3], 4294967040 }
  0x2d   : > { %877 = dma.done.wait (%p962_p5), [#allocation5], 16  }
  0x2e   : > { %879 = vsyncadd (%p962_p5), [#allocation5], 4294967280  ;;  %s666_s9 = sshll.u32 %s882_s12, 4  ;;  %p211_p7 = scmp.lt.s32.totalorder %s886_s13, 1 }
  0x2f   : > { %p213_p8 = scmp.lt.s32.totalorder %s666_s9, 31  ;;  %p669_p3 = scmp.ne.s32.totalorder %s882_s12, 0 }
  0x30   : > { %s1124_s13 = smov (!%p211_p7, %s886_s13), 1 }
  0x31   : > { %s1126_s9 = smov (!%p213_p8, %s666_s9), 31  ;;  %s667_s10 = sshll.u32 %s1124_s13, 5 }
  0x32   : > { %s1010_s20 = scalar_lea.vmem %s1109_s3, %s1124_s13  ;;  %s216_s22 = sadd.s32 %s667_s10, %s1126_s9 }
  0x33   : > { %s668_s23 = sshll.u32 %s216_s22, 2  ;;  %227 = sbr.rel (%p669_p3) target bundleno = 58 (0x3a), region = 44 }
  0x34   : > { %s218_s21 = scalar_lea.vmem %s1106_s0, %s668_s23 }
  0x38   : > { %v904_v0 = vmov 0.0  }
  0x39   : > { %228 = vst [vmem:[%s1010_s20] sm:$0x1] %v904_v0 }
  0x3a PF: > { %v790_v1 = vld [vmem:[#allocation2 + $0x8] sm:$0xff]   ;;  %v791_v2 = vld [vmem:[#allocation2] sm:$0xff]   ;;  %vm308_vm0 = vcmask 261120   ;;  %v794_v5 = vld [vmem:[%s218_s21 + $0x10] sm:$0xff]   ;;  %v446_v11 = vlaneseq  ;;  %s689_s13 = sshll.u32 %s882_s12, 7 }
  0x3b   : > { %702 = vmatprep.subr.bf16.mxu0 %v790_v1  ;;  %v792_v3 = vld [vmem:[%s218_s21] sm:$0xff]   ;;  %722 = vmatprep.subr.bf16.mxu1 %v790_v1  ;;  %v793_v4 = vld [vmem:[%s218_s21 + $0x8] sm:$0xff]   ;;  %v798_v8 = vld [vmem:[%s218_s21 + $0x30] sm:$0xff]   ;;  %v1034_v20 = vstv %s689_s13 }
  0x3c   : > { %703 = vmatpush3.bf16.msra.mxu0 %v790_v1  ;;  %724 = vmatpush3.bf16.msra.mxu1 %v790_v1  ;;  %v796_v6 = vld [vmem:[%s218_s21 + $0x20] sm:$0xff]   ;;  %v797_v7 = vld [vmem:[%s218_s21 + $0x28] sm:$0xff]   ;;  %v795_v9 = vld [vmem:[%s218_s21 + $0x18] sm:$0xff]   ;;  %v1025_v12 = vshrl.u32 %v446_v11, 7 }
  0x3d   : > { %704 = vmatprep.subr.bf16.mxu0 %v791_v2  ;;  %706 = vmatprep.mubr.msk.bf16.mxu0 %vm308_vm0, %v792_v3  ;;  %v799_v10 = vld [vmem:[%s218_s21 + $0x38] sm:$0xff]   ;;  %v1031_v16 = vld [vmem:[#allocation4] ss:$0 sm:$0xff] }
  0x3e   : > { %723 = vmatprep.subr.bf16.mxu1 %v791_v2  ;;  %714 = vmatprep.mubr.msk.bf16.mxu1 %vm308_vm0, %v796_v6  ;;  %v448_v14 = vadd.s32 8, %v1025_v12  ;;  %v449_v17 = vadd.s32 16, %v1025_v12  ;;  %v465_v22 = vadd.s32 %v1034_v20, %v1025_v12  ;;  %v450_v24 = vadd.s32 24, %v1025_v12 }
  0x3f   : > { %v451_v30 = vadd.s32 32, %v1025_v12  ;;  %v452_v36 = vadd.s32 40, %v1025_v12  ;;  %v453_v40 = vadd.s32 48, %v1025_v12  ;;  %v454_v49 = vadd.s32 56, %v1025_v12 }
  0x40   : > { %705 = vmatpush3.bf16.msra.mxu0 %v791_v2  ;;  %725 = vmatpush3.bf16.msra.mxu1 %v791_v2  ;;  %v466_v25 = vadd.s32 %v1034_v20, %v448_v14  ;;  %v467_v28 = vadd.s32 %v1034_v20, %v449_v17  ;;  %vm481_vm1 = vcmp.lt.s32.totalorder %v465_v22, 256  ;;  %v468_v34 = vadd.s32 %v1034_v20, %v450_v24 }
  0x41   : > { %v469_v42 = vadd.s32 %v1034_v20, %v451_v30  ;;  %v470_v50 = vadd.s32 %v1034_v20, %v452_v36  ;;  %v471_v56 = vadd.s32 %v1034_v20, %v453_v40  ;;  %v455_v57 = vadd.s32 64, %v1025_v12 }
  0x42   : > { %vm482_vm2 = vcmp.lt.s32.totalorder %v466_v25, 256  ;;  %vm483_vm3 = vcmp.lt.s32.totalorder %v467_v28, 256  ;;  %vm484_vm4 = vcmp.lt.s32.totalorder %v468_v34, 256  ;;  %v472_v63 = vadd.s32 %v1034_v20, %v454_v49 }
  0x43   : > { %707 = vmatmul.mubr.msk.bf16.vlgmr.msra.gmra.mxu0 %vm308_vm0, %v793_v4  ;;  %715 = vmatmul.mubr.msk.bf16.vlgmr.msra.gmra.mxu1 %vm308_vm0, %v797_v7  ;;  %vm485_vm5 = vcmp.lt.s32.totalorder %v469_v42, 256  ;;  %vm486_vm6 = vcmp.lt.s32.totalorder %v470_v50, 256  ;;  %v456_v0 = vadd.s32 72, %v1025_v12  ;;  %vm487_vm7 = vcmp.lt.s32.totalorder %v471_v56, 256 }
  0x44   : > { %710 = vmatprep.mubr.msk.bf16.mxu0 %vm308_vm0, %v794_v5  ;;  %718 = vmatprep.mubr.msk.bf16.mxu1 %vm308_vm0, %v798_v8  ;;  %v457_v7 = vadd.s32 80, %v1025_v12  ;;  %v473_v8 = vadd.s32 %v1034_v20, %v455_v57  ;;  %vm488_vm8 = vcmp.lt.s32.totalorder %v472_v63, 256  ;;  %v458_v14 = vadd.s32 88, %v1025_v12 }
  0x45   : > { %v474_v17 = vadd.s32 %v1034_v20, %v456_v0  ;;  %v459_v25 = vadd.s32 96, %v1025_v12  ;;  %v462_v42 = vadd.s32 120, %v1025_v12 }
  0x46   : > { %vm489_vm9 = vcmp.lt.s32.totalorder %v473_v8, 256  ;;  %v476_v30 = vadd.s32 %v1034_v20, %v458_v14 }
  0x47   : > { %vm490_vm10 = vcmp.lt.s32.totalorder %v474_v17, 256 }
  0x48   : > { %vm492_vm12 = vcmp.lt.s32.totalorder %v476_v30, 256 }
  0x4b   : > { %711 = vmatmul.mubr.msk.bf16.gmra.mxu0 %vm308_vm0, %v795_v9  ;;  %719 = vmatmul.mubr.msk.bf16.gmra.mxu1 %vm308_vm0, %v799_v10 }
 0x103   : > { %v708_v13 = vpop.f32.mrf.mxu0  ;;  %v1029_v15 = vpop.f32.mrf.mxu1 }
 0x104   : > { %v376_v27 = vadd.f32 %v708_v13, %v1031_v16 }
 0x105   : > { %v367_v18 = vpop.f32.mrf.mxu0  ;;  %v399_v19 = vpop.f32.mrf.mxu1 }
 0x106   : > { %v368_v21 = vadd.f32 %v1031_v16, %v367_v18  ;;  %v432_v38 = vmax.f32 %v376_v27, 0.0  ;;  %v400_v4 = vadd.f32 %v1031_v16, %v399_v19  ;;  %v408_v19 = vadd.f32 %v1029_v15, %v1031_v16 }
 0x107   : > { %v709_v23 = vpop.f32.mrf.mxu0  ;;  %v1041_v26 = vpop.f32.mrf.mxu1 }
 0x108   : > { %v430_v31 = vmax.f32 %v368_v21, 0.0  ;;  %v379_v32 = vadd.f32 %v709_v23, %v1031_v16  ;;  %v531_v52 = vsel %vm483_vm3, %v432_v38, 0.0  ;;  %v438_v22 = vmax.f32 %v400_v4, 0.0 }
 0x109   : > { %v370_v29 = vpop.f32.mrf.mxu0  ;;  %v402_v37 = vpop.f32.mrf.mxu1  ;;  %v475_v23 = vadd.s32 %v1034_v20, %v457_v7  ;;  %v411_v28 = vadd.f32 %v1041_v26, %v1031_v16  ;;  %v440_v15 = vmax.f32 %v408_v19, 0.0  ;;  %v477_v38 = vadd.s32 %v1034_v20, %v459_v25 }
 0x10a   : > { %v371_v33 = vadd.f32 %v1031_v16, %v370_v29  ;;  %v529_v43 = vsel %vm481_vm1, %v430_v31, 0.0  ;;  %v433_v44 = vmax.f32 %v379_v32, 0.0  ;;  %v403_v11 = vadd.f32 %v1031_v16, %v402_v37 }
 0x10b   : > { %v712_v35 = vpop.f32.mrf.mxu0  ;;  %v1055_v51 = vpop.f32.mrf.mxu1  ;;  %v537_v34 = vsel %vm489_vm9, %v438_v22, 0.0  ;;  %vm491_vm11 = vcmp.lt.s32.totalorder %v475_v23, 256  ;;  %v461_v37 = vadd.s32 112, %v1025_v12  ;;  %vm493_vm13 = vcmp.lt.s32.totalorder %v477_v38, 256 }
 0x10c   : > { %v431_v39 = vmax.f32 %v371_v33, 0.0  ;;  %v392_v53 = vadd.f32 %v712_v35, %v1031_v16  ;;  %v532_v59 = vsel %vm484_vm4, %v433_v44, 0.0  ;;  %v439_v29 = vmax.f32 %v403_v11, 0.0 }
 0x10d   : > { %v383_v41 = vpop.f32.mrf.mxu0  ;;  %v415_v1 = vpop.f32.mrf.mxu1  ;;  %v460_v33 = vadd.s32 104, %v1025_v12  ;;  %v539_v44 = vsel %vm491_vm11, %v440_v15, 0.0 }
 0x10e   : > { %v530_v45 = vsel %vm482_vm2, %v431_v39, 0.0  ;;  %v384_v46 = vadd.f32 %v1031_v16, %v383_v41  ;;  %v436_v2 = vmax.f32 %v392_v53, 0.0  ;;  %v416_v35 = vadd.f32 %v1031_v16, %v415_v1 }
 0x10f   : > { %v546_v47 = vadd.f32 %v530_v45, %v529_v43  ;;  %v713_v48 = vpop.f32.mrf.mxu0  ;;  %v721_v18 = vpop.f32.mrf.mxu1  ;;  %v441_v39 = vmax.f32 %v411_v28, 0.0  ;;  %v538_v26 = vsel %vm490_vm10, %v439_v29, 0.0  ;;  %v478_v43 = vadd.s32 %v1034_v20, %v460_v33 }
 0x110   : > { %v434_v54 = vmax.f32 %v384_v46, 0.0  ;;  %v395_v60 = vadd.f32 %v713_v48, %v1031_v16  ;;  %v535_v21 = vsel %vm487_vm7, %v436_v2, 0.0  ;;  %v424_v45 = vadd.f32 %v1055_v51, %v1031_v16 }
 0x111   : > { %v547_v55 = vadd.f32 %v546_v47, %v531_v52  ;;  %v386_v58 = vpop.f32.mrf.mxu0  ;;  %v418_v32 = vpop.f32.mrf.mxu1  ;;  %v442_v46 = vmax.f32 %v416_v35, 0.0  ;;  %v479_v48 = vadd.s32 %v1034_v20, %v461_v37  ;;  %v540_v49 = vsel %vm492_vm12, %v441_v39, 0.0 }
 0x112   : > { %v387_v61 = vadd.f32 %v1031_v16, %v386_v58  ;;  %v533_v3 = vsel %vm485_vm5, %v434_v54, 0.0  ;;  %v437_v9 = vmax.f32 %v395_v60, 0.0  ;;  %v419_v40 = vadd.f32 %v1031_v16, %v418_v32 }
 0x113   : > { %v548_v62 = vadd.f32 %v547_v55, %v532_v59  ;;  %v427_v50 = vadd.f32 %v721_v18, %v1031_v16  ;;  %v480_v54 = vadd.s32 %v1034_v20, %v462_v42  ;;  %vm494_vm14 = vcmp.lt.s32.totalorder %v478_v43, 256 }
 0x114   : > { %v435_v5 = vmax.f32 %v387_v61, 0.0  ;;  %v536_v27 = vsel %vm488_vm8, %v437_v9, 0.0  ;;  %v443_v52 = vmax.f32 %v419_v40, 0.0  ;;  %v444_v12 = vmax.f32 %v424_v45, 0.0 }
 0x115   : > { %v549_v6 = vadd.f32 %v548_v62, %v533_v3  ;;  %v541_v55 = vsel %vm493_vm13, %v442_v46, 0.0  ;;  %vm495_vm15 = vcmp.lt.s32.totalorder %v479_v48, 256  ;;  %v445_v57 = vmax.f32 %v427_v50, 0.0  ;;  %v545_v3 = vld [vmem:[%s1010_s20] sm:$0x1] }
 0x116   : > { %v534_v10 = vsel %vm486_vm6, %v435_v5, 0.0  ;;  %v542_v51 = vsel %vm494_vm14, %v443_v52, 0.0  ;;  %vm496_vm0 = vcmp.lt.s32.totalorder %v480_v54, 256  ;;  %v543_v59 = vsel %vm495_vm15, %v444_v12, 0.0 }
 0x117   : > { %v550_v13 = vadd.f32 %v549_v6, %v534_v10  ;;  %v544_v61 = vsel %vm496_vm0, %v445_v57, 0.0 }
 0x119   : > { %v551_v24 = vadd.f32 %v550_v13, %v535_v21 }
 0x11b   : > { %v552_v31 = vadd.f32 %v551_v24, %v536_v27 }
 0x11d   : > { %v553_v36 = vadd.f32 %v552_v31, %v537_v34 }
 0x11f   : > { %v554_v41 = vadd.f32 %v553_v36, %v538_v26 }
 0x121   : > { %v555_v47 = vadd.f32 %v554_v41, %v539_v44 }
 0x123   : > { %v556_v53 = vadd.f32 %v555_v47, %v540_v49 }
 0x125   : > { %v557_v56 = vadd.f32 %v556_v53, %v541_v55 }
 0x127   : > { %v558_v58 = vadd.f32 %v557_v56, %v542_v51 }
 0x129   : > { %v559_v60 = vadd.f32 %v558_v58, %v543_v59 }
 0x12b   : > { %v560_v62 = vadd.f32 %v559_v60, %v544_v61 }
 0x12d   : > { %v561_v16 = vrot.slane %v560_v62, 4 }
 0x12f   : > { %v562_v63 = vadd.f32 %v561_v16, %v560_v62 }
 0x131   : > { %v563_v0 = vrot.slane %v562_v63, 2 }
 0x133   : > { %v564_v1 = vadd.f32 %v563_v0, %v562_v63 }
 0x135   : > { %v565_v20 = vrot.slane %v564_v1, 1 }
 0x137   : > { %v566_v2 = vadd.f32 %v565_v20, %v564_v1 }
 0x139   : > { %v567_v4 = vmul.f32 0.00390625, %v566_v2 }
 0x13b   : > { %v568_v5 = vadd.f32 %v567_v4, %v545_v3 }
 0x13d   : > { %569 = vst [vmem:[%s1010_s20] sm:$0x1] %v568_v5 }
 0x13e PF: > { %s15_s16 = sadd.s32 1, %s898_s16   ;;  %s1113_s12 = smov %s890_s14 }
 0x13f   : > { %p12_p5 = scmp.ge.s32.totalorder %s15_s16, 6   ;;  %s1114_s13 = smov %s894_s15 }
 0x140   : > { %s1115_s14 = smov %s1118_s18  ;;  %s1116_s15 = smov %s1122_s19 }
 0x141   :  { %14 = sbr.rel (!%p12_p5) target bundleno = 4 (0x4), region = 75 }
 0x146   :  { %587 = vsyncpa [#allocation3], 1 }
 0x147   :  { %589 = vsyncpa [#allocation3 + $0x1], 1 }
 0x148   :  { %590 = vsyncpa [#allocation5], 1 }

// kernel: densenet_two_forward.3
= control target key start
LH: loop header
LB: loop body
LE: loop exit
PB: predicated region body
PF: predicated region fallthrough
CT: control target
= control target key end

     0   :  { %s14114_s0 = inlined_call_operand.vmem [shape: f32[2,128], index: 0, kind: input, shape index: {}]   ;;  %s14115_s1 = inlined_call_operand.vmem [shape: f32[2,128], index: 1, kind: input, shape index: {}]   ;;  %s14116_s2 = inlined_call_operand.hbm [shape: bf16[128,128], index: 2, kind: input, shape index: {}]   ;;  %s14117_s3 = inlined_call_operand.hbm [shape: f32[1,128], index: 3, kind: input, shape index: {}]   ;;  %s14118_s4 = inlined_call_operand.hbm [shape: bf16[128,512], index: 4, kind: input, shape index: {}]   ;;  %s14119_s5 = inlined_call_operand.hbm [shape: f32[1,512], index: 5, kind: input, shape index: {}]   ;;  %s14120_s6 = inlined_call_operand.hbm [shape: bf16[128,2048], index: 6, kind: input, shape index: {}]   ;;  %s14121_s7 = inlined_call_operand.hbm [shape: bf16[512,2048], index: 7, kind: input, shape index: {}]   ;;  %s14122_s8 = inlined_call_operand.hbm [shape: f32[1,2048], index: 8, kind: input, shape index: {}]   ;;  %s14123_s9 = inlined_call_operand.hbm [shape: bf16[2048,1024], index: 9, kind: input, shape index: {}]   ;;  %s14124_s10 = inlined_call_operand.hbm [shape: f32[1,1024], index: 10, kind: input, shape index: {}]   ;;  %s14125_s11 = inlined_call_operand.hbm [shape: bf16[1024,128], index: 11, kind: input, shape index: {}]   ;;  %s14126_s12 = inlined_call_operand.vmem [shape: f32[2,2,128], index: 12, kind: output, shape index: {}]  }
   0x1   :  { %14143 = sst [smem:[#allocation27_spill]] %s14116_s2 }
   0x2   :  { %14144 = sst [smem:[#allocation28_spill]] %s14117_s3 }
   0x3   :  { %14145 = sst [smem:[#allocation29_spill]] %s14118_s4 }
   0x4   :  { %14146 = sst [smem:[#allocation30_spill]] %s14119_s5 }
   0x5   :  { %14147 = sst [smem:[#allocation31_spill]] %s14120_s6 }
   0x6   :  { %14148 = sst [smem:[#allocation32_spill]] %s14121_s7 }
   0x7   :  { %17 = vsyncpa [#allocation3], 0 }
   0x8   :  { %18 = vsyncpa [#allocation5], 0 }
   0x9   :  { %19 = vsyncpa [#allocation8], 0 }
   0xa   :  { %20 = vsyncpa [#allocation11], 0 }
   0xb   :  { %21 = vsyncpa [#allocation14], 0 }
   0xc   :  { %23 = vsyncpa [#allocation14 + $0x1], 0 }
   0xd   :  { %24 = vsyncpa [#allocation17], 0 }
   0xe   :  { %26 = vsyncpa [#allocation17 + $0x1], 0  ;;  %s12982_s21 = smov 0   ;;  %s12984_s22 = smov 0  }
   0xf   :  { %s12986_s23 = smov 0   ;;  %s12988_s24 = smov 0  }
  0x10 LB: > { %14149 = sst [smem:[#allocation24_spill]] %s12892_s23  ;;  %s12898_s25 = smov [#allocation4]   ;;  %s12896_s24 = sphi %s12988_s24, %s14182_s24   ;;  %s12892_s23 = sphi %s12986_s23, %s14184_s23   ;;  %s12888_s22 = sphi %s12984_s22, %s14186_s22   ;;  %s12884_s21 = sphi %s12982_s21, %s14185_s21  }
  0x11   : > { %s362_s26 = sshll.u32 %s12898_s25, 4  ;;  %s13003_s27 = sadd.s32 4294967295, %s12896_s24   ;;  %s363_s26 = int_to_ptr.vmem [resolvable:$true] %s362_s26 }
  0x12   : > { %p10257_p0 = scmp.ge.s32.totalorder %s12896_s24, 1  ;;  %p14127_p1 = scmp.eq.s32.totalorder %s13003_s27, 0 }
  0x13   : > { %p330_p2 = scmp.lt.s32.totalorder %s12896_s24, 3  ;;  %s12899_s29 = smov [#allocation7]  }
  0x14   : > { %s386_s30 = sshll.u32 %s12899_s29, 4  ;;  %s12900_s14 = smov [#allocation10]   ;;  %s387_s30 = int_to_ptr.vmem [resolvable:$true] %s386_s30 }
  0x15   : > { %p13008_p3 = pnand %p10257_p0, %p330_p2  ;;  %s409_s15 = sshll.u32 %s12900_s14, 4  ;;  %s13020_s15 = int_to_ptr.vmem [resolvable:$true] %s409_s15 }
  0x16   : > { %s12587_s17 = scalar_lea.vmem %s363_s26, 16  ;;  %s12594_s18 = scalar_lea.vmem %s363_s26, 32 }
  0x17   : > { %s14150_s28 = scalar_select %p13008_p3, 1, 0 }
  0x18   : > { %p11624_p4 = pneg %p13008_p3  ;;  %p12588_p7 = scmp.ne.s32.totalorder %s363_s26, %s12587_s17 }
  0x19   : > { %p12595_p10 = scmp.lt.s32.totalorder %s363_s26, %s363_s26  ;;  %p12596_p11 = scmp.lt.s32.totalorder %s12594_s18, %s12587_s17 }
  0x1a   : > { %p13016_p5 = pnand %p11624_p4, %p14127_p1 }
  0x1b   : > { %p12597_p12 = por %p12596_p11, %p12595_p10 }
  0x1c   : > { %s14151_s13 = scalar_select %p13016_p5, 1, 0 }
  0x1d   : > { %p13024_p6 = pneg %p13016_p5 }
  0x1f   : > { %s14152_s16 = scalar_select %p13024_p6, 1, 0 }
  0x20   : > { %p12590_p8 = pnand %p12588_p7, %p13024_p6 }
  0x22   : > { %p12591_p9 = pneg %p12590_p8 }
  0x24   : > { %p12598_p13 = pnand %p12597_p12, %p12591_p9 }
  0x26   : > { %12601 = shalt.err (!%p12598_p13)
}
  0x27   : > { %s14153_s3 = sld [smem:[#allocation28_spill]]  ;;  %s12613_s25 = scalar_lea.vmem %s387_s30, 64 }
  0x28   : > { %p12614_p0 = scmp.ne.s32.totalorder %s387_s30, %s12613_s25  ;;  %p12621_p7 = scmp.lt.s32.totalorder %s387_s30, %s387_s30 }
  0x29   : > { %p12622_p8 = scmp.lt.s32.totalorder %s12613_s25, %s12613_s25 }
  0x2a   : > { %p12616_p2 = pnand %p12614_p0, %p13024_p6 }
  0x2b   : > { %p12623_p1 = por %p12622_p8, %p12621_p7 }
  0x2c   : > { %p12617_p4 = pneg %p12616_p2 }
  0x2d   : > { %11630 = dma.hbm_to_vmem [thread:$0]  (!%p13016_p5), %s14153_s3, 16, %s363_s26, [#allocation5]  }
  0x2e   : > { %p12624_p3 = pnand %p12623_p1, %p12617_p4 }
  0x30   : > { %12627 = shalt.err (!%p12624_p3)
}
  0x31   : > { %s14154_s5 = sld [smem:[#allocation30_spill]]  ;;  %s12639_s26 = scalar_lea.vmem %s13020_s15, 65536 }
  0x32   : > { %p12640_p9 = scmp.ne.s32.totalorder %s13020_s15, %s12639_s26  ;;  %p12647_p12 = scmp.lt.s32.totalorder %s13020_s15, %s13020_s15 }
  0x33   : > { %p12648_p13 = scmp.lt.s32.totalorder %s12639_s26, %s12639_s26 }
  0x34   : > { %p12642_p10 = pnand %p12640_p9, %p13024_p6 }
  0x35   : > { %p12649_p1 = por %p12648_p13, %p12647_p12 }
  0x36   : > { %p12643_p11 = pneg %p12642_p10 }
  0x37   : > { %11636 = dma.hbm_to_vmem [thread:$0]  (!%p13016_p5), %s14154_s5, 64, %s387_s30, [#allocation8]  }
  0x38   : > { %p12650_p3 = pnand %p12649_p1, %p12643_p11 }
  0x3a   : > { %12653 = shalt.err (!%p12650_p3)
}
  0x3b   : > { %s14129_s17 = smov 1024   ;;  %s14130_s30 = smov 64  }
  0x3c   : > { %s14155_s7 = sld [smem:[#allocation32_spill]]  ;;  %s13058_s20 = sadd.s32 1, %s12896_s24  }
  0x3d   : > { %14156 = sst [smem:[#allocation25_spill]] %s13058_s20  ;;  %s225_s25 = ssub.s32 %s12896_s24, %s13058_s20 }
  0x3e   : > { %s228_s29 = sadd.s32 1, %s12892_s23  ;;  %p226_p0 = scmp.eq.s32.totalorder %s225_s25, 0 }
  0x3f   : > { %p235_p2 = scmp.ne.s32.totalorder %s12892_s23, %s12888_s22  ;;  %p236_p4 = scmp.eq.s32.totalorder %s12896_s24, 0 }
  0x40   : > { %p241_p7 = scmp.ne.s32.totalorder %s12888_s22, %s12884_s21  ;;  %p14158_p9 = scmp.eq.s32.totalorder %s13003_s27, 0 }
  0x41   : > { %s13069_s14 = scalar_select %p226_p0, %s12892_s23, %s228_s29  }
  0x42   : > { %11642 = dma.hbm_to_vmem [thread:$0]  (!%p13016_p5), %s14155_s7, 65536, %s13020_s15, [#allocation11], %s14129_s17, %s14129_s17, %s14130_s30  }
  0x43   : > { %14157 = sst [smem:[#allocation26_spill]] %s13069_s14  ;;  %p237_p8 = por %p236_p4, %p235_p2 }
  0x44   : > { %p13073_p10 = por %p14158_p9, %p241_p7  ;;  %p11663_p11 = scmp.lt.s32.totalorder %s12896_s24, 2 }
  0x45   : > { %s434_s18 = sand.u32 1, %s12896_s24   ;;  %s13080_s15 = sand.u32 1, %s12892_s23  }
  0x46   : > { %s14159_s26 = scalar_select %p13073_p10, 1, 0 }
  0x47   : > { %s10266_s19 = sshll.u32 %s13080_s15, 12  ;;  %s11514_s17 = sshll.u32 %s12896_s24, 8 }
  0x48   : > { %s13087_s3 = scalar_lea.hbm %s14123_s9, %s11514_s17  ;;  %s438_s21 = scalar_lea.vmem [#allocation13], %s10266_s19 }
  0x49   : > { %s445_s29 = sshll.u32 %s438_s21, 4  ;;  %p13089_p12 = pnand %p11663_p11, %p237_p8  ;;  %s13093_s29 = int_to_ptr.vmem [resolvable:$true] %s445_s29 }
  0x4a   : > { %s13095_s7 = scalar_lea.sflag [#allocation14], %s434_s18  ;;  %s12654_s14 = scalar_lea.hbm %s13087_s3, 65536 }
  0x4b   : > { %p12655_p13 = scmp.ne.s32.totalorder %s13087_s3, %s12654_s14  ;;  %p13101_p1 = pneg %p13089_p12 }
  0x4c   : > { %s12659_s25 = scalar_lea.hbm %s14123_s9, 131072  ;;  %p12660_p2 = scmp.lt.s32.totalorder %s13087_s3, %s14123_s9 }
  0x4d   : > { %p12657_p3 = pnand %p13101_p1, %p12655_p13  ;;  %p12661_p4 = scmp.lt.s32.totalorder %s12659_s25, %s12654_s14 }
  0x4f   : > { %p12658_p0 = pneg %p12657_p3  ;;  %p12662_p7 = por %p12661_p4, %p12660_p2 }
  0x51   : > { %p12663_p8 = pnand %p12662_p7, %p12658_p0 }
  0x53   : > { %12666 = shalt.err (!%p12663_p8)
}
  0x54   : > { %s12667_s18 = scalar_lea.vmem %s13093_s29, 65536  ;;  %s12903_s20 = smov [#allocation13]  }
  0x55   : > { %p12668_p9 = scmp.ne.s32.totalorder %s13093_s29, %s12667_s18  ;;  %s12672_s30 = sshll.u32 %s12903_s20, 4  ;;  %s12673_s30 = int_to_ptr.vmem [resolvable:$false] %s12672_s30 }
  0x56   : > { %s12674_s19 = scalar_lea.vmem %s12673_s30, 131072  ;;  %p12675_p3 = scmp.lt.s32.totalorder %s13093_s29, %s12673_s30 }
  0x57   : > { %p12670_p11 = pnand %p12668_p9, %p13101_p1  ;;  %p12676_p10 = scmp.lt.s32.totalorder %s12674_s19, %s12667_s18 }
  0x59   : > { %p12671_p13 = pneg %p12670_p11  ;;  %p12677_p5 = por %p12676_p10, %p12675_p3 }
  0x5b   : > { %p12678_p6 = pnand %p12677_p5, %p12671_p13 }
  0x5d   : > { %12681 = shalt.err (!%p12678_p6)
}
  0x5e   : > { %s12904_s23 = smov 512   ;;  %s14140_s14 = smov 256  }
  0x5f   : > { %s14141_s25 = smov 16   ;;  %s12907_s20 = smov [#allocation2]  }
  0x60   : > { %11649 = dma.hbm_to_vmem [thread:$0]  (!%p13089_p12), %s13087_s3, 65536, %s13093_s29, %s13095_s7, %s12904_s23, %s14140_s14, %s14141_s25  }
  0x61   : > { %s348_s21 = sshll.u32 %s12907_s20, 4  ;;  %p14162_p10 = scmp.ne.s32.totalorder %s14152_s16, 0  ;;  %s349_s21 = int_to_ptr.vmem [resolvable:$true] %s348_s21 }
  0x62   : > { %s12693_s30 = scalar_lea.vmem %s349_s21, 1024  ;;  %p12701_p2 = scmp.lt.s32.totalorder %s349_s21, %s349_s21 }
  0x63   : > { %p12694_p0 = scmp.ne.s32.totalorder %s349_s21, %s12693_s30  ;;  %p12702_p4 = scmp.lt.s32.totalorder %s12693_s30, %s12693_s30 }
  0x65   : > { %p12696_p5 = pnand %p12694_p0, %p14162_p10  ;;  %p12703_p7 = por %p12702_p4, %p12701_p2 }
  0x67   : > { %p12697_p6 = pneg %p12696_p5 }
  0x69   : > { %p12704_p8 = pnand %p12703_p7, %p12697_p6 }
  0x6b   : > { %12707 = shalt.err (!%p12704_p8)
}
  0x6c   : > { %s14142_s18 = smov 4   ;;  %p14163_p9 = scmp.ne.s32.totalorder %s14151_s13, 0 }
  0x6d   : > { %s14164_s19 = smov 64   ;;  %s14165_s2 = sld [smem:[#allocation27_spill]] }
  0x6e   : > { %s12909_s23 = smov [#allocation6]   ;;  %s12910_s14 = smov [#allocation9]  }
  0x6f   : > { %s372_s20 = sshll.u32 %s12909_s23, 4  ;;  %s396_s25 = sshll.u32 %s12910_s14, 4  ;;  %s373_s20 = int_to_ptr.vmem [resolvable:$true] %s372_s20  ;;  %s397_s25 = int_to_ptr.vmem [resolvable:$true] %s396_s25 }
  0x70   : > { %s12719_s30 = scalar_lea.vmem %s373_s20, 4096  ;;  %p12727_p0 = scmp.lt.s32.totalorder %s373_s20, %s373_s20 }
  0x71   : > { %p12720_p11 = scmp.ne.s32.totalorder %s373_s20, %s12719_s30  ;;  %p12728_p5 = scmp.lt.s32.totalorder %s12719_s30, %s12719_s30 }
  0x73   : > { %11627 = dma.hbm_to_vmem [thread:$0]  (!%p14163_p9), %s14165_s2, 1024, %s349_s21, [#allocation3], %s14164_s19, %s14164_s19, %s14142_s18  }
  0x74   : > { %p12722_p13 = pnand %p12720_p11, %p14162_p10  ;;  %p12729_p6 = por %p12728_p5, %p12727_p0 }
  0x76   : > { %p12723_p3 = pneg %p12722_p13 }
  0x78   : > { %p12730_p2 = pnand %p12729_p6, %p12723_p3 }
  0x7a   : > { %12733 = shalt.err (!%p12730_p2)
}
  0x7b   : > { %s14166_s3 = smov 16   ;;  %s14167_s29 = smov 256  }
  0x7c   : > { %s14168_s4 = sld [smem:[#allocation29_spill]]  ;;  %s12745_s14 = scalar_lea.vmem %s397_s25, 16384 }
  0x7d   : > { %p12746_p4 = scmp.ne.s32.totalorder %s397_s25, %s12745_s14  ;;  %p12753_p11 = scmp.lt.s32.totalorder %s397_s25, %s397_s25 }
  0x7e   : > { %p12754_p13 = scmp.lt.s32.totalorder %s12745_s14, %s12745_s14 }
  0x7f   : > { %p12748_p7 = pnand %p12746_p4, %p14162_p10 }
  0x80   : > { %p12755_p3 = por %p12754_p13, %p12753_p11 }
  0x81   : > { %p12749_p8 = pneg %p12748_p7 }
  0x82   : > { %11633 = dma.hbm_to_vmem [thread:$0]  (!%p14163_p9), %s14168_s4, 4096, %s373_s20, [#allocation5], %s14167_s29, %s14167_s29, %s14166_s3  }
  0x83   : > { %p12756_p0 = pnand %p12755_p3, %p12749_p8 }
  0x85   : > { %12759 = shalt.err (!%p12756_p0)
}
  0x86   : > { %s14169_s30 = smov 1024   ;;  %s14170_s6 = sld [smem:[#allocation31_spill]] }
  0x87   : > { %s12911_s20 = smov [#allocation12]   ;;  %s10269_s29 = sshll.u32 %s13080_s15, 2 }
  0x88   : > { %s423_s3 = sshll.u32 %s12911_s20, 4  ;;  %s424_s3 = int_to_ptr.vmem [resolvable:$true] %s423_s3 }
  0x89   : > { %s12771_s23 = scalar_lea.vmem %s424_s3, 256  ;;  %p12779_p4 = scmp.lt.s32.totalorder %s424_s3, %s424_s3 }
  0x8a   : > { %p12772_p5 = scmp.ne.s32.totalorder %s424_s3, %s12771_s23  ;;  %p12780_p7 = scmp.lt.s32.totalorder %s12771_s23, %s12771_s23 }
  0x8c   : > { %11639 = dma.hbm_to_vmem [thread:$0]  (!%p14163_p9), %s14170_s6, 16384, %s397_s25, [#allocation8], %s14169_s30, %s14169_s30, %s14164_s19  }
  0x8d   : > { %p12774_p6 = pnand %p12772_p5, %p14162_p10  ;;  %p12781_p8 = por %p12780_p7, %p12779_p4 }
  0x8f   : > { %p12775_p2 = pneg %p12774_p6 }
  0x91   : > { %p12782_p11 = pnand %p12781_p8, %p12775_p2 }
  0x93   : > { %12785 = shalt.err (!%p12782_p11)
}
  0x94   : > { %11645 = dma.hbm_to_vmem [thread:$0]  (!%p14163_p9), %s14122_s8, 256, %s424_s3, [#allocation11]  }
  0x95   : > { %s11515_s25 = sshll.u32 %s12896_s24, 6  ;;  %s459_s30 = scalar_lea.vmem [#allocation15], %s10269_s29 }
  0x96   : > { %s467_s21 = sshll.u32 %s459_s30, 4  ;;  %s465_s2 = scalar_lea.hbm %s14124_s10, %s11515_s25  ;;  %s468_s21 = int_to_ptr.vmem [resolvable:$true] %s467_s21 }
  0x97   : > { %s12786_s23 = scalar_lea.hbm %s465_s2, 64  ;;  %s12791_s18 = scalar_lea.hbm %s14124_s10, 128 }
  0x98   : > { %p12787_p10 = scmp.ne.s32.totalorder %s465_s2, %s12786_s23  ;;  %p12792_p9 = scmp.lt.s32.totalorder %s465_s2, %s14124_s10 }
  0x99   : > { %p12793_p0 = scmp.lt.s32.totalorder %s12791_s18, %s12786_s23 }
  0x9a   : > { %p12789_p13 = pnand %p12787_p10, %p13101_p1 }
  0x9b   : > { %p12794_p5 = por %p12793_p0, %p12792_p9 }
  0x9c   : > { %p12790_p3 = pneg %p12789_p13 }
  0x9e   : > { %p12795_p6 = pnand %p12794_p5, %p12790_p3 }
  0xa0   : > { %12798 = shalt.err (!%p12795_p6)
}
  0xa1   : > { %s12799_s3 = scalar_lea.vmem %s468_s21, 64  ;;  %s12912_s29 = smov [#allocation15]  }
  0xa2   : > { %p12800_p2 = scmp.ne.s32.totalorder %s468_s21, %s12799_s3  ;;  %s12804_s25 = sshll.u32 %s12912_s29, 4  ;;  %s12805_s25 = int_to_ptr.vmem [resolvable:$false] %s12804_s25 }
  0xa3   : > { %s12806_s30 = scalar_lea.vmem %s12805_s25, 128  ;;  %p12807_p8 = scmp.lt.s32.totalorder %s468_s21, %s12805_s25 }
  0xa4   : > { %p12802_p4 = pnand %p12800_p2, %p13101_p1  ;;  %p12808_p11 = scmp.lt.s32.totalorder %s12806_s30, %s12799_s3 }
  0xa6   : > { %p12803_p7 = pneg %p12802_p4  ;;  %p12809_p10 = por %p12808_p11, %p12807_p8 }
  0xa8   : > { %p12810_p13 = pnand %p12809_p10, %p12803_p7 }
  0xaa   : > { %12813 = shalt.err (!%p12810_p13)
}
  0xab   : > { %11652 = dma.hbm_to_vmem [thread:$0]  (!%p13089_p12), %s465_s2, 64, %s468_s21, %s13095_s7  }
  0xac   : > { %s10272_s4 = sshll.u32 %s13080_s15, 8  ;;  %s11516_s6 = sshll.u32 %s12896_s24, 12 }
  0xad   : > { %s13186_s23 = scalar_lea.hbm %s14125_s11, %s11516_s6  ;;  %s478_s13 = scalar_lea.vmem [#allocation16], %s10272_s4 }
  0xae   : > { %s485_s18 = sshll.u32 %s478_s13, 4  ;;  %s475_s14 = scalar_lea.sflag [#allocation17], %s13080_s15  ;;  %s13188_s18 = int_to_ptr.vmem [resolvable:$true] %s485_s18 }
  0xaf   : > { %s12814_s3 = scalar_lea.hbm %s13186_s23, 4096  ;;  %s12819_s24 = scalar_lea.hbm %s14125_s11, 8192 }
  0xb0   : > { %p12815_p3 = scmp.ne.s32.totalorder %s13186_s23, %s12814_s3  ;;  %p12820_p5 = scmp.lt.s32.totalorder %s13186_s23, %s14125_s11 }
  0xb1   : > { %p12821_p6 = scmp.lt.s32.totalorder %s12819_s24, %s12814_s3 }
  0xb2   : > { %p12817_p9 = pnand %p12815_p3, %p13101_p1 }
  0xb3   : > { %p12822_p2 = por %p12821_p6, %p12820_p5 }
  0xb4   : > { %p12818_p0 = pneg %p12817_p9 }
  0xb6   : > { %p12823_p4 = pnand %p12822_p2, %p12818_p0 }
  0xb8   : > { %12826 = shalt.err (!%p12823_p4)
}
  0xb9   : > { %s12827_s15 = scalar_lea.vmem %s13188_s18, 4096  ;;  %s12913_s25 = smov [#allocation16]  }
  0xba   : > { %p12828_p7 = scmp.ne.s32.totalorder %s13188_s18, %s12827_s15  ;;  %s12832_s30 = sshll.u32 %s12913_s25, 4  ;;  %s12833_s30 = int_to_ptr.vmem [resolvable:$false] %s12832_s30 }
  0xbb   : > { %s12834_s4 = scalar_lea.vmem %s12833_s30, 8192  ;;  %p12835_p10 = scmp.lt.s32.totalorder %s13188_s18, %s12833_s30 }
  0xbc   : > { %p12830_p8 = pnand %p12828_p7, %p13101_p1  ;;  %p12836_p13 = scmp.lt.s32.totalorder %s12834_s4, %s12827_s15 }
  0xbe   : > { %p12831_p11 = pneg %p12830_p8  ;;  %p12837_p3 = por %p12836_p13, %p12835_p10 }
  0xc0   : > { %p12838_p9 = pnand %p12837_p3, %p12831_p11 }
  0xc2   : > { %12841 = shalt.err (!%p12838_p9)
}
  0xc3   : > { %s14171_s6 = smov 4   ;;  %p14172_p1 = scmp.ne.s32.totalorder %s14150_s28, 0 }
  0xc4   : > { %11655 = dma.hbm_to_vmem [thread:$0]  (!%p13089_p12), %s13186_s23, 4096, %s13188_s18, %s475_s14, %s14164_s19, %s14164_s19, %s14171_s6  }
  0xc5   : > { %497 = sbr.rel (%p14172_p1) target bundleno = 2191 (0x88f), region = 68  ;;  %p14173_p0 = scmp.eq.s32.totalorder (!%p14172_p1), %s13003_s27, 0 }
  0xca   : > { %12859 = dma.done.wait (%p14173_p0), [#allocation3], 1024   ;;  %p14174_p5 = pmov %p14173_p0 }
  0xcb   : > { %p14175_p6 = pmov %p14173_p0 }
  0xcc   : > { %12861 = vsyncadd (%p14174_p5), [#allocation3], 4294966272 }
  0xcd   : > { %12863 = dma.done.wait (%p14175_p6), [#allocation5], 4112   ;;  %p14176_p2 = pmov %p14173_p0 }
  0xce   : > { %p14177_p4 = pmov %p14173_p0 }
  0xcf   : > { %12865 = vsyncadd (%p14176_p2), [#allocation5], 4294963184 }
  0xd0   : > { %12867 = dma.done.wait (%p14177_p4), [#allocation8], 16448   ;;  %p14178_p12 = pmov %p14173_p0 }
  0xd1   : > { %p14179_p7 = pmov %p14173_p0 }
  0xd2   : > { %12869 = vsyncadd (%p14178_p12), [#allocation8], 4294950848 }
  0xd3   : > { %12871 = dma.done.wait (%p14179_p7), [#allocation11], 65792   ;;  %p14180_p8 = pmov %p14173_p0 }
  0xd4   : > { %s527_s5 = sand.u32 1, %s13003_s27   ;;  %s529_s28 = sand.u32 1, %s12888_s22  }
  0xd5   : > { %12873 = vsyncadd (%p14180_p8), [#allocation11], 4294901504  ;;  %s10283_s17 = sshll.u32 %s529_s28, 12  ;;  %s528_s19 = scalar_lea.sflag [#allocation14], %s527_s5 }
  0xd6   : > { %s13234_s20 = scalar_lea.vmem [#allocation13], %s10283_s17  ;;  %p14181_p11 = scmp.ne.s32.totalorder %s14159_s26, 0 }
  0xd8   : > { %12875 = dma.done.wait (%p14181_p11), %s528_s19, 65600  }
  0xd9   : > { %12877 = vsyncadd (%p14181_p11), %s528_s19, 4294901696  ;;  %s10284_s16 = sshll.u32 %s529_s28, 2  ;;  %s10285_s23 = sshll.u32 %s529_s28, 8 }
  0xda   : > { %s13240_s13 = scalar_lea.vmem [#allocation15], %s10284_s16  ;;  %s546_s18 = scalar_lea.sflag [#allocation17], %s529_s28 }
  0xdb   : > { %s13242_s14 = scalar_lea.vmem [#allocation16], %s10285_s23 }
  0xdc   : > { %12879 = dma.done.wait (%p14181_p11), %s546_s18, 4096  }
  0xdd   : > { %12881 = vsyncadd (%p14181_p11), %s546_s18, 4294963200  ;;  %v12914_v0 = vmov 0.0   ;;  %vm12915_vm0 = vmmov 0   ;;  %v11719_v1 = vld [vmem:[#allocation2 + $0x38] sm:$0xff]   ;;  %v11720_v2 = vld [vmem:[#allocation2 + $0x30] sm:$0xff]   ;;  %v12916_v43 = vmov 0  }
  0xde   : > { %11570 = vmatprep.subr.bf16.mxu0 %v12914_v0  ;;  %11586 = vmatprep.mubr.msk.bf16.mxu0 %vm12915_vm0, %v12914_v0  ;;  %v11721_v3 = vld [vmem:[#allocation2 + $0x28] sm:$0xff]   ;;  %v11722_v5 = vld [vmem:[#allocation2 + $0x20] sm:$0xff]   ;;  %v11723_v8 = vld [vmem:[#allocation2 + $0x18] sm:$0xff]   ;;  %p602_p10 = scmp.lt.s32.totalorder %s13003_s27, 1 }
  0xdf   : > { %11571 = vmatpush3.bf16.msra.mxu0 %v11719_v1  ;;  %v11727_v4 = vld [vmem:[#allocation6 + $0xe4] ss:$16 sps:$4 sm:$0xff]   ;;  %v11732_v6 = vld [vmem:[#allocation6 + $0xe0] ss:$16 sps:$4 sm:$0xff]   ;;  %v607_v20 = vld [vmem:[%s14115_s1] sm:$0x3]  ;;  %968 = vmatprep.mubr.bf16.mxu1 %v12916_v43 }
  0xe0   : > { %11572 = vmatprep.subr.bf16.mxu0 %v12914_v0  ;;  %936 = vmatprep.subr.bf16.mxu1 %v11727_v4  ;;  %v11733_v7 = vld [vmem:[#allocation6 + $0xc4] ss:$16 sps:$4 sm:$0xff]   ;;  %v11738_v9 = vld [vmem:[#allocation6 + $0xc0] ss:$16 sps:$4 sm:$0xff]   ;;  %v11731_v21 = vld [vmem:[#allocation6 + $0xec] ss:$16 sps:$4 sm:$0xff]   ;;  %v608_v25 = vpack.c.bf16 %v607_v20, %v607_v20 }
  0xe1   : > { %937 = vmatpush1.bf16.msra.mxu1 %v11732_v6  ;;  %v11739_v10 = vld [vmem:[#allocation6 + $0xa4] ss:$16 sps:$4 sm:$0xff]   ;;  %v11744_v11 = vld [vmem:[#allocation6 + $0xa0] ss:$16 sps:$4 sm:$0xff]   ;;  %v11729_v24 = vld [vmem:[#allocation6 + $0xe8] ss:$16 sps:$4 sm:$0xff]  }
  0xe2   : > { %938 = vmatprep.subr.bf16.mxu1 %v11733_v7  ;;  %v11745_v12 = vld [vmem:[#allocation6 + $0x84] ss:$16 sps:$4 sm:$0xff]   ;;  %v11750_v14 = vld [vmem:[#allocation6 + $0x80] ss:$16 sps:$4 sm:$0xff]   ;;  %v11737_v26 = vld [vmem:[#allocation6 + $0xcc] ss:$16 sps:$4 sm:$0xff]  }
  0xe3   : > { %11573 = vmatpush3.bf16.msra.mxu0 %v11720_v2  ;;  %v11724_v13 = vld [vmem:[#allocation2 + $0x10] sm:$0xff]   ;;  %v11725_v16 = vld [vmem:[#allocation2 + $0x8] sm:$0xff]   ;;  %v11726_v17 = vld [vmem:[#allocation2] sm:$0xff]   ;;  %s14188_s27 = smov (!%p602_p10, %s13003_s27), 1 }
  0xe4   : > { %11574 = vmatprep.subr.bf16.mxu0 %v12914_v0  ;;  %v11751_v15 = vld [vmem:[#allocation6 + $0x64] ss:$16 sps:$4 sm:$0xff]   ;;  %v11756_v18 = vld [vmem:[#allocation6 + $0x60] ss:$16 sps:$4 sm:$0xff]   ;;  %v11735_v27 = vld [vmem:[#allocation6 + $0xc8] ss:$16 sps:$4 sm:$0xff]  }
  0xe5   : > { %939 = vmatpush1.bf16.msra.mxu1 %v11738_v9  ;;  %v11757_v19 = vld [vmem:[#allocation6 + $0x44] ss:$16 sps:$4 sm:$0xff]   ;;  %v11762_v22 = vld [vmem:[#allocation6 + $0x40] ss:$16 sps:$4 sm:$0xff]   ;;  %v11743_v28 = vld [vmem:[#allocation6 + $0xac] ss:$16 sps:$4 sm:$0xff]  }
  0xe6   : > { %940 = vmatprep.subr.bf16.mxu1 %v11739_v10  ;;  %v11763_v23 = vld [vmem:[#allocation6 + $0x24] ss:$16 sps:$4 sm:$0xff]   ;;  %v11741_v29 = vld [vmem:[#allocation6 + $0xa8] ss:$16 sps:$4 sm:$0xff]   ;;  %v11749_v30 = vld [vmem:[#allocation6 + $0x8c] ss:$16 sps:$4 sm:$0xff]  }
  0xe7   : > { %11575 = vmatpush3.bf16.msra.mxu0 %v11721_v3  ;;  %v11747_v31 = vld [vmem:[#allocation6 + $0x88] ss:$16 sps:$4 sm:$0xff]   ;;  %v11755_v32 = vld [vmem:[#allocation6 + $0x6c] ss:$16 sps:$4 sm:$0xff]   ;;  %v11768_v38 = vld [vmem:[#allocation6 + $0x20] ss:$16 sps:$4 sm:$0xff]  }
  0xe8   : > { %11576 = vmatprep.subr.bf16.mxu0 %v12914_v0  ;;  %v11753_v33 = vld [vmem:[#allocation6 + $0x68] ss:$16 sps:$4 sm:$0xff]   ;;  %v11761_v34 = vld [vmem:[#allocation6 + $0x4c] ss:$16 sps:$4 sm:$0xff]   ;;  %v11769_v39 = vld [vmem:[#allocation6 + $0x4] ss:$16 sps:$4 sm:$0xff]  }
  0xe9   : > { %941 = vmatpush1.bf16.msra.mxu1 %v11744_v11  ;;  %v11759_v35 = vld [vmem:[#allocation6 + $0x48] ss:$16 sps:$4 sm:$0xff]   ;;  %v11767_v36 = vld [vmem:[#allocation6 + $0x2c] ss:$16 sps:$4 sm:$0xff]   ;;  %v11774_v42 = vld [vmem:[#allocation6] ss:$16 sps:$4 sm:$0xff]  }
  0xea   : > { %942 = vmatprep.subr.bf16.mxu1 %v11745_v12  ;;  %v11765_v37 = vld [vmem:[#allocation6 + $0x28] ss:$16 sps:$4 sm:$0xff]   ;;  %v11773_v40 = vld [vmem:[#allocation6 + $0xc] ss:$16 sps:$4 sm:$0xff]   ;;  %s10286_s24 = sshll.u32 %s14188_s27, 1 }
  0xeb   : > { %11577 = vmatpush3.bf16.msra.mxu0 %v11722_v5  ;;  %v11771_v41 = vld [vmem:[#allocation6 + $0x8] ss:$16 sps:$4 sm:$0xff]   ;;  %v10287_v52 = vld [vmem:[#allocation4] ss:$0 sm:$0xff]  ;;  %s605_s15 = scalar_lea.vmem %s14126_s12, %s10286_s24 }
  0xec   : > { %11578 = vmatprep.subr.bf16.mxu0 %v12914_v0  ;;  %v1268_v44 = vld [vmem:[#allocation10 + $0x380] sm:$0xff] }
  0xed   : > { %943 = vmatpush1.bf16.msra.mxu1 %v11750_v14  ;;  %v1276_v45 = vld [vmem:[#allocation10 + $0x3c0] sm:$0xff] }
  0xee   : > { %944 = vmatprep.subr.bf16.mxu1 %v11751_v15  ;;  %v1524_v46 = vld [vmem:[#allocation10 + $0xb80] sm:$0xff]  ;;  %v10440_v47 = vcombine.low %v1268_v44, %v1276_v45  ;;  %v10441_v48 = vcombine.high %v1268_v44, %v1276_v45 }
  0xef   : > { %11579 = vmatpush3.bf16.msra.mxu0 %v11723_v8  ;;  %v1532_v49 = vld [vmem:[#allocation10 + $0xbc0] sm:$0xff] }
  0xf0   : > { %11580 = vmatprep.subr.bf16.mxu0 %v12914_v0  ;;  %v10696_v50 = vcombine.low %v1524_v46, %v1532_v49  ;;  %v10697_v51 = vcombine.high %v1524_v46, %v1532_v49  ;;  %v1252_v54 = vld [vmem:[#allocation10 + $0x300] sm:$0xff] }
  0xf1   : > { %945 = vmatpush1.bf16.msra.mxu1 %v11756_v18  ;;  %v1260_v55 = vld [vmem:[#allocation10 + $0x340] sm:$0xff] }
  0xf2   : > { %946 = vmatprep.subr.bf16.mxu1 %v11757_v19  ;;  %v1508_v56 = vld [vmem:[#allocation10 + $0xb00] sm:$0xff]  ;;  %v10425_v3 = vcombine.high %v1252_v54, %v1260_v55  ;;  %v10424_v6 = vcombine.low %v1252_v54, %v1260_v55 }
  0xf3   : > { %11581 = vmatpush3.bf16.msra.mxu0 %v11724_v13  ;;  %v1516_v57 = vld [vmem:[#allocation10 + $0xb40] sm:$0xff] }
  0xf4   : > { %11582 = vmatprep.subr.bf16.mxu0 %v12914_v0  ;;  %v1236_v62 = vld [vmem:[#allocation10 + $0x280] sm:$0xff]  ;;  %v10681_v4 = vcombine.high %v1508_v56, %v1516_v57  ;;  %v10680_v7 = vcombine.low %v1508_v56, %v1516_v57 }
  0xf5   : > { %947 = vmatpush1.bf16.msra.mxu1 %v11762_v22  ;;  %v1244_v63 = vld [vmem:[#allocation10 + $0x2c0] sm:$0xff] }
  0xf6   : > { %948 = vmatprep.subr.bf16.mxu1 %v11763_v23  ;;  %v1500_v1 = vld [vmem:[#allocation10 + $0xac0] sm:$0xff]  ;;  %v10409_v12 = vcombine.high %v1236_v62, %v1244_v63  ;;  %v10408_v14 = vcombine.low %v1236_v62, %v1244_v63 }
  0xf7   : > { %11583 = vmatpush3.bf16.msra.mxu0 %v11725_v16  ;;  %v1220_v8 = vld [vmem:[#allocation10 + $0x200] sm:$0xff] }
  0xf8   : > { %11584 = vmatprep.subr.bf16.mxu0 %v12914_v0  ;;  %v1492_v0 = vld [vmem:[#allocation10 + $0xa80] sm:$0xff] }
  0xf9   : > { %949 = vmatpush1.bf16.msra.mxu1 %v11768_v38  ;;  %v1228_v9 = vld [vmem:[#allocation10 + $0x240] sm:$0xff]  ;;  %v10665_v13 = vcombine.high %v1492_v0, %v1500_v1  ;;  %v10664_v15 = vcombine.low %v1492_v0, %v1500_v1 }
  0xfa   : > { %950 = vmatprep.subr.bf16.mxu1 %v11769_v39  ;;  %v1476_v10 = vld [vmem:[#allocation10 + $0xa00] sm:$0xff]  ;;  %v10393_v20 = vcombine.high %v1220_v8, %v1228_v9  ;;  %v10392_v22 = vcombine.low %v1220_v8, %v1228_v9 }
  0xfb   : > { %11585 = vmatpush3.bf16.msra.mxu0 %v11726_v17  ;;  %v1484_v11 = vld [vmem:[#allocation10 + $0xa40] sm:$0xff] }
  0xfc   : > { %977 = vmatprep.subr.bf16.mxu0 %v11731_v21  ;;  %v1204_v16 = vld [vmem:[#allocation10 + $0x180] sm:$0xff]  ;;  %v10649_v21 = vcombine.high %v1476_v10, %v1484_v11  ;;  %v10648_v23 = vcombine.low %v1476_v10, %v1484_v11 }
  0xfd   : > { %951 = vmatpush1.bf16.msra.mxu1 %v11774_v42  ;;  %v1212_v17 = vld [vmem:[#allocation10 + $0x1c0] sm:$0xff] }
  0xfe   : > { %11587 = vmatmul.mubr.bf16.vlgmr.msra.gmra.mxu0 %v608_v25  ;;  %4228 = vmatprep.subr.bf16.mxu1 %v10441_v48  ;;  %v1460_v18 = vld [vmem:[#allocation10 + $0x980] sm:$0xff] }
  0xff   : > { %978 = vmatpush1.bf16.msra.mxu0 %v11729_v24  ;;  %1009 = vmatprep.mubr.bf16.mxu0 %v12916_v43  ;;  %v1468_v19 = vld [vmem:[#allocation10 + $0x9c0] sm:$0xff]  ;;  %v10377_v24 = vcombine.high %v1204_v16, %v1212_v17 }
 0x100   : > { %979 = vmatprep.subr.bf16.mxu0 %v11737_v26  ;;  %v10633_v25 = vcombine.high %v1460_v18, %v1468_v19  ;;  %v1188_v26 = vld [vmem:[#allocation10 + $0x100] sm:$0xff] }
 0x101   : > { %v1156_v42 = vld [vmem:[#allocation10] sm:$0xff] }
 0x102   : > { %v1164_v44 = vld [vmem:[#allocation10 + $0x40] sm:$0xff] }
 0x103   : > { %980 = vmatpush1.bf16.msra.mxu0 %v11735_v27  ;;  %v1196_v27 = vld [vmem:[#allocation10 + $0x140] sm:$0xff]  ;;  %v10329_v49 = vcombine.high %v1156_v42, %v1164_v44  ;;  %v10328_v55 = vcombine.low %v1156_v42, %v1164_v44 }
 0x104   : > { %981 = vmatprep.subr.bf16.mxu0 %v11743_v28  ;;  %v1444_v28 = vld [vmem:[#allocation10 + $0x900] sm:$0xff]  ;;  %v10360_v38 = vcombine.low %v1188_v26, %v1196_v27 }
 0x105   : > { %v1412_v45 = vld [vmem:[#allocation10 + $0x800] sm:$0xff] }
 0x106   : > { %v1420_v46 = vld [vmem:[#allocation10 + $0x840] sm:$0xff] }
 0x107   : > { %982 = vmatpush1.bf16.msra.mxu0 %v11741_v29  ;;  %v1452_v29 = vld [vmem:[#allocation10 + $0x940] sm:$0xff]  ;;  %v10584_v56 = vcombine.low %v1412_v45, %v1420_v46 }
 0x108   : > { %983 = vmatprep.subr.bf16.mxu0 %v11749_v30  ;;  %v10376_v30 = vcombine.low %v1204_v16, %v1212_v17  ;;  %v10616_v39 = vcombine.low %v1444_v28, %v1452_v29  ;;  %v1660_v54 = vld [vmem:[#allocation10 + $0xfc0] sm:$0xff] }
 0x109   : > { %v1644_v62 = vld [vmem:[#allocation10 + $0xf40] sm:$0xff] }
 0x10a   : > { %v1348_v11 = vld [vmem:[#allocation10 + $0x600] sm:$0xff] }
 0x10b   : > { %984 = vmatpush1.bf16.msra.mxu0 %v11747_v31  ;;  %v10632_v31 = vcombine.low %v1460_v18, %v1468_v19  ;;  %v1332_v19 = vld [vmem:[#allocation10 + $0x580] sm:$0xff] }
 0x10c   : > { %985 = vmatprep.subr.bf16.mxu0 %v11755_v32  ;;  %v10361_v32 = vcombine.high %v1188_v26, %v1196_v27  ;;  %v1316_v27 = vld [vmem:[#allocation10 + $0x500] sm:$0xff] }
 0x10f   : > { %986 = vmatpush1.bf16.msra.mxu0 %v11753_v33  ;;  %v10617_v33 = vcombine.high %v1444_v28, %v1452_v29  ;;  %v1324_v28 = vld [vmem:[#allocation10 + $0x540] sm:$0xff] }
 0x110   : > { %987 = vmatprep.subr.bf16.mxu0 %v11761_v34  ;;  %v1172_v34 = vld [vmem:[#allocation10 + $0x80] sm:$0xff] }
 0x111   : > { %v1572_v29 = vld [vmem:[#allocation10 + $0xd00] sm:$0xff] }
 0x113   : > { %988 = vmatpush1.bf16.msra.mxu0 %v11759_v35  ;;  %v1180_v35 = vld [vmem:[#allocation10 + $0xc0] sm:$0xff] }
 0x114   : > { %989 = vmatprep.subr.bf16.mxu0 %v11767_v36  ;;  %v1428_v36 = vld [vmem:[#allocation10 + $0x880] sm:$0xff] }
 0x117   : > { %990 = vmatpush1.bf16.msra.mxu0 %v11765_v37  ;;  %v1436_v37 = vld [vmem:[#allocation10 + $0x8c0] sm:$0xff] }
 0x118   : > { %991 = vmatprep.subr.bf16.mxu0 %v11773_v40  ;;  %v10345_v40 = vcombine.high %v1172_v34, %v1180_v35  ;;  %v10600_v48 = vcombine.low %v1428_v36, %v1436_v37 }
 0x11b   : > { %992 = vmatpush1.bf16.msra.mxu0 %v11771_v41  ;;  %v10601_v41 = vcombine.high %v1428_v36, %v1436_v37  ;;  %v1300_v37 = vld [vmem:[#allocation10 + $0x480] sm:$0xff] }
 0x11c   : > { %4269 = vmatprep.subr.bf16.mxu0 %v10697_v51  ;;  %v1396_v51 = vld [vmem:[#allocation10 + $0x780] sm:$0xff] }
 0x1be   : > { %v714_v53 = vpop.f32.mrf.mxu0 }
 0x1bf   : > { %v715_v58 = vadd.f32 %v10287_v52, %v714_v53  ;;  %v1404_v52 = vld [vmem:[#allocation10 + $0x7c0] sm:$0xff] }
 0x1c0   : > { %v11588_v59 = vpop.f32.mrf.mxu0  ;;  %v1652_v53 = vld [vmem:[#allocation10 + $0xf80] sm:$0xff]  ;;  %v10569_v57 = vcombine.high %v1396_v51, %v1404_v52  ;;  %v10568_v63 = vcombine.low %v1396_v51, %v1404_v52 }
 0x1c1   : > { %v720_v60 = vmax.f32 %v715_v58, 0.0  ;;  %v10825_v58 = vcombine.high %v1652_v53, %v1660_v54  ;;  %v1380_v59 = vld [vmem:[#allocation10 + $0x700] sm:$0xff]  ;;  %v10824_v0 = vcombine.low %v1652_v53, %v1660_v54  ;;  %v1269_v54 = vld [vmem:[#allocation10 + $0x388] sm:$0xff] }
 0x1c2   : > { %v717_v61 = vpop.f32.mrf.mxu0 }
 0x1c3   : > { %v721_v2 = vpack.c.bf16 %v720_v60, %v720_v60  ;;  %v1388_v60 = vld [vmem:[#allocation10 + $0x740] sm:$0xff] }
 0x1c4   : > { %v11589_v5 = vpop.f32.mrf.mxu0  ;;  %v1636_v61 = vld [vmem:[#allocation10 + $0xf00] sm:$0xff]  ;;  %v10553_v1 = vcombine.high %v1380_v59, %v1388_v60 }
 0x1c5   : > { %969 = vmatmul.mubr.bf16.vlgmr.msra.gmra.mxu1 %v721_v2  ;;  %1010 = vmatmul.mubr.bf16.vlgmr.msra.gmra.mxu0 %v721_v2  ;;  %v10809_v2 = vcombine.high %v1636_v61, %v1644_v62  ;;  %v1620_v5 = vld [vmem:[#allocation10 + $0xe80] sm:$0xff]  ;;  %v10808_v8 = vcombine.low %v1636_v61, %v1644_v62  ;;  %v756_v62 = vlaneseq }
 0x1c6   : > { %4229 = vmatpush1.bf16.msra.mxu1 %v10440_v47  ;;  %4270 = vmatpush1.bf16.msra.mxu0 %v10696_v50  ;;  %v10344_v47 = vcombine.low %v1172_v34, %v1180_v35  ;;  %v10585_v50 = vcombine.high %v1412_v45, %v1420_v46  ;;  %v10488_v35 = vcombine.low %v1316_v27, %v1324_v28  ;;  %v1284_v46 = vld [vmem:[#allocation10 + $0x400] sm:$0xff] }
 0x1c7   : > { %4230 = vmatprep.subr.bf16.mxu1 %v10425_v3  ;;  %4271 = vmatprep.subr.bf16.mxu0 %v10681_v4  ;;  %v1364_v3 = vld [vmem:[#allocation10 + $0x680] sm:$0xff] }
 0x1c8   : > { %v1372_v4 = vld [vmem:[#allocation10 + $0x6c0] sm:$0xff] }
 0x1c9   : > { %v10537_v9 = vcombine.high %v1364_v3, %v1372_v4 }
 0x1ca   : > { %4231 = vmatpush1.bf16.msra.mxu1 %v10424_v6  ;;  %4272 = vmatpush1.bf16.msra.mxu0 %v10680_v7  ;;  %v1628_v6 = vld [vmem:[#allocation10 + $0xec0] sm:$0xff]  ;;  %v10552_v7 = vcombine.low %v1380_v59, %v1388_v60 }
 0x1cb   : > { %4232 = vmatprep.subr.bf16.mxu1 %v10409_v12  ;;  %4273 = vmatprep.subr.bf16.mxu0 %v10665_v13  ;;  %v10793_v10 = vcombine.high %v1620_v5, %v1628_v6  ;;  %v1356_v12 = vld [vmem:[#allocation10 + $0x640] sm:$0xff]  ;;  %v10792_v16 = vcombine.low %v1620_v5, %v1628_v6 }
 0x1cc   : > { %v1604_v13 = vld [vmem:[#allocation10 + $0xe00] sm:$0xff]  ;;  %v10521_v17 = vcombine.high %v1348_v11, %v1356_v12 }
 0x1ce   : > { %4233 = vmatpush1.bf16.msra.mxu1 %v10408_v14  ;;  %4274 = vmatpush1.bf16.msra.mxu0 %v10664_v15  ;;  %v1612_v14 = vld [vmem:[#allocation10 + $0xe40] sm:$0xff]  ;;  %v10536_v15 = vcombine.low %v1364_v3, %v1372_v4 }
 0x1cf   : > { %4234 = vmatprep.subr.bf16.mxu1 %v10393_v20  ;;  %4275 = vmatprep.subr.bf16.mxu0 %v10649_v21  ;;  %v10777_v18 = vcombine.high %v1604_v13, %v1612_v14  ;;  %v1340_v20 = vld [vmem:[#allocation10 + $0x5c0] sm:$0xff] }
 0x1d0   : > { %v1588_v21 = vld [vmem:[#allocation10 + $0xd80] sm:$0xff] }
 0x1d2   : > { %4235 = vmatpush1.bf16.msra.mxu1 %v10392_v22  ;;  %4276 = vmatpush1.bf16.msra.mxu0 %v10648_v23  ;;  %v1596_v22 = vld [vmem:[#allocation10 + $0xdc0] sm:$0xff]  ;;  %v10520_v23 = vcombine.low %v1348_v11, %v1356_v12 }
 0x1d3   : > { %4236 = vmatprep.subr.bf16.mxu1 %v10377_v24  ;;  %4277 = vmatprep.subr.bf16.mxu0 %v10633_v25  ;;  %v10776_v24 = vcombine.low %v1604_v13, %v1612_v14  ;;  %v10505_v25 = vcombine.high %v1332_v19, %v1340_v20  ;;  %v10761_v26 = vcombine.high %v1588_v21, %v1596_v22 }
 0x1d6   : > { %4237 = vmatpush1.bf16.msra.mxu1 %v10376_v30  ;;  %4278 = vmatpush1.bf16.msra.mxu0 %v10632_v31  ;;  %v1580_v30 = vld [vmem:[#allocation10 + $0xd40] sm:$0xff]  ;;  %v10504_v31 = vcombine.low %v1332_v19, %v1340_v20 }
 0x1d7   : > { %4238 = vmatprep.subr.bf16.mxu1 %v10361_v32  ;;  %4279 = vmatprep.subr.bf16.mxu0 %v10617_v33  ;;  %v10760_v32 = vcombine.low %v1588_v21, %v1596_v22  ;;  %v10489_v33 = vcombine.high %v1316_v27, %v1324_v28  ;;  %v10745_v34 = vcombine.high %v1572_v29, %v1580_v30  ;;  %v1509_v27 = vld [vmem:[#allocation10 + $0xb08] sm:$0xff] }
 0x1d8   : > { %v10744_v36 = vcombine.low %v1572_v29, %v1580_v30  ;;  %v1517_v28 = vld [vmem:[#allocation10 + $0xb48] sm:$0xff] }
 0x1da   : > { %4239 = vmatpush1.bf16.msra.mxu1 %v10360_v38  ;;  %4280 = vmatpush1.bf16.msra.mxu0 %v10616_v39  ;;  %v1308_v38 = vld [vmem:[#allocation10 + $0x4c0] sm:$0xff] }
 0x1db   : > { %4240 = vmatprep.subr.bf16.mxu1 %v10345_v40  ;;  %4281 = vmatprep.subr.bf16.mxu0 %v10601_v41  ;;  %v1556_v39 = vld [vmem:[#allocation10 + $0xc80] sm:$0xff]  ;;  %v10473_v40 = vcombine.high %v1300_v37, %v1308_v38  ;;  %v10472_v42 = vcombine.low %v1300_v37, %v1308_v38  ;;  %v1493_v37 = vld [vmem:[#allocation10 + $0xa88] sm:$0xff] }
 0x1dc   : > { %v1564_v41 = vld [vmem:[#allocation10 + $0xcc0] sm:$0xff]  ;;  %v1501_v38 = vld [vmem:[#allocation10 + $0xac8] sm:$0xff] }
 0x1dd   : > { %v10728_v44 = vcombine.low %v1556_v39, %v1564_v41  ;;  %v10729_v45 = vcombine.high %v1556_v39, %v1564_v41 }
 0x1de   : > { %4241 = vmatpush1.bf16.msra.mxu1 %v10344_v47  ;;  %4282 = vmatpush1.bf16.msra.mxu0 %v10600_v48  ;;  %v1292_v47 = vld [vmem:[#allocation10 + $0x440] sm:$0xff] }
 0x1df   : > { %4242 = vmatprep.subr.bf16.mxu1 %v10329_v49  ;;  %4283 = vmatprep.subr.bf16.mxu0 %v10585_v50  ;;  %v1540_v48 = vld [vmem:[#allocation10 + $0xc00] sm:$0xff]  ;;  %v10457_v49 = vcombine.high %v1284_v46, %v1292_v47  ;;  %v10456_v51 = vcombine.low %v1284_v46, %v1292_v47  ;;  %v1477_v46 = vld [vmem:[#allocation10 + $0xa08] sm:$0xff] }
 0x1e0   : > { %v1548_v50 = vld [vmem:[#allocation10 + $0xc40] sm:$0xff]  ;;  %v1485_v47 = vld [vmem:[#allocation10 + $0xa48] sm:$0xff] }
 0x1e1   : > { %v10712_v52 = vcombine.low %v1540_v48, %v1548_v50  ;;  %v10713_v53 = vcombine.high %v1540_v48, %v1548_v50 }
 0x1e2   : > { %4243 = vmatpush1.bf16.msra.mxu1 %v10328_v55  ;;  %4284 = vmatpush1.bf16.msra.mxu0 %v10584_v56  ;;  %v1277_v55 = vld [vmem:[#allocation10 + $0x3c8] sm:$0xff] }
 0x1e3   : > { %4244 = vmatprep.subr.bf16.mxu1 %v10569_v57  ;;  %4285 = vmatprep.subr.bf16.mxu0 %v10825_v58  ;;  %v1525_v56 = vld [vmem:[#allocation10 + $0xb88] sm:$0xff]  ;;  %v10443_v57 = vcombine.high %v1269_v54, %v1277_v55  ;;  %v10442_v59 = vcombine.low %v1269_v54, %v1277_v55 }
 0x1e4   : > { %v1533_v58 = vld [vmem:[#allocation10 + $0xbc8] sm:$0xff] }
 0x1e5   : > { %v10698_v60 = vcombine.low %v1525_v56, %v1533_v58  ;;  %v10699_v61 = vcombine.high %v1525_v56, %v1533_v58  ;;  %v1461_v54 = vld [vmem:[#allocation10 + $0x988] sm:$0xff] }
 0x1e6   : > { %4245 = vmatpush2.bf16.msra.mxu1 %v10568_v63  ;;  %4286 = vmatpush2.bf16.msra.mxu0 %v10824_v0  ;;  %v13253_v63 = vshrl.u32 %v756_v62, 7  ;;  %v1469_v55 = vld [vmem:[#allocation10 + $0x9c8] sm:$0xff] }
 0x1e7   : > { %4246 = vmatprep.subr.bf16.mxu1 %v10553_v1  ;;  %4287 = vmatprep.subr.bf16.mxu0 %v10809_v2  ;;  %v754_v2 = vld [vmem:[#allocation7] sm:$0xf]  ;;  %v1445_v62 = vld [vmem:[#allocation10 + $0x908] sm:$0xff] }
 0x1e8   : > { %v13256_v0 = vsub.s32 0, %v13253_v63  ;;  %v13259_v1 = vsub.s32 2, %v13253_v63  ;;  %v13262_v3 = vsub.s32 1, %v13253_v63  ;;  %v13265_v4 = vsub.s32 3, %v13253_v63 }
 0x1ea   : > { %4247 = vmatpush2.bf16.msra.mxu1 %v10552_v7  ;;  %4288 = vmatpush2.bf16.msra.mxu0 %v10808_v8  ;;  %v759_v5 = vrot.slane %v754_v2, %v13256_v0  ;;  %v767_v6 = vrot.slane %v754_v2, %v13259_v1  ;;  %v763_v7 = vrot.slane %v754_v2, %v13262_v3 }
 0x1eb   : > { %4248 = vmatprep.subr.bf16.mxu1 %v10537_v9  ;;  %4289 = vmatprep.subr.bf16.mxu0 %v10793_v10  ;;  %v771_v8 = vrot.slane %v754_v2, %v13265_v4  ;;  %v1453_v2 = vld [vmem:[#allocation10 + $0x948] sm:$0xff] }
 0x1ee   : > { %4249 = vmatpush2.bf16.msra.mxu1 %v10536_v15  ;;  %4290 = vmatpush2.bf16.msra.mxu0 %v10792_v16 }
 0x1ef   : > { %4250 = vmatprep.subr.bf16.mxu1 %v10521_v17  ;;  %4291 = vmatprep.subr.bf16.mxu0 %v10777_v18 }
 0x1f2   : > { %4251 = vmatpush2.bf16.msra.mxu1 %v10520_v23  ;;  %4292 = vmatpush2.bf16.msra.mxu0 %v10776_v24  ;;  %v1253_v23 = vld [vmem:[#allocation10 + $0x308] sm:$0xff] }
 0x1f3   : > { %4252 = vmatprep.subr.bf16.mxu1 %v10505_v25  ;;  %4293 = vmatprep.subr.bf16.mxu0 %v10761_v26  ;;  %v1261_v26 = vld [vmem:[#allocation10 + $0x348] sm:$0xff] }
 0x1f4   : > { %v10426_v39 = vcombine.low %v1253_v23, %v1261_v26 }
 0x1f6   : > { %4253 = vmatpush2.bf16.msra.mxu1 %v10504_v31  ;;  %4294 = vmatpush2.bf16.msra.mxu0 %v10760_v32 }
 0x1f7   : > { %4254 = vmatprep.subr.bf16.mxu1 %v10489_v33  ;;  %4295 = vmatprep.subr.bf16.mxu0 %v10745_v34  ;;  %v1237_v33 = vld [vmem:[#allocation10 + $0x288] sm:$0xff]  ;;  %v10427_v34 = vcombine.high %v1253_v23, %v1261_v26 }
 0x1f8   : > { %v1405_v26 = vld [vmem:[#allocation10 + $0x7c8] sm:$0xff] }
 0x1fa   : > { %4255 = vmatpush2.bf16.msra.mxu1 %v10488_v35  ;;  %4296 = vmatpush2.bf16.msra.mxu0 %v10744_v36  ;;  %v10683_v35 = vcombine.high %v1509_v27, %v1517_v28  ;;  %v1245_v36 = vld [vmem:[#allocation10 + $0x2c8] sm:$0xff] }
 0x1fb   : > { %4256 = vmatprep.subr.bf16.mxu1 %v10473_v40  ;;  %4297 = vmatprep.subr.bf16.mxu0 %v10729_v45  ;;  %v10682_v40 = vcombine.low %v1509_v27, %v1517_v28  ;;  %v10411_v41 = vcombine.high %v1237_v33, %v1245_v36  ;;  %v1229_v45 = vld [vmem:[#allocation10 + $0x248] sm:$0xff]  ;;  %v10410_v48 = vcombine.low %v1237_v33, %v1245_v36 }
 0x1fc   : > { %v1653_v27 = vld [vmem:[#allocation10 + $0xf88] sm:$0xff] }
 0x1fd   : > { %v1661_v28 = vld [vmem:[#allocation10 + $0xfc8] sm:$0xff] }
 0x1fe   : > { %4257 = vmatpush2.bf16.msra.mxu1 %v10472_v42  ;;  %4298 = vmatpush2.bf16.msra.mxu0 %v10728_v44  ;;  %v10667_v42 = vcombine.high %v1493_v37, %v1501_v38  ;;  %v1221_v44 = vld [vmem:[#allocation10 + $0x208] sm:$0xff]  ;;  %v10827_v36 = vcombine.high %v1653_v27, %v1661_v28 }
 0x1ff   : > { %4258 = vmatprep.subr.bf16.mxu1 %v10457_v49  ;;  %4299 = vmatprep.subr.bf16.mxu0 %v10713_v53  ;;  %v10666_v49 = vcombine.low %v1493_v37, %v1501_v38  ;;  %v10395_v50 = vcombine.high %v1221_v44, %v1229_v45  ;;  %v1213_v53 = vld [vmem:[#allocation10 + $0x1c8] sm:$0xff]  ;;  %v10394_v56 = vcombine.low %v1221_v44, %v1229_v45 }
 0x200   : > { %v1381_v37 = vld [vmem:[#allocation10 + $0x708] sm:$0xff] }
 0x201   : > { %v1389_v38 = vld [vmem:[#allocation10 + $0x748] sm:$0xff] }
 0x202   : > { %4259 = vmatpush2.bf16.msra.mxu1 %v10456_v51  ;;  %4300 = vmatpush2.bf16.msra.mxu0 %v10712_v52  ;;  %v10651_v51 = vcombine.high %v1477_v46, %v1485_v47  ;;  %v1205_v52 = vld [vmem:[#allocation10 + $0x188] sm:$0xff]  ;;  %v10555_v44 = vcombine.high %v1381_v37, %v1389_v38 }
 0x203   : > { %4310 = vmatprep.subr.bf16.mxu1 %v10443_v57  ;;  %4351 = vmatprep.subr.bf16.mxu0 %v10699_v61  ;;  %v10650_v57 = vcombine.low %v1477_v46, %v1485_v47  ;;  %v10379_v58 = vcombine.high %v1205_v52, %v1213_v53  ;;  %v1197_v61 = vld [vmem:[#allocation10 + $0x148] sm:$0xff] }
 0x204   : > { %v1365_v46 = vld [vmem:[#allocation10 + $0x688] sm:$0xff] }
 0x205   : > { %v1373_v47 = vld [vmem:[#allocation10 + $0x6c8] sm:$0xff] }
 0x285   : > { %v970_v9 = vpop.f32.mrf.mxu1  ;;  %v1011_v10 = vpop.f32.mrf.mxu0 }
 0x286   : > { %v971_v11 = vadd.f32 %v970_v9, %v759_v5  ;;  %v1012_v12 = vadd.f32 %v1011_v10, %v767_v6  ;;  %v10378_v5 = vcombine.low %v1205_v52, %v1213_v53  ;;  %v10634_v6 = vcombine.low %v1461_v54, %v1469_v55  ;;  %v1173_v9 = vld [vmem:[#allocation10 + $0x88] sm:$0xff] }
 0x287   : > { %v972_v13 = vpop.f32.mrf.mxu1  ;;  %v1013_v14 = vpop.f32.mrf.mxu0  ;;  %v1181_v10 = vld [vmem:[#allocation10 + $0xc8] sm:$0xff]  ;;  %v10539_v52 = vcombine.high %v1365_v46, %v1373_v47 }
 0x288   : > { %v973_v15 = vadd.f32 %v972_v13, %v763_v7  ;;  %v1014_v16 = vadd.f32 %v1013_v14, %v771_v8  ;;  %v1018_v17 = vmax.f32 %v971_v11, 0.0  ;;  %v1020_v18 = vmax.f32 %v1012_v12, 0.0  ;;  %v1429_v11 = vld [vmem:[#allocation10 + $0x888] sm:$0xff] }
 0x289   : > { %v974_v19 = vpop.f32.mrf.mxu1  ;;  %v1015_v20 = vpop.f32.mrf.mxu0  ;;  %v10619_v8 = vcombine.high %v1445_v62, %v1453_v2  ;;  %v1437_v12 = vld [vmem:[#allocation10 + $0x8c8] sm:$0xff]  ;;  %v10618_v14 = vcombine.low %v1445_v62, %v1453_v2 }
 0x28a   : > { %v1019_v21 = vmax.f32 %v973_v15, 0.0  ;;  %v1021_v22 = vmax.f32 %v1014_v16, 0.0  ;;  %v13275_v31 = vpack.c.bf16 %v1018_v17, %v1018_v17  ;;  %v13277_v32 = vpack.c.bf16 %v1020_v18, %v1020_v18  ;;  %v1157_v17 = vld [vmem:[#allocation10 + $0x8] sm:$0xff] }
 0x28b   : > { %v975_v24 = vpop.f32.mrf.mxu1  ;;  %v1016_v25 = vpop.f32.mrf.mxu0  ;;  %v10347_v15 = vcombine.high %v1173_v9, %v1181_v10  ;;  %v10603_v16 = vcombine.high %v1429_v11, %v1437_v12  ;;  %v1165_v18 = vld [vmem:[#allocation10 + $0x48] sm:$0xff] }
 0x28c   : > { %v13271_v29 = vpack.c.bf16 %v1019_v21, %v1019_v21  ;;  %v13273_v30 = vpack.c.bf16 %v1021_v22, %v1021_v22  ;;  %v1413_v19 = vld [vmem:[#allocation10 + $0x808] sm:$0xff]  ;;  %v10346_v21 = vcombine.low %v1173_v9, %v1181_v10  ;;  %v10602_v22 = vcombine.low %v1429_v11, %v1437_v12 }
 0x28d   : > { %v1421_v20 = vld [vmem:[#allocation10 + $0x848] sm:$0xff]  ;;  %v10331_v23 = vcombine.high %v1157_v17, %v1165_v18  ;;  %v10330_v33 = vcombine.low %v1157_v17, %v1165_v18 }
 0x28e   : > { %4260 = vmatprep.mubr.bf16.mxu1 %v13271_v29  ;;  %4301 = vmatprep.mubr.bf16.mxu0 %v13273_v30  ;;  %v10587_v24 = vcombine.high %v1413_v19, %v1421_v20  ;;  %v1397_v25 = vld [vmem:[#allocation10 + $0x788] sm:$0xff] }
 0x28f   : > { %4261 = vmatmul.mubr.bf16.vlgmr.msra.gmra.mxu1 %v13275_v31  ;;  %4302 = vmatmul.mubr.bf16.vlgmr.msra.gmra.mxu0 %v13277_v32  ;;  %v1333_v62 = vld [vmem:[#allocation10 + $0x588] sm:$0xff] }
 0x290   : > { %4311 = vmatpush1.bf16.msra.mxu1 %v10442_v59  ;;  %4352 = vmatpush1.bf16.msra.mxu0 %v10698_v60  ;;  %v10635_v59 = vcombine.high %v1461_v54, %v1469_v55  ;;  %v1189_v60 = vld [vmem:[#allocation10 + $0x108] sm:$0xff] }
 0x291   : > { %4342 = vmatprep.mubr.bf16.mxu1 %v13271_v29  ;;  %4383 = vmatprep.mubr.bf16.mxu0 %v13273_v30  ;;  %v10363_v7 = vcombine.high %v1189_v60, %v1197_v61  ;;  %v10362_v13 = vcombine.low %v1189_v60, %v1197_v61  ;;  %v1349_v54 = vld [vmem:[#allocation10 + $0x608] sm:$0xff] }
 0x292   : > { %4312 = vmatprep.subr.bf16.mxu1 %v10427_v34  ;;  %4353 = vmatprep.subr.bf16.mxu0 %v10683_v35  ;;  %v10586_v34 = vcombine.low %v1413_v19, %v1421_v20  ;;  %v10571_v35 = vcombine.high %v1397_v25, %v1405_v26  ;;  %v1357_v55 = vld [vmem:[#allocation10 + $0x648] sm:$0xff] }
 0x293   : > { %v10523_v60 = vcombine.high %v1349_v54, %v1357_v55  ;;  %v1341_v2 = vld [vmem:[#allocation10 + $0x5c8] sm:$0xff] }
 0x294   : > { %4313 = vmatpush1.bf16.msra.mxu1 %v10426_v39  ;;  %4354 = vmatpush1.bf16.msra.mxu0 %v10682_v40  ;;  %v1637_v39 = vld [vmem:[#allocation10 + $0xf08] sm:$0xff]  ;;  %v10507_v9 = vcombine.high %v1333_v62, %v1341_v2 }
 0x295   : > { %4314 = vmatprep.subr.bf16.mxu1 %v10411_v41  ;;  %4355 = vmatprep.subr.bf16.mxu0 %v10667_v42  ;;  %v1645_v40 = vld [vmem:[#allocation10 + $0xf48] sm:$0xff]  ;;  %v10570_v41 = vcombine.low %v1397_v25, %v1405_v26  ;;  %v10826_v42 = vcombine.low %v1653_v27, %v1661_v28 }
 0x296   : > { %v10811_v45 = vcombine.high %v1637_v39, %v1645_v40  ;;  %v1317_v11 = vld [vmem:[#allocation10 + $0x508] sm:$0xff] }
 0x297   : > { %v1325_v12 = vld [vmem:[#allocation10 + $0x548] sm:$0xff] }
 0x298   : > { %4315 = vmatpush1.bf16.msra.mxu1 %v10410_v48  ;;  %4356 = vmatpush1.bf16.msra.mxu0 %v10666_v49  ;;  %v1621_v48 = vld [vmem:[#allocation10 + $0xe88] sm:$0xff]  ;;  %v10491_v17 = vcombine.high %v1317_v11, %v1325_v12 }
 0x299   : > { %4316 = vmatprep.subr.bf16.mxu1 %v10395_v50  ;;  %4357 = vmatprep.subr.bf16.mxu0 %v10651_v51  ;;  %v1629_v49 = vld [vmem:[#allocation10 + $0xec8] sm:$0xff]  ;;  %v10554_v50 = vcombine.low %v1381_v37, %v1389_v38  ;;  %v10810_v51 = vcombine.low %v1637_v39, %v1645_v40  ;;  %v1270_v39 = vld [vmem:[#allocation10 + $0x390] sm:$0xff] }
 0x29a   : > { %v10795_v53 = vcombine.high %v1621_v48, %v1629_v49  ;;  %v1301_v19 = vld [vmem:[#allocation10 + $0x488] sm:$0xff]  ;;  %v1278_v40 = vld [vmem:[#allocation10 + $0x3d0] sm:$0xff] }
 0x29b   : > { %v1309_v20 = vld [vmem:[#allocation10 + $0x4c8] sm:$0xff] }
 0x29c   : > { %4317 = vmatpush1.bf16.msra.mxu1 %v10394_v56  ;;  %4358 = vmatpush1.bf16.msra.mxu0 %v10650_v57  ;;  %v1605_v56 = vld [vmem:[#allocation10 + $0xe08] sm:$0xff]  ;;  %v10475_v25 = vcombine.high %v1301_v19, %v1309_v20 }
 0x29d   : > { %4318 = vmatprep.subr.bf16.mxu1 %v10379_v58  ;;  %4359 = vmatprep.subr.bf16.mxu0 %v10635_v59  ;;  %v1613_v57 = vld [vmem:[#allocation10 + $0xe48] sm:$0xff]  ;;  %v10538_v58 = vcombine.low %v1365_v46, %v1373_v47  ;;  %v10794_v59 = vcombine.low %v1621_v48, %v1629_v49  ;;  %v10445_v46 = vcombine.high %v1270_v39, %v1278_v40  ;;  %v1254_v48 = vld [vmem:[#allocation10 + $0x310] sm:$0xff] }
 0x29e   : > { %v10779_v61 = vcombine.high %v1605_v56, %v1613_v57  ;;  %v1285_v27 = vld [vmem:[#allocation10 + $0x408] sm:$0xff]  ;;  %v1262_v49 = vld [vmem:[#allocation10 + $0x350] sm:$0xff] }
 0x29f   : > { %v1293_v28 = vld [vmem:[#allocation10 + $0x448] sm:$0xff] }
 0x2a0   : > { %4319 = vmatpush1.bf16.msra.mxu1 %v10378_v5  ;;  %4360 = vmatpush1.bf16.msra.mxu0 %v10634_v6  ;;  %v1589_v5 = vld [vmem:[#allocation10 + $0xd88] sm:$0xff]  ;;  %v10459_v37 = vcombine.high %v1285_v27, %v1293_v28 }
 0x2a1   : > { %4320 = vmatprep.subr.bf16.mxu1 %v10363_v7  ;;  %4361 = vmatprep.subr.bf16.mxu0 %v10619_v8  ;;  %v1597_v6 = vld [vmem:[#allocation10 + $0xdc8] sm:$0xff]  ;;  %v10522_v7 = vcombine.low %v1349_v54, %v1357_v55  ;;  %v10778_v8 = vcombine.low %v1605_v56, %v1613_v57  ;;  %v10429_v54 = vcombine.high %v1254_v48, %v1262_v49  ;;  %v1238_v56 = vld [vmem:[#allocation10 + $0x290] sm:$0xff] }
 0x2a2   : > { %v10763_v10 = vcombine.high %v1589_v5, %v1597_v6  ;;  %v1246_v57 = vld [vmem:[#allocation10 + $0x2d0] sm:$0xff] }
 0x2a4   : > { %4321 = vmatpush1.bf16.msra.mxu1 %v10362_v13  ;;  %4362 = vmatpush1.bf16.msra.mxu0 %v10618_v14  ;;  %v1573_v13 = vld [vmem:[#allocation10 + $0xd08] sm:$0xff] }
 0x2a5   : > { %4322 = vmatprep.subr.bf16.mxu1 %v10347_v15  ;;  %4363 = vmatprep.subr.bf16.mxu0 %v10603_v16  ;;  %v1581_v14 = vld [vmem:[#allocation10 + $0xd48] sm:$0xff]  ;;  %v10506_v15 = vcombine.low %v1333_v62, %v1341_v2  ;;  %v10762_v16 = vcombine.low %v1589_v5, %v1597_v6  ;;  %v10413_v62 = vcombine.high %v1238_v56, %v1246_v57  ;;  %v1222_v5 = vld [vmem:[#allocation10 + $0x210] sm:$0xff] }
 0x2a6   : > { %v10747_v18 = vcombine.high %v1573_v13, %v1581_v14  ;;  %v1230_v6 = vld [vmem:[#allocation10 + $0x250] sm:$0xff] }
 0x2a8   : > { %4323 = vmatpush1.bf16.msra.mxu1 %v10346_v21  ;;  %4364 = vmatpush1.bf16.msra.mxu0 %v10602_v22  ;;  %v1557_v21 = vld [vmem:[#allocation10 + $0xc88] sm:$0xff] }
 0x2a9   : > { %4324 = vmatprep.subr.bf16.mxu1 %v10331_v23  ;;  %4365 = vmatprep.subr.bf16.mxu0 %v10587_v24  ;;  %v1565_v22 = vld [vmem:[#allocation10 + $0xcc8] sm:$0xff]  ;;  %v10490_v23 = vcombine.low %v1317_v11, %v1325_v12  ;;  %v10746_v24 = vcombine.low %v1573_v13, %v1581_v14  ;;  %v10397_v11 = vcombine.high %v1222_v5, %v1230_v6  ;;  %v1206_v13 = vld [vmem:[#allocation10 + $0x190] sm:$0xff] }
 0x2aa   : > { %v10731_v26 = vcombine.high %v1557_v21, %v1565_v22  ;;  %v1214_v14 = vld [vmem:[#allocation10 + $0x1d0] sm:$0xff] }
 0x2ac   : > { %4325 = vmatpush1.bf16.msra.mxu1 %v10330_v33  ;;  %4366 = vmatpush1.bf16.msra.mxu0 %v10586_v34  ;;  %v1541_v33 = vld [vmem:[#allocation10 + $0xc08] sm:$0xff] }
 0x2ad   : > { %4326 = vmatprep.subr.bf16.mxu1 %v10571_v35  ;;  %4367 = vmatprep.subr.bf16.mxu0 %v10827_v36  ;;  %v1549_v34 = vld [vmem:[#allocation10 + $0xc48] sm:$0xff]  ;;  %v10474_v35 = vcombine.low %v1301_v19, %v1309_v20  ;;  %v10730_v36 = vcombine.low %v1557_v21, %v1565_v22  ;;  %v10381_v19 = vcombine.high %v1206_v13, %v1214_v14  ;;  %v1190_v21 = vld [vmem:[#allocation10 + $0x110] sm:$0xff] }
 0x2ae   : > { %v10715_v38 = vcombine.high %v1541_v33, %v1549_v34  ;;  %v1198_v22 = vld [vmem:[#allocation10 + $0x150] sm:$0xff] }
 0x2b0   : > { %4327 = vmatpush2.bf16.msra.mxu1 %v10570_v41  ;;  %4368 = vmatpush2.bf16.msra.mxu0 %v10826_v42  ;;  %v1526_v41 = vld [vmem:[#allocation10 + $0xb90] sm:$0xff] }
 0x2b1   : > { %4328 = vmatprep.subr.bf16.mxu1 %v10555_v44  ;;  %4369 = vmatprep.subr.bf16.mxu0 %v10811_v45  ;;  %v1534_v42 = vld [vmem:[#allocation10 + $0xbd0] sm:$0xff]  ;;  %v10458_v44 = vcombine.low %v1285_v27, %v1293_v28  ;;  %v10714_v45 = vcombine.low %v1541_v33, %v1549_v34  ;;  %v10365_v27 = vcombine.high %v1190_v21, %v1198_v22 }
 0x2b2   : > { %v10701_v47 = vcombine.high %v1526_v41, %v1534_v42  ;;  %v1174_v33 = vld [vmem:[#allocation10 + $0x90] sm:$0xff] }
 0x2b3   : > { %v1182_v34 = vld [vmem:[#allocation10 + $0xd0] sm:$0xff] }
 0x2b4   : > { %4329 = vmatpush2.bf16.msra.mxu1 %v10554_v50  ;;  %4370 = vmatpush2.bf16.msra.mxu0 %v10810_v51  ;;  %v1510_v50 = vld [vmem:[#allocation10 + $0xb10] sm:$0xff] }
 0x2b5   : > { %4330 = vmatprep.subr.bf16.mxu1 %v10539_v52  ;;  %4371 = vmatprep.subr.bf16.mxu0 %v10795_v53  ;;  %v1518_v51 = vld [vmem:[#allocation10 + $0xb50] sm:$0xff]  ;;  %v10444_v52 = vcombine.low %v1270_v39, %v1278_v40  ;;  %v10700_v53 = vcombine.low %v1526_v41, %v1534_v42  ;;  %v10349_v39 = vcombine.high %v1174_v33, %v1182_v34 }
 0x2b6   : > { %v10685_v55 = vcombine.high %v1510_v50, %v1518_v51  ;;  %v1158_v41 = vld [vmem:[#allocation10 + $0x10] sm:$0xff] }
 0x2b7   : > { %v1166_v42 = vld [vmem:[#allocation10 + $0x50] sm:$0xff] }
 0x2b8   : > { %4331 = vmatpush2.bf16.msra.mxu1 %v10538_v58  ;;  %4372 = vmatpush2.bf16.msra.mxu0 %v10794_v59  ;;  %v1494_v58 = vld [vmem:[#allocation10 + $0xa90] sm:$0xff] }
 0x2b9   : > { %4332 = vmatprep.subr.bf16.mxu1 %v10523_v60  ;;  %4373 = vmatprep.subr.bf16.mxu0 %v10779_v61  ;;  %v1502_v59 = vld [vmem:[#allocation10 + $0xad0] sm:$0xff]  ;;  %v10428_v60 = vcombine.low %v1254_v48, %v1262_v49  ;;  %v10684_v61 = vcombine.low %v1510_v50, %v1518_v51  ;;  %v10333_v48 = vcombine.high %v1158_v41, %v1166_v42 }
 0x2ba   : > { %v10669_v2 = vcombine.high %v1494_v58, %v1502_v59  ;;  %v1398_v50 = vld [vmem:[#allocation10 + $0x790] sm:$0xff] }
 0x2bb   : > { %v1406_v51 = vld [vmem:[#allocation10 + $0x7d0] sm:$0xff] }
 0x2bc   : > { %4333 = vmatpush2.bf16.msra.mxu1 %v10522_v7  ;;  %4374 = vmatpush2.bf16.msra.mxu0 %v10778_v8  ;;  %v1478_v7 = vld [vmem:[#allocation10 + $0xa10] sm:$0xff] }
 0x2bd   : > { %4334 = vmatprep.subr.bf16.mxu1 %v10507_v9  ;;  %4375 = vmatprep.subr.bf16.mxu0 %v10763_v10  ;;  %v1486_v8 = vld [vmem:[#allocation10 + $0xa50] sm:$0xff]  ;;  %v10412_v9 = vcombine.low %v1238_v56, %v1246_v57  ;;  %v10668_v10 = vcombine.low %v1494_v58, %v1502_v59  ;;  %v10573_v56 = vcombine.high %v1398_v50, %v1406_v51 }
 0x2be   : > { %v10653_v12 = vcombine.high %v1478_v7, %v1486_v8  ;;  %v1382_v58 = vld [vmem:[#allocation10 + $0x710] sm:$0xff] }
 0x2bf   : > { %v1390_v59 = vld [vmem:[#allocation10 + $0x750] sm:$0xff] }
 0x2c0   : > { %4335 = vmatpush2.bf16.msra.mxu1 %v10506_v15  ;;  %4376 = vmatpush2.bf16.msra.mxu0 %v10762_v16  ;;  %v1462_v15 = vld [vmem:[#allocation10 + $0x990] sm:$0xff] }
 0x2c1   : > { %4336 = vmatprep.subr.bf16.mxu1 %v10491_v17  ;;  %4377 = vmatprep.subr.bf16.mxu0 %v10747_v18  ;;  %v1470_v16 = vld [vmem:[#allocation10 + $0x9d0] sm:$0xff]  ;;  %v10396_v17 = vcombine.low %v1222_v5, %v1230_v6  ;;  %v10652_v18 = vcombine.low %v1478_v7, %v1486_v8  ;;  %v10557_v5 = vcombine.high %v1382_v58, %v1390_v59 }
 0x2c2   : > { %v10637_v20 = vcombine.high %v1462_v15, %v1470_v16  ;;  %v1366_v7 = vld [vmem:[#allocation10 + $0x690] sm:$0xff] }
 0x2c3   : > { %v1374_v8 = vld [vmem:[#allocation10 + $0x6d0] sm:$0xff] }
 0x2c4   : > { %4337 = vmatpush2.bf16.msra.mxu1 %v10490_v23  ;;  %4378 = vmatpush2.bf16.msra.mxu0 %v10746_v24  ;;  %v1446_v23 = vld [vmem:[#allocation10 + $0x910] sm:$0xff] }
 0x2c5   : > { %4338 = vmatprep.subr.bf16.mxu1 %v10475_v25  ;;  %4379 = vmatprep.subr.bf16.mxu0 %v10731_v26  ;;  %v1454_v24 = vld [vmem:[#allocation10 + $0x950] sm:$0xff]  ;;  %v10380_v25 = vcombine.low %v1206_v13, %v1214_v14  ;;  %v10636_v26 = vcombine.low %v1462_v15, %v1470_v16  ;;  %v10541_v13 = vcombine.high %v1366_v7, %v1374_v8 }
 0x2c6   : > { %v10621_v28 = vcombine.high %v1446_v23, %v1454_v24  ;;  %v1350_v15 = vld [vmem:[#allocation10 + $0x610] sm:$0xff] }
 0x2c7   : > { %v1358_v16 = vld [vmem:[#allocation10 + $0x650] sm:$0xff] }
 0x2c8   : > { %4339 = vmatpush2.bf16.msra.mxu1 %v10474_v35  ;;  %4380 = vmatpush2.bf16.msra.mxu0 %v10730_v36  ;;  %v1430_v35 = vld [vmem:[#allocation10 + $0x890] sm:$0xff] }
 0x2c9   : > { %4340 = vmatprep.subr.bf16.mxu1 %v10459_v37  ;;  %4381 = vmatprep.subr.bf16.mxu0 %v10715_v38  ;;  %v1438_v36 = vld [vmem:[#allocation10 + $0x8d0] sm:$0xff]  ;;  %v10364_v37 = vcombine.low %v1190_v21, %v1198_v22  ;;  %v10620_v38 = vcombine.low %v1446_v23, %v1454_v24  ;;  %v10525_v21 = vcombine.high %v1350_v15, %v1358_v16 }
 0x2ca   : > { %v10605_v40 = vcombine.high %v1430_v35, %v1438_v36  ;;  %v1334_v23 = vld [vmem:[#allocation10 + $0x590] sm:$0xff] }
 0x2cb   : > { %v1342_v24 = vld [vmem:[#allocation10 + $0x5d0] sm:$0xff] }
 0x2cc   : > { %4341 = vmatpush2.bf16.msra.mxu1 %v10458_v44  ;;  %4382 = vmatpush2.bf16.msra.mxu0 %v10714_v45  ;;  %v1414_v44 = vld [vmem:[#allocation10 + $0x810] sm:$0xff] }
 0x2cd   : > { %4392 = vmatprep.subr.bf16.mxu1 %v10445_v46  ;;  %4433 = vmatprep.subr.bf16.mxu0 %v10701_v47  ;;  %v1422_v45 = vld [vmem:[#allocation10 + $0x850] sm:$0xff]  ;;  %v10348_v46 = vcombine.low %v1174_v33, %v1182_v34  ;;  %v10604_v47 = vcombine.low %v1430_v35, %v1438_v36  ;;  %v10509_v33 = vcombine.high %v1334_v23, %v1342_v24 }
 0x2ce   : > { %v10589_v49 = vcombine.high %v1414_v44, %v1422_v45  ;;  %v1318_v35 = vld [vmem:[#allocation10 + $0x510] sm:$0xff] }
 0x2cf   : > { %4343 = vmatmul.mubr.bf16.vlgmr.msra.gmra.mxu1 %v13275_v31  ;;  %4384 = vmatmul.mubr.bf16.vlgmr.msra.gmra.mxu0 %v13277_v32  ;;  %v1326_v36 = vld [vmem:[#allocation10 + $0x550] sm:$0xff] }
 0x2d0   : > { %4393 = vmatpush1.bf16.msra.mxu1 %v10444_v52  ;;  %4424 = vmatprep.mubr.bf16.mxu1 %v13271_v29  ;;  %v1654_v52 = vld [vmem:[#allocation10 + $0xf90] sm:$0xff] }
 0x2d1   : > { %4434 = vmatpush1.bf16.msra.mxu0 %v10700_v53  ;;  %4465 = vmatprep.mubr.bf16.mxu0 %v13273_v30  ;;  %v1662_v53 = vld [vmem:[#allocation10 + $0xfd0] sm:$0xff] }
 0x2d2   : > { %4394 = vmatprep.subr.bf16.mxu1 %v10429_v54  ;;  %4435 = vmatprep.subr.bf16.mxu0 %v10685_v55  ;;  %v10332_v54 = vcombine.low %v1158_v41, %v1166_v42  ;;  %v10588_v55 = vcombine.low %v1414_v44, %v1422_v45  ;;  %v10829_v57 = vcombine.high %v1654_v52, %v1662_v53  ;;  %v1302_v44 = vld [vmem:[#allocation10 + $0x490] sm:$0xff] }
 0x2d3   : > { %v10493_v41 = vcombine.high %v1318_v35, %v1326_v36  ;;  %v1310_v45 = vld [vmem:[#allocation10 + $0x4d0] sm:$0xff] }
 0x2d4   : > { %4395 = vmatpush1.bf16.msra.mxu1 %v10428_v60  ;;  %v1638_v60 = vld [vmem:[#allocation10 + $0xf10] sm:$0xff] }
 0x2d5   : > { %4436 = vmatpush1.bf16.msra.mxu0 %v10684_v61  ;;  %4396 = vmatprep.subr.bf16.mxu1 %v10413_v62  ;;  %v1646_v61 = vld [vmem:[#allocation10 + $0xf50] sm:$0xff]  ;;  %v10572_v62 = vcombine.low %v1398_v50, %v1406_v51  ;;  %v10477_v50 = vcombine.high %v1302_v44, %v1310_v45 }
 0x2d6   : > { %4437 = vmatprep.subr.bf16.mxu0 %v10669_v2  ;;  %v10828_v2 = vcombine.low %v1654_v52, %v1662_v53  ;;  %v10813_v6 = vcombine.high %v1638_v60, %v1646_v61  ;;  %v1286_v52 = vld [vmem:[#allocation10 + $0x410] sm:$0xff] }
 0x2d7   : > { %v1294_v53 = vld [vmem:[#allocation10 + $0x450] sm:$0xff] }
 0x2d8   : > { %4397 = vmatpush1.bf16.msra.mxu1 %v10412_v9  ;;  %v1622_v9 = vld [vmem:[#allocation10 + $0xe90] sm:$0xff] }
 0x2d9   : > { %4438 = vmatpush1.bf16.msra.mxu0 %v10668_v10  ;;  %4398 = vmatprep.subr.bf16.mxu1 %v10397_v11  ;;  %v1630_v10 = vld [vmem:[#allocation10 + $0xed0] sm:$0xff]  ;;  %v10556_v11 = vcombine.low %v1382_v58, %v1390_v59  ;;  %v10461_v58 = vcombine.high %v1286_v52, %v1294_v53 }
 0x2da   : > { %4439 = vmatprep.subr.bf16.mxu0 %v10653_v12  ;;  %v10812_v12 = vcombine.low %v1638_v60, %v1646_v61  ;;  %v10797_v14 = vcombine.high %v1622_v9, %v1630_v10  ;;  %v1271_v60 = vld [vmem:[#allocation10 + $0x398] sm:$0xff] }
 0x2db   : > { %v1279_v61 = vld [vmem:[#allocation10 + $0x3d8] sm:$0xff] }
 0x2dc   : > { %4399 = vmatpush1.bf16.msra.mxu1 %v10396_v17  ;;  %v1606_v17 = vld [vmem:[#allocation10 + $0xe10] sm:$0xff] }
 0x2dd   : > { %4440 = vmatpush1.bf16.msra.mxu0 %v10652_v18  ;;  %4400 = vmatprep.subr.bf16.mxu1 %v10381_v19  ;;  %v1614_v18 = vld [vmem:[#allocation10 + $0xe50] sm:$0xff]  ;;  %v10540_v19 = vcombine.low %v1366_v7, %v1374_v8  ;;  %v10447_v7 = vcombine.high %v1271_v60, %v1279_v61 }
 0x2de   : > { %4441 = vmatprep.subr.bf16.mxu0 %v10637_v20  ;;  %v10796_v20 = vcombine.low %v1622_v9, %v1630_v10  ;;  %v10781_v22 = vcombine.high %v1606_v17, %v1614_v18  ;;  %v1255_v9 = vld [vmem:[#allocation10 + $0x318] sm:$0xff] }
 0x2df   : > { %v1263_v10 = vld [vmem:[#allocation10 + $0x358] sm:$0xff] }
 0x2e0   : > { %4401 = vmatpush1.bf16.msra.mxu1 %v10380_v25  ;;  %v1590_v25 = vld [vmem:[#allocation10 + $0xd90] sm:$0xff] }
 0x2e1   : > { %4442 = vmatpush1.bf16.msra.mxu0 %v10636_v26  ;;  %4402 = vmatprep.subr.bf16.mxu1 %v10365_v27  ;;  %v1598_v26 = vld [vmem:[#allocation10 + $0xdd0] sm:$0xff]  ;;  %v10524_v27 = vcombine.low %v1350_v15, %v1358_v16  ;;  %v10431_v15 = vcombine.high %v1255_v9, %v1263_v10  ;;  %v1239_v16 = vld [vmem:[#allocation10 + $0x298] sm:$0xff] }
 0x2e2   : > { %4443 = vmatprep.subr.bf16.mxu0 %v10621_v28  ;;  %v10780_v28 = vcombine.low %v1606_v17, %v1614_v18  ;;  %v10765_v34 = vcombine.high %v1590_v25, %v1598_v26  ;;  %v1247_v17 = vld [vmem:[#allocation10 + $0x2d8] sm:$0xff] }
 0x2e4   : > { %4403 = vmatpush1.bf16.msra.mxu1 %v10364_v37  ;;  %v1574_v37 = vld [vmem:[#allocation10 + $0xd10] sm:$0xff] }
 0x2e5   : > { %4444 = vmatpush1.bf16.msra.mxu0 %v10620_v38  ;;  %4404 = vmatprep.subr.bf16.mxu1 %v10349_v39  ;;  %v1582_v38 = vld [vmem:[#allocation10 + $0xd50] sm:$0xff]  ;;  %v10508_v39 = vcombine.low %v1334_v23, %v1342_v24  ;;  %v10415_v23 = vcombine.high %v1239_v16, %v1247_v17 }
 0x2e6   : > { %4445 = vmatprep.subr.bf16.mxu0 %v10605_v40  ;;  %v10764_v40 = vcombine.low %v1590_v25, %v1598_v26  ;;  %v10749_v42 = vcombine.high %v1574_v37, %v1582_v38  ;;  %v1223_v25 = vld [vmem:[#allocation10 + $0x218] sm:$0xff] }
 0x2e7   : > { %v1231_v26 = vld [vmem:[#allocation10 + $0x258] sm:$0xff] }
 0x2e8   : > { %4405 = vmatpush1.bf16.msra.mxu1 %v10348_v46  ;;  %v1558_v46 = vld [vmem:[#allocation10 + $0xc90] sm:$0xff] }
 0x2e9   : > { %4446 = vmatpush1.bf16.msra.mxu0 %v10604_v47  ;;  %4406 = vmatprep.subr.bf16.mxu1 %v10333_v48  ;;  %v1566_v47 = vld [vmem:[#allocation10 + $0xcd0] sm:$0xff]  ;;  %v10492_v48 = vcombine.low %v1318_v35, %v1326_v36  ;;  %v10399_v35 = vcombine.high %v1223_v25, %v1231_v26 }
 0x2ea   : > { %4447 = vmatprep.subr.bf16.mxu0 %v10589_v49  ;;  %v10748_v49 = vcombine.low %v1574_v37, %v1582_v38  ;;  %v10733_v51 = vcombine.high %v1558_v46, %v1566_v47  ;;  %v1207_v37 = vld [vmem:[#allocation10 + $0x198] sm:$0xff] }
 0x2eb   : > { %v1215_v38 = vld [vmem:[#allocation10 + $0x1d8] sm:$0xff] }
 0x2ec   : > { %4407 = vmatpush1.bf16.msra.mxu1 %v10332_v54  ;;  %v1542_v54 = vld [vmem:[#allocation10 + $0xc10] sm:$0xff] }
 0x2ed   : > { %4448 = vmatpush1.bf16.msra.mxu0 %v10588_v55  ;;  %4408 = vmatprep.subr.bf16.mxu1 %v10573_v56  ;;  %v1550_v55 = vld [vmem:[#allocation10 + $0xc50] sm:$0xff]  ;;  %v10476_v56 = vcombine.low %v1302_v44, %v1310_v45  ;;  %v10383_v44 = vcombine.high %v1207_v37, %v1215_v38 }
 0x2ee   : > { %4449 = vmatprep.subr.bf16.mxu0 %v10829_v57  ;;  %v10732_v57 = vcombine.low %v1558_v46, %v1566_v47  ;;  %v10717_v59 = vcombine.high %v1542_v54, %v1550_v55  ;;  %v1191_v46 = vld [vmem:[#allocation10 + $0x118] sm:$0xff] }
 0x2ef   : > { %v1199_v47 = vld [vmem:[#allocation10 + $0x158] sm:$0xff] }
 0x2f0   : > { %4409 = vmatpush2.bf16.msra.mxu1 %v10572_v62  ;;  %v1527_v62 = vld [vmem:[#allocation10 + $0xb98] sm:$0xff] }
 0x2f1   : > { %4450 = vmatpush2.bf16.msra.mxu0 %v10828_v2  ;;  %4410 = vmatprep.subr.bf16.mxu1 %v10557_v5  ;;  %v1535_v2 = vld [vmem:[#allocation10 + $0xbd8] sm:$0xff]  ;;  %v10460_v5 = vcombine.low %v1286_v52, %v1294_v53  ;;  %v10367_v52 = vcombine.high %v1191_v46, %v1199_v47 }
 0x2f2   : > { %4451 = vmatprep.subr.bf16.mxu0 %v10813_v6  ;;  %v10716_v6 = vcombine.low %v1542_v54, %v1550_v55  ;;  %v10703_v8 = vcombine.high %v1527_v62, %v1535_v2  ;;  %v1175_v54 = vld [vmem:[#allocation10 + $0x98] sm:$0xff] }
 0x2f3   : > { %v1183_v55 = vld [vmem:[#allocation10 + $0xd8] sm:$0xff] }
 0x2f4   : > { %4411 = vmatpush2.bf16.msra.mxu1 %v10556_v11  ;;  %v10446_v11 = vcombine.low %v1271_v60, %v1279_v61  ;;  %v10351_v60 = vcombine.high %v1175_v54, %v1183_v55 }
 0x2f5   : > { %4452 = vmatpush2.bf16.msra.mxu0 %v10812_v12  ;;  %4412 = vmatprep.subr.bf16.mxu1 %v10541_v13  ;;  %v1511_v12 = vld [vmem:[#allocation10 + $0xb18] sm:$0xff] }
 0x2f6   : > { %4453 = vmatprep.subr.bf16.mxu0 %v10797_v14  ;;  %v1519_v13 = vld [vmem:[#allocation10 + $0xb58] sm:$0xff]  ;;  %v10702_v14 = vcombine.low %v1527_v62, %v1535_v2 }
 0x2f7   : > { %v10687_v18 = vcombine.high %v1511_v12, %v1519_v13  ;;  %v1159_v62 = vld [vmem:[#allocation10 + $0x18] sm:$0xff] }
 0x2f8   : > { %4413 = vmatpush2.bf16.msra.mxu1 %v10540_v19  ;;  %v1495_v19 = vld [vmem:[#allocation10 + $0xa98] sm:$0xff] }
 0x2f9   : > { %4454 = vmatpush2.bf16.msra.mxu0 %v10796_v20  ;;  %4414 = vmatprep.subr.bf16.mxu1 %v10525_v21  ;;  %v1503_v20 = vld [vmem:[#allocation10 + $0xad8] sm:$0xff]  ;;  %v10430_v21 = vcombine.low %v1255_v9, %v1263_v10 }
 0x2fa   : > { %4455 = vmatprep.subr.bf16.mxu0 %v10781_v22  ;;  %v10686_v22 = vcombine.low %v1511_v12, %v1519_v13  ;;  %v10671_v24 = vcombine.high %v1495_v19, %v1503_v20  ;;  %v1167_v2 = vld [vmem:[#allocation10 + $0x58] sm:$0xff] }
 0x2fb   : > { %v10335_v9 = vcombine.high %v1159_v62, %v1167_v2  ;;  %v1407_v12 = vld [vmem:[#allocation10 + $0x7d8] sm:$0xff] }
 0x2fc   : > { %4415 = vmatpush2.bf16.msra.mxu1 %v10524_v27  ;;  %v1479_v27 = vld [vmem:[#allocation10 + $0xa18] sm:$0xff] }
 0x2fd   : > { %4456 = vmatpush2.bf16.msra.mxu0 %v10780_v28  ;;  %4416 = vmatprep.subr.bf16.mxu1 %v10509_v33  ;;  %v1487_v28 = vld [vmem:[#allocation10 + $0xa58] sm:$0xff]  ;;  %v10414_v33 = vcombine.low %v1239_v16, %v1247_v17 }
 0x2fe   : > { %4457 = vmatprep.subr.bf16.mxu0 %v10765_v34  ;;  %v10670_v34 = vcombine.low %v1495_v19, %v1503_v20  ;;  %v10655_v36 = vcombine.high %v1479_v27, %v1487_v28  ;;  %v1655_v13 = vld [vmem:[#allocation10 + $0xf98] sm:$0xff] }
 0x2ff   : > { %v1383_v19 = vld [vmem:[#allocation10 + $0x718] sm:$0xff] }
 0x300   : > { %4417 = vmatpush2.bf16.msra.mxu1 %v10508_v39  ;;  %v1463_v39 = vld [vmem:[#allocation10 + $0x998] sm:$0xff] }
 0x301   : > { %4458 = vmatpush2.bf16.msra.mxu0 %v10764_v40  ;;  %4418 = vmatprep.subr.bf16.mxu1 %v10493_v41  ;;  %v1471_v40 = vld [vmem:[#allocation10 + $0x9d8] sm:$0xff]  ;;  %v10398_v41 = vcombine.low %v1223_v25, %v1231_v26 }
 0x302   : > { %4459 = vmatprep.subr.bf16.mxu0 %v10749_v42  ;;  %v10654_v42 = vcombine.low %v1479_v27, %v1487_v28  ;;  %v10639_v45 = vcombine.high %v1463_v39, %v1471_v40  ;;  %v1391_v20 = vld [vmem:[#allocation10 + $0x758] sm:$0xff] }
 0x303   : > { %v10559_v25 = vcombine.high %v1383_v19, %v1391_v20  ;;  %v1367_v27 = vld [vmem:[#allocation10 + $0x698] sm:$0xff] }
 0x304   : > { %4419 = vmatpush2.bf16.msra.mxu1 %v10492_v48  ;;  %v1447_v48 = vld [vmem:[#allocation10 + $0x918] sm:$0xff] }
 0x305   : > { %4460 = vmatpush2.bf16.msra.mxu0 %v10748_v49  ;;  %4420 = vmatprep.subr.bf16.mxu1 %v10477_v50  ;;  %v1455_v49 = vld [vmem:[#allocation10 + $0x958] sm:$0xff]  ;;  %v10382_v50 = vcombine.low %v1207_v37, %v1215_v38 }
 0x306   : > { %4461 = vmatprep.subr.bf16.mxu0 %v10733_v51  ;;  %v10638_v51 = vcombine.low %v1463_v39, %v1471_v40  ;;  %v10623_v53 = vcombine.high %v1447_v48, %v1455_v49  ;;  %v1375_v28 = vld [vmem:[#allocation10 + $0x6d8] sm:$0xff] }
 0x307   : > { %v10543_v37 = vcombine.high %v1367_v27, %v1375_v28  ;;  %v1351_v39 = vld [vmem:[#allocation10 + $0x618] sm:$0xff] }
 0x308   : > { %4421 = vmatpush2.bf16.msra.mxu1 %v10476_v56  ;;  %v1431_v56 = vld [vmem:[#allocation10 + $0x898] sm:$0xff] }
 0x309   : > { %4462 = vmatpush2.bf16.msra.mxu0 %v10732_v57  ;;  %4422 = vmatprep.subr.bf16.mxu1 %v10461_v58  ;;  %v1439_v57 = vld [vmem:[#allocation10 + $0x8d8] sm:$0xff]  ;;  %v10366_v58 = vcombine.low %v1191_v46, %v1199_v47 }
 0x30a   : > { %4463 = vmatprep.subr.bf16.mxu0 %v10717_v59  ;;  %v10622_v59 = vcombine.low %v1447_v48, %v1455_v49  ;;  %v10607_v61 = vcombine.high %v1431_v56, %v1439_v57  ;;  %v1359_v40 = vld [vmem:[#allocation10 + $0x658] sm:$0xff] }
 0x30b   : > { %v10527_v46 = vcombine.high %v1351_v39, %v1359_v40  ;;  %v1335_v48 = vld [vmem:[#allocation10 + $0x598] sm:$0xff] }
 0x30c   : > { %4423 = vmatpush2.bf16.msra.mxu1 %v10460_v5  ;;  %v1415_v5 = vld [vmem:[#allocation10 + $0x818] sm:$0xff] }
 0x30d   : > { %4464 = vmatpush2.bf16.msra.mxu0 %v10716_v6  ;;  %4474 = vmatprep.subr.bf16.mxu1 %v10447_v7  ;;  %v1423_v6 = vld [vmem:[#allocation10 + $0x858] sm:$0xff]  ;;  %v10350_v7 = vcombine.low %v1175_v54, %v1183_v55 }
 0x30e   : > { %4515 = vmatprep.subr.bf16.mxu0 %v10703_v8  ;;  %v10606_v8 = vcombine.low %v1431_v56, %v1439_v57  ;;  %v10591_v10 = vcombine.high %v1415_v5, %v1423_v6  ;;  %v10590_v16 = vcombine.low %v1415_v5, %v1423_v6  ;;  %v1343_v49 = vld [vmem:[#allocation10 + $0x5d8] sm:$0xff] }
 0x30f   : > { %4425 = vmatmul.mubr.bf16.vlgmr.msra.gmra.mxu1 %v13275_v31  ;;  %v10511_v54 = vcombine.high %v1335_v48, %v1343_v49  ;;  %v1319_v56 = vld [vmem:[#allocation10 + $0x518] sm:$0xff] }
 0x310   : > { %4466 = vmatmul.mubr.bf16.vlgmr.msra.gmra.mxu0 %v13277_v32  ;;  %4475 = vmatpush1.bf16.msra.mxu1 %v10446_v11  ;;  %v1399_v11 = vld [vmem:[#allocation10 + $0x798] sm:$0xff] }
 0x311   : > { %4506 = vmatprep.mubr.bf16.mxu1 %v13271_v29  ;;  %4516 = vmatpush1.bf16.msra.mxu0 %v10702_v14  ;;  %v1663_v14 = vld [vmem:[#allocation10 + $0xfd8] sm:$0xff]  ;;  %v10575_v17 = vcombine.high %v1399_v11, %v1407_v12 }
 0x312   : > { %4547 = vmatprep.mubr.bf16.mxu0 %v13273_v30  ;;  %4476 = vmatprep.subr.bf16.mxu1 %v10431_v15  ;;  %v10334_v15 = vcombine.low %v1159_v62, %v1167_v2  ;;  %v1327_v57 = vld [vmem:[#allocation10 + $0x558] sm:$0xff] }
 0x313   : > { %4517 = vmatprep.subr.bf16.mxu0 %v10687_v18  ;;  %v10831_v18 = vcombine.high %v1655_v13, %v1663_v14  ;;  %v10495_v62 = vcombine.high %v1319_v56, %v1327_v57  ;;  %v1303_v5 = vld [vmem:[#allocation10 + $0x498] sm:$0xff] }
 0x314   : > { %4477 = vmatpush1.bf16.msra.mxu1 %v10430_v21  ;;  %v1639_v21 = vld [vmem:[#allocation10 + $0xf18] sm:$0xff] }
 0x315   : > { %4518 = vmatpush1.bf16.msra.mxu0 %v10686_v22  ;;  %4478 = vmatprep.subr.bf16.mxu1 %v10415_v23  ;;  %v1647_v22 = vld [vmem:[#allocation10 + $0xf58] sm:$0xff]  ;;  %v10574_v23 = vcombine.low %v1399_v11, %v1407_v12 }
 0x316   : > { %4519 = vmatprep.subr.bf16.mxu0 %v10671_v24  ;;  %v10830_v24 = vcombine.low %v1655_v13, %v1663_v14  ;;  %v10815_v26 = vcombine.high %v1639_v21, %v1647_v22  ;;  %v1311_v6 = vld [vmem:[#allocation10 + $0x4d8] sm:$0xff] }
 0x317   : > { %v10479_v11 = vcombine.high %v1303_v5, %v1311_v6  ;;  %v1287_v13 = vld [vmem:[#allocation10 + $0x418] sm:$0xff] }
 0x318   : > { %4479 = vmatpush1.bf16.msra.mxu1 %v10414_v33  ;;  %v1623_v33 = vld [vmem:[#allocation10 + $0xe98] sm:$0xff] }
 0x319   : > { %4520 = vmatpush1.bf16.msra.mxu0 %v10670_v34  ;;  %4480 = vmatprep.subr.bf16.mxu1 %v10399_v35  ;;  %v1631_v34 = vld [vmem:[#allocation10 + $0xed8] sm:$0xff]  ;;  %v10558_v35 = vcombine.low %v1383_v19, %v1391_v20 }
 0x31a   : > { %4521 = vmatprep.subr.bf16.mxu0 %v10655_v36  ;;  %v10814_v36 = vcombine.low %v1639_v21, %v1647_v22  ;;  %v10799_v38 = vcombine.high %v1623_v33, %v1631_v34  ;;  %v1295_v14 = vld [vmem:[#allocation10 + $0x458] sm:$0xff]  ;;  %v1272_v21 = vld [vmem:[#allocation10 + $0x3a0] sm:$0xff] }
 0x31b   : > { %v10463_v19 = vcombine.high %v1287_v13, %v1295_v14  ;;  %v1280_v22 = vld [vmem:[#allocation10 + $0x3e0] sm:$0xff] }
 0x31c   : > { %4481 = vmatpush1.bf16.msra.mxu1 %v10398_v41  ;;  %v1607_v41 = vld [vmem:[#allocation10 + $0xe18] sm:$0xff] }
 0x31d   : > { %4522 = vmatpush1.bf16.msra.mxu0 %v10654_v42  ;;  %4482 = vmatprep.subr.bf16.mxu1 %v10383_v44  ;;  %v1615_v42 = vld [vmem:[#allocation10 + $0xe58] sm:$0xff]  ;;  %v10542_v44 = vcombine.low %v1367_v27, %v1375_v28  ;;  %v10449_v27 = vcombine.high %v1272_v21, %v1280_v22 }
 0x31e   : > { %4523 = vmatprep.subr.bf16.mxu0 %v10639_v45  ;;  %v10798_v45 = vcombine.low %v1623_v33, %v1631_v34  ;;  %v10783_v47 = vcombine.high %v1607_v41, %v1615_v42  ;;  %v1256_v33 = vld [vmem:[#allocation10 + $0x320] sm:$0xff] }
 0x31f   : > { %v1264_v34 = vld [vmem:[#allocation10 + $0x360] sm:$0xff] }
 0x320   : > { %4483 = vmatpush1.bf16.msra.mxu1 %v10382_v50  ;;  %v1591_v50 = vld [vmem:[#allocation10 + $0xd98] sm:$0xff] }
 0x321   : > { %4524 = vmatpush1.bf16.msra.mxu0 %v10638_v51  ;;  %4484 = vmatprep.subr.bf16.mxu1 %v10367_v52  ;;  %v1599_v51 = vld [vmem:[#allocation10 + $0xdd8] sm:$0xff]  ;;  %v10526_v52 = vcombine.low %v1351_v39, %v1359_v40  ;;  %v10433_v39 = vcombine.high %v1256_v33, %v1264_v34  ;;  %v1240_v40 = vld [vmem:[#allocation10 + $0x2a0] sm:$0xff] }
 0x322   : > { %4525 = vmatprep.subr.bf16.mxu0 %v10623_v53  ;;  %v10782_v53 = vcombine.low %v1607_v41, %v1615_v42  ;;  %v10767_v55 = vcombine.high %v1591_v50, %v1599_v51  ;;  %v1248_v41 = vld [vmem:[#allocation10 + $0x2e0] sm:$0xff] }
 0x324   : > { %4485 = vmatpush1.bf16.msra.mxu1 %v10366_v58  ;;  %v1575_v58 = vld [vmem:[#allocation10 + $0xd18] sm:$0xff] }
 0x325   : > { %4526 = vmatpush1.bf16.msra.mxu0 %v10622_v59  ;;  %4486 = vmatprep.subr.bf16.mxu1 %v10351_v60  ;;  %v1583_v59 = vld [vmem:[#allocation10 + $0xd58] sm:$0xff]  ;;  %v10510_v60 = vcombine.low %v1335_v48, %v1343_v49  ;;  %v10432_v49 = vcombine.low %v1256_v33, %v1264_v34 }
 0x326   : > { %4527 = vmatprep.subr.bf16.mxu0 %v10607_v61  ;;  %v10766_v61 = vcombine.low %v1591_v50, %v1599_v51  ;;  %v10751_v2 = vcombine.high %v1575_v58, %v1583_v59 }
 0x328   : > { %4487 = vmatpush1.bf16.msra.mxu1 %v10350_v7  ;;  %v1559_v7 = vld [vmem:[#allocation10 + $0xc98] sm:$0xff] }
 0x329   : > { %4528 = vmatpush1.bf16.msra.mxu0 %v10606_v8  ;;  %4488 = vmatprep.subr.bf16.mxu1 %v10335_v9  ;;  %v1567_v8 = vld [vmem:[#allocation10 + $0xcd8] sm:$0xff]  ;;  %v10494_v9 = vcombine.low %v1319_v56, %v1327_v57  ;;  %v1224_v56 = vld [vmem:[#allocation10 + $0x220] sm:$0xff] }
 0x32a   : > { %4529 = vmatprep.subr.bf16.mxu0 %v10591_v10  ;;  %v10750_v10 = vcombine.low %v1575_v58, %v1583_v59  ;;  %v10735_v12 = vcombine.high %v1559_v7, %v1567_v8  ;;  %v1232_v57 = vld [vmem:[#allocation10 + $0x260] sm:$0xff] }
 0x32c   : > { %4489 = vmatpush1.bf16.msra.mxu1 %v10334_v15  ;;  %v1543_v15 = vld [vmem:[#allocation10 + $0xc18] sm:$0xff] }
 0x32d   : > { %4530 = vmatpush1.bf16.msra.mxu0 %v10590_v16  ;;  %4490 = vmatprep.subr.bf16.mxu1 %v10575_v17  ;;  %v1551_v16 = vld [vmem:[#allocation10 + $0xc58] sm:$0xff]  ;;  %v10478_v17 = vcombine.low %v1303_v5, %v1311_v6 }
 0x32e   : > { %4531 = vmatprep.subr.bf16.mxu0 %v10831_v18  ;;  %v10734_v18 = vcombine.low %v1559_v7, %v1567_v8  ;;  %v10719_v20 = vcombine.high %v1543_v15, %v1551_v16  ;;  %v10401_v7 = vcombine.high %v1224_v56, %v1232_v57 }
 0x330   : > { %4491 = vmatpush2.bf16.msra.mxu1 %v10574_v23  ;;  %v1528_v23 = vld [vmem:[#allocation10 + $0xba0] sm:$0xff] }
 0x331   : > { %4532 = vmatpush2.bf16.msra.mxu0 %v10830_v24  ;;  %4492 = vmatprep.subr.bf16.mxu1 %v10559_v25  ;;  %v1536_v24 = vld [vmem:[#allocation10 + $0xbe0] sm:$0xff]  ;;  %v10462_v25 = vcombine.low %v1287_v13, %v1295_v14  ;;  %v10400_v13 = vcombine.low %v1224_v56, %v1232_v57 }
 0x332   : > { %4533 = vmatprep.subr.bf16.mxu0 %v10815_v26  ;;  %v10718_v26 = vcombine.low %v1543_v15, %v1551_v16  ;;  %v10705_v28 = vcombine.high %v1528_v23, %v1536_v24  ;;  %v1384_v56 = vld [vmem:[#allocation10 + $0x720] sm:$0xff] }
 0x333   : > { %v1392_v57 = vld [vmem:[#allocation10 + $0x760] sm:$0xff] }
 0x334   : > { %4493 = vmatpush2.bf16.msra.mxu1 %v10558_v35  ;;  %v10448_v35 = vcombine.low %v1272_v21, %v1280_v22 }
 0x335   : > { %4534 = vmatpush2.bf16.msra.mxu0 %v10814_v36  ;;  %4494 = vmatprep.subr.bf16.mxu1 %v10543_v37  ;;  %v1512_v36 = vld [vmem:[#allocation10 + $0xb20] sm:$0xff] }
 0x336   : > { %4535 = vmatprep.subr.bf16.mxu0 %v10799_v38  ;;  %v1520_v37 = vld [vmem:[#allocation10 + $0xb60] sm:$0xff]  ;;  %v10704_v38 = vcombine.low %v1528_v23, %v1536_v24 }
 0x338   : > { %4495 = vmatpush2.bf16.msra.mxu1 %v10542_v44 }
 0x339   : > { %4536 = vmatpush2.bf16.msra.mxu0 %v10798_v45  ;;  %4496 = vmatprep.subr.bf16.mxu1 %v10527_v46  ;;  %v10689_v45 = vcombine.high %v1512_v36, %v1520_v37  ;;  %v1496_v46 = vld [vmem:[#allocation10 + $0xaa0] sm:$0xff] }
 0x33a   : > { %4537 = vmatprep.subr.bf16.mxu0 %v10783_v47  ;;  %v1504_v47 = vld [vmem:[#allocation10 + $0xae0] sm:$0xff] }
 0x33b   : > { %v10672_v6 = vcombine.low %v1496_v46, %v1504_v47 }
 0x33c   : > { %4497 = vmatpush2.bf16.msra.mxu1 %v10526_v52  ;;  %v10688_v52 = vcombine.low %v1512_v36, %v1520_v37  ;;  %v1160_v37 = vld [vmem:[#allocation10 + $0x20] sm:$0xff] }
 0x33d   : > { %4538 = vmatpush2.bf16.msra.mxu0 %v10782_v53  ;;  %4498 = vmatprep.subr.bf16.mxu1 %v10511_v54  ;;  %v10417_v53 = vcombine.high %v1240_v40, %v1248_v41 }
 0x33e   : > { %4539 = vmatprep.subr.bf16.mxu0 %v10767_v55  ;;  %v10673_v55 = vcombine.high %v1496_v46, %v1504_v47  ;;  %v1400_v46 = vld [vmem:[#allocation10 + $0x7a0] sm:$0xff] }
 0x33f   : > { %v1408_v47 = vld [vmem:[#allocation10 + $0x7e0] sm:$0xff] }
 0x340   : > { %4499 = vmatpush2.bf16.msra.mxu1 %v10510_v60  ;;  %v1480_v60 = vld [vmem:[#allocation10 + $0xa20] sm:$0xff] }
 0x341   : > { %4540 = vmatpush2.bf16.msra.mxu0 %v10766_v61  ;;  %4500 = vmatprep.subr.bf16.mxu1 %v10495_v62  ;;  %v1488_v61 = vld [vmem:[#allocation10 + $0xa60] sm:$0xff]  ;;  %v10416_v62 = vcombine.low %v1240_v40, %v1248_v41 }
 0x342   : > { %4541 = vmatprep.subr.bf16.mxu0 %v10751_v2  ;;  %v10657_v8 = vcombine.high %v1480_v60, %v1488_v61  ;;  %v10656_v14 = vcombine.low %v1480_v60, %v1488_v61  ;;  %v1424_v40 = vld [vmem:[#allocation10 + $0x860] sm:$0xff]  ;;  %v10576_v60 = vcombine.low %v1400_v46, %v1408_v47 }
 0x344   : > { %4501 = vmatpush2.bf16.msra.mxu1 %v10494_v9  ;;  %v1208_v9 = vld [vmem:[#allocation10 + $0x1a0] sm:$0xff] }
 0x345   : > { %4542 = vmatpush2.bf16.msra.mxu0 %v10750_v10  ;;  %4502 = vmatprep.subr.bf16.mxu1 %v10479_v11  ;;  %v1216_v10 = vld [vmem:[#allocation10 + $0x1e0] sm:$0xff] }
 0x346   : > { %4543 = vmatprep.subr.bf16.mxu0 %v10735_v12  ;;  %v1464_v11 = vld [vmem:[#allocation10 + $0x9a0] sm:$0xff]  ;;  %v10385_v15 = vcombine.high %v1208_v9, %v1216_v10  ;;  %v10384_v21 = vcombine.low %v1208_v9, %v1216_v10  ;;  %v10560_v9 = vcombine.low %v1384_v56, %v1392_v57 }
 0x347   : > { %v1472_v12 = vld [vmem:[#allocation10 + $0x9e0] sm:$0xff] }
 0x348   : > { %4503 = vmatpush2.bf16.msra.mxu1 %v10478_v17  ;;  %v10641_v16 = vcombine.high %v1464_v11, %v1472_v12  ;;  %v1192_v17 = vld [vmem:[#allocation10 + $0x120] sm:$0xff]  ;;  %v10640_v22 = vcombine.low %v1464_v11, %v1472_v12 }
 0x349   : > { %4544 = vmatpush2.bf16.msra.mxu0 %v10734_v18  ;;  %4504 = vmatprep.subr.bf16.mxu1 %v10463_v19  ;;  %v1200_v18 = vld [vmem:[#allocation10 + $0x160] sm:$0xff] }
 0x34a   : > { %4545 = vmatprep.subr.bf16.mxu0 %v10719_v20  ;;  %v1448_v19 = vld [vmem:[#allocation10 + $0x920] sm:$0xff]  ;;  %v10369_v23 = vcombine.high %v1192_v17, %v1200_v18  ;;  %v10368_v33 = vcombine.low %v1192_v17, %v1200_v18 }
 0x34b   : > { %v1456_v20 = vld [vmem:[#allocation10 + $0x960] sm:$0xff] }
 0x34c   : > { %4505 = vmatpush2.bf16.msra.mxu1 %v10462_v25  ;;  %v10625_v24 = vcombine.high %v1448_v19, %v1456_v20  ;;  %v1176_v25 = vld [vmem:[#allocation10 + $0xa0] sm:$0xff]  ;;  %v10624_v34 = vcombine.low %v1448_v19, %v1456_v20 }
 0x34d   : > { %4546 = vmatpush2.bf16.msra.mxu0 %v10718_v26  ;;  %4556 = vmatprep.subr.bf16.mxu1 %v10449_v27  ;;  %v1184_v26 = vld [vmem:[#allocation10 + $0xe0] sm:$0xff] }
 0x34e   : > { %4597 = vmatprep.subr.bf16.mxu0 %v10705_v28  ;;  %v1432_v27 = vld [vmem:[#allocation10 + $0x8a0] sm:$0xff]  ;;  %v10352_v41 = vcombine.low %v1176_v25, %v1184_v26 }
 0x34f   : > { %4507 = vmatmul.mubr.bf16.vlgmr.msra.gmra.mxu1 %v13275_v31  ;;  %v4262_v42 = vpop.f32.mrf.mxu1  ;;  %v4303_v44 = vpop.f32.mrf.mxu0  ;;  %v1440_v28 = vld [vmem:[#allocation10 + $0x8e0] sm:$0xff] }
 0x350   : > { %4548 = vmatmul.mubr.bf16.vlgmr.msra.gmra.mxu0 %v13277_v32  ;;  %v13295_v48 = vadd.f32 %v4303_v44, %v4262_v42  ;;  %4557 = vmatpush1.bf16.msra.mxu1 %v10448_v35  ;;  %v10353_v35 = vcombine.high %v1176_v25, %v1184_v26  ;;  %v10609_v36 = vcombine.high %v1432_v27, %v1440_v28 }
 0x351   : > { %4588 = vmatprep.mubr.bf16.mxu1 %v13271_v29  ;;  %4598 = vmatpush1.bf16.msra.mxu0 %v10704_v38  ;;  %v4264_v50 = vpop.f32.mrf.mxu1  ;;  %v4305_v51 = vpop.f32.mrf.mxu0  ;;  %v1168_v38 = vld [vmem:[#allocation10 + $0x60] sm:$0xff]  ;;  %v10608_v42 = vcombine.low %v1432_v27, %v1440_v28 }
 0x352   : > { %4629 = vmatprep.mubr.bf16.mxu0 %v13273_v30  ;;  %v13299_v54 = vadd.f32 %v4305_v51, %v4264_v50  ;;  %4558 = vmatprep.subr.bf16.mxu1 %v10433_v39  ;;  %v1416_v39 = vld [vmem:[#allocation10 + $0x820] sm:$0xff]  ;;  %v10337_v44 = vcombine.high %v1160_v37, %v1168_v38  ;;  %v10336_v51 = vcombine.low %v1160_v37, %v1168_v38 }
 0x353   : > { %4599 = vmatprep.subr.bf16.mxu0 %v10689_v45  ;;  %v4266_v58 = vpop.f32.mrf.mxu1  ;;  %v4307_v59 = vpop.f32.mrf.mxu0  ;;  %v10593_v45 = vcombine.high %v1416_v39, %v1424_v40  ;;  %v1664_v50 = vld [vmem:[#allocation10 + $0xfe0] sm:$0xff] }
 0x354   : > { %4559 = vmatpush1.bf16.msra.mxu1 %v10432_v49  ;;  %v1656_v49 = vld [vmem:[#allocation10 + $0xfa0] sm:$0xff] }
 0x355   : > { %4600 = vmatpush1.bf16.msra.mxu0 %v10688_v52  ;;  %v4267_v2 = vpop.f32.mrf.mxu1  ;;  %v4308_v5 = vpop.f32.mrf.mxu0  ;;  %4560 = vmatprep.subr.bf16.mxu1 %v10417_v53  ;;  %v10592_v52 = vcombine.low %v1416_v39, %v1424_v40  ;;  %v10577_v53 = vcombine.high %v1400_v46, %v1408_v47  ;;  %v1640_v58 = vld [vmem:[#allocation10 + $0xf20] sm:$0xff]  ;;  %v10832_v61 = vcombine.low %v1656_v49, %v1664_v50 }
 0x356   : > { %4601 = vmatprep.subr.bf16.mxu0 %v10673_v55  ;;  %v10833_v55 = vcombine.high %v1656_v49, %v1664_v50  ;;  %v1648_v59 = vld [vmem:[#allocation10 + $0xf60] sm:$0xff] }
 0x357   : > { %v10817_v2 = vcombine.high %v1640_v58, %v1648_v59  ;;  %v1368_v5 = vld [vmem:[#allocation10 + $0x6a0] sm:$0xff]  ;;  %v10816_v10 = vcombine.low %v1640_v58, %v1648_v59 }
 0x358   : > { %4561 = vmatpush1.bf16.msra.mxu1 %v10416_v62  ;;  %v10561_v62 = vcombine.high %v1384_v56, %v1392_v57 }
 0x359   : > { %4602 = vmatpush1.bf16.msra.mxu0 %v10672_v6  ;;  %4562 = vmatprep.subr.bf16.mxu1 %v10401_v7  ;;  %v1376_v6 = vld [vmem:[#allocation10 + $0x6e0] sm:$0xff] }
 0x35a   : > { %4603 = vmatprep.subr.bf16.mxu0 %v10657_v8  ;;  %v1624_v7 = vld [vmem:[#allocation10 + $0xea0] sm:$0xff]  ;;  %v10545_v11 = vcombine.high %v1368_v5, %v1376_v6  ;;  %v10544_v17 = vcombine.low %v1368_v5, %v1376_v6 }
 0x35b   : > { %v1632_v8 = vld [vmem:[#allocation10 + $0xee0] sm:$0xff] }
 0x35c   : > { %4563 = vmatpush1.bf16.msra.mxu1 %v10400_v13  ;;  %v10801_v12 = vcombine.high %v1624_v7, %v1632_v8  ;;  %v1352_v13 = vld [vmem:[#allocation10 + $0x620] sm:$0xff]  ;;  %v10800_v18 = vcombine.low %v1624_v7, %v1632_v8 }
 0x35d   : > { %4604 = vmatpush1.bf16.msra.mxu0 %v10656_v14  ;;  %4564 = vmatprep.subr.bf16.mxu1 %v10385_v15  ;;  %v1360_v14 = vld [vmem:[#allocation10 + $0x660] sm:$0xff] }
 0x35e   : > { %4605 = vmatprep.subr.bf16.mxu0 %v10641_v16  ;;  %v1608_v15 = vld [vmem:[#allocation10 + $0xe20] sm:$0xff]  ;;  %v10529_v19 = vcombine.high %v1352_v13, %v1360_v14  ;;  %v10528_v25 = vcombine.low %v1352_v13, %v1360_v14  ;;  %v1521_v13 = vld [vmem:[#allocation10 + $0xb68] sm:$0xff] }
 0x35f   : > { %v1616_v16 = vld [vmem:[#allocation10 + $0xe60] sm:$0xff] }
 0x360   : > { %4565 = vmatpush1.bf16.msra.mxu1 %v10384_v21  ;;  %v10785_v20 = vcombine.high %v1608_v15, %v1616_v16  ;;  %v1336_v21 = vld [vmem:[#allocation10 + $0x5a0] sm:$0xff]  ;;  %v10784_v26 = vcombine.low %v1608_v15, %v1616_v16  ;;  %v1241_v16 = vld [vmem:[#allocation10 + $0x2a8] sm:$0xff] }
 0x361   : > { %4606 = vmatpush1.bf16.msra.mxu0 %v10640_v22  ;;  %4566 = vmatprep.subr.bf16.mxu1 %v10369_v23  ;;  %v1344_v22 = vld [vmem:[#allocation10 + $0x5e0] sm:$0xff] }
 0x362   : > { %4607 = vmatprep.subr.bf16.mxu0 %v10625_v24  ;;  %v1592_v23 = vld [vmem:[#allocation10 + $0xda0] sm:$0xff]  ;;  %v10513_v27 = vcombine.high %v1336_v21, %v1344_v22  ;;  %v10512_v37 = vcombine.low %v1336_v21, %v1344_v22  ;;  %v1497_v21 = vld [vmem:[#allocation10 + $0xaa8] sm:$0xff] }
 0x363   : > { %v1600_v24 = vld [vmem:[#allocation10 + $0xde0] sm:$0xff]  ;;  %v1505_v22 = vld [vmem:[#allocation10 + $0xae8] sm:$0xff] }
 0x364   : > { %4567 = vmatpush1.bf16.msra.mxu1 %v10368_v33  ;;  %v10769_v28 = vcombine.high %v1592_v23, %v1600_v24  ;;  %v1320_v33 = vld [vmem:[#allocation10 + $0x520] sm:$0xff]  ;;  %v10768_v38 = vcombine.low %v1592_v23, %v1600_v24 }
 0x365   : > { %4608 = vmatpush1.bf16.msra.mxu0 %v10624_v34  ;;  %4568 = vmatprep.subr.bf16.mxu1 %v10353_v35  ;;  %v1328_v34 = vld [vmem:[#allocation10 + $0x560] sm:$0xff] }
 0x366   : > { %4609 = vmatprep.subr.bf16.mxu0 %v10609_v36  ;;  %v1576_v35 = vld [vmem:[#allocation10 + $0xd20] sm:$0xff]  ;;  %v10497_v39 = vcombine.high %v1320_v33, %v1328_v34  ;;  %v10496_v46 = vcombine.low %v1320_v33, %v1328_v34  ;;  %v10675_v34 = vcombine.high %v1497_v21, %v1505_v22 }
 0x367   : > { %v1584_v36 = vld [vmem:[#allocation10 + $0xd60] sm:$0xff] }
 0x368   : > { %4569 = vmatpush1.bf16.msra.mxu1 %v10352_v41  ;;  %v10753_v40 = vcombine.high %v1576_v35, %v1584_v36  ;;  %v1304_v41 = vld [vmem:[#allocation10 + $0x4a0] sm:$0xff]  ;;  %v10752_v47 = vcombine.low %v1576_v35, %v1584_v36  ;;  %v1225_v35 = vld [vmem:[#allocation10 + $0x228] sm:$0xff] }
 0x369   : > { %4610 = vmatpush1.bf16.msra.mxu0 %v10608_v42  ;;  %4570 = vmatprep.subr.bf16.mxu1 %v10337_v44  ;;  %v1312_v42 = vld [vmem:[#allocation10 + $0x4e0] sm:$0xff]  ;;  %v1233_v36 = vld [vmem:[#allocation10 + $0x268] sm:$0xff] }
 0x36a   : > { %4611 = vmatprep.subr.bf16.mxu0 %v10593_v45  ;;  %v1560_v44 = vld [vmem:[#allocation10 + $0xca0] sm:$0xff]  ;;  %v10481_v49 = vcombine.high %v1304_v41, %v1312_v42  ;;  %v10480_v56 = vcombine.low %v1304_v41, %v1312_v42 }
 0x36b   : > { %v1568_v45 = vld [vmem:[#allocation10 + $0xce0] sm:$0xff] }
 0x36c   : > { %4571 = vmatpush1.bf16.msra.mxu1 %v10336_v51  ;;  %v10737_v50 = vcombine.high %v1560_v44, %v1568_v45  ;;  %v1288_v51 = vld [vmem:[#allocation10 + $0x420] sm:$0xff]  ;;  %v10736_v57 = vcombine.low %v1560_v44, %v1568_v45  ;;  %v10674_v45 = vcombine.low %v1497_v21, %v1505_v22 }
 0x36d   : > { %4612 = vmatpush1.bf16.msra.mxu0 %v10592_v52  ;;  %4572 = vmatprep.subr.bf16.mxu1 %v10577_v53  ;;  %v1296_v52 = vld [vmem:[#allocation10 + $0x460] sm:$0xff] }
 0x36e   : > { %4613 = vmatprep.subr.bf16.mxu0 %v10833_v55  ;;  %v1544_v53 = vld [vmem:[#allocation10 + $0xc20] sm:$0xff]  ;;  %v10465_v58 = vcombine.high %v1288_v51, %v1296_v52  ;;  %v10464_v5 = vcombine.low %v1288_v51, %v1296_v52  ;;  %v1465_v51 = vld [vmem:[#allocation10 + $0x9a8] sm:$0xff] }
 0x36f   : > { %v1552_v55 = vld [vmem:[#allocation10 + $0xc60] sm:$0xff]  ;;  %v1473_v52 = vld [vmem:[#allocation10 + $0x9e8] sm:$0xff] }
 0x370   : > { %4573 = vmatpush2.bf16.msra.mxu1 %v10576_v60  ;;  %v10721_v59 = vcombine.high %v1544_v53, %v1552_v55  ;;  %v1273_v60 = vld [vmem:[#allocation10 + $0x3a8] sm:$0xff]  ;;  %v10720_v6 = vcombine.low %v1544_v53, %v1552_v55  ;;  %v10402_v53 = vcombine.low %v1225_v35, %v1233_v36 }
 0x371   : > { %4614 = vmatpush2.bf16.msra.mxu0 %v10832_v61  ;;  %4574 = vmatprep.subr.bf16.mxu1 %v10561_v62  ;;  %v1281_v61 = vld [vmem:[#allocation10 + $0x3e8] sm:$0xff] }
 0x372   : > { %4615 = vmatprep.subr.bf16.mxu0 %v10817_v2  ;;  %v1529_v62 = vld [vmem:[#allocation10 + $0xba8] sm:$0xff]  ;;  %v10451_v7 = vcombine.high %v1273_v60, %v1281_v61 }
 0x373   : > { %v1537_v2 = vld [vmem:[#allocation10 + $0xbe8] sm:$0xff] }
 0x374   : > { %4575 = vmatpush2.bf16.msra.mxu1 %v10560_v9  ;;  %v10707_v8 = vcombine.high %v1529_v62, %v1537_v2  ;;  %v1257_v9 = vld [vmem:[#allocation10 + $0x328] sm:$0xff]  ;;  %v10706_v14 = vcombine.low %v1529_v62, %v1537_v2  ;;  %v10642_v2 = vcombine.low %v1465_v51, %v1473_v52 }
 0x375   : > { %4616 = vmatpush2.bf16.msra.mxu0 %v10816_v10  ;;  %4576 = vmatprep.subr.bf16.mxu1 %v10545_v11  ;;  %v1265_v10 = vld [vmem:[#allocation10 + $0x368] sm:$0xff]  ;;  %v10450_v11 = vcombine.low %v1273_v60, %v1281_v61 }
 0x376   : > { %4617 = vmatprep.subr.bf16.mxu0 %v10801_v12  ;;  %v1513_v12 = vld [vmem:[#allocation10 + $0xb28] sm:$0xff]  ;;  %v10435_v15 = vcombine.high %v1257_v9, %v1265_v10  ;;  %v10434_v24 = vcombine.low %v1257_v9, %v1265_v10 }
 0x377   : > { %v1449_v60 = vld [vmem:[#allocation10 + $0x928] sm:$0xff] }
 0x378   : > { %4577 = vmatpush2.bf16.msra.mxu1 %v10544_v17  ;;  %v1249_v17 = vld [vmem:[#allocation10 + $0x2e8] sm:$0xff] }
 0x379   : > { %4618 = vmatpush2.bf16.msra.mxu0 %v10800_v18  ;;  %4578 = vmatprep.subr.bf16.mxu1 %v10529_v19  ;;  %v10418_v41 = vcombine.low %v1241_v16, %v1249_v17  ;;  %v1457_v61 = vld [vmem:[#allocation10 + $0x968] sm:$0xff] }
 0x37a   : > { %4619 = vmatprep.subr.bf16.mxu0 %v10785_v20  ;;  %v10691_v20 = vcombine.high %v1513_v12, %v1521_v13  ;;  %v1433_v9 = vld [vmem:[#allocation10 + $0x8a8] sm:$0xff] }
 0x37b   : > { %v1441_v10 = vld [vmem:[#allocation10 + $0x8e8] sm:$0xff] }
 0x37c   : > { %4579 = vmatpush2.bf16.msra.mxu1 %v10528_v25 }
 0x37d   : > { %4620 = vmatpush2.bf16.msra.mxu0 %v10784_v26  ;;  %4580 = vmatprep.subr.bf16.mxu1 %v10513_v27  ;;  %v10690_v27 = vcombine.low %v1513_v12, %v1521_v13  ;;  %v10626_v12 = vcombine.low %v1449_v60, %v1457_v61 }
 0x37e   : > { %4621 = vmatprep.subr.bf16.mxu0 %v10769_v28  ;;  %v10419_v28 = vcombine.high %v1241_v16, %v1249_v17  ;;  %v1169_v16 = vld [vmem:[#allocation10 + $0x68] sm:$0xff] }
 0x37f   : > { %v1417_v17 = vld [vmem:[#allocation10 + $0x828] sm:$0xff] }
 0x380   : > { %4581 = vmatpush2.bf16.msra.mxu1 %v10512_v37 }
 0x381   : > { %4622 = vmatpush2.bf16.msra.mxu0 %v10768_v38  ;;  %4582 = vmatprep.subr.bf16.mxu1 %v10497_v39  ;;  %v1481_v39 = vld [vmem:[#allocation10 + $0xa28] sm:$0xff] }
 0x382   : > { %4623 = vmatprep.subr.bf16.mxu0 %v10753_v40  ;;  %v1489_v40 = vld [vmem:[#allocation10 + $0xa68] sm:$0xff] }
 0x383   : > { %v10658_v55 = vcombine.low %v1481_v39, %v1489_v40 }
 0x384   : > { %4583 = vmatpush2.bf16.msra.mxu1 %v10496_v46  ;;  %v10403_v46 = vcombine.high %v1225_v35, %v1233_v36 }
 0x385   : > { %4624 = vmatpush2.bf16.msra.mxu0 %v10752_v47  ;;  %4584 = vmatprep.subr.bf16.mxu1 %v10481_v49  ;;  %v10659_v47 = vcombine.high %v1481_v39, %v1489_v40  ;;  %v1209_v49 = vld [vmem:[#allocation10 + $0x1a8] sm:$0xff] }
 0x386   : > { %4625 = vmatprep.subr.bf16.mxu0 %v10737_v50  ;;  %v1217_v50 = vld [vmem:[#allocation10 + $0x1e8] sm:$0xff] }
 0x387   : > { %v10386_v62 = vcombine.low %v1209_v49, %v1217_v50  ;;  %v1641_v39 = vld [vmem:[#allocation10 + $0xf28] sm:$0xff] }
 0x388   : > { %4585 = vmatpush2.bf16.msra.mxu1 %v10480_v56  ;;  %v10387_v56 = vcombine.high %v1209_v49, %v1217_v50  ;;  %v1649_v40 = vld [vmem:[#allocation10 + $0xf68] sm:$0xff] }
 0x389   : > { %4626 = vmatpush2.bf16.msra.mxu0 %v10736_v57  ;;  %4586 = vmatprep.subr.bf16.mxu1 %v10465_v58  ;;  %v10643_v57 = vcombine.high %v1465_v51, %v1473_v52  ;;  %v1193_v58 = vld [vmem:[#allocation10 + $0x128] sm:$0xff]  ;;  %v10818_v52 = vcombine.low %v1641_v39, %v1649_v40 }
 0x38a   : > { %4627 = vmatprep.subr.bf16.mxu0 %v10721_v59  ;;  %v1201_v59 = vld [vmem:[#allocation10 + $0x168] sm:$0xff] }
 0x38b   : > { %v1625_v49 = vld [vmem:[#allocation10 + $0xea8] sm:$0xff] }
 0x38c   : > { %4587 = vmatpush2.bf16.msra.mxu1 %v10464_v5  ;;  %v10371_v5 = vcombine.high %v1193_v58, %v1201_v59  ;;  %v1633_v50 = vld [vmem:[#allocation10 + $0xee8] sm:$0xff] }
 0x38d   : > { %4628 = vmatpush2.bf16.msra.mxu0 %v10720_v6  ;;  %4638 = vmatprep.subr.bf16.mxu1 %v10451_v7  ;;  %v10627_v6 = vcombine.high %v1449_v60, %v1457_v61  ;;  %v1177_v7 = vld [vmem:[#allocation10 + $0xa8] sm:$0xff]  ;;  %v10802_v61 = vcombine.low %v1625_v49, %v1633_v50 }
 0x38e   : > { %4679 = vmatprep.subr.bf16.mxu0 %v10707_v8  ;;  %v1185_v8 = vld [vmem:[#allocation10 + $0xe8] sm:$0xff] }
 0x38f   : > { %v4344_v18 = vpop.f32.mrf.mxu1  ;;  %v4385_v19 = vpop.f32.mrf.mxu0  ;;  %4589 = vmatmul.mubr.bf16.vlgmr.msra.gmra.mxu1 %v13275_v31  ;;  %v10355_v13 = vcombine.high %v1177_v7, %v1185_v8 }
 0x390   : > { %v13302_v23 = vadd.f32 %v4385_v19, %v4344_v18  ;;  %4630 = vmatmul.mubr.bf16.vlgmr.msra.gmra.mxu0 %v13277_v32  ;;  %4639 = vmatpush1.bf16.msra.mxu1 %v10450_v11  ;;  %v10370_v11 = vcombine.low %v1193_v58, %v1201_v59  ;;  %v1425_v18 = vld [vmem:[#allocation10 + $0x868] sm:$0xff]  ;;  %v10354_v19 = vcombine.low %v1177_v7, %v1185_v8 }
 0x391   : > { %4670 = vmatprep.mubr.bf16.mxu1 %v13271_v29  ;;  %4680 = vmatpush1.bf16.msra.mxu0 %v10706_v14  ;;  %v4346_v25 = vpop.f32.mrf.mxu1  ;;  %v4387_v26 = vpop.f32.mrf.mxu0  ;;  %v10611_v14 = vcombine.high %v1433_v9, %v1441_v10  ;;  %v10595_v22 = vcombine.high %v1417_v17, %v1425_v18  ;;  %v1609_v58 = vld [vmem:[#allocation10 + $0xe28] sm:$0xff] }
 0x392   : > { %4711 = vmatprep.mubr.bf16.mxu0 %v13273_v30  ;;  %v13307_v33 = vadd.f32 %v4387_v26, %v4346_v25  ;;  %4640 = vmatprep.subr.bf16.mxu1 %v10435_v15  ;;  %v1161_v15 = vld [vmem:[#allocation10 + $0x28] sm:$0xff] }
 0x393   : > { %v4348_v37 = vpop.f32.mrf.mxu1  ;;  %v4389_v38 = vpop.f32.mrf.mxu0  ;;  %4681 = vmatprep.subr.bf16.mxu0 %v10691_v20  ;;  %v10610_v20 = vcombine.low %v1433_v9, %v1441_v10  ;;  %v10339_v21 = vcombine.high %v1161_v15, %v1169_v16  ;;  %v1409_v25 = vld [vmem:[#allocation10 + $0x7e8] sm:$0xff] }
 0x394   : > { %4641 = vmatpush1.bf16.msra.mxu1 %v10434_v24  ;;  %v1401_v24 = vld [vmem:[#allocation10 + $0x7a8] sm:$0xff] }
 0x395   : > { %4682 = vmatpush1.bf16.msra.mxu0 %v10690_v27  ;;  %v4349_v42 = vpop.f32.mrf.mxu1  ;;  %v4390_v44 = vpop.f32.mrf.mxu0  ;;  %4642 = vmatprep.subr.bf16.mxu1 %v10419_v28  ;;  %v1657_v26 = vld [vmem:[#allocation10 + $0xfa8] sm:$0xff]  ;;  %v10338_v28 = vcombine.low %v1161_v15, %v1169_v16  ;;  %v10579_v35 = vcombine.high %v1401_v24, %v1409_v25 }
 0x396   : > { %4683 = vmatprep.subr.bf16.mxu0 %v10675_v34  ;;  %v1665_v27 = vld [vmem:[#allocation10 + $0xfe8] sm:$0xff]  ;;  %v10594_v34 = vcombine.low %v1417_v17, %v1425_v18 }
 0x397   : > { %v10835_v36 = vcombine.high %v1657_v26, %v1665_v27  ;;  %v1385_v37 = vld [vmem:[#allocation10 + $0x728] sm:$0xff]  ;;  %v10834_v42 = vcombine.low %v1657_v26, %v1665_v27 }
 0x398   : > { %4643 = vmatpush1.bf16.msra.mxu1 %v10418_v41  ;;  %v1393_v38 = vld [vmem:[#allocation10 + $0x768] sm:$0xff]  ;;  %v10578_v41 = vcombine.low %v1401_v24, %v1409_v25 }
 0x399   : > { %4684 = vmatpush1.bf16.msra.mxu0 %v10674_v45  ;;  %4644 = vmatprep.subr.bf16.mxu1 %v10403_v46  ;;  %v10563_v44 = vcombine.high %v1385_v37, %v1393_v38  ;;  %v10819_v45 = vcombine.high %v1641_v39, %v1649_v40  ;;  %v1369_v46 = vld [vmem:[#allocation10 + $0x6a8] sm:$0xff]  ;;  %v10562_v51 = vcombine.low %v1385_v37, %v1393_v38 }
 0x39a   : > { %4685 = vmatprep.subr.bf16.mxu0 %v10659_v47  ;;  %v1377_v47 = vld [vmem:[#allocation10 + $0x6e8] sm:$0xff] }
 0x39b   : > { %v1617_v59 = vld [vmem:[#allocation10 + $0xe68] sm:$0xff]  ;;  %v10546_v60 = vcombine.low %v1369_v46, %v1377_v47 }
 0x39c   : > { %4645 = vmatpush1.bf16.msra.mxu1 %v10402_v53  ;;  %v10547_v53 = vcombine.high %v1369_v46, %v1377_v47  ;;  %v1593_v7 = vld [vmem:[#allocation10 + $0xda8] sm:$0xff]  ;;  %v10786_v10 = vcombine.low %v1609_v58, %v1617_v59  ;;  %v1530_v46 = vld [vmem:[#allocation10 + $0xbb0] sm:$0xff] }
 0x39d   : > { %4686 = vmatpush1.bf16.msra.mxu0 %v10658_v55  ;;  %4646 = vmatprep.subr.bf16.mxu1 %v10387_v56  ;;  %v10803_v55 = vcombine.high %v1625_v49, %v1633_v50  ;;  %v1353_v56 = vld [vmem:[#allocation10 + $0x628] sm:$0xff]  ;;  %v1538_v47 = vld [vmem:[#allocation10 + $0xbf0] sm:$0xff] }
 0x39e   : > { %4687 = vmatprep.subr.bf16.mxu0 %v10643_v57  ;;  %v1361_v57 = vld [vmem:[#allocation10 + $0x668] sm:$0xff] }
 0x39f   : > { %v1601_v8 = vld [vmem:[#allocation10 + $0xde8] sm:$0xff]  ;;  %v10530_v9 = vcombine.low %v1353_v56, %v1361_v57 }
 0x3a0   : > { %4647 = vmatpush1.bf16.msra.mxu1 %v10386_v62  ;;  %v10531_v62 = vcombine.high %v1353_v56, %v1361_v57  ;;  %v1577_v15 = vld [vmem:[#allocation10 + $0xd28] sm:$0xff]  ;;  %v10770_v18 = vcombine.low %v1593_v7, %v1601_v8  ;;  %v1514_v57 = vld [vmem:[#allocation10 + $0xb30] sm:$0xff] }
 0x3a1   : > { %4688 = vmatpush1.bf16.msra.mxu0 %v10642_v2  ;;  %4648 = vmatprep.subr.bf16.mxu1 %v10371_v5  ;;  %v10787_v2 = vcombine.high %v1609_v58, %v1617_v59  ;;  %v1337_v5 = vld [vmem:[#allocation10 + $0x5a8] sm:$0xff]  ;;  %v1522_v58 = vld [vmem:[#allocation10 + $0xb70] sm:$0xff]  ;;  %v10708_v59 = vcombine.low %v1530_v46, %v1538_v47 }
 0x3a2   : > { %4689 = vmatprep.subr.bf16.mxu0 %v10627_v6  ;;  %v1345_v6 = vld [vmem:[#allocation10 + $0x5e8] sm:$0xff] }
 0x3a3   : > { %v1585_v16 = vld [vmem:[#allocation10 + $0xd68] sm:$0xff]  ;;  %v10514_v17 = vcombine.low %v1337_v5, %v1345_v6 }
 0x3a4   : > { %4649 = vmatpush1.bf16.msra.mxu1 %v10370_v11  ;;  %v10515_v11 = vcombine.high %v1337_v5, %v1345_v6  ;;  %v1561_v24 = vld [vmem:[#allocation10 + $0xca8] sm:$0xff]  ;;  %v10754_v27 = vcombine.low %v1577_v15, %v1585_v16  ;;  %v10693_v5 = vcombine.high %v1514_v57, %v1522_v58  ;;  %v1498_v6 = vld [vmem:[#allocation10 + $0xab0] sm:$0xff] }
 0x3a5   : > { %4690 = vmatpush1.bf16.msra.mxu0 %v10626_v12  ;;  %4650 = vmatprep.subr.bf16.mxu1 %v10355_v13  ;;  %v10771_v12 = vcombine.high %v1593_v7, %v1601_v8  ;;  %v1321_v13 = vld [vmem:[#allocation10 + $0x528] sm:$0xff]  ;;  %v1506_v7 = vld [vmem:[#allocation10 + $0xaf0] sm:$0xff] }
 0x3a6   : > { %4691 = vmatprep.subr.bf16.mxu0 %v10611_v14  ;;  %v1329_v14 = vld [vmem:[#allocation10 + $0x568] sm:$0xff] }
 0x3a7   : > { %v1569_v25 = vld [vmem:[#allocation10 + $0xce8] sm:$0xff]  ;;  %v10498_v26 = vcombine.low %v1321_v13, %v1329_v14 }
 0x3a8   : > { %4651 = vmatpush1.bf16.msra.mxu1 %v10354_v19  ;;  %v10499_v19 = vcombine.high %v1321_v13, %v1329_v14  ;;  %v1545_v37 = vld [vmem:[#allocation10 + $0xc28] sm:$0xff]  ;;  %v10738_v40 = vcombine.low %v1561_v24, %v1569_v25 }
 0x3a9   : > { %4692 = vmatpush1.bf16.msra.mxu0 %v10610_v20  ;;  %4652 = vmatprep.subr.bf16.mxu1 %v10339_v21  ;;  %v10755_v20 = vcombine.high %v1577_v15, %v1585_v16  ;;  %v1305_v21 = vld [vmem:[#allocation10 + $0x4a8] sm:$0xff]  ;;  %v10677_v15 = vcombine.high %v1498_v6, %v1506_v7  ;;  %v1226_v16 = vld [vmem:[#allocation10 + $0x230] sm:$0xff] }
 0x3aa   : > { %4693 = vmatprep.subr.bf16.mxu0 %v10595_v22  ;;  %v1313_v22 = vld [vmem:[#allocation10 + $0x4e8] sm:$0xff] }
 0x3ab   : > { %v1553_v38 = vld [vmem:[#allocation10 + $0xc68] sm:$0xff]  ;;  %v10482_v39 = vcombine.low %v1305_v21, %v1313_v22 }
 0x3ac   : > { %4653 = vmatpush1.bf16.msra.mxu1 %v10338_v28  ;;  %v10483_v28 = vcombine.high %v1305_v21, %v1313_v22  ;;  %v10722_v50 = vcombine.low %v1545_v37, %v1553_v38  ;;  %v1490_v21 = vld [vmem:[#allocation10 + $0xa70] sm:$0xff] }
 0x3ad   : > { %4694 = vmatpush1.bf16.msra.mxu0 %v10594_v34  ;;  %4654 = vmatprep.subr.bf16.mxu1 %v10579_v35  ;;  %v10739_v34 = vcombine.high %v1561_v24, %v1569_v25  ;;  %v1289_v35 = vld [vmem:[#allocation10 + $0x428] sm:$0xff] }
 0x3ae   : > { %4695 = vmatprep.subr.bf16.mxu0 %v10835_v36  ;;  %v1297_v36 = vld [vmem:[#allocation10 + $0x468] sm:$0xff] }
 0x3af   : > { %v10466_v49 = vcombine.low %v1289_v35, %v1297_v36 }
 0x3b0   : > { %4655 = vmatpush2.bf16.msra.mxu1 %v10578_v41  ;;  %v10467_v41 = vcombine.high %v1289_v35, %v1297_v36  ;;  %v1210_v35 = vld [vmem:[#allocation10 + $0x1b0] sm:$0xff] }
 0x3b1   : > { %4696 = vmatpush2.bf16.msra.mxu0 %v10834_v42  ;;  %4656 = vmatprep.subr.bf16.mxu1 %v10563_v44  ;;  %v10723_v42 = vcombine.high %v1545_v37, %v1553_v38  ;;  %v1274_v44 = vld [vmem:[#allocation10 + $0x3b0] sm:$0xff] }
 0x3b2   : > { %4697 = vmatprep.subr.bf16.mxu0 %v10819_v45  ;;  %v1282_v45 = vld [vmem:[#allocation10 + $0x3f0] sm:$0xff] }
 0x3b3   : > { %v10452_v56 = vcombine.low %v1274_v44, %v1282_v45  ;;  %v1218_v36 = vld [vmem:[#allocation10 + $0x1f0] sm:$0xff] }
 0x3b4   : > { %4657 = vmatpush2.bf16.msra.mxu1 %v10562_v51  ;;  %v10453_v51 = vcombine.high %v1274_v44, %v1282_v45  ;;  %v1466_v37 = vld [vmem:[#allocation10 + $0x9b0] sm:$0xff] }
 0x3b5   : > { %4698 = vmatpush2.bf16.msra.mxu0 %v10818_v52  ;;  %4658 = vmatprep.subr.bf16.mxu1 %v10547_v53  ;;  %v10709_v52 = vcombine.high %v1530_v46, %v1538_v47  ;;  %v1258_v53 = vld [vmem:[#allocation10 + $0x330] sm:$0xff] }
 0x3b6   : > { %4699 = vmatprep.subr.bf16.mxu0 %v10803_v55  ;;  %v1266_v55 = vld [vmem:[#allocation10 + $0x370] sm:$0xff] }
 0x3b7   : > { %v1474_v38 = vld [vmem:[#allocation10 + $0x9f0] sm:$0xff] }
 0x3b8   : > { %4659 = vmatpush2.bf16.msra.mxu1 %v10546_v60  ;;  %v10437_v60 = vcombine.high %v1258_v53, %v1266_v55  ;;  %v1194_v44 = vld [vmem:[#allocation10 + $0x130] sm:$0xff] }
 0x3b9   : > { %4700 = vmatpush2.bf16.msra.mxu0 %v10802_v61  ;;  %4660 = vmatprep.subr.bf16.mxu1 %v10531_v62  ;;  %v1242_v61 = vld [vmem:[#allocation10 + $0x2b0] sm:$0xff] }
 0x3ba   : > { %4701 = vmatprep.subr.bf16.mxu0 %v10787_v2  ;;  %v1250_v62 = vld [vmem:[#allocation10 + $0x2f0] sm:$0xff] }
 0x3bb   : > { %v10421_v13 = vcombine.high %v1242_v61, %v1250_v62  ;;  %v10420_v24 = vcombine.low %v1242_v61, %v1250_v62  ;;  %v1202_v45 = vld [vmem:[#allocation10 + $0x170] sm:$0xff] }
 0x3bc   : > { %4661 = vmatpush2.bf16.msra.mxu1 %v10530_v9  ;;  %v10436_v9 = vcombine.low %v1258_v53, %v1266_v55  ;;  %v1450_v46 = vld [vmem:[#allocation10 + $0x930] sm:$0xff] }
 0x3bd   : > { %4702 = vmatpush2.bf16.msra.mxu0 %v10786_v10  ;;  %4662 = vmatprep.subr.bf16.mxu1 %v10515_v11  ;;  %v1458_v47 = vld [vmem:[#allocation10 + $0x970] sm:$0xff] }
 0x3be   : > { %4703 = vmatprep.subr.bf16.mxu0 %v10771_v12  ;;  %v10692_v12 = vcombine.low %v1514_v57, %v1522_v58  ;;  %v1178_v53 = vld [vmem:[#allocation10 + $0xb0] sm:$0xff]  ;;  %v10372_v58 = vcombine.low %v1194_v44, %v1202_v45 }
 0x3bf   : > { %v1186_v55 = vld [vmem:[#allocation10 + $0xf0] sm:$0xff] }
 0x3c0   : > { %4663 = vmatpush2.bf16.msra.mxu1 %v10514_v17  ;;  %v1234_v17 = vld [vmem:[#allocation10 + $0x270] sm:$0xff] }
 0x3c1   : > { %4704 = vmatpush2.bf16.msra.mxu0 %v10770_v18  ;;  %4664 = vmatprep.subr.bf16.mxu1 %v10499_v19  ;;  %v1442_v57 = vld [vmem:[#allocation10 + $0x8f0] sm:$0xff] }
 0x3c2   : > { %4705 = vmatprep.subr.bf16.mxu0 %v10755_v20  ;;  %v1482_v20 = vld [vmem:[#allocation10 + $0xa30] sm:$0xff] }
 0x3c3   : > { %v1162_v62 = vld [vmem:[#allocation10 + $0x30] sm:$0xff] }
 0x3c4   : > { %4665 = vmatpush2.bf16.msra.mxu1 %v10498_v26  ;;  %v10676_v26 = vcombine.low %v1498_v6, %v1506_v7  ;;  %v1426_v6 = vld [vmem:[#allocation10 + $0x870] sm:$0xff]  ;;  %v10356_v7 = vcombine.low %v1178_v53, %v1186_v55 }
 0x3c5   : > { %4706 = vmatpush2.bf16.msra.mxu0 %v10754_v27  ;;  %4666 = vmatprep.subr.bf16.mxu1 %v10483_v28  ;;  %v10405_v27 = vcombine.high %v1226_v16, %v1234_v17 }
 0x3c6   : > { %4707 = vmatprep.subr.bf16.mxu0 %v10739_v34  ;;  %v10661_v34 = vcombine.high %v1482_v20, %v1490_v21 }
 0x3c8   : > { %4667 = vmatpush2.bf16.msra.mxu1 %v10482_v39  ;;  %v10404_v39 = vcombine.low %v1226_v16, %v1234_v17 }
 0x3c9   : > { %4708 = vmatpush2.bf16.msra.mxu0 %v10738_v40  ;;  %4668 = vmatprep.subr.bf16.mxu1 %v10467_v41  ;;  %v10660_v40 = vcombine.low %v1482_v20, %v1490_v21  ;;  %v10389_v41 = vcombine.high %v1210_v35, %v1218_v36  ;;  %v1386_v21 = vld [vmem:[#allocation10 + $0x730] sm:$0xff] }
 0x3ca   : > { %4709 = vmatprep.subr.bf16.mxu0 %v10723_v42  ;;  %v10645_v42 = vcombine.high %v1466_v37, %v1474_v38 }
 0x3cc   : > { %4669 = vmatpush2.bf16.msra.mxu1 %v10466_v49  ;;  %v10388_v49 = vcombine.low %v1210_v35, %v1218_v36  ;;  %v1370_v35 = vld [vmem:[#allocation10 + $0x6b0] sm:$0xff] }
 0x3cd   : > { %4710 = vmatpush2.bf16.msra.mxu0 %v10722_v50  ;;  %4720 = vmatprep.subr.bf16.mxu1 %v10453_v51  ;;  %v10644_v50 = vcombine.low %v1466_v37, %v1474_v38  ;;  %v10373_v51 = vcombine.high %v1194_v44, %v1202_v45  ;;  %v1378_v36 = vld [vmem:[#allocation10 + $0x6f0] sm:$0xff] }
 0x3ce   : > { %4761 = vmatprep.subr.bf16.mxu0 %v10709_v52  ;;  %v10629_v52 = vcombine.high %v1450_v46, %v1458_v47  ;;  %v1626_v37 = vld [vmem:[#allocation10 + $0xeb0] sm:$0xff] }
 0x3cf   : > { %v4426_v2 = vpop.f32.mrf.mxu1  ;;  %4671 = vmatmul.mubr.bf16.vlgmr.msra.gmra.mxu1 %v13275_v31  ;;  %v1634_v38 = vld [vmem:[#allocation10 + $0xef0] sm:$0xff] }
 0x3d0   : > { %v4467_v8 = vpop.f32.mrf.mxu0  ;;  %4712 = vmatmul.mubr.bf16.vlgmr.msra.gmra.mxu0 %v13277_v32  ;;  %4721 = vmatpush1.bf16.msra.mxu1 %v10452_v56  ;;  %v1434_v56 = vld [vmem:[#allocation10 + $0x8b0] sm:$0xff] }
 0x3d1   : > { %v13311_v10 = vadd.f32 %v4467_v8, %v4426_v2  ;;  %4752 = vmatprep.mubr.bf16.mxu1 %v13271_v29  ;;  %4762 = vmatpush1.bf16.msra.mxu0 %v10708_v59  ;;  %v4428_v11 = vpop.f32.mrf.mxu1  ;;  %v10628_v59 = vcombine.low %v1450_v46, %v1458_v47  ;;  %v10613_v61 = vcombine.high %v1434_v56, %v1442_v57  ;;  %v1170_v2 = vld [vmem:[#allocation10 + $0x70] sm:$0xff] }
 0x3d2   : > { %4793 = vmatprep.mubr.bf16.mxu0 %v13273_v30  ;;  %v4469_v14 = vpop.f32.mrf.mxu0  ;;  %4722 = vmatprep.subr.bf16.mxu1 %v10437_v60  ;;  %v10357_v60 = vcombine.high %v1178_v53, %v1186_v55  ;;  %v10612_v8 = vcombine.low %v1434_v56, %v1442_v57  ;;  %v10340_v16 = vcombine.low %v1162_v62, %v1170_v2  ;;  %v1354_v44 = vld [vmem:[#allocation10 + $0x630] sm:$0xff] }
 0x3d3   : > { %v13315_v18 = vadd.f32 %v4469_v14, %v4428_v11  ;;  %v4430_v19 = vpop.f32.mrf.mxu1  ;;  %4763 = vmatprep.subr.bf16.mxu0 %v10693_v5  ;;  %v1418_v5 = vld [vmem:[#allocation10 + $0x830] sm:$0xff] }
 0x3d4   : > { %v4471_v22 = vpop.f32.mrf.mxu0  ;;  %4723 = vmatpush1.bf16.msra.mxu1 %v10436_v9  ;;  %v10341_v9 = vcombine.high %v1162_v62, %v1170_v2  ;;  %v10597_v11 = vcombine.high %v1418_v5, %v1426_v6  ;;  %v1658_v14 = vld [vmem:[#allocation10 + $0xfb0] sm:$0xff]  ;;  %v10596_v17 = vcombine.low %v1418_v5, %v1426_v6 }
 0x3d5   : > { %4764 = vmatpush1.bf16.msra.mxu0 %v10692_v12  ;;  %v4431_v25 = vpop.f32.mrf.mxu1  ;;  %4724 = vmatprep.subr.bf16.mxu1 %v10421_v13  ;;  %v1402_v12 = vld [vmem:[#allocation10 + $0x7b0] sm:$0xff] }
 0x3d6   : > { %v4472_v28 = vpop.f32.mrf.mxu0  ;;  %4765 = vmatprep.subr.bf16.mxu0 %v10677_v15  ;;  %v1410_v13 = vld [vmem:[#allocation10 + $0x7f0] sm:$0xff] }
 0x3d7   : > { %v1666_v15 = vld [vmem:[#allocation10 + $0xff0] sm:$0xff]  ;;  %v10581_v19 = vcombine.high %v1402_v12, %v1410_v13 }
 0x3d8   : > { %4725 = vmatpush1.bf16.msra.mxu1 %v10420_v24  ;;  %v10837_v20 = vcombine.high %v1658_v14, %v1666_v15  ;;  %v1394_v22 = vld [vmem:[#allocation10 + $0x770] sm:$0xff] }
 0x3d9   : > { %4766 = vmatpush1.bf16.msra.mxu0 %v10676_v26  ;;  %4726 = vmatprep.subr.bf16.mxu1 %v10405_v27  ;;  %v1642_v24 = vld [vmem:[#allocation10 + $0xf30] sm:$0xff]  ;;  %v10580_v26 = vcombine.low %v1402_v12, %v1410_v13  ;;  %v10836_v27 = vcombine.low %v1658_v14, %v1666_v15  ;;  %v10565_v28 = vcombine.high %v1386_v21, %v1394_v22 }
 0x3da   : > { %4767 = vmatprep.subr.bf16.mxu0 %v10661_v34  ;;  %v1650_v25 = vld [vmem:[#allocation10 + $0xf70] sm:$0xff] }
 0x3db   : > { %v10821_v34 = vcombine.high %v1642_v24, %v1650_v25  ;;  %v1362_v45 = vld [vmem:[#allocation10 + $0x670] sm:$0xff] }
 0x3dc   : > { %4727 = vmatpush1.bf16.msra.mxu1 %v10404_v39  ;;  %v10564_v39 = vcombine.low %v1386_v21, %v1394_v22  ;;  %v1610_v46 = vld [vmem:[#allocation10 + $0xe30] sm:$0xff] }
 0x3dd   : > { %4768 = vmatpush1.bf16.msra.mxu0 %v10660_v40  ;;  %4728 = vmatprep.subr.bf16.mxu1 %v10389_v41  ;;  %v10820_v40 = vcombine.low %v1642_v24, %v1650_v25  ;;  %v10549_v41 = vcombine.high %v1370_v35, %v1378_v36  ;;  %v1618_v47 = vld [vmem:[#allocation10 + $0xe70] sm:$0xff] }
 0x3de   : > { %4769 = vmatprep.subr.bf16.mxu0 %v10645_v42  ;;  %v10805_v42 = vcombine.high %v1626_v37, %v1634_v38  ;;  %v1338_v53 = vld [vmem:[#allocation10 + $0x5b0] sm:$0xff] }
 0x3df   : > { %v1346_v55 = vld [vmem:[#allocation10 + $0x5f0] sm:$0xff] }
 0x3e0   : > { %4729 = vmatpush1.bf16.msra.mxu1 %v10388_v49  ;;  %v10548_v49 = vcombine.low %v1370_v35, %v1378_v36  ;;  %v1594_v56 = vld [vmem:[#allocation10 + $0xdb0] sm:$0xff]  ;;  %v1275_v35 = vld [vmem:[#allocation10 + $0x3b8] sm:$0xff] }
 0x3e1   : > { %4770 = vmatpush1.bf16.msra.mxu0 %v10644_v50  ;;  %4730 = vmatprep.subr.bf16.mxu1 %v10373_v51  ;;  %v10804_v50 = vcombine.low %v1626_v37, %v1634_v38  ;;  %v10533_v51 = vcombine.high %v1354_v44, %v1362_v45  ;;  %v1602_v57 = vld [vmem:[#allocation10 + $0xdf0] sm:$0xff]  ;;  %v1283_v36 = vld [vmem:[#allocation10 + $0x3f8] sm:$0xff] }
 0x3e2   : > { %4771 = vmatprep.subr.bf16.mxu0 %v10629_v52  ;;  %v10789_v52 = vcombine.high %v1610_v46, %v1618_v47  ;;  %v1322_v62 = vld [vmem:[#allocation10 + $0x530] sm:$0xff]  ;;  %v1531_v37 = vld [vmem:[#allocation10 + $0xbb8] sm:$0xff] }
 0x3e3   : > { %v1330_v2 = vld [vmem:[#allocation10 + $0x570] sm:$0xff]  ;;  %v1539_v38 = vld [vmem:[#allocation10 + $0xbf8] sm:$0xff] }
 0x3e4   : > { %4731 = vmatpush1.bf16.msra.mxu1 %v10372_v58  ;;  %v10532_v58 = vcombine.low %v1354_v44, %v1362_v45  ;;  %v1578_v5 = vld [vmem:[#allocation10 + $0xd30] sm:$0xff]  ;;  %v1259_v44 = vld [vmem:[#allocation10 + $0x338] sm:$0xff] }
 0x3e5   : > { %4772 = vmatpush1.bf16.msra.mxu0 %v10628_v59  ;;  %4732 = vmatprep.subr.bf16.mxu1 %v10357_v60  ;;  %v10788_v59 = vcombine.low %v1610_v46, %v1618_v47  ;;  %v10517_v60 = vcombine.high %v1338_v53, %v1346_v55  ;;  %v1586_v6 = vld [vmem:[#allocation10 + $0xd70] sm:$0xff]  ;;  %v1267_v45 = vld [vmem:[#allocation10 + $0x378] sm:$0xff]  ;;  %v10454_v46 = vcombine.low %v1275_v35, %v1283_v36 }
 0x3e6   : > { %4773 = vmatprep.subr.bf16.mxu0 %v10613_v61  ;;  %v10773_v61 = vcombine.high %v1594_v56, %v1602_v57  ;;  %v1306_v12 = vld [vmem:[#allocation10 + $0x4b0] sm:$0xff]  ;;  %v1515_v47 = vld [vmem:[#allocation10 + $0xb38] sm:$0xff] }
 0x3e7   : > { %v1314_v13 = vld [vmem:[#allocation10 + $0x4f0] sm:$0xff] }
 0x3e8   : > { %4733 = vmatpush1.bf16.msra.mxu1 %v10356_v7  ;;  %v10516_v7 = vcombine.low %v1338_v53, %v1346_v55  ;;  %v1562_v14 = vld [vmem:[#allocation10 + $0xcb0] sm:$0xff]  ;;  %v1251_v53 = vld [vmem:[#allocation10 + $0x2f8] sm:$0xff] }
 0x3e9   : > { %4774 = vmatpush1.bf16.msra.mxu0 %v10612_v8  ;;  %4734 = vmatprep.subr.bf16.mxu1 %v10341_v9  ;;  %v10772_v8 = vcombine.low %v1594_v56, %v1602_v57  ;;  %v10501_v9 = vcombine.high %v1322_v62, %v1330_v2  ;;  %v1570_v15 = vld [vmem:[#allocation10 + $0xcf0] sm:$0xff]  ;;  %v1499_v57 = vld [vmem:[#allocation10 + $0xab8] sm:$0xff] }
 0x3ea   : > { %4775 = vmatprep.subr.bf16.mxu0 %v10597_v11  ;;  %v10757_v11 = vcombine.high %v1578_v5, %v1586_v6  ;;  %v1290_v21 = vld [vmem:[#allocation10 + $0x430] sm:$0xff] }
 0x3eb   : > { %v1298_v22 = vld [vmem:[#allocation10 + $0x470] sm:$0xff] }
 0x3ec   : > { %4735 = vmatpush1.bf16.msra.mxu1 %v10340_v16  ;;  %v10500_v16 = vcombine.low %v1322_v62, %v1330_v2  ;;  %v1546_v24 = vld [vmem:[#allocation10 + $0xc30] sm:$0xff] }
 0x3ed   : > { %4776 = vmatpush1.bf16.msra.mxu0 %v10596_v17  ;;  %4736 = vmatprep.subr.bf16.mxu1 %v10581_v19  ;;  %v10756_v17 = vcombine.low %v1578_v5, %v1586_v6  ;;  %v10485_v19 = vcombine.high %v1306_v12, %v1314_v13  ;;  %v1554_v25 = vld [vmem:[#allocation10 + $0xc70] sm:$0xff] }
 0x3ee   : > { %4777 = vmatprep.subr.bf16.mxu0 %v10837_v20  ;;  %v10741_v20 = vcombine.high %v1562_v14, %v1570_v15 }
 0x3f0   : > { %4737 = vmatpush2.bf16.msra.mxu1 %v10580_v26  ;;  %v10484_v26 = vcombine.low %v1306_v12, %v1314_v13  ;;  %v1483_v13 = vld [vmem:[#allocation10 + $0xa38] sm:$0xff] }
 0x3f1   : > { %4778 = vmatpush2.bf16.msra.mxu0 %v10836_v27  ;;  %4738 = vmatprep.subr.bf16.mxu1 %v10565_v28  ;;  %v10740_v27 = vcombine.low %v1562_v14, %v1570_v15  ;;  %v10469_v28 = vcombine.high %v1290_v21, %v1298_v22  ;;  %v1491_v14 = vld [vmem:[#allocation10 + $0xa78] sm:$0xff] }
 0x3f2   : > { %4779 = vmatprep.subr.bf16.mxu0 %v10821_v34  ;;  %v10725_v34 = vcombine.high %v1546_v24, %v1554_v25 }
 0x3f4   : > { %4739 = vmatpush2.bf16.msra.mxu1 %v10564_v39  ;;  %v10468_v39 = vcombine.low %v1290_v21, %v1298_v22  ;;  %v1211_v21 = vld [vmem:[#allocation10 + $0x1b8] sm:$0xff] }
 0x3f5   : > { %4780 = vmatpush2.bf16.msra.mxu0 %v10820_v40  ;;  %4740 = vmatprep.subr.bf16.mxu1 %v10549_v41  ;;  %v10724_v40 = vcombine.low %v1546_v24, %v1554_v25  ;;  %v10455_v41 = vcombine.high %v1275_v35, %v1283_v36  ;;  %v1219_v22 = vld [vmem:[#allocation10 + $0x1f8] sm:$0xff] }
 0x3f6   : > { %4781 = vmatprep.subr.bf16.mxu0 %v10805_v42  ;;  %v10711_v42 = vcombine.high %v1531_v37, %v1539_v38  ;;  %v1467_v24 = vld [vmem:[#allocation10 + $0x9b8] sm:$0xff] }
 0x3f7   : > { %v1475_v25 = vld [vmem:[#allocation10 + $0x9f8] sm:$0xff] }
 0x3f8   : > { %4741 = vmatpush2.bf16.msra.mxu1 %v10548_v49  ;;  %v1523_v49 = vld [vmem:[#allocation10 + $0xb78] sm:$0xff] }
 0x3f9   : > { %4782 = vmatpush2.bf16.msra.mxu0 %v10804_v50  ;;  %4742 = vmatprep.subr.bf16.mxu1 %v10533_v51  ;;  %v10710_v50 = vcombine.low %v1531_v37, %v1539_v38  ;;  %v10439_v51 = vcombine.high %v1259_v44, %v1267_v45  ;;  %v10695_v56 = vcombine.high %v1515_v47, %v1523_v49  ;;  %v1195_v35 = vld [vmem:[#allocation10 + $0x138] sm:$0xff] }
 0x3fa   : > { %4783 = vmatprep.subr.bf16.mxu0 %v10789_v52  ;;  %v1243_v52 = vld [vmem:[#allocation10 + $0x2b8] sm:$0xff]  ;;  %v10694_v2 = vcombine.low %v1515_v47, %v1523_v49 }
 0x3fb   : > { %v10423_v5 = vcombine.high %v1243_v52, %v1251_v53  ;;  %v1203_v36 = vld [vmem:[#allocation10 + $0x178] sm:$0xff] }
 0x3fc   : > { %4743 = vmatpush2.bf16.msra.mxu1 %v10532_v58  ;;  %v1507_v58 = vld [vmem:[#allocation10 + $0xaf8] sm:$0xff]  ;;  %v10374_v49 = vcombine.low %v1195_v35, %v1203_v36 }
 0x3fd   : > { %4784 = vmatpush2.bf16.msra.mxu0 %v10788_v59  ;;  %4744 = vmatprep.subr.bf16.mxu1 %v10517_v60  ;;  %v10438_v60 = vcombine.low %v1259_v44, %v1267_v45  ;;  %v1451_v37 = vld [vmem:[#allocation10 + $0x938] sm:$0xff] }
 0x3fe   : > { %4785 = vmatprep.subr.bf16.mxu0 %v10773_v61  ;;  %v1459_v38 = vld [vmem:[#allocation10 + $0x978] sm:$0xff] }
 0x3ff   : > { %v1179_v44 = vld [vmem:[#allocation10 + $0xb8] sm:$0xff] }
 0x400   : > { %4745 = vmatpush2.bf16.msra.mxu1 %v10516_v7  ;;  %v10679_v7 = vcombine.high %v1499_v57, %v1507_v58  ;;  %v1187_v45 = vld [vmem:[#allocation10 + $0xf8] sm:$0xff] }
 0x401   : > { %4786 = vmatpush2.bf16.msra.mxu0 %v10772_v8  ;;  %4746 = vmatprep.subr.bf16.mxu1 %v10501_v9  ;;  %v1227_v8 = vld [vmem:[#allocation10 + $0x238] sm:$0xff] }
 0x402   : > { %4787 = vmatprep.subr.bf16.mxu0 %v10757_v11  ;;  %v1235_v9 = vld [vmem:[#allocation10 + $0x278] sm:$0xff] }
 0x403   : > { %v1443_v47 = vld [vmem:[#allocation10 + $0x8f8] sm:$0xff] }
 0x404   : > { %4747 = vmatpush2.bf16.msra.mxu1 %v10500_v16 }
 0x405   : > { %4788 = vmatpush2.bf16.msra.mxu0 %v10756_v17  ;;  %4748 = vmatprep.subr.bf16.mxu1 %v10485_v19  ;;  %v10678_v17 = vcombine.low %v1499_v57, %v1507_v58  ;;  %v10407_v19 = vcombine.high %v1227_v8, %v1235_v9  ;;  %v1427_v57 = vld [vmem:[#allocation10 + $0x878] sm:$0xff]  ;;  %v10358_v58 = vcombine.low %v1179_v44, %v1187_v45 }
 0x406   : > { %4789 = vmatprep.subr.bf16.mxu0 %v10741_v20  ;;  %v10663_v20 = vcombine.high %v1483_v13, %v1491_v14 }
 0x408   : > { %4749 = vmatpush2.bf16.msra.mxu1 %v10484_v26  ;;  %v10406_v26 = vcombine.low %v1227_v8, %v1235_v9 }
 0x409   : > { %4790 = vmatpush2.bf16.msra.mxu0 %v10740_v27  ;;  %4750 = vmatprep.subr.bf16.mxu1 %v10469_v28  ;;  %v10662_v27 = vcombine.low %v1483_v13, %v1491_v14  ;;  %v10391_v28 = vcombine.high %v1211_v21, %v1219_v22  ;;  %v1387_v14 = vld [vmem:[#allocation10 + $0x738] sm:$0xff] }
 0x40a   : > { %4791 = vmatprep.subr.bf16.mxu0 %v10725_v34  ;;  %v10647_v34 = vcombine.high %v1467_v24, %v1475_v25 }
 0x40c   : > { %4751 = vmatpush2.bf16.msra.mxu1 %v10468_v39  ;;  %v10390_v39 = vcombine.low %v1211_v21, %v1219_v22  ;;  %v1371_v21 = vld [vmem:[#allocation10 + $0x6b8] sm:$0xff] }
 0x40d   : > { %4792 = vmatpush2.bf16.msra.mxu0 %v10724_v40  ;;  %4802 = vmatprep.subr.bf16.mxu1 %v10455_v41  ;;  %v10646_v40 = vcombine.low %v1467_v24, %v1475_v25  ;;  %v10375_v41 = vcombine.high %v1195_v35, %v1203_v36  ;;  %v1379_v22 = vld [vmem:[#allocation10 + $0x6f8] sm:$0xff] }
 0x40e   : > { %4843 = vmatprep.subr.bf16.mxu0 %v10711_v42  ;;  %v10631_v42 = vcombine.high %v1451_v37, %v1459_v38  ;;  %v1627_v24 = vld [vmem:[#allocation10 + $0xeb8] sm:$0xff] }
 0x40f   : > { %v4508_v55 = vpop.f32.mrf.mxu1  ;;  %4753 = vmatmul.mubr.bf16.vlgmr.msra.gmra.mxu1 %v13275_v31  ;;  %v1635_v25 = vld [vmem:[#allocation10 + $0xef8] sm:$0xff] }
 0x410   : > { %v4549_v59 = vpop.f32.mrf.mxu0  ;;  %4794 = vmatmul.mubr.bf16.vlgmr.msra.gmra.mxu0 %v13277_v32  ;;  %4803 = vmatpush1.bf16.msra.mxu1 %v10454_v46  ;;  %v1435_v46 = vld [vmem:[#allocation10 + $0x8b8] sm:$0xff] }
 0x411   : > { %v13319_v61 = vadd.f32 %v4549_v59, %v4508_v55  ;;  %4834 = vmatprep.mubr.bf16.mxu1 %v13271_v29  ;;  %4844 = vmatpush1.bf16.msra.mxu0 %v10710_v50  ;;  %v4510_v62 = vpop.f32.mrf.mxu1  ;;  %v10422_v29 = vcombine.low %v1243_v52, %v1251_v53  ;;  %v10630_v50 = vcombine.low %v1451_v37, %v1459_v38  ;;  %v1163_v53 = vld [vmem:[#allocation10 + $0x38] sm:$0xff] }
 0x412   : > { %4875 = vmatprep.mubr.bf16.mxu0 %v13273_v30  ;;  %v4551_v6 = vpop.f32.mrf.mxu0  ;;  %4804 = vmatprep.subr.bf16.mxu1 %v10439_v51  ;;  %v10359_v51 = vcombine.high %v1179_v44, %v1187_v45  ;;  %v10615_v52 = vcombine.high %v1435_v46, %v1443_v47  ;;  %v1171_v55 = vld [vmem:[#allocation10 + $0x78] sm:$0xff]  ;;  %v10614_v59 = vcombine.low %v1435_v46, %v1443_v47 }
 0x413   : > { %v13323_v11 = vadd.f32 %v4551_v6, %v4510_v62  ;;  %v4512_v12 = vpop.f32.mrf.mxu1  ;;  %4845 = vmatprep.subr.bf16.mxu0 %v10695_v56  ;;  %v1419_v56 = vld [vmem:[#allocation10 + $0x838] sm:$0xff]  ;;  %v10342_v8 = vcombine.low %v1163_v53, %v1171_v55 }
 0x414   : > { %v4553_v15 = vpop.f32.mrf.mxu0  ;;  %4805 = vmatpush1.bf16.msra.mxu1 %v10438_v60  ;;  %v10343_v60 = vcombine.high %v1163_v53, %v1171_v55  ;;  %v10599_v62 = vcombine.high %v1419_v56, %v1427_v57  ;;  %v1659_v6 = vld [vmem:[#allocation10 + $0xfb8] sm:$0xff]  ;;  %v10598_v9 = vcombine.low %v1419_v56, %v1427_v57 }
 0x415   : > { %4846 = vmatpush1.bf16.msra.mxu0 %v10694_v2  ;;  %v4513_v16 = vpop.f32.mrf.mxu1  ;;  %4806 = vmatprep.subr.bf16.mxu1 %v10423_v5  ;;  %v1403_v2 = vld [vmem:[#allocation10 + $0x7b8] sm:$0xff] }
 0x416   : > { %v4554_v30 = vpop.f32.mrf.mxu0  ;;  %4847 = vmatprep.subr.bf16.mxu0 %v10679_v7  ;;  %v1411_v5 = vld [vmem:[#allocation10 + $0x7f8] sm:$0xff] }
 0x417   : > { %v1667_v7 = vld [vmem:[#allocation10 + $0xff8] sm:$0xff]  ;;  %v10583_v12 = vcombine.high %v1403_v2, %v1411_v5 }
 0x418   : > { %4807 = vmatpush1.bf16.msra.mxu1 %v10422_v29  ;;  %v10839_v13 = vcombine.high %v1659_v6, %v1667_v7  ;;  %v1395_v15 = vld [vmem:[#allocation10 + $0x778] sm:$0xff] }
 0x419   : > { %4848 = vmatpush1.bf16.msra.mxu0 %v10678_v17  ;;  %4808 = vmatprep.subr.bf16.mxu1 %v10407_v19  ;;  %v1643_v29 = vld [vmem:[#allocation10 + $0xf38] sm:$0xff]  ;;  %v10582_v17 = vcombine.low %v1403_v2, %v1411_v5  ;;  %v10838_v19 = vcombine.low %v1659_v6, %v1667_v7  ;;  %v10567_v30 = vcombine.high %v1387_v14, %v1395_v15 }
 0x41a   : > { %4849 = vmatprep.subr.bf16.mxu0 %v10663_v20  ;;  %v1651_v16 = vld [vmem:[#allocation10 + $0xf78] sm:$0xff] }
 0x41b   : > { %v10823_v20 = vcombine.high %v1643_v29, %v1651_v16  ;;  %v1355_v35 = vld [vmem:[#allocation10 + $0x638] sm:$0xff] }
 0x41c   : > { %4809 = vmatpush1.bf16.msra.mxu1 %v10406_v26  ;;  %v10566_v26 = vcombine.low %v1387_v14, %v1395_v15  ;;  %v1363_v36 = vld [vmem:[#allocation10 + $0x678] sm:$0xff] }
 0x41d   : > { %4850 = vmatpush1.bf16.msra.mxu0 %v10662_v27  ;;  %4810 = vmatprep.subr.bf16.mxu1 %v10391_v28  ;;  %v10822_v27 = vcombine.low %v1643_v29, %v1651_v16  ;;  %v10551_v28 = vcombine.high %v1371_v21, %v1379_v22  ;;  %v1611_v37 = vld [vmem:[#allocation10 + $0xe38] sm:$0xff] }
 0x41e   : > { %4851 = vmatprep.subr.bf16.mxu0 %v10647_v34  ;;  %v10807_v34 = vcombine.high %v1627_v24, %v1635_v25  ;;  %v1619_v38 = vld [vmem:[#allocation10 + $0xe78] sm:$0xff] }
 0x41f   : > { %v1339_v44 = vld [vmem:[#allocation10 + $0x5b8] sm:$0xff] }
 0x420   : > { %4811 = vmatpush1.bf16.msra.mxu1 %v10390_v39  ;;  %v10550_v39 = vcombine.low %v1371_v21, %v1379_v22  ;;  %v1347_v45 = vld [vmem:[#allocation10 + $0x5f8] sm:$0xff]  ;;  %v1136_v21 = vld [vmem:[#allocation9 + $0x380] sm:$0xff] }
 0x421   : > { %4852 = vmatpush1.bf16.msra.mxu0 %v10646_v40  ;;  %4812 = vmatprep.subr.bf16.mxu1 %v10375_v41  ;;  %v10806_v40 = vcombine.low %v1627_v24, %v1635_v25  ;;  %v10535_v41 = vcombine.high %v1355_v35, %v1363_v36  ;;  %v1595_v46 = vld [vmem:[#allocation10 + $0xdb8] sm:$0xff]  ;;  %v1144_v22 = vld [vmem:[#allocation9 + $0x3c0] sm:$0xff]  ;;  %v1137_v24 = vld [vmem:[#allocation9 + $0x388] sm:$0xff] }
 0x422   : > { %4853 = vmatprep.subr.bf16.mxu0 %v10631_v42  ;;  %v10791_v42 = vcombine.high %v1611_v37, %v1619_v38  ;;  %v1603_v47 = vld [vmem:[#allocation10 + $0xdf8] sm:$0xff]  ;;  %v1145_v25 = vld [vmem:[#allocation9 + $0x3c8] sm:$0xff] }
 0x423   : > { %v1323_v53 = vld [vmem:[#allocation10 + $0x538] sm:$0xff] }
 0x424   : > { %4813 = vmatpush1.bf16.msra.mxu1 %v10374_v49  ;;  %v10534_v49 = vcombine.low %v1355_v35, %v1363_v36  ;;  %v1331_v55 = vld [vmem:[#allocation10 + $0x578] sm:$0xff]  ;;  %v1120_v35 = vld [vmem:[#allocation9 + $0x300] sm:$0xff] }
 0x425   : > { %4854 = vmatpush1.bf16.msra.mxu0 %v10630_v50  ;;  %4814 = vmatprep.subr.bf16.mxu1 %v10359_v51  ;;  %v10790_v50 = vcombine.low %v1611_v37, %v1619_v38  ;;  %v10519_v51 = vcombine.high %v1339_v44, %v1347_v45  ;;  %v1579_v56 = vld [vmem:[#allocation10 + $0xd38] sm:$0xff]  ;;  %v1128_v36 = vld [vmem:[#allocation9 + $0x340] sm:$0xff]  ;;  %v1121_v37 = vld [vmem:[#allocation9 + $0x308] sm:$0xff] }
 0x426   : > { %4855 = vmatprep.subr.bf16.mxu0 %v10615_v52  ;;  %v10775_v52 = vcombine.high %v1595_v46, %v1603_v47  ;;  %v1587_v57 = vld [vmem:[#allocation10 + $0xd78] sm:$0xff]  ;;  %v1129_v38 = vld [vmem:[#allocation9 + $0x348] sm:$0xff] }
 0x427   : > { %v1307_v2 = vld [vmem:[#allocation10 + $0x4b8] sm:$0xff] }
 0x428   : > { %4815 = vmatpush1.bf16.msra.mxu1 %v10358_v58  ;;  %v10518_v58 = vcombine.low %v1339_v44, %v1347_v45  ;;  %v1315_v5 = vld [vmem:[#allocation10 + $0x4f8] sm:$0xff]  ;;  %v1104_v44 = vld [vmem:[#allocation9 + $0x280] sm:$0xff] }
 0x429   : > { %4856 = vmatpush1.bf16.msra.mxu0 %v10614_v59  ;;  %4816 = vmatprep.subr.bf16.mxu1 %v10343_v60  ;;  %v10774_v59 = vcombine.low %v1595_v46, %v1603_v47  ;;  %v10503_v60 = vcombine.high %v1323_v53, %v1331_v55  ;;  %v1563_v6 = vld [vmem:[#allocation10 + $0xcb8] sm:$0xff]  ;;  %v1112_v45 = vld [vmem:[#allocation9 + $0x2c0] sm:$0xff]  ;;  %v1105_v47 = vld [vmem:[#allocation9 + $0x288] sm:$0xff] }
 0x42a   : > { %4857 = vmatprep.subr.bf16.mxu0 %v10599_v62  ;;  %v10759_v62 = vcombine.high %v1579_v56, %v1587_v57  ;;  %v1571_v7 = vld [vmem:[#allocation10 + $0xcf8] sm:$0xff] }
 0x42b   : > { %v1291_v14 = vld [vmem:[#allocation10 + $0x438] sm:$0xff] }
 0x42c   : > { %4817 = vmatpush1.bf16.msra.mxu1 %v10342_v8  ;;  %v10502_v8 = vcombine.low %v1323_v53, %v1331_v55  ;;  %v1299_v15 = vld [vmem:[#allocation10 + $0x478] sm:$0xff]  ;;  %v10938_v55 = vcombine.low %v1121_v37, %v1129_v38 }
 0x42d   : > { %4858 = vmatpush1.bf16.msra.mxu0 %v10598_v9  ;;  %4818 = vmatprep.subr.bf16.mxu1 %v10583_v12  ;;  %v10758_v9 = vcombine.low %v1579_v56, %v1587_v57  ;;  %v10487_v12 = vcombine.high %v1307_v2, %v1315_v5  ;;  %v1547_v29 = vld [vmem:[#allocation10 + $0xc38] sm:$0xff]  ;;  %v10921_v56 = vcombine.high %v1104_v44, %v1112_v45 }
 0x42e   : > { %4859 = vmatprep.subr.bf16.mxu0 %v10839_v13  ;;  %v10743_v13 = vcombine.high %v1563_v6, %v1571_v7  ;;  %v1555_v16 = vld [vmem:[#allocation10 + $0xc78] sm:$0xff] }
 0x430   : > { %4819 = vmatpush2.bf16.msra.mxu1 %v10582_v17  ;;  %v10486_v17 = vcombine.low %v1307_v2, %v1315_v5  ;;  %v1097_v2 = vld [vmem:[#allocation9 + $0x248] sm:$0xff] }
 0x431   : > { %4860 = vmatpush2.bf16.msra.mxu0 %v10838_v19  ;;  %4820 = vmatprep.subr.bf16.mxu1 %v10567_v30  ;;  %v10742_v19 = vcombine.low %v1563_v6, %v1571_v7  ;;  %v10471_v30 = vcombine.high %v1291_v14, %v1299_v15  ;;  %v10920_v6 = vcombine.low %v1104_v44, %v1112_v45  ;;  %v1024_v44 = vld [vmem:[#allocation9] sm:$0xff] }
 0x432   : > { %4861 = vmatprep.subr.bf16.mxu0 %v10823_v20  ;;  %v10727_v20 = vcombine.high %v1547_v29, %v1555_v16  ;;  %v1032_v45 = vld [vmem:[#allocation9 + $0x40] sm:$0xff] }
 0x434   : > { %4821 = vmatpush2.bf16.msra.mxu1 %v10566_v26  ;;  %v10470_v26 = vcombine.low %v1291_v14, %v1299_v15  ;;  %v1072_v14 = vld [vmem:[#allocation9 + $0x180] sm:$0xff] }
 0x435   : > { %4862 = vmatpush2.bf16.msra.mxu0 %v10822_v27  ;;  %4822 = vmatprep.subr.bf16.mxu1 %v10551_v28  ;;  %v10726_v27 = vcombine.low %v1547_v29, %v1555_v16  ;;  %v10953_v28 = vcombine.high %v1136_v21, %v1144_v22  ;;  %v1080_v15 = vld [vmem:[#allocation9 + $0x1c0] sm:$0xff]  ;;  %v1073_v29 = vld [vmem:[#allocation9 + $0x188] sm:$0xff] }
 0x436   : > { %4863 = vmatprep.subr.bf16.mxu0 %v10807_v34  ;;  %v10955_v34 = vcombine.high %v1137_v24, %v1145_v25  ;;  %v1081_v16 = vld [vmem:[#allocation9 + $0x1c8] sm:$0xff] }
 0x438   : > { %4823 = vmatpush2.bf16.msra.mxu1 %v10550_v39  ;;  %v10952_v39 = vcombine.low %v1136_v21, %v1144_v22  ;;  %v1056_v21 = vld [vmem:[#allocation9 + $0x100] sm:$0xff] }
 0x439   : > { %4864 = vmatpush2.bf16.msra.mxu0 %v10806_v40  ;;  %4824 = vmatprep.subr.bf16.mxu1 %v10535_v41  ;;  %v10954_v40 = vcombine.low %v1137_v24, %v1145_v25  ;;  %v10937_v41 = vcombine.high %v1120_v35, %v1128_v36  ;;  %v1064_v22 = vld [vmem:[#allocation9 + $0x140] sm:$0xff]  ;;  %v1057_v24 = vld [vmem:[#allocation9 + $0x108] sm:$0xff] }
 0x43a   : > { %4865 = vmatprep.subr.bf16.mxu0 %v10791_v42  ;;  %v10939_v42 = vcombine.high %v1121_v37, %v1129_v38  ;;  %v1065_v25 = vld [vmem:[#allocation9 + $0x148] sm:$0xff] }
 0x43b   : > { %v1041_v37 = vld [vmem:[#allocation9 + $0x88] sm:$0xff] }
 0x43c   : > { %4825 = vmatpush2.bf16.msra.mxu1 %v10534_v49  ;;  %v1113_v49 = vld [vmem:[#allocation9 + $0x2c8] sm:$0xff] }
 0x43d   : > { %4866 = vmatpush2.bf16.msra.mxu0 %v10790_v50  ;;  %4826 = vmatprep.subr.bf16.mxu1 %v10519_v51  ;;  %v10936_v51 = vcombine.low %v1120_v35, %v1128_v36  ;;  %v1040_v35 = vld [vmem:[#allocation9 + $0x80] sm:$0xff]  ;;  %v1049_v38 = vld [vmem:[#allocation9 + $0xc8] sm:$0xff] }
 0x43e   : > { %4867 = vmatprep.subr.bf16.mxu0 %v10775_v52  ;;  %v1048_v36 = vld [vmem:[#allocation9 + $0xc0] sm:$0xff] }
 0x440   : > { %4827 = vmatpush2.bf16.msra.mxu1 %v10518_v58  ;;  %v10923_v58 = vcombine.high %v1105_v47, %v1113_v49 }
 0x441   : > { %4868 = vmatpush2.bf16.msra.mxu0 %v10774_v59  ;;  %4828 = vmatprep.subr.bf16.mxu1 %v10503_v60  ;;  %v1088_v59 = vld [vmem:[#allocation9 + $0x200] sm:$0xff] }
 0x442   : > { %4869 = vmatprep.subr.bf16.mxu0 %v10759_v62  ;;  %v1096_v60 = vld [vmem:[#allocation9 + $0x240] sm:$0xff] }
 0x444   : > { %4829 = vmatpush2.bf16.msra.mxu1 %v10502_v8  ;;  %v10922_v8 = vcombine.low %v1105_v47, %v1113_v49  ;;  %v1033_v47 = vld [vmem:[#allocation9 + $0x48] sm:$0xff]  ;;  %v10856_v49 = vcombine.low %v1040_v35, %v1048_v36 }
 0x445   : > { %4870 = vmatpush2.bf16.msra.mxu0 %v10758_v9  ;;  %4830 = vmatprep.subr.bf16.mxu1 %v10487_v12  ;;  %v10905_v9 = vcombine.high %v1088_v59, %v1096_v60 }
 0x446   : > { %4871 = vmatprep.subr.bf16.mxu0 %v10743_v13 }
 0x448   : > { %4831 = vmatpush2.bf16.msra.mxu1 %v10486_v17  ;;  %v10904_v17 = vcombine.low %v1088_v59, %v1096_v60  ;;  %v10840_v59 = vcombine.low %v1024_v44, %v1032_v45  ;;  %v1022_v60 = vld [vmem:[%s14114_s0] sm:$0x3] }
 0x449   : > { %4872 = vmatpush2.bf16.msra.mxu0 %v10742_v19  ;;  %4832 = vmatprep.subr.bf16.mxu1 %v10471_v30  ;;  %v10889_v30 = vcombine.high %v1072_v14, %v1080_v15 }
 0x44a   : > { %4873 = vmatprep.subr.bf16.mxu0 %v10727_v20  ;;  %v10891_v20 = vcombine.high %v1073_v29, %v1081_v16 }
 0x44c   : > { %4833 = vmatpush2.bf16.msra.mxu1 %v10470_v26  ;;  %v10888_v26 = vcombine.low %v1072_v14, %v1080_v15 }
 0x44d   : > { %4874 = vmatpush2.bf16.msra.mxu0 %v10726_v27  ;;  %5524 = vmatprep.subr.bf16.mxu1 %v10953_v28  ;;  %v10890_v27 = vcombine.low %v1073_v29, %v1081_v16  ;;  %v10873_v28 = vcombine.high %v1056_v21, %v1064_v22  ;;  %v1106_v29 = vld [vmem:[#allocation9 + $0x290] sm:$0xff] }
 0x44e   : > { %5565 = vmatprep.subr.bf16.mxu0 %v10955_v34  ;;  %v10875_v34 = vcombine.high %v1057_v24, %v1065_v25  ;;  %v1114_v16 = vld [vmem:[#allocation9 + $0x2d0] sm:$0xff] }
 0x44f   : > { %v4590_v46 = vpop.f32.mrf.mxu1  ;;  %4835 = vmatmul.mubr.bf16.vlgmr.msra.gmra.mxu1 %v13275_v31 }
 0x450   : > { %v4631_v50 = vpop.f32.mrf.mxu0  ;;  %4876 = vmatmul.mubr.bf16.vlgmr.msra.gmra.mxu0 %v13277_v32  ;;  %5525 = vmatpush1.bf16.msra.mxu1 %v10952_v39  ;;  %v1089_v32 = vld [vmem:[#allocation9 + $0x208] sm:$0xff]  ;;  %v10872_v39 = vcombine.low %v1056_v21, %v1064_v22  ;;  %v10925_v21 = vcombine.high %v1106_v29, %v1114_v16 }
 0x451   : > { %v13327_v52 = vadd.f32 %v4631_v50, %v4590_v46  ;;  %5566 = vmatpush1.bf16.msra.mxu0 %v10954_v40  ;;  %v4592_v53 = vpop.f32.mrf.mxu1  ;;  %5526 = vmatprep.subr.bf16.mxu1 %v10937_v41  ;;  %v10907_v13 = vcombine.high %v1089_v32, %v1097_v2  ;;  %v10906_v19 = vcombine.low %v1089_v32, %v1097_v2  ;;  %v1025_v46 = vld [vmem:[#allocation9 + $0x8] sm:$0xff] }
 0x452   : > { %v4633_v57 = vpop.f32.mrf.mxu0  ;;  %5567 = vmatprep.subr.bf16.mxu0 %v10939_v42  ;;  %5556 = vmatprep.mubr.bf16.mxu1 %v12916_v43  ;;  %v10874_v40 = vcombine.low %v1057_v24, %v1065_v25  ;;  %v10857_v41 = vcombine.high %v1040_v35, %v1048_v36  ;;  %v10859_v42 = vcombine.high %v1041_v37, %v1049_v38  ;;  %v1090_v24 = vld [vmem:[#allocation9 + $0x210] sm:$0xff] }
 0x453   : > { %v13330_v31 = vadd.f32 %v4633_v57, %v4592_v53  ;;  %v4594_v62 = vpop.f32.mrf.mxu1  ;;  %5597 = vmatprep.mubr.bf16.mxu0 %v12916_v43  ;;  %v10858_v50 = vcombine.low %v1041_v37, %v1049_v38  ;;  %v10843_v53 = vcombine.high %v1025_v46, %v1033_v47  ;;  %v1139_v57 = vld [vmem:[#allocation9 + $0x398] sm:$0xff]  ;;  %v1098_v25 = vld [vmem:[#allocation9 + $0x250] sm:$0xff] }
 0x454   : > { %v4635_v5 = vpop.f32.mrf.mxu0  ;;  %5527 = vmatpush1.bf16.msra.mxu1 %v10936_v51  ;;  %v10841_v51 = vcombine.high %v1024_v44, %v1032_v45  ;;  %v10842_v62 = vcombine.low %v1025_v46, %v1033_v47  ;;  %v10909_v35 = vcombine.high %v1090_v24, %v1098_v25  ;;  %v1074_v37 = vld [vmem:[#allocation9 + $0x190] sm:$0xff] }
 0x455   : > { %5568 = vmatpush1.bf16.msra.mxu0 %v10938_v55  ;;  %v4595_v7 = vpop.f32.mrf.mxu1  ;;  %5528 = vmatprep.subr.bf16.mxu1 %v10921_v56  ;;  %v1138_v55 = vld [vmem:[#allocation9 + $0x390] sm:$0xff] }
 0x456   : > { %v4636_v12 = vpop.f32.mrf.mxu0  ;;  %5569 = vmatprep.subr.bf16.mxu0 %v10923_v58  ;;  %v1146_v56 = vld [vmem:[#allocation9 + $0x3d0] sm:$0xff]  ;;  %v1147_v58 = vld [vmem:[#allocation9 + $0x3d8] sm:$0xff]  ;;  %v13336_v7 = vpack.c.bf16 %v1022_v60, %v1022_v60 }
 0x457   : > { %v10957_v32 = vcombine.high %v1138_v55, %v1146_v56  ;;  %v10959_v2 = vcombine.high %v1139_v57, %v1147_v58  ;;  %v1122_v5 = vld [vmem:[#allocation9 + $0x310] sm:$0xff]  ;;  %v10956_v12 = vcombine.low %v1138_v55, %v1146_v56  ;;  %v1051_v60 = vld [vmem:[#allocation9 + $0xd8] sm:$0xff] }
 0x458   : > { %5529 = vmatpush1.bf16.msra.mxu1 %v10920_v6  ;;  %v1130_v6 = vld [vmem:[#allocation9 + $0x350] sm:$0xff] }
 0x459   : > { %5570 = vmatpush1.bf16.msra.mxu0 %v10922_v8  ;;  %5530 = vmatprep.subr.bf16.mxu1 %v10905_v9  ;;  %v1123_v8 = vld [vmem:[#allocation9 + $0x318] sm:$0xff]  ;;  %v10941_v14 = vcombine.high %v1122_v5, %v1130_v6  ;;  %v1082_v38 = vld [vmem:[#allocation9 + $0x1d0] sm:$0xff] }
 0x45a   : > { %5571 = vmatprep.subr.bf16.mxu0 %v10907_v13  ;;  %v1131_v9 = vld [vmem:[#allocation9 + $0x358] sm:$0xff]  ;;  %v10958_v13 = vcombine.low %v1139_v57, %v1147_v58  ;;  %v10893_v44 = vcombine.high %v1074_v37, %v1082_v38  ;;  %v1058_v46 = vld [vmem:[#allocation9 + $0x110] sm:$0xff] }
 0x45b   : > { %v10943_v15 = vcombine.high %v1123_v8, %v1131_v9  ;;  %v1066_v47 = vld [vmem:[#allocation9 + $0x150] sm:$0xff] }
 0x45c   : > { %5531 = vmatpush1.bf16.msra.mxu1 %v10904_v17  ;;  %v1107_v17 = vld [vmem:[#allocation9 + $0x298] sm:$0xff]  ;;  %v10877_v55 = vcombine.high %v1058_v46, %v1066_v47  ;;  %v1042_v57 = vld [vmem:[#allocation9 + $0x90] sm:$0xff] }
 0x45d   : > { %5572 = vmatpush1.bf16.msra.mxu0 %v10906_v19  ;;  %5532 = vmatprep.subr.bf16.mxu1 %v10889_v30  ;;  %v1115_v19 = vld [vmem:[#allocation9 + $0x2d8] sm:$0xff]  ;;  %v10940_v30 = vcombine.low %v1122_v5, %v1130_v6  ;;  %v1050_v58 = vld [vmem:[#allocation9 + $0xd0] sm:$0xff] }
 0x45e   : > { %5573 = vmatprep.subr.bf16.mxu0 %v10891_v20  ;;  %v10942_v20 = vcombine.low %v1123_v8, %v1131_v9  ;;  %v10927_v22 = vcombine.high %v1107_v17, %v1115_v19  ;;  %v1026_v6 = vld [vmem:[#allocation9 + $0x10] sm:$0xff]  ;;  %v1027_v9 = vld [vmem:[#allocation9 + $0x18] sm:$0xff] }
 0x45f   : > { %v1034_v8 = vld [vmem:[#allocation9 + $0x50] sm:$0xff] }
 0x460   : > { %5533 = vmatpush1.bf16.msra.mxu1 %v10888_v26  ;;  %v1091_v26 = vld [vmem:[#allocation9 + $0x218] sm:$0xff] }
 0x461   : > { %5574 = vmatpush1.bf16.msra.mxu0 %v10890_v27  ;;  %5534 = vmatprep.subr.bf16.mxu1 %v10873_v28  ;;  %v1099_v27 = vld [vmem:[#allocation9 + $0x258] sm:$0xff]  ;;  %v10924_v28 = vcombine.low %v1106_v29, %v1114_v16  ;;  %v1140_v16 = vld [vmem:[#allocation9 + $0x3a0] sm:$0xff] }
 0x462   : > { %5575 = vmatprep.subr.bf16.mxu0 %v10875_v34  ;;  %v10926_v34 = vcombine.low %v1107_v17, %v1115_v19  ;;  %v10911_v36 = vcombine.high %v1091_v26, %v1099_v27  ;;  %v1148_v17 = vld [vmem:[#allocation9 + $0x3e0] sm:$0xff]  ;;  %v1141_v19 = vld [vmem:[#allocation9 + $0x3a8] sm:$0xff] }
 0x464   : > { %5535 = vmatpush1.bf16.msra.mxu1 %v10872_v39  ;;  %v1075_v39 = vld [vmem:[#allocation9 + $0x198] sm:$0xff] }
 0x465   : > { %5576 = vmatpush1.bf16.msra.mxu0 %v10874_v40  ;;  %5536 = vmatprep.subr.bf16.mxu1 %v10857_v41  ;;  %v1083_v40 = vld [vmem:[#allocation9 + $0x1d8] sm:$0xff]  ;;  %v10908_v41 = vcombine.low %v1090_v24, %v1098_v25  ;;  %v1124_v25 = vld [vmem:[#allocation9 + $0x320] sm:$0xff] }
 0x466   : > { %5577 = vmatprep.subr.bf16.mxu0 %v10859_v42  ;;  %v10910_v42 = vcombine.low %v1091_v26, %v1099_v27  ;;  %v10895_v45 = vcombine.high %v1075_v39, %v1083_v40  ;;  %v1132_v26 = vld [vmem:[#allocation9 + $0x360] sm:$0xff]  ;;  %v1125_v27 = vld [vmem:[#allocation9 + $0x328] sm:$0xff] }
 0x468   : > { %5537 = vmatpush1.bf16.msra.mxu1 %v10856_v49  ;;  %v1059_v49 = vld [vmem:[#allocation9 + $0x118] sm:$0xff] }
 0x469   : > { %5578 = vmatpush1.bf16.msra.mxu0 %v10858_v50  ;;  %5538 = vmatprep.subr.bf16.mxu1 %v10841_v51  ;;  %v1067_v50 = vld [vmem:[#allocation9 + $0x158] sm:$0xff]  ;;  %v10892_v51 = vcombine.low %v1074_v37, %v1082_v38  ;;  %v1108_v38 = vld [vmem:[#allocation9 + $0x2a0] sm:$0xff] }
 0x46a   : > { %5579 = vmatprep.subr.bf16.mxu0 %v10843_v53  ;;  %v10894_v53 = vcombine.low %v1075_v39, %v1083_v40  ;;  %v10879_v56 = vcombine.high %v1059_v49, %v1067_v50  ;;  %v1116_v39 = vld [vmem:[#allocation9 + $0x2e0] sm:$0xff] }
 0x46c   : > { %5539 = vmatpush1.bf16.msra.mxu1 %v10840_v59  ;;  %v1043_v59 = vld [vmem:[#allocation9 + $0x98] sm:$0xff] }
 0x46d   : > { %5580 = vmatpush1.bf16.msra.mxu0 %v10842_v62  ;;  %5606 = vmatprep.subr.bf16.mxu1 %v10957_v32  ;;  %v10876_v62 = vcombine.low %v1058_v46, %v1066_v47  ;;  %v10878_v32 = vcombine.low %v1059_v49, %v1067_v50  ;;  %v10863_v5 = vcombine.high %v1043_v59, %v1051_v60 }
 0x46e   : > { %5647 = vmatprep.subr.bf16.mxu0 %v10959_v2  ;;  %v10861_v2 = vcombine.high %v1042_v57, %v1050_v58  ;;  %v10929_v50 = vcombine.high %v1108_v38, %v1116_v39 }
 0x46f   : > { %5557 = vmatmul.mubr.bf16.vlgmr.msra.gmra.mxu1 %v13336_v7 }
 0x470   : > { %5598 = vmatmul.mubr.bf16.vlgmr.msra.gmra.mxu0 %v13336_v7  ;;  %5607 = vmatpush1.bf16.msra.mxu1 %v10956_v12  ;;  %v1035_v12 = vld [vmem:[#allocation9 + $0x58] sm:$0xff] }
 0x471   : > { %5648 = vmatpush1.bf16.msra.mxu0 %v10958_v13  ;;  %5608 = vmatprep.subr.bf16.mxu1 %v10941_v14  ;;  %v10860_v13 = vcombine.low %v1042_v57, %v1050_v58  ;;  %v10862_v14 = vcombine.low %v1043_v59, %v1051_v60  ;;  %v10847_v29 = vcombine.high %v1027_v9, %v1035_v12  ;;  %v1093_v59 = vld [vmem:[#allocation9 + $0x228] sm:$0xff] }
 0x472   : > { %5649 = vmatprep.subr.bf16.mxu0 %v10943_v15  ;;  %5638 = vmatprep.mubr.bf16.mxu1 %v12916_v43  ;;  %v10845_v15 = vcombine.high %v1026_v6, %v1034_v8  ;;  %v1101_v60 = vld [vmem:[#allocation9 + $0x268] sm:$0xff] }
 0x473   : > { %5679 = vmatprep.mubr.bf16.mxu0 %v12916_v43 }
 0x474   : > { %5609 = vmatpush1.bf16.msra.mxu1 %v10940_v30  ;;  %v1149_v30 = vld [vmem:[#allocation9 + $0x3e8] sm:$0xff] }
 0x475   : > { %5650 = vmatpush1.bf16.msra.mxu0 %v10942_v20  ;;  %5610 = vmatprep.subr.bf16.mxu1 %v10925_v21  ;;  %v10844_v20 = vcombine.low %v1026_v6, %v1034_v8  ;;  %v10846_v21 = vcombine.low %v1027_v9, %v1035_v12  ;;  %v10963_v24 = vcombine.high %v1141_v19, %v1149_v30  ;;  %v1076_v12 = vld [vmem:[#allocation9 + $0x1a0] sm:$0xff] }
 0x476   : > { %5651 = vmatprep.subr.bf16.mxu0 %v10927_v22  ;;  %v10961_v22 = vcombine.high %v1140_v16, %v1148_v17  ;;  %v10915_v9 = vcombine.high %v1093_v59, %v1101_v60 }
 0x478   : > { %5611 = vmatpush1.bf16.msra.mxu1 %v10924_v28  ;;  %v1133_v28 = vld [vmem:[#allocation9 + $0x368] sm:$0xff] }
 0x479   : > { %5652 = vmatpush1.bf16.msra.mxu0 %v10926_v34  ;;  %5612 = vmatprep.subr.bf16.mxu1 %v10909_v35  ;;  %v10960_v34 = vcombine.low %v1140_v16, %v1148_v17  ;;  %v10962_v35 = vcombine.low %v1141_v19, %v1149_v30  ;;  %v10947_v37 = vcombine.high %v1125_v27, %v1133_v28  ;;  %v1060_v30 = vld [vmem:[#allocation9 + $0x120] sm:$0xff] }
 0x47a   : > { %5653 = vmatprep.subr.bf16.mxu0 %v10911_v36  ;;  %v10945_v36 = vcombine.high %v1124_v25, %v1132_v26  ;;  %v10946_v49 = vcombine.low %v1125_v27, %v1133_v28  ;;  %v10914_v16 = vcombine.low %v1093_v59, %v1101_v60  ;;  %v1044_v28 = vld [vmem:[#allocation9 + $0xa0] sm:$0xff] }
 0x47c   : > { %5613 = vmatpush1.bf16.msra.mxu1 %v10908_v41  ;;  %v1109_v41 = vld [vmem:[#allocation9 + $0x2a8] sm:$0xff] }
 0x47d   : > { %5654 = vmatpush1.bf16.msra.mxu0 %v10910_v42  ;;  %5614 = vmatprep.subr.bf16.mxu1 %v10893_v44  ;;  %v1117_v42 = vld [vmem:[#allocation9 + $0x2e8] sm:$0xff] }
 0x47e   : > { %5655 = vmatprep.subr.bf16.mxu0 %v10895_v45  ;;  %v10944_v45 = vcombine.low %v1124_v25, %v1132_v26 }
 0x480   : > { %5615 = vmatpush1.bf16.msra.mxu1 %v10892_v51 }
 0x481   : > { %5656 = vmatpush1.bf16.msra.mxu0 %v10894_v53  ;;  %5616 = vmatprep.subr.bf16.mxu1 %v10877_v55  ;;  %v10931_v53 = vcombine.high %v1109_v41, %v1117_v42  ;;  %v1092_v55 = vld [vmem:[#allocation9 + $0x220] sm:$0xff] }
 0x482   : > { %5657 = vmatprep.subr.bf16.mxu0 %v10879_v56  ;;  %v1100_v56 = vld [vmem:[#allocation9 + $0x260] sm:$0xff] }
 0x483   : > { %v10913_v6 = vcombine.high %v1092_v55, %v1100_v56 }
 0x484   : > { %5617 = vmatpush1.bf16.msra.mxu1 %v10876_v62 }
 0x485   : > { %5658 = vmatpush1.bf16.msra.mxu0 %v10878_v32  ;;  %5618 = vmatprep.subr.bf16.mxu1 %v10861_v2  ;;  %v10928_v32 = vcombine.low %v1108_v38, %v1116_v39 }
 0x486   : > { %5659 = vmatprep.subr.bf16.mxu0 %v10863_v5  ;;  %v10930_v5 = vcombine.low %v1109_v41, %v1117_v42  ;;  %v1028_v41 = vld [vmem:[#allocation9 + $0x20] sm:$0xff] }
 0x487   : > { %v1036_v42 = vld [vmem:[#allocation9 + $0x60] sm:$0xff] }
 0x488   : > { %5619 = vmatpush1.bf16.msra.mxu1 %v10860_v13  ;;  %v1084_v13 = vld [vmem:[#allocation9 + $0x1e0] sm:$0xff]  ;;  %v10848_v59 = vcombine.low %v1028_v41, %v1036_v42 }
 0x489   : > { %5660 = vmatpush1.bf16.msra.mxu0 %v10862_v14  ;;  %5620 = vmatprep.subr.bf16.mxu1 %v10845_v15  ;;  %v1077_v14 = vld [vmem:[#allocation9 + $0x1a8] sm:$0xff]  ;;  %v10897_v17 = vcombine.high %v1076_v12, %v1084_v13 }
 0x48a   : > { %5661 = vmatprep.subr.bf16.mxu0 %v10847_v29  ;;  %v1085_v15 = vld [vmem:[#allocation9 + $0x1e8] sm:$0xff]  ;;  %v10912_v29 = vcombine.low %v1092_v55, %v1100_v56  ;;  %v1150_v55 = vld [vmem:[#allocation9 + $0x3f0] sm:$0xff]  ;;  %v1143_v56 = vld [vmem:[#allocation9 + $0x3b8] sm:$0xff] }
 0x48b   : > { %v10899_v19 = vcombine.high %v1077_v14, %v1085_v15  ;;  %v10898_v25 = vcombine.low %v1077_v14, %v1085_v15  ;;  %v1110_v15 = vld [vmem:[#allocation9 + $0x2b0] sm:$0xff] }
 0x48c   : > { %5621 = vmatpush1.bf16.msra.mxu1 %v10844_v20  ;;  %v1068_v20 = vld [vmem:[#allocation9 + $0x160] sm:$0xff] }
 0x48d   : > { %5662 = vmatpush1.bf16.msra.mxu0 %v10846_v21  ;;  %5688 = vmatprep.subr.bf16.mxu1 %v10961_v22  ;;  %v1061_v21 = vld [vmem:[#allocation9 + $0x128] sm:$0xff]  ;;  %v10881_v26 = vcombine.high %v1060_v30, %v1068_v20 }
 0x48e   : > { %5729 = vmatprep.subr.bf16.mxu0 %v10963_v24  ;;  %v1069_v22 = vld [vmem:[#allocation9 + $0x168] sm:$0xff]  ;;  %v10896_v24 = vcombine.low %v1076_v12, %v1084_v13 }
 0x48f   : > { %v4672_v40 = vpop.f32.mrf.mxu1  ;;  %5639 = vmatmul.mubr.bf16.vlgmr.msra.gmra.mxu1 %v13336_v7  ;;  %v10883_v27 = vcombine.high %v1061_v21, %v1069_v22  ;;  %v10882_v38 = vcombine.low %v1061_v21, %v1069_v22  ;;  %v1094_v22 = vld [vmem:[#allocation9 + $0x230] sm:$0xff] }
 0x490   : > { %v4713_v44 = vpop.f32.mrf.mxu0  ;;  %5680 = vmatmul.mubr.bf16.vlgmr.msra.gmra.mxu0 %v13336_v7  ;;  %5689 = vmatpush1.bf16.msra.mxu1 %v10960_v34  ;;  %v1052_v34 = vld [vmem:[#allocation9 + $0xe0] sm:$0xff] }
 0x491   : > { %v13344_v46 = vadd.f32 %v4713_v44, %v4672_v40  ;;  %5730 = vmatpush1.bf16.msra.mxu0 %v10962_v35  ;;  %v4674_v47 = vpop.f32.mrf.mxu1  ;;  %5690 = vmatprep.subr.bf16.mxu1 %v10945_v36  ;;  %v1045_v35 = vld [vmem:[#allocation9 + $0xa8] sm:$0xff]  ;;  %v10865_v39 = vcombine.high %v1044_v28, %v1052_v34 }
 0x492   : > { %v4715_v51 = vpop.f32.mrf.mxu0  ;;  %5731 = vmatprep.subr.bf16.mxu0 %v10947_v37  ;;  %5720 = vmatprep.mubr.bf16.mxu1 %v12916_v43  ;;  %v1053_v36 = vld [vmem:[#allocation9 + $0xe8] sm:$0xff]  ;;  %v10880_v37 = vcombine.low %v1060_v30, %v1068_v20 }
 0x493   : > { %v13347_v57 = vadd.f32 %v4715_v51, %v4674_v47  ;;  %v4676_v58 = vpop.f32.mrf.mxu1  ;;  %5761 = vmatprep.mubr.bf16.mxu0 %v12916_v43  ;;  %v10867_v40 = vcombine.high %v1045_v35, %v1053_v36  ;;  %v1029_v44 = vld [vmem:[#allocation9 + $0x28] sm:$0xff]  ;;  %v10864_v47 = vcombine.low %v1044_v28, %v1052_v34 }
 0x494   : > { %v4717_v62 = vpop.f32.mrf.mxu0  ;;  %5691 = vmatpush1.bf16.msra.mxu1 %v10944_v45  ;;  %v1037_v45 = vld [vmem:[#allocation9 + $0x68] sm:$0xff]  ;;  %v1151_v58 = vld [vmem:[#allocation9 + $0x3f8] sm:$0xff] }
 0x495   : > { %5732 = vmatpush1.bf16.msra.mxu0 %v10946_v49  ;;  %v4677_v2 = vpop.f32.mrf.mxu1  ;;  %5692 = vmatprep.subr.bf16.mxu1 %v10929_v50  ;;  %v10866_v49 = vcombine.low %v1045_v35, %v1053_v36  ;;  %v10849_v50 = vcombine.high %v1028_v41, %v1036_v42  ;;  %v10851_v51 = vcombine.high %v1029_v44, %v1037_v45  ;;  %v1078_v36 = vld [vmem:[#allocation9 + $0x1b0] sm:$0xff] }
 0x496   : > { %v4718_v8 = vpop.f32.mrf.mxu0  ;;  %5733 = vmatprep.subr.bf16.mxu0 %v10931_v53  ;;  %v1142_v53 = vld [vmem:[#allocation9 + $0x3b0] sm:$0xff]  ;;  %v10850_v60 = vcombine.low %v1029_v44, %v1037_v45  ;;  %v10966_v12 = vcombine.low %v1143_v56, %v1151_v58 }
 0x497   : > { %v10965_v62 = vcombine.high %v1142_v53, %v1150_v55  ;;  %v1126_v2 = vld [vmem:[#allocation9 + $0x330] sm:$0xff]  ;;  %v1135_v8 = vld [vmem:[#allocation9 + $0x378] sm:$0xff] }
 0x498   : > { %5693 = vmatpush1.bf16.msra.mxu1 %v10928_v32  ;;  %v10967_v32 = vcombine.high %v1143_v56, %v1151_v58  ;;  %v1062_v44 = vld [vmem:[#allocation9 + $0x130] sm:$0xff] }
 0x499   : > { %5734 = vmatpush1.bf16.msra.mxu0 %v10930_v5  ;;  %5694 = vmatprep.subr.bf16.mxu1 %v10913_v6  ;;  %v1134_v5 = vld [vmem:[#allocation9 + $0x370] sm:$0xff]  ;;  %v1127_v6 = vld [vmem:[#allocation9 + $0x338] sm:$0xff] }
 0x49a   : > { %5735 = vmatprep.subr.bf16.mxu0 %v10915_v9  ;;  %v10964_v9 = vcombine.low %v1142_v53, %v1150_v55  ;;  %v10949_v13 = vcombine.high %v1126_v2, %v1134_v5  ;;  %v10951_v14 = vcombine.high %v1127_v6, %v1135_v8  ;;  %v10950_v30 = vcombine.low %v1127_v6, %v1135_v8  ;;  %v1070_v45 = vld [vmem:[#allocation9 + $0x170] sm:$0xff] }
 0x49b   : > { %v10885_v53 = vcombine.high %v1062_v44, %v1070_v45  ;;  %v1046_v56 = vld [vmem:[#allocation9 + $0xb0] sm:$0xff] }
 0x49c   : > { %5695 = vmatpush1.bf16.msra.mxu1 %v10912_v29  ;;  %v1118_v29 = vld [vmem:[#allocation9 + $0x2f0] sm:$0xff] }
 0x49d   : > { %5736 = vmatpush1.bf16.msra.mxu0 %v10914_v16  ;;  %5696 = vmatprep.subr.bf16.mxu1 %v10897_v17  ;;  %v1111_v16 = vld [vmem:[#allocation9 + $0x2b8] sm:$0xff]  ;;  %v10933_v20 = vcombine.high %v1110_v15, %v1118_v29  ;;  %v1054_v58 = vld [vmem:[#allocation9 + $0xf0] sm:$0xff] }
 0x49e   : > { %5737 = vmatprep.subr.bf16.mxu0 %v10899_v19  ;;  %v1119_v17 = vld [vmem:[#allocation9 + $0x2f8] sm:$0xff]  ;;  %v10948_v19 = vcombine.low %v1126_v2, %v1134_v5  ;;  %v10869_v2 = vcombine.high %v1046_v56, %v1054_v58  ;;  %v1030_v6 = vld [vmem:[#allocation9 + $0x30] sm:$0xff] }
 0x49f   : > { %v10935_v21 = vcombine.high %v1111_v16, %v1119_v17  ;;  %v10934_v28 = vcombine.low %v1111_v16, %v1119_v17  ;;  %v1038_v8 = vld [vmem:[#allocation9 + $0x70] sm:$0xff] }
 0x4a0   : > { %5697 = vmatpush1.bf16.msra.mxu1 %v10896_v24  ;;  %v1102_v24 = vld [vmem:[#allocation9 + $0x270] sm:$0xff]  ;;  %v10852_v16 = vcombine.low %v1030_v6, %v1038_v8 }
 0x4a1   : > { %5738 = vmatpush1.bf16.msra.mxu0 %v10898_v25  ;;  %5698 = vmatprep.subr.bf16.mxu1 %v10881_v26  ;;  %v1095_v25 = vld [vmem:[#allocation9 + $0x238] sm:$0xff]  ;;  %v10917_v34 = vcombine.high %v1094_v22, %v1102_v24 }
 0x4a2   : > { %5739 = vmatprep.subr.bf16.mxu0 %v10883_v27  ;;  %v1103_v26 = vld [vmem:[#allocation9 + $0x278] sm:$0xff]  ;;  %v10932_v27 = vcombine.low %v1110_v15, %v1118_v29  ;;  %v10853_v15 = vcombine.high %v1030_v6, %v1038_v8  ;;  %v11814_v6 = vld [vmem:[%s13234_s20 + $0x220] ss:$16 sps:$4 sm:$0xff]   ;;  %v11819_v8 = vld [vmem:[%s13234_s20 + $0x4] ss:$16 sps:$4 sm:$0xff]  }
 0x4a3   : > { %v10919_v35 = vcombine.high %v1095_v25, %v1103_v26  ;;  %v10918_v41 = vcombine.low %v1095_v25, %v1103_v26 }
 0x4a4   : > { %5699 = vmatpush1.bf16.msra.mxu1 %v10880_v37  ;;  %v1086_v37 = vld [vmem:[#allocation9 + $0x1f0] sm:$0xff] }
 0x4a5   : > { %5740 = vmatpush1.bf16.msra.mxu0 %v10882_v38  ;;  %5700 = vmatprep.subr.bf16.mxu1 %v10865_v39  ;;  %v1079_v38 = vld [vmem:[#allocation9 + $0x1b8] sm:$0xff]  ;;  %v10901_v42 = vcombine.high %v1078_v36, %v1086_v37 }
 0x4a6   : > { %5741 = vmatprep.subr.bf16.mxu0 %v10867_v40  ;;  %v1087_v39 = vld [vmem:[#allocation9 + $0x1f8] sm:$0xff]  ;;  %v10916_v40 = vcombine.low %v1094_v22, %v1102_v24  ;;  %v11783_v22 = vld [vmem:[%s13234_s20 + $0xc4] ss:$16 sps:$4 sm:$0xff]  }
 0x4a7   : > { %v11786_v24 = vld [vmem:[%s13234_s20 + $0x2c4] ss:$16 sps:$4 sm:$0xff]  }
 0x4a8   : > { %5701 = vmatpush1.bf16.msra.mxu1 %v10864_v47  ;;  %v1063_v47 = vld [vmem:[#allocation9 + $0x138] sm:$0xff] }
 0x4a9   : > { %5742 = vmatpush1.bf16.msra.mxu0 %v10866_v49  ;;  %5702 = vmatprep.subr.bf16.mxu1 %v10849_v50  ;;  %v1071_v49 = vld [vmem:[#allocation9 + $0x178] sm:$0xff]  ;;  %v10900_v50 = vcombine.low %v1078_v36, %v1086_v37  ;;  %v11789_v36 = vld [vmem:[%s13234_s20 + $0xa4] ss:$16 sps:$4 sm:$0xff]  }
 0x4aa   : > { %5743 = vmatprep.subr.bf16.mxu0 %v10851_v51  ;;  %v10902_v51 = vcombine.low %v1079_v38, %v1087_v39  ;;  %v10887_v55 = vcombine.high %v1063_v47, %v1071_v49 }
 0x4ac   : > { %5703 = vmatpush1.bf16.msra.mxu1 %v10848_v59  ;;  %v1047_v59 = vld [vmem:[#allocation9 + $0xb8] sm:$0xff] }
 0x4ad   : > { %5744 = vmatpush1.bf16.msra.mxu0 %v10850_v60  ;;  %5770 = vmatprep.subr.bf16.mxu1 %v10965_v62  ;;  %v1055_v60 = vld [vmem:[#allocation9 + $0xf8] sm:$0xff]  ;;  %v10884_v62 = vcombine.low %v1062_v44, %v1070_v45  ;;  %v11795_v44 = vld [vmem:[%s13234_s20 + $0x84] ss:$16 sps:$4 sm:$0xff]  }
 0x4ae   : > { %5811 = vmatprep.subr.bf16.mxu0 %v10967_v32  ;;  %v10886_v32 = vcombine.low %v1063_v47, %v1071_v49  ;;  %v10871_v5 = vcombine.high %v1047_v59, %v1055_v60  ;;  %v11798_v47 = vld [vmem:[%s13234_s20 + $0x284] ss:$16 sps:$4 sm:$0xff]   ;;  %v11793_v49 = vld [vmem:[%s13234_s20 + $0x80] ss:$16 sps:$4 sm:$0xff]  }
 0x4af   : > { %5721 = vmatmul.mubr.bf16.vlgmr.msra.gmra.mxu1 %v13336_v7 }
 0x4b0   : > { %5762 = vmatmul.mubr.bf16.vlgmr.msra.gmra.mxu0 %v13336_v7  ;;  %5771 = vmatpush1.bf16.msra.mxu1 %v10964_v9  ;;  %v1031_v9 = vld [vmem:[#allocation9 + $0x38] sm:$0xff] }
 0x4b1   : > { %5812 = vmatpush1.bf16.msra.mxu0 %v10966_v12  ;;  %5772 = vmatprep.subr.bf16.mxu1 %v10949_v13  ;;  %v1039_v12 = vld [vmem:[#allocation9 + $0x78] sm:$0xff]  ;;  %v10868_v13 = vcombine.low %v1046_v56, %v1054_v58  ;;  %v11802_v56 = vld [vmem:[%s13234_s20 + $0x260] ss:$16 sps:$4 sm:$0xff]   ;;  %v11807_v58 = vld [vmem:[%s13234_s20 + $0x44] ss:$16 sps:$4 sm:$0xff]  }
 0x4b2   : > { %5813 = vmatprep.subr.bf16.mxu0 %v10951_v14  ;;  %5802 = vmatprep.mubr.bf16.mxu1 %v12916_v43  ;;  %v10870_v14 = vcombine.low %v1047_v59, %v1055_v60  ;;  %v10855_v29 = vcombine.high %v1031_v9, %v1039_v12  ;;  %v10854_v17 = vcombine.low %v1031_v9, %v1039_v12  ;;  %v11810_v59 = vld [vmem:[%s13234_s20 + $0x244] ss:$16 sps:$4 sm:$0xff]   ;;  %v11805_v60 = vld [vmem:[%s13234_s20 + $0x40] ss:$16 sps:$4 sm:$0xff]  }
 0x4b3   : > { %5843 = vmatprep.mubr.bf16.mxu0 %v12916_v43  ;;  %v10903_v43 = vcombine.high %v1079_v38, %v1087_v39  ;;  %v11792_v38 = vld [vmem:[%s13234_s20 + $0x2a4] ss:$16 sps:$4 sm:$0xff]   ;;  %v11817_v12 = vld [vmem:[%s13234_s20] ss:$16 sps:$4 sm:$0xff]  }
 0x4b4   : > { %5773 = vmatpush1.bf16.msra.mxu1 %v10948_v19  ;;  %v11777_v19 = vld [vmem:[%s13234_s20 + $0xe4] ss:$16 sps:$4 sm:$0xff]  }
 0x4b5   : > { %5814 = vmatpush1.bf16.msra.mxu0 %v10950_v30  ;;  %5774 = vmatprep.subr.bf16.mxu1 %v10933_v20  ;;  %v11780_v30 = vld [vmem:[%s13234_s20 + $0x2e4] ss:$16 sps:$4 sm:$0xff]   ;;  %v11775_v20 = vld [vmem:[%s13234_s20 + $0xe0] ss:$16 sps:$4 sm:$0xff]  }
 0x4b6   : > { %5815 = vmatprep.subr.bf16.mxu0 %v10935_v21  ;;  %v11778_v21 = vld [vmem:[%s13234_s20 + $0x2e0] ss:$16 sps:$4 sm:$0xff]   ;;  %v11822_v9 = vld [vmem:[%s13234_s20 + $0x204] ss:$16 sps:$4 sm:$0xff]  }
 0x4b8   : > { %5775 = vmatpush1.bf16.msra.mxu1 %v10932_v27  ;;  %v11781_v27 = vld [vmem:[%s13234_s20 + $0xc0] ss:$16 sps:$4 sm:$0xff]  }
 0x4b9   : > { %5816 = vmatpush1.bf16.msra.mxu0 %v10934_v28  ;;  %5776 = vmatprep.subr.bf16.mxu1 %v10917_v34 }
 0x4ba   : > { %5817 = vmatprep.subr.bf16.mxu0 %v10919_v35  ;;  %v11784_v35 = vld [vmem:[%s13234_s20 + $0x2c0] ss:$16 sps:$4 sm:$0xff]  }
 0x4bc   : > { %5777 = vmatpush1.bf16.msra.mxu1 %v10916_v40 }
 0x4bd   : > { %5818 = vmatpush1.bf16.msra.mxu0 %v10918_v41  ;;  %5778 = vmatprep.subr.bf16.mxu1 %v10901_v42  ;;  %v11787_v41 = vld [vmem:[%s13234_s20 + $0xa0] ss:$16 sps:$4 sm:$0xff]  }
 0x4be   : > { %5819 = vmatprep.subr.bf16.mxu0 %v10903_v43  ;;  %v11790_v43 = vld [vmem:[%s13234_s20 + $0x2a0] ss:$16 sps:$4 sm:$0xff]  }
 0x4c0   : > { %5779 = vmatpush1.bf16.msra.mxu1 %v10900_v50  ;;  %v11796_v50 = vld [vmem:[%s13234_s20 + $0x280] ss:$16 sps:$4 sm:$0xff]  }
 0x4c1   : > { %5820 = vmatpush1.bf16.msra.mxu0 %v10902_v51  ;;  %5780 = vmatprep.subr.bf16.mxu1 %v10885_v53  ;;  %v11801_v51 = vld [vmem:[%s13234_s20 + $0x64] ss:$16 sps:$4 sm:$0xff]  }
 0x4c2   : > { %5821 = vmatprep.subr.bf16.mxu0 %v10887_v55  ;;  %v11804_v53 = vld [vmem:[%s13234_s20 + $0x264] ss:$16 sps:$4 sm:$0xff]   ;;  %v11799_v55 = vld [vmem:[%s13234_s20 + $0x60] ss:$16 sps:$4 sm:$0xff]  }
 0x4c4   : > { %5781 = vmatpush1.bf16.msra.mxu1 %v10884_v62  ;;  %v11808_v62 = vld [vmem:[%s13234_s20 + $0x240] ss:$16 sps:$4 sm:$0xff]  }
 0x4c5   : > { %5822 = vmatpush1.bf16.msra.mxu0 %v10886_v32  ;;  %5782 = vmatprep.subr.bf16.mxu1 %v10869_v2  ;;  %v11813_v32 = vld [vmem:[%s13234_s20 + $0x24] ss:$16 sps:$4 sm:$0xff]  }
 0x4c6   : > { %5823 = vmatprep.subr.bf16.mxu0 %v10871_v5  ;;  %v11816_v2 = vld [vmem:[%s13234_s20 + $0x224] ss:$16 sps:$4 sm:$0xff]   ;;  %v11811_v5 = vld [vmem:[%s13234_s20 + $0x20] ss:$16 sps:$4 sm:$0xff]  }
 0x4c8   : > { %5783 = vmatpush1.bf16.msra.mxu1 %v10868_v13  ;;  %v11820_v13 = vld [vmem:[%s13234_s20 + $0x200] ss:$16 sps:$4 sm:$0xff]  }
 0x4c9   : > { %5824 = vmatpush1.bf16.msra.mxu0 %v10870_v14  ;;  %5784 = vmatprep.subr.bf16.mxu1 %v10853_v15  ;;  %v11825_v14 = vld [vmem:[%s13234_s20 + $0x1e4] ss:$16 sps:$4 sm:$0xff]  }
 0x4ca   : > { %5825 = vmatprep.subr.bf16.mxu0 %v10855_v29  ;;  %v11828_v15 = vld [vmem:[%s13234_s20 + $0x3e4] ss:$16 sps:$4 sm:$0xff]   ;;  %v11823_v29 = vld [vmem:[%s13234_s20 + $0x1e0] ss:$16 sps:$4 sm:$0xff]  }
 0x4cc   : > { %5785 = vmatpush1.bf16.msra.mxu1 %v10852_v16  ;;  %v11826_v16 = vld [vmem:[%s13234_s20 + $0x3e0] ss:$16 sps:$4 sm:$0xff]  }
 0x4cd   : > { %5826 = vmatpush1.bf16.msra.mxu0 %v10854_v17  ;;  %9078 = vmatprep.subr.bf16.mxu1 %v11777_v19  ;;  %v11831_v17 = vld [vmem:[%s13234_s20 + $0x1c4] ss:$16 sps:$4 sm:$0xff]  }
 0x4ce   : > { %9119 = vmatprep.subr.bf16.mxu0 %v11780_v30  ;;  %v11834_v19 = vld [vmem:[%s13234_s20 + $0x3c4] ss:$16 sps:$4 sm:$0xff]   ;;  %v11829_v30 = vld [vmem:[%s13234_s20 + $0x1c0] ss:$16 sps:$4 sm:$0xff]  }
 0x4cf   : > { %v4754_v25 = vpop.f32.mrf.mxu1  ;;  %5803 = vmatmul.mubr.bf16.vlgmr.msra.gmra.mxu1 %v13336_v7 }
 0x4d0   : > { %v4795_v26 = vpop.f32.mrf.mxu0  ;;  %5844 = vmatmul.mubr.bf16.vlgmr.msra.gmra.mxu0 %v13336_v7  ;;  %9079 = vmatpush1.bf16.msra.mxu1 %v11775_v20  ;;  %v11832_v20 = vld [vmem:[%s13234_s20 + $0x3c0] ss:$16 sps:$4 sm:$0xff]  }
 0x4d1   : > { %v13363_v28 = vadd.f32 %v4795_v26, %v4754_v25  ;;  %v4756_v34 = vpop.f32.mrf.mxu1  ;;  %9120 = vmatpush1.bf16.msra.mxu0 %v11778_v21  ;;  %9080 = vmatprep.subr.bf16.mxu1 %v11783_v22  ;;  %v11837_v21 = vld [vmem:[%s13234_s20 + $0x1a4] ss:$16 sps:$4 sm:$0xff]   ;;  %v11838_v25 = vld [vmem:[%s13234_s20 + $0x3a0] ss:$16 sps:$4 sm:$0xff]  }
 0x4d2   : > { %v4797_v37 = vpop.f32.mrf.mxu0  ;;  %9121 = vmatprep.subr.bf16.mxu0 %v11786_v24  ;;  %v11840_v22 = vld [vmem:[%s13234_s20 + $0x3a4] ss:$16 sps:$4 sm:$0xff]   ;;  %v11835_v24 = vld [vmem:[%s13234_s20 + $0x1a0] ss:$16 sps:$4 sm:$0xff]  }
 0x4d3   : > { %v13368_v39 = vadd.f32 %v4797_v37, %v4756_v34  ;;  %v4758_v7 = vpop.f32.mrf.mxu1  ;;  %v11843_v26 = vld [vmem:[%s13234_s20 + $0x184] ss:$16 sps:$4 sm:$0xff]   ;;  %v11841_v34 = vld [vmem:[%s13234_s20 + $0x180] ss:$16 sps:$4 sm:$0xff]  }
 0x4d4   : > { %v4799_v40 = vpop.f32.mrf.mxu0  ;;  %9081 = vmatpush1.bf16.msra.mxu1 %v11781_v27  ;;  %v11846_v27 = vld [vmem:[%s13234_s20 + $0x384] ss:$16 sps:$4 sm:$0xff]   ;;  %v11850_v7 = vld [vmem:[%s13234_s20 + $0x360] ss:$16 sps:$4 sm:$0xff]  }
 0x4d5   : > { %v4759_v42 = vpop.f32.mrf.mxu1  ;;  %9122 = vmatpush1.bf16.msra.mxu0 %v11784_v35  ;;  %9082 = vmatprep.subr.bf16.mxu1 %v11789_v36  ;;  %v11844_v35 = vld [vmem:[%s13234_s20 + $0x380] ss:$16 sps:$4 sm:$0xff]   ;;  %v11849_v36 = vld [vmem:[%s13234_s20 + $0x164] ss:$16 sps:$4 sm:$0xff]  }
 0x4d6   : > { %v4800_v45 = vpop.f32.mrf.mxu0  ;;  %9123 = vmatprep.subr.bf16.mxu0 %v11792_v38  ;;  %v11852_v37 = vld [vmem:[%s13234_s20 + $0x364] ss:$16 sps:$4 sm:$0xff]   ;;  %v11847_v38 = vld [vmem:[%s13234_s20 + $0x160] ss:$16 sps:$4 sm:$0xff]  }
 0x4d7   : > { %v11855_v40 = vld [vmem:[%s13234_s20 + $0x144] ss:$16 sps:$4 sm:$0xff]   ;;  %v11853_v42 = vld [vmem:[%s13234_s20 + $0x140] ss:$16 sps:$4 sm:$0xff]  }
 0x4d8   : > { %9083 = vmatpush1.bf16.msra.mxu1 %v11787_v41  ;;  %v11858_v41 = vld [vmem:[%s13234_s20 + $0x344] ss:$16 sps:$4 sm:$0xff]  }
 0x4d9   : > { %9124 = vmatpush1.bf16.msra.mxu0 %v11790_v43  ;;  %9084 = vmatprep.subr.bf16.mxu1 %v11795_v44  ;;  %v11856_v43 = vld [vmem:[%s13234_s20 + $0x340] ss:$16 sps:$4 sm:$0xff]   ;;  %v11861_v44 = vld [vmem:[%s13234_s20 + $0x124] ss:$16 sps:$4 sm:$0xff]  }
 0x4da   : > { %9125 = vmatprep.subr.bf16.mxu0 %v11798_v47  ;;  %v11864_v45 = vld [vmem:[%s13234_s20 + $0x324] ss:$16 sps:$4 sm:$0xff]   ;;  %v11859_v47 = vld [vmem:[%s13234_s20 + $0x120] ss:$16 sps:$4 sm:$0xff]  }
 0x4dc   : > { %9085 = vmatpush1.bf16.msra.mxu1 %v11793_v49  ;;  %v11862_v49 = vld [vmem:[%s13234_s20 + $0x320] ss:$16 sps:$4 sm:$0xff]  }
 0x4dd   : > { %9126 = vmatpush1.bf16.msra.mxu0 %v11796_v50  ;;  %9086 = vmatprep.subr.bf16.mxu1 %v11801_v51  ;;  %v11867_v50 = vld [vmem:[%s13234_s20 + $0x104] ss:$16 sps:$4 sm:$0xff]  }
 0x4de   : > { %9127 = vmatprep.subr.bf16.mxu0 %v11804_v53  ;;  %v11870_v51 = vld [vmem:[%s13234_s20 + $0x304] ss:$16 sps:$4 sm:$0xff]   ;;  %v11865_v53 = vld [vmem:[%s13234_s20 + $0x100] ss:$16 sps:$4 sm:$0xff]  }
 0x4e0   : > { %9087 = vmatpush1.bf16.msra.mxu1 %v11799_v55  ;;  %v11868_v55 = vld [vmem:[%s13234_s20 + $0x300] ss:$16 sps:$4 sm:$0xff]  }
 0x4e1   : > { %9128 = vmatpush1.bf16.msra.mxu0 %v11802_v56  ;;  %9088 = vmatprep.subr.bf16.mxu1 %v11807_v58  ;;  %v11873_v56 = vld [vmem:[%s13234_s20 + $0x4e4] ss:$16 sps:$4 sm:$0xff]  }
 0x4e2   : > { %9129 = vmatprep.subr.bf16.mxu0 %v11810_v59  ;;  %v11876_v58 = vld [vmem:[%s13234_s20 + $0x6e4] ss:$16 sps:$4 sm:$0xff]   ;;  %v5874_v59 = vsub.s32 4, %v13253_v63 }
 0x4e4   : > { %9089 = vmatpush1.bf16.msra.mxu1 %v11805_v60 }
 0x4e5   : > { %9130 = vmatpush1.bf16.msra.mxu0 %v11808_v62  ;;  %9090 = vmatprep.subr.bf16.mxu1 %v11813_v32  ;;  %v13427_v62 = vld [vmem:[#allocation12 + $0x8] sm:$0xff] }
 0x4e6   : > { %9131 = vmatprep.subr.bf16.mxu0 %v11816_v2  ;;  %v13432_v2 = vrot.slane %v13427_v62, %v5874_v59 }
 0x4e8   : > { %9091 = vmatpush1.bf16.msra.mxu1 %v11811_v5 }
 0x4e9   : > { %9132 = vmatpush1.bf16.msra.mxu0 %v11814_v6  ;;  %9092 = vmatprep.subr.bf16.mxu1 %v11819_v8 }
 0x4ea   : > { %9133 = vmatprep.subr.bf16.mxu0 %v11822_v9 }
 0x4ec   : > { %9093 = vmatpush1.bf16.msra.mxu1 %v11817_v12 }
 0x4ed   : > { %9134 = vmatpush1.bf16.msra.mxu0 %v11820_v13  ;;  %9094 = vmatprep.subr.bf16.mxu1 %v11825_v14 }
 0x4ee   : > { %9135 = vmatprep.subr.bf16.mxu0 %v11828_v15 }
 0x4f0   : > { %9095 = vmatpush2.bf16.msra.mxu1 %v11823_v29  ;;  %v13438_v29 = vld [vmem:[#allocation12] sm:$0xff] }
 0x4f1   : > { %9136 = vmatpush2.bf16.msra.mxu0 %v11826_v16  ;;  %9096 = vmatprep.subr.bf16.mxu1 %v11831_v17  ;;  %v5859_v16 = vrot.slane %v13438_v29, %v13256_v0 }
 0x4f2   : > { %9137 = vmatprep.subr.bf16.mxu0 %v11834_v19  ;;  %v5867_v19 = vrot.slane %v13438_v29, %v13259_v1 }
 0x4f4   : > { %9097 = vmatpush2.bf16.msra.mxu1 %v11829_v30 }
 0x4f5   : > { %9138 = vmatpush2.bf16.msra.mxu0 %v11832_v20  ;;  %9098 = vmatprep.subr.bf16.mxu1 %v11837_v21  ;;  %v5863_v21 = vrot.slane %v13438_v29, %v13262_v3 }
 0x4f6   : > { %9139 = vmatprep.subr.bf16.mxu0 %v11840_v22 }
 0x4f8   : > { %9099 = vmatpush2.bf16.msra.mxu1 %v11835_v24 }
 0x4f9   : > { %9140 = vmatpush2.bf16.msra.mxu0 %v11838_v25  ;;  %9100 = vmatprep.subr.bf16.mxu1 %v11843_v26  ;;  %v5871_v25 = vrot.slane %v13438_v29, %v13265_v4 }
 0x4fa   : > { %9141 = vmatprep.subr.bf16.mxu0 %v11846_v27 }
 0x4fc   : > { %9101 = vmatpush2.bf16.msra.mxu1 %v11841_v34 }
 0x4fd   : > { %9142 = vmatpush2.bf16.msra.mxu0 %v11844_v35  ;;  %9102 = vmatprep.subr.bf16.mxu1 %v11849_v36 }
 0x4fe   : > { %9143 = vmatprep.subr.bf16.mxu0 %v11852_v37 }
 0x500   : > { %9103 = vmatpush2.bf16.msra.mxu1 %v11847_v38 }
 0x501   : > { %9144 = vmatpush2.bf16.msra.mxu0 %v11850_v7  ;;  %9104 = vmatprep.subr.bf16.mxu1 %v11855_v40 }
 0x502   : > { %9145 = vmatprep.subr.bf16.mxu0 %v11858_v41 }
 0x504   : > { %9105 = vmatpush2.bf16.msra.mxu1 %v11853_v42 }
 0x505   : > { %9146 = vmatpush2.bf16.msra.mxu0 %v11856_v43  ;;  %9106 = vmatprep.subr.bf16.mxu1 %v11861_v44 }
 0x506   : > { %9147 = vmatprep.subr.bf16.mxu0 %v11864_v45 }
 0x508   : > { %9107 = vmatpush2.bf16.msra.mxu1 %v11859_v47 }
 0x509   : > { %9148 = vmatpush2.bf16.msra.mxu0 %v11862_v49  ;;  %9108 = vmatprep.subr.bf16.mxu1 %v11867_v50  ;;  %v11874_v49 = vld [vmem:[%s13234_s20 + $0x6e0] ss:$16 sps:$4 sm:$0xff]   ;;  %v11879_v50 = vld [vmem:[%s13234_s20 + $0x4c4] ss:$16 sps:$4 sm:$0xff]  }
 0x50a   : > { %9149 = vmatprep.subr.bf16.mxu0 %v11870_v51 }
 0x50c   : > { %9109 = vmatpush2.bf16.msra.mxu1 %v11865_v53  ;;  %v11882_v53 = vld [vmem:[%s13234_s20 + $0x6c4] ss:$16 sps:$4 sm:$0xff]  }
 0x50d   : > { %9150 = vmatpush2.bf16.msra.mxu0 %v11868_v55  ;;  %9160 = vmatprep.subr.bf16.mxu1 %v11873_v56  ;;  %v11877_v55 = vld [vmem:[%s13234_s20 + $0x4c0] ss:$16 sps:$4 sm:$0xff]  }
 0x50e   : > { %9201 = vmatprep.subr.bf16.mxu0 %v11876_v58  ;;  %v11880_v56 = vld [vmem:[%s13234_s20 + $0x6c0] ss:$16 sps:$4 sm:$0xff]   ;;  %v11885_v58 = vld [vmem:[%s13234_s20 + $0x4a4] ss:$16 sps:$4 sm:$0xff]  }
 0x50f   : > { %v4836_v60 = vpop.f32.mrf.mxu1 }
 0x510   : > { %v4877_v32 = vpop.f32.mrf.mxu0 }
 0x511   : > { %v13434_v5 = vadd.f32 %v4877_v32, %v4836_v60  ;;  %v4838_v6 = vpop.f32.mrf.mxu1  ;;  %v11888_v60 = vld [vmem:[%s13234_s20 + $0x6a4] ss:$16 sps:$4 sm:$0xff]   ;;  %v11883_v32 = vld [vmem:[%s13234_s20 + $0x4a0] ss:$16 sps:$4 sm:$0xff]  }
 0x512   : > { %v4879_v8 = vpop.f32.mrf.mxu0 }
 0x513   : > { %v13436_v9 = vadd.f32 %v4879_v8, %v4838_v6  ;;  %v4840_v12 = vpop.f32.mrf.mxu1  ;;  %v11886_v6 = vld [vmem:[%s13234_s20 + $0x6a0] ss:$16 sps:$4 sm:$0xff]   ;;  %v11891_v8 = vld [vmem:[%s13234_s20 + $0x484] ss:$16 sps:$4 sm:$0xff]  }
 0x514   : > { %v4881_v13 = vpop.f32.mrf.mxu0  ;;  %v11894_v12 = vld [vmem:[%s13234_s20 + $0x684] ss:$16 sps:$4 sm:$0xff]  }
 0x515   : > { %v4841_v14 = vpop.f32.mrf.mxu1  ;;  %v11889_v13 = vld [vmem:[%s13234_s20 + $0x480] ss:$16 sps:$4 sm:$0xff]  }
 0x516   : > { %v4882_v15 = vpop.f32.mrf.mxu0  ;;  %v11892_v14 = vld [vmem:[%s13234_s20 + $0x680] ss:$16 sps:$4 sm:$0xff]  }
 0x517   : > { %v11897_v15 = vld [vmem:[%s13234_s20 + $0x464] ss:$16 sps:$4 sm:$0xff]  }
 0x52f   : > { %v5558_v17 = vpop.f32.mrf.mxu1 }
 0x530   : > { %v5559_v30 = vadd.f32 %v5558_v17, %v13295_v48  ;;  %v5599_v20 = vpop.f32.mrf.mxu0  ;;  %v11895_v17 = vld [vmem:[%s13234_s20 + $0x460] ss:$16 sps:$4 sm:$0xff]  }
 0x531   : > { %v5600_v22 = vadd.f32 %v5599_v20, %v13302_v23  ;;  %v5560_v24 = vpop.f32.mrf.mxu1  ;;  %v11906_v20 = vld [vmem:[%s13234_s20 + $0x644] ss:$16 sps:$4 sm:$0xff]  }
 0x532   : > { %v5936_v26 = vadd.f32 %v5859_v16, %v5559_v30  ;;  %v5561_v27 = vadd.f32 %v5560_v24, %v13299_v54  ;;  %v5601_v34 = vpop.f32.mrf.mxu0  ;;  %v11871_v54 = vld [vmem:[%s13234_s20 + $0x4e0] ss:$16 sps:$4 sm:$0xff]   ;;  %v11900_v16 = vld [vmem:[%s13234_s20 + $0x664] ss:$16 sps:$4 sm:$0xff]   ;;  %v5878_v24 = vsub.s32 5, %v13253_v63 }
 0x533   : > { %v5938_v35 = vadd.f32 %v5867_v19, %v5600_v22  ;;  %v5602_v36 = vadd.f32 %v5601_v34, %v13307_v33  ;;  %v5562_v48 = vpop.f32.mrf.mxu1  ;;  %v11898_v19 = vld [vmem:[%s13234_s20 + $0x660] ss:$16 sps:$4 sm:$0xff]   ;;  %v11903_v30 = vld [vmem:[%s13234_s20 + $0x444] ss:$16 sps:$4 sm:$0xff]   ;;  %v5875_v34 = vrot.slane %v13438_v29, %v5874_v59 }
 0x534   : > { %v5937_v37 = vadd.f32 %v5863_v21, %v5561_v27  ;;  %v5603_v38 = vpop.f32.mrf.mxu0  ;;  %v5952_v7 = vmax.f32 %v5936_v26, 0.0  ;;  %v5882_v21 = vsub.s32 6, %v13253_v63  ;;  %v11901_v22 = vld [vmem:[%s13234_s20 + $0x440] ss:$16 sps:$4 sm:$0xff]   ;;  %v5886_v26 = vsub.s32 7, %v13253_v63 }
 0x535   : > { %v5939_v23 = vadd.f32 %v5871_v25, %v5602_v36  ;;  %v5563_v40 = vpop.f32.mrf.mxu1  ;;  %v5954_v41 = vmax.f32 %v5938_v35, 0.0  ;;  %v11904_v25 = vld [vmem:[%s13234_s20 + $0x640] ss:$16 sps:$4 sm:$0xff]   ;;  %v11909_v27 = vld [vmem:[%s13234_s20 + $0x424] ss:$16 sps:$4 sm:$0xff]  }
 0x536   : > { %v5953_v42 = vmax.f32 %v5937_v37, 0.0  ;;  %v5604_v43 = vpop.f32.mrf.mxu0  ;;  %v13455_v47 = vpack.c.bf16 %v5952_v7, %v5952_v7  ;;  %v11912_v35 = vld [vmem:[%s13234_s20 + $0x624] ss:$16 sps:$4 sm:$0xff]   ;;  %v5883_v48 = vrot.slane %v13438_v29, %v5882_v21  ;;  %v5879_v7 = vrot.slane %v13438_v29, %v5878_v24 }
 0x537   : > { %v5955_v44 = vmax.f32 %v5939_v23, 0.0  ;;  %v13461_v51 = vpack.c.bf16 %v5954_v41, %v5954_v41  ;;  %v11907_v23 = vld [vmem:[%s13234_s20 + $0x420] ss:$16 sps:$4 sm:$0xff]   ;;  %v5887_v41 = vrot.slane %v13438_v29, %v5886_v26 }
 0x538   : > { %v13452_v45 = vpack.c.bf16 %v5953_v42, %v5953_v42  ;;  %v11910_v42 = vld [vmem:[%s13234_s20 + $0x620] ss:$16 sps:$4 sm:$0xff]  }
 0x539   : > { %v13457_v33 = vpack.c.bf16 %v5955_v44, %v5955_v44  ;;  %v11913_v29 = vld [vmem:[%s13234_s20 + $0x400] ss:$16 sps:$4 sm:$0xff]  }
 0x53a   : > { %9110 = vmatprep.mubr.bf16.mxu1 %v13452_v45 }
 0x53b   : > { %9151 = vmatprep.mubr.bf16.mxu0 %v13457_v33  ;;  %9111 = vmatmul.mubr.bf16.vlgmr.msra.gmra.mxu1 %v13455_v47 }
 0x53c   : > { %9152 = vmatmul.mubr.bf16.vlgmr.msra.gmra.mxu0 %v13461_v51  ;;  %9161 = vmatpush1.bf16.msra.mxu1 %v11871_v54 }
 0x53d   : > { %9202 = vmatpush1.bf16.msra.mxu0 %v11874_v49  ;;  %9162 = vmatprep.subr.bf16.mxu1 %v11879_v50  ;;  %v11918_v49 = vld [vmem:[%s13234_s20 + $0x604] ss:$16 sps:$4 sm:$0xff]  }
 0x53e   : > { %9203 = vmatprep.subr.bf16.mxu0 %v11882_v53 }
 0x540   : > { %9163 = vmatpush1.bf16.msra.mxu1 %v11877_v55 }
 0x541   : > { %9204 = vmatpush1.bf16.msra.mxu0 %v11880_v56  ;;  %9164 = vmatprep.subr.bf16.mxu1 %v11885_v58 }
 0x542   : > { %9205 = vmatprep.subr.bf16.mxu0 %v11888_v60  ;;  %v11921_v60 = vld [vmem:[%s13234_s20 + $0x5e4] ss:$16 sps:$4 sm:$0xff]  }
 0x544   : > { %9165 = vmatpush1.bf16.msra.mxu1 %v11883_v32 }
 0x545   : > { %9206 = vmatpush1.bf16.msra.mxu0 %v11886_v6  ;;  %9166 = vmatprep.subr.bf16.mxu1 %v11891_v8  ;;  %v11924_v8 = vld [vmem:[%s13234_s20 + $0x7e4] ss:$16 sps:$4 sm:$0xff]  }
 0x546   : > { %9207 = vmatprep.subr.bf16.mxu0 %v11894_v12 }
 0x548   : > { %9167 = vmatpush1.bf16.msra.mxu1 %v11889_v13 }
 0x549   : > { %9208 = vmatpush1.bf16.msra.mxu0 %v11892_v14  ;;  %9168 = vmatprep.subr.bf16.mxu1 %v11897_v15  ;;  %v11919_v14 = vld [vmem:[%s13234_s20 + $0x5e0] ss:$16 sps:$4 sm:$0xff]  }
 0x54a   : > { %9209 = vmatprep.subr.bf16.mxu0 %v11900_v16  ;;  %v11922_v16 = vld [vmem:[%s13234_s20 + $0x7e0] ss:$16 sps:$4 sm:$0xff]  }
 0x54c   : > { %9169 = vmatpush1.bf16.msra.mxu1 %v11895_v17  ;;  %v11927_v17 = vld [vmem:[%s13234_s20 + $0x5c4] ss:$16 sps:$4 sm:$0xff]  }
 0x54d   : > { %9210 = vmatpush1.bf16.msra.mxu0 %v11898_v19  ;;  %9170 = vmatprep.subr.bf16.mxu1 %v11903_v30  ;;  %v11930_v19 = vld [vmem:[%s13234_s20 + $0x7c4] ss:$16 sps:$4 sm:$0xff]   ;;  %v11925_v30 = vld [vmem:[%s13234_s20 + $0x5c0] ss:$16 sps:$4 sm:$0xff]  }
 0x54e   : > { %9211 = vmatprep.subr.bf16.mxu0 %v11906_v20  ;;  %v11928_v20 = vld [vmem:[%s13234_s20 + $0x7c0] ss:$16 sps:$4 sm:$0xff]  }
 0x54f   : > { %v5640_v36 = vpop.f32.mrf.mxu1 }
 0x550   : > { %v5641_v37 = vadd.f32 %v5640_v36, %v13311_v10  ;;  %v5681_v38 = vpop.f32.mrf.mxu0  ;;  %9171 = vmatpush1.bf16.msra.mxu1 %v11901_v22  ;;  %v11915_v10 = vld [vmem:[%s13234_s20 + $0x404] ss:$16 sps:$4 sm:$0xff]  }
 0x551   : > { %v5682_v40 = vadd.f32 %v5681_v38, %v13319_v61  ;;  %9212 = vmatpush1.bf16.msra.mxu0 %v11904_v25  ;;  %v5642_v59 = vpop.f32.mrf.mxu1  ;;  %9172 = vmatprep.subr.bf16.mxu1 %v11909_v27  ;;  %v11933_v22 = vld [vmem:[%s13234_s20 + $0x5a4] ss:$16 sps:$4 sm:$0xff]   ;;  %v11931_v27 = vld [vmem:[%s13234_s20 + $0x5a0] ss:$16 sps:$4 sm:$0xff]  }
 0x552   : > { %v13508_v43 = vadd.f32 %v5875_v34, %v5641_v37  ;;  %v5643_v44 = vadd.f32 %v5642_v59, %v13315_v18  ;;  %v5683_v54 = vpop.f32.mrf.mxu0  ;;  %9213 = vmatprep.subr.bf16.mxu0 %v11912_v35  ;;  %v11916_v18 = vld [vmem:[%s13234_s20 + $0x600] ss:$16 sps:$4 sm:$0xff]   ;;  %v11936_v25 = vld [vmem:[%s13234_s20 + $0x7a4] ss:$16 sps:$4 sm:$0xff]  }
 0x553   : > { %v13512_v61 = vadd.f32 %v5883_v48, %v5682_v40  ;;  %v5684_v50 = vadd.f32 %v5683_v54, %v13323_v11  ;;  %v5644_v53 = vpop.f32.mrf.mxu1  ;;  %v11934_v34 = vld [vmem:[%s13234_s20 + $0x7a0] ss:$16 sps:$4 sm:$0xff]   ;;  %v11939_v35 = vld [vmem:[%s13234_s20 + $0x584] ss:$16 sps:$4 sm:$0xff]  }
 0x554   : > { %v5941_v55 = vadd.f32 %v5879_v7, %v5643_v44  ;;  %9173 = vmatpush1.bf16.msra.mxu1 %v11907_v23  ;;  %v5685_v56 = vpop.f32.mrf.mxu0  ;;  %v11942_v36 = vld [vmem:[%s13234_s20 + $0x784] ss:$16 sps:$4 sm:$0xff]   ;;  %v11937_v48 = vld [vmem:[%s13234_s20 + $0x580] ss:$16 sps:$4 sm:$0xff]  }
 0x555   : > { %v5943_v58 = vadd.f32 %v5887_v41, %v5684_v50  ;;  %9214 = vmatpush1.bf16.msra.mxu0 %v11910_v42  ;;  %9174 = vmatprep.subr.bf16.mxu1 %v11915_v10  ;;  %v5645_v32 = vpop.f32.mrf.mxu1  ;;  %v11940_v37 = vld [vmem:[%s13234_s20 + $0x780] ss:$16 sps:$4 sm:$0xff]   ;;  %v11945_v38 = vld [vmem:[%s13234_s20 + $0x564] ss:$16 sps:$4 sm:$0xff]  }
 0x556   : > { %v5957_v6 = vmax.f32 %v5941_v55, 0.0  ;;  %9215 = vmatprep.subr.bf16.mxu0 %v11918_v49  ;;  %v5686_v11 = vpop.f32.mrf.mxu0  ;;  %v11948_v7 = vld [vmem:[%s13234_s20 + $0x764] ss:$16 sps:$4 sm:$0xff]   ;;  %v11943_v23 = vld [vmem:[%s13234_s20 + $0x560] ss:$16 sps:$4 sm:$0xff]   ;;  %v5895_v55 = vrot.slane %v13427_v62, %v13262_v3 }
 0x557   : > { %v5959_v12 = vmax.f32 %v5943_v58, 0.0  ;;  %v11946_v40 = vld [vmem:[%s13234_s20 + $0x760] ss:$16 sps:$4 sm:$0xff]   ;;  %v11951_v59 = vld [vmem:[%s13234_s20 + $0x544] ss:$16 sps:$4 sm:$0xff]  }
 0x558   : > { %v13519_v13 = vpack.c.bf16 %v5957_v6, %v5957_v6  ;;  %9175 = vmatpush1.bf16.msra.mxu1 %v11913_v29  ;;  %v11954_v41 = vld [vmem:[%s13234_s20 + $0x744] ss:$16 sps:$4 sm:$0xff]   ;;  %v11949_v42 = vld [vmem:[%s13234_s20 + $0x540] ss:$16 sps:$4 sm:$0xff]  }
 0x559   : > { %v13522_v15 = vpack.c.bf16 %v5959_v12, %v5959_v12  ;;  %9216 = vmatpush1.bf16.msra.mxu0 %v11916_v18  ;;  %9176 = vmatprep.subr.bf16.mxu1 %v11921_v60  ;;  %v11952_v10 = vld [vmem:[%s13234_s20 + $0x740] ss:$16 sps:$4 sm:$0xff]   ;;  %v11957_v44 = vld [vmem:[%s13234_s20 + $0x524] ss:$16 sps:$4 sm:$0xff]   ;;  %v5903_v18 = vrot.slane %v13427_v62, %v13265_v4 }
 0x55a   : > { %9192 = vmatprep.mubr.bf16.mxu1 %v13519_v13  ;;  %9217 = vmatprep.subr.bf16.mxu0 %v11924_v8  ;;  %v11960_v54 = vld [vmem:[%s13234_s20 + $0x724] ss:$16 sps:$4 sm:$0xff]   ;;  %v11955_v29 = vld [vmem:[%s13234_s20 + $0x520] ss:$16 sps:$4 sm:$0xff]  }
 0x55b   : > { %9233 = vmatprep.mubr.bf16.mxu0 %v13522_v15  ;;  %v11958_v60 = vld [vmem:[%s13234_s20 + $0x720] ss:$16 sps:$4 sm:$0xff]   ;;  %v11966_v8 = vld [vmem:[%s13234_s20 + $0x704] ss:$16 sps:$4 sm:$0xff]  }
 0x55c   : > { %9177 = vmatpush2.bf16.msra.mxu1 %v11919_v14  ;;  %v11961_v14 = vld [vmem:[%s13234_s20 + $0x500] ss:$16 sps:$4 sm:$0xff]  }
 0x55d   : > { %9218 = vmatpush2.bf16.msra.mxu0 %v11922_v16  ;;  %9178 = vmatprep.subr.bf16.mxu1 %v11927_v17  ;;  %v5956_v17 = vmax.f32 %v13508_v43, 0.0 }
 0x55e   : > { %9219 = vmatprep.subr.bf16.mxu0 %v11930_v19 }
 0x55f   : > { %v13572_v43 = vpack.c.bf16 %v5956_v17, %v5956_v17  ;;  %v5911_v17 = vrot.slane %v13427_v62, %v5878_v24 }
 0x560   : > { %9179 = vmatpush2.bf16.msra.mxu1 %v11925_v30  ;;  %v11964_v30 = vld [vmem:[%s13234_s20 + $0x700] ss:$16 sps:$4 sm:$0xff]  }
 0x561   : > { %9220 = vmatpush2.bf16.msra.mxu0 %v11928_v20  ;;  %9180 = vmatprep.subr.bf16.mxu1 %v11933_v22  ;;  %v5958_v22 = vmax.f32 %v13512_v61, 0.0 }
 0x562   : > { %9221 = vmatprep.subr.bf16.mxu0 %v11936_v25  ;;  %v11972_v25 = vld [vmem:[%s13234_s20 + $0xae4] ss:$16 sps:$4 sm:$0xff]  }
 0x563   : > { %v13577_v61 = vpack.c.bf16 %v5958_v22, %v5958_v22 }
 0x564   : > { %9181 = vmatpush2.bf16.msra.mxu1 %v11931_v27 }
 0x565   : > { %9222 = vmatpush2.bf16.msra.mxu0 %v11934_v34  ;;  %9182 = vmatprep.subr.bf16.mxu1 %v11939_v35  ;;  %v11967_v35 = vld [vmem:[%s13234_s20 + $0x8e0] ss:$16 sps:$4 sm:$0xff]  }
 0x566   : > { %9223 = vmatprep.subr.bf16.mxu0 %v11942_v36 }
 0x568   : > { %9183 = vmatpush2.bf16.msra.mxu1 %v11937_v48  ;;  %v11970_v48 = vld [vmem:[%s13234_s20 + $0xae0] ss:$16 sps:$4 sm:$0xff]  }
 0x569   : > { %9224 = vmatpush2.bf16.msra.mxu0 %v11940_v37  ;;  %9184 = vmatprep.subr.bf16.mxu1 %v11945_v38  ;;  %v11975_v38 = vld [vmem:[%s13234_s20 + $0x8c4] ss:$16 sps:$4 sm:$0xff]  }
 0x56a   : > { %9225 = vmatprep.subr.bf16.mxu0 %v11948_v7  ;;  %v11978_v7 = vld [vmem:[%s13234_s20 + $0xac4] ss:$16 sps:$4 sm:$0xff]  }
 0x56c   : > { %9185 = vmatpush2.bf16.msra.mxu1 %v11943_v23  ;;  %v11973_v23 = vld [vmem:[%s13234_s20 + $0x8c0] ss:$16 sps:$4 sm:$0xff]  }
 0x56d   : > { %9226 = vmatpush2.bf16.msra.mxu0 %v11946_v40  ;;  %9186 = vmatprep.subr.bf16.mxu1 %v11951_v59  ;;  %v11976_v40 = vld [vmem:[%s13234_s20 + $0xac0] ss:$16 sps:$4 sm:$0xff]   ;;  %v11981_v59 = vld [vmem:[%s13234_s20 + $0x8a4] ss:$16 sps:$4 sm:$0xff]  }
 0x56e   : > { %9227 = vmatprep.subr.bf16.mxu0 %v11954_v41  ;;  %v11984_v41 = vld [vmem:[%s13234_s20 + $0xaa4] ss:$16 sps:$4 sm:$0xff]  }
 0x56f   : > { %v5722_v49 = vpop.f32.mrf.mxu1 }
 0x570   : > { %v13550_v50 = vadd.f32 %v5722_v49, %v13327_v52  ;;  %v5763_v53 = vpop.f32.mrf.mxu0  ;;  %9187 = vmatpush2.bf16.msra.mxu1 %v11949_v42  ;;  %v11963_v52 = vld [vmem:[%s13234_s20 + $0x504] ss:$16 sps:$4 sm:$0xff]   ;;  %v11979_v42 = vld [vmem:[%s13234_s20 + $0x8a0] ss:$16 sps:$4 sm:$0xff]  }
 0x571   : > { %v13556_v56 = vadd.f32 %v5763_v53, %v13344_v46  ;;  %9228 = vmatpush2.bf16.msra.mxu0 %v11952_v10  ;;  %v5724_v58 = vpop.f32.mrf.mxu1  ;;  %9188 = vmatprep.subr.bf16.mxu1 %v11957_v44  ;;  %v11982_v10 = vld [vmem:[%s13234_s20 + $0xaa0] ss:$16 sps:$4 sm:$0xff]   ;;  %v11987_v44 = vld [vmem:[%s13234_s20 + $0x884] ss:$16 sps:$4 sm:$0xff]  }
 0x572   : > { %v5725_v32 = vadd.f32 %v5724_v58, %v13330_v31  ;;  %v5765_v6 = vpop.f32.mrf.mxu0  ;;  %9229 = vmatprep.subr.bf16.mxu0 %v11960_v54  ;;  %v11969_v31 = vld [vmem:[%s13234_s20 + $0x8e4] ss:$16 sps:$4 sm:$0xff]   ;;  %v11985_v49 = vld [vmem:[%s13234_s20 + $0x880] ss:$16 sps:$4 sm:$0xff]  }
 0x573   : > { %v5766_v11 = vadd.f32 %v5765_v6, %v13347_v57  ;;  %v5726_v46 = vpop.f32.mrf.mxu1  ;;  %v11990_v54 = vld [vmem:[%s13234_s20 + $0xa84] ss:$16 sps:$4 sm:$0xff]   ;;  %v11988_v53 = vld [vmem:[%s13234_s20 + $0xa80] ss:$16 sps:$4 sm:$0xff]  }
 0x574   : > { %v5945_v12 = vadd.f32 %v5895_v55, %v5725_v32  ;;  %9189 = vmatpush2.bf16.msra.mxu1 %v11955_v29  ;;  %v5767_v16 = vpop.f32.mrf.mxu0  ;;  %v11993_v55 = vld [vmem:[%s13234_s20 + $0x864] ss:$16 sps:$4 sm:$0xff]   ;;  %v11991_v58 = vld [vmem:[%s13234_s20 + $0x860] ss:$16 sps:$4 sm:$0xff]  }
 0x575   : > { %v5947_v19 = vadd.f32 %v5903_v18, %v5766_v11  ;;  %9230 = vmatpush2.bf16.msra.mxu0 %v11958_v60  ;;  %9190 = vmatprep.subr.bf16.mxu1 %v11963_v52  ;;  %v5727_v20 = vpop.f32.mrf.mxu1  ;;  %v11996_v29 = vld [vmem:[%s13234_s20 + $0xa64] ss:$16 sps:$4 sm:$0xff]   ;;  %v11994_v18 = vld [vmem:[%s13234_s20 + $0xa60] ss:$16 sps:$4 sm:$0xff]  }
 0x576   : > { %v5961_v57 = vmax.f32 %v5945_v12, 0.0  ;;  %9231 = vmatprep.subr.bf16.mxu0 %v11966_v8  ;;  %v5768_v27 = vpop.f32.mrf.mxu0  ;;  %v11999_v60 = vld [vmem:[%s13234_s20 + $0x844] ss:$16 sps:$4 sm:$0xff]   ;;  %v11997_v32 = vld [vmem:[%s13234_s20 + $0x840] ss:$16 sps:$4 sm:$0xff]   ;;  %v5915_v12 = vrot.slane %v13427_v62, %v5882_v21  ;;  %v5919_v20 = vrot.slane %v13427_v62, %v5886_v26 }
 0x577   : > { %v5963_v34 = vmax.f32 %v5947_v19, 0.0  ;;  %v12002_v52 = vld [vmem:[%s13234_s20 + $0xa44] ss:$16 sps:$4 sm:$0xff]   ;;  %v12000_v6 = vld [vmem:[%s13234_s20 + $0xa40] ss:$16 sps:$4 sm:$0xff]  }
 0x578   : > { %9191 = vmatpush2.bf16.msra.mxu1 %v11961_v14  ;;  %v13574_v36 = vpack.c.bf16 %v5961_v57, %v5961_v57  ;;  %v12005_v8 = vld [vmem:[%s13234_s20 + $0x824] ss:$16 sps:$4 sm:$0xff]   ;;  %v12003_v19 = vld [vmem:[%s13234_s20 + $0x820] ss:$16 sps:$4 sm:$0xff]  }
 0x579   : > { %9232 = vmatpush2.bf16.msra.mxu0 %v11964_v30  ;;  %9242 = vmatprep.subr.bf16.mxu1 %v11969_v31  ;;  %v13579_v37 = vpack.c.bf16 %v5963_v34, %v5963_v34  ;;  %v12008_v11 = vld [vmem:[%s13234_s20 + $0xa24] ss:$16 sps:$4 sm:$0xff]   ;;  %v12006_v21 = vld [vmem:[%s13234_s20 + $0xa20] ss:$16 sps:$4 sm:$0xff]  }
 0x57a   : > { %9283 = vmatprep.subr.bf16.mxu0 %v11972_v25  ;;  %v12009_v34 = vld [vmem:[%s13234_s20 + $0x800] ss:$16 sps:$4 sm:$0xff]  }
 0x57b   : > { %9193 = vmatmul.mubr.bf16.vlgmr.msra.gmra.mxu1 %v13572_v43 }
 0x57c   : > { %9234 = vmatmul.mubr.bf16.vlgmr.msra.gmra.mxu0 %v13577_v61  ;;  %9243 = vmatpush1.bf16.msra.mxu1 %v11967_v35 }
 0x57d   : > { %9274 = vmatprep.mubr.bf16.mxu1 %v13574_v36  ;;  %9284 = vmatpush1.bf16.msra.mxu0 %v11970_v48  ;;  %v12017_v48 = vld [vmem:[%s13234_s20 + $0x9e4] ss:$16 sps:$4 sm:$0xff]  }
 0x57e   : > { %9315 = vmatprep.mubr.bf16.mxu0 %v13579_v37  ;;  %9244 = vmatprep.subr.bf16.mxu1 %v11975_v38 }
 0x57f   : > { %9285 = vmatprep.subr.bf16.mxu0 %v11978_v7 }
 0x580   : > { %9245 = vmatpush1.bf16.msra.mxu1 %v11973_v23  ;;  %v12015_v23 = vld [vmem:[%s13234_s20 + $0x9e0] ss:$16 sps:$4 sm:$0xff]  }
 0x581   : > { %9286 = vmatpush1.bf16.msra.mxu0 %v11976_v40  ;;  %9246 = vmatprep.subr.bf16.mxu1 %v11981_v59  ;;  %v12018_v40 = vld [vmem:[%s13234_s20 + $0xbe0] ss:$16 sps:$4 sm:$0xff]   ;;  %v12023_v59 = vld [vmem:[%s13234_s20 + $0x9c4] ss:$16 sps:$4 sm:$0xff]  }
 0x582   : > { %9287 = vmatprep.subr.bf16.mxu0 %v11984_v41  ;;  %v12026_v41 = vld [vmem:[%s13234_s20 + $0xbc4] ss:$16 sps:$4 sm:$0xff]  }
 0x584   : > { %9247 = vmatpush1.bf16.msra.mxu1 %v11979_v42  ;;  %v12021_v42 = vld [vmem:[%s13234_s20 + $0x9c0] ss:$16 sps:$4 sm:$0xff]  }
 0x585   : > { %9288 = vmatpush1.bf16.msra.mxu0 %v11982_v10  ;;  %9248 = vmatprep.subr.bf16.mxu1 %v11987_v44  ;;  %v12024_v10 = vld [vmem:[%s13234_s20 + $0xbc0] ss:$16 sps:$4 sm:$0xff]   ;;  %v12029_v44 = vld [vmem:[%s13234_s20 + $0x9a4] ss:$16 sps:$4 sm:$0xff]  }
 0x586   : > { %9289 = vmatprep.subr.bf16.mxu0 %v11990_v54  ;;  %v12032_v54 = vld [vmem:[%s13234_s20 + $0xba4] ss:$16 sps:$4 sm:$0xff]  }
 0x588   : > { %9249 = vmatpush1.bf16.msra.mxu1 %v11985_v49  ;;  %v12027_v49 = vld [vmem:[%s13234_s20 + $0x9a0] ss:$16 sps:$4 sm:$0xff]  }
 0x589   : > { %9290 = vmatpush1.bf16.msra.mxu0 %v11988_v53  ;;  %9250 = vmatprep.subr.bf16.mxu1 %v11993_v55  ;;  %v12030_v53 = vld [vmem:[%s13234_s20 + $0xba0] ss:$16 sps:$4 sm:$0xff]   ;;  %v12035_v55 = vld [vmem:[%s13234_s20 + $0x984] ss:$16 sps:$4 sm:$0xff]  }
 0x58a   : > { %9291 = vmatprep.subr.bf16.mxu0 %v11996_v29  ;;  %v12038_v29 = vld [vmem:[%s13234_s20 + $0xb84] ss:$16 sps:$4 sm:$0xff]  }
 0x58c   : > { %9251 = vmatpush1.bf16.msra.mxu1 %v11991_v58  ;;  %v12033_v58 = vld [vmem:[%s13234_s20 + $0x980] ss:$16 sps:$4 sm:$0xff]  }
 0x58d   : > { %9292 = vmatpush1.bf16.msra.mxu0 %v11994_v18  ;;  %9252 = vmatprep.subr.bf16.mxu1 %v11999_v60  ;;  %v12036_v18 = vld [vmem:[%s13234_s20 + $0xb80] ss:$16 sps:$4 sm:$0xff]   ;;  %v12041_v60 = vld [vmem:[%s13234_s20 + $0x964] ss:$16 sps:$4 sm:$0xff]  }
 0x58e   : > { %9293 = vmatprep.subr.bf16.mxu0 %v12002_v52  ;;  %v12044_v52 = vld [vmem:[%s13234_s20 + $0xb64] ss:$16 sps:$4 sm:$0xff]  }
 0x58f   : > { %v5804_v46 = vpop.f32.mrf.mxu1 }
 0x590   : > { %v5805_v14 = vadd.f32 %v5804_v46, %v13363_v28  ;;  %v5845_v16 = vpop.f32.mrf.mxu0  ;;  %9253 = vmatpush1.bf16.msra.mxu1 %v11997_v32  ;;  %v12011_v28 = vld [vmem:[%s13234_s20 + $0x804] ss:$16 sps:$4 sm:$0xff]   ;;  %v12039_v32 = vld [vmem:[%s13234_s20 + $0x960] ss:$16 sps:$4 sm:$0xff]  }
 0x591   : > { %v5846_v30 = vadd.f32 %v5845_v16, %v13434_v5  ;;  %9294 = vmatpush1.bf16.msra.mxu0 %v12000_v6  ;;  %v5806_v31 = vpop.f32.mrf.mxu1  ;;  %9254 = vmatprep.subr.bf16.mxu1 %v12005_v8  ;;  %v12014_v5 = vld [vmem:[%s13234_s20 + $0xa04] ss:$16 sps:$4 sm:$0xff]   ;;  %v12042_v6 = vld [vmem:[%s13234_s20 + $0xb60] ss:$16 sps:$4 sm:$0xff]  }
 0x592   : > { %v13622_v22 = vadd.f32 %v13432_v2, %v5805_v14  ;;  %v5807_v24 = vadd.f32 %v5806_v31, %v13368_v39  ;;  %v5847_v57 = vpop.f32.mrf.mxu0  ;;  %9295 = vmatprep.subr.bf16.mxu0 %v12008_v11  ;;  %v12012_v39 = vld [vmem:[%s13234_s20 + $0xa00] ss:$16 sps:$4 sm:$0xff]   ;;  %v12047_v8 = vld [vmem:[%s13234_s20 + $0x944] ss:$16 sps:$4 sm:$0xff]  }
 0x593   : > { %v13626_v25 = vadd.f32 %v5915_v12, %v5846_v30  ;;  %v5848_v63 = vadd.f32 %v5847_v57, %v13436_v9  ;;  %v5808_v26 = vpop.f32.mrf.mxu1  ;;  %v12020_v9 = vld [vmem:[%s13234_s20 + $0xbe4] ss:$16 sps:$4 sm:$0xff]   ;;  %v12045_v46 = vld [vmem:[%s13234_s20 + $0x940] ss:$16 sps:$4 sm:$0xff]   ;;  %v5891_v12 = vrot.slane %v13427_v62, %v13256_v0 }
 0x594   : > { %v13629_v27 = vadd.f32 %v5911_v17, %v5807_v24  ;;  %9255 = vmatpush1.bf16.msra.mxu1 %v12003_v19  ;;  %v5849_v2 = vpop.f32.mrf.mxu0  ;;  %v12050_v11 = vld [vmem:[%s13234_s20 + $0xb44] ss:$16 sps:$4 sm:$0xff]   ;;  %v12048_v14 = vld [vmem:[%s13234_s20 + $0xb40] ss:$16 sps:$4 sm:$0xff]   ;;  %v5899_v17 = vrot.slane %v13427_v62, %v13259_v1 }
 0x595   : > { %v13632_v35 = vadd.f32 %v5919_v20, %v5848_v63  ;;  %9296 = vmatpush1.bf16.msra.mxu0 %v12006_v21  ;;  %9256 = vmatprep.subr.bf16.mxu1 %v12011_v28  ;;  %v5809_v38 = vpop.f32.mrf.mxu1  ;;  %v12053_v16 = vld [vmem:[%s13234_s20 + $0x924] ss:$16 sps:$4 sm:$0xff]   ;;  %v12051_v30 = vld [vmem:[%s13234_s20 + $0x920] ss:$16 sps:$4 sm:$0xff]   ;;  %v5944_v31 = vadd.f32 %v5891_v12, %v13550_v50 }
 0x596   : > { %9297 = vmatprep.subr.bf16.mxu0 %v12014_v5  ;;  %v5850_v7 = vpop.f32.mrf.mxu0  ;;  %v12056_v19 = vld [vmem:[%s13234_s20 + $0xb24] ss:$16 sps:$4 sm:$0xff]   ;;  %v12054_v20 = vld [vmem:[%s13234_s20 + $0xb20] ss:$16 sps:$4 sm:$0xff]   ;;  %v5946_v28 = vadd.f32 %v5899_v17, %v13556_v56 }
 0x597   : > { %v12059_v21 = vld [vmem:[%s13234_s20 + $0x904] ss:$16 sps:$4 sm:$0xff]   ;;  %v12057_v62 = vld [vmem:[%s13234_s20 + $0x900] ss:$16 sps:$4 sm:$0xff]   ;;  %v5960_v57 = vmax.f32 %v5944_v31, 0.0  ;;  %v5967_v56 = vmax.f32 %v13632_v35, 0.0 }
 0x598   : > { %9257 = vmatpush1.bf16.msra.mxu1 %v12009_v34  ;;  %v12062_v24 = vld [vmem:[%s13234_s20 + $0xb04] ss:$16 sps:$4 sm:$0xff]   ;;  %v12060_v5 = vld [vmem:[%s13234_s20 + $0xb00] ss:$16 sps:$4 sm:$0xff]   ;;  %v5962_v50 = vmax.f32 %v5946_v28, 0.0  ;;  %v5965_v34 = vmax.f32 %v13629_v27, 0.0 }
 0x599   : > { %9298 = vmatpush1.bf16.msra.mxu0 %v12012_v39  ;;  %9258 = vmatprep.subr.bf16.mxu1 %v12017_v48  ;;  %v12065_v63 = vld [vmem:[%s13234_s20 + $0xce4] ss:$16 sps:$4 sm:$0xff]   ;;  %v12063_v2 = vld [vmem:[%s13234_s20 + $0xce0] ss:$16 sps:$4 sm:$0xff]   ;;  %v13678_v39 = vpack.c.bf16 %v5960_v57, %v5960_v57  ;;  %v13688_v35 = vpack.c.bf16 %v5967_v56, %v5967_v56 }
 0x59a   : > { %9299 = vmatprep.subr.bf16.mxu0 %v12020_v9  ;;  %v12068_v26 = vld [vmem:[%s13234_s20 + $0xee4] ss:$16 sps:$4 sm:$0xff]   ;;  %v12066_v48 = vld [vmem:[%s13234_s20 + $0xee0] ss:$16 sps:$4 sm:$0xff]   ;;  %v13681_v38 = vpack.c.bf16 %v5962_v50, %v5962_v50  ;;  %v13684_v7 = vpack.c.bf16 %v5965_v34, %v5965_v34 }
 0x59b   : > { %v12071_v9 = vld [vmem:[%s13234_s20 + $0xcc4] ss:$16 sps:$4 sm:$0xff]   ;;  %v12102_v12 = vld [vmem:[%s13234_s20 + $0xe20] ss:$16 sps:$4 sm:$0xff]  }
 0x59c   : > { %9259 = vmatpush2.bf16.msra.mxu1 %v12015_v23  ;;  %v12074_v27 = vld [vmem:[%s13234_s20 + $0xec4] ss:$16 sps:$4 sm:$0xff]   ;;  %v12069_v23 = vld [vmem:[%s13234_s20 + $0xcc0] ss:$16 sps:$4 sm:$0xff]  }
 0x59d   : > { %9300 = vmatpush2.bf16.msra.mxu0 %v12018_v40  ;;  %9260 = vmatprep.subr.bf16.mxu1 %v12023_v59  ;;  %v12072_v40 = vld [vmem:[%s13234_s20 + $0xec0] ss:$16 sps:$4 sm:$0xff]   ;;  %v12077_v59 = vld [vmem:[%s13234_s20 + $0xca4] ss:$16 sps:$4 sm:$0xff]  }
 0x59e   : > { %9301 = vmatprep.subr.bf16.mxu0 %v12026_v41  ;;  %v12080_v41 = vld [vmem:[%s13234_s20 + $0xea4] ss:$16 sps:$4 sm:$0xff]   ;;  %v12105_v17 = vld [vmem:[%s13234_s20 + $0xc00] ss:$16 sps:$4 sm:$0xff]  }
 0x59f   : > { %v12116_v31 = vld [vmem:[%s13234_s20 + $0xfe4] ss:$16 sps:$4 sm:$0xff]   ;;  %v12120_v57 = vld [vmem:[%s13234_s20 + $0xfc0] ss:$16 sps:$4 sm:$0xff]  }
 0x5a0   : > { %9261 = vmatpush2.bf16.msra.mxu1 %v12021_v42  ;;  %v12075_v42 = vld [vmem:[%s13234_s20 + $0xca0] ss:$16 sps:$4 sm:$0xff]   ;;  %v12119_v28 = vld [vmem:[%s13234_s20 + $0xdc4] ss:$16 sps:$4 sm:$0xff]  }
 0x5a1   : > { %9302 = vmatpush2.bf16.msra.mxu0 %v12024_v10  ;;  %9262 = vmatprep.subr.bf16.mxu1 %v12029_v44  ;;  %v12078_v10 = vld [vmem:[%s13234_s20 + $0xea0] ss:$16 sps:$4 sm:$0xff]   ;;  %v12083_v44 = vld [vmem:[%s13234_s20 + $0xc84] ss:$16 sps:$4 sm:$0xff]  }
 0x5a2   : > { %9303 = vmatprep.subr.bf16.mxu0 %v12032_v54  ;;  %v12086_v54 = vld [vmem:[%s13234_s20 + $0xe84] ss:$16 sps:$4 sm:$0xff]   ;;  %v12123_v50 = vld [vmem:[%s13234_s20 + $0xda0] ss:$16 sps:$4 sm:$0xff]  }
 0x5a3   : > { %v12131_v34 = vld [vmem:[%s13234_s20 + $0xd84] ss:$16 sps:$4 sm:$0xff]  }
 0x5a4   : > { %9263 = vmatpush2.bf16.msra.mxu1 %v12027_v49  ;;  %v12081_v49 = vld [vmem:[%s13234_s20 + $0xc80] ss:$16 sps:$4 sm:$0xff]   ;;  %v12134_v56 = vld [vmem:[%s13234_s20 + $0xf84] ss:$16 sps:$4 sm:$0xff]  }
 0x5a5   : > { %9304 = vmatpush2.bf16.msra.mxu0 %v12030_v53  ;;  %9264 = vmatprep.subr.bf16.mxu1 %v12035_v55  ;;  %v12084_v53 = vld [vmem:[%s13234_s20 + $0xe80] ss:$16 sps:$4 sm:$0xff]   ;;  %v12089_v55 = vld [vmem:[%s13234_s20 + $0xc64] ss:$16 sps:$4 sm:$0xff]  }
 0x5a6   : > { %9305 = vmatprep.subr.bf16.mxu0 %v12038_v29  ;;  %v12092_v29 = vld [vmem:[%s13234_s20 + $0xe64] ss:$16 sps:$4 sm:$0xff]  }
 0x5a8   : > { %9265 = vmatpush2.bf16.msra.mxu1 %v12033_v58  ;;  %v12087_v58 = vld [vmem:[%s13234_s20 + $0xc60] ss:$16 sps:$4 sm:$0xff]  }
 0x5a9   : > { %9306 = vmatpush2.bf16.msra.mxu0 %v12036_v18  ;;  %9266 = vmatprep.subr.bf16.mxu1 %v12041_v60  ;;  %v12090_v18 = vld [vmem:[%s13234_s20 + $0xe60] ss:$16 sps:$4 sm:$0xff]   ;;  %v12095_v60 = vld [vmem:[%s13234_s20 + $0xc44] ss:$16 sps:$4 sm:$0xff]  }
 0x5aa   : > { %9307 = vmatprep.subr.bf16.mxu0 %v12044_v52  ;;  %v12098_v52 = vld [vmem:[%s13234_s20 + $0xe44] ss:$16 sps:$4 sm:$0xff]  }
 0x5ac   : > { %9267 = vmatpush2.bf16.msra.mxu1 %v12039_v32  ;;  %v12093_v32 = vld [vmem:[%s13234_s20 + $0xc40] ss:$16 sps:$4 sm:$0xff]  }
 0x5ad   : > { %9308 = vmatpush2.bf16.msra.mxu0 %v12042_v6  ;;  %9268 = vmatprep.subr.bf16.mxu1 %v12047_v8  ;;  %v12096_v6 = vld [vmem:[%s13234_s20 + $0xe40] ss:$16 sps:$4 sm:$0xff]   ;;  %v12101_v8 = vld [vmem:[%s13234_s20 + $0xc24] ss:$16 sps:$4 sm:$0xff]  }
 0x5ae   : > { %9309 = vmatprep.subr.bf16.mxu0 %v12050_v11  ;;  %v12104_v11 = vld [vmem:[%s13234_s20 + $0xe24] ss:$16 sps:$4 sm:$0xff]  }
 0x5b0   : > { %9269 = vmatpush2.bf16.msra.mxu1 %v12045_v46  ;;  %v12099_v46 = vld [vmem:[%s13234_s20 + $0xc20] ss:$16 sps:$4 sm:$0xff]  }
 0x5b1   : > { %9310 = vmatpush2.bf16.msra.mxu0 %v12048_v14  ;;  %9270 = vmatprep.subr.bf16.mxu1 %v12053_v16  ;;  %v12107_v14 = vld [vmem:[%s13234_s20 + $0xc04] ss:$16 sps:$4 sm:$0xff]  }
 0x5b2   : > { %9311 = vmatprep.subr.bf16.mxu0 %v12056_v19  ;;  %v12110_v16 = vld [vmem:[%s13234_s20 + $0xe04] ss:$16 sps:$4 sm:$0xff]   ;;  %v12108_v19 = vld [vmem:[%s13234_s20 + $0xe00] ss:$16 sps:$4 sm:$0xff]  }
 0x5b4   : > { %9271 = vmatpush2.bf16.msra.mxu1 %v12051_v30  ;;  %v12113_v30 = vld [vmem:[%s13234_s20 + $0xde4] ss:$16 sps:$4 sm:$0xff]  }
 0x5b5   : > { %9312 = vmatpush2.bf16.msra.mxu0 %v12054_v20  ;;  %9272 = vmatprep.subr.bf16.mxu1 %v12059_v21  ;;  %v12111_v20 = vld [vmem:[%s13234_s20 + $0xde0] ss:$16 sps:$4 sm:$0xff]  }
 0x5b6   : > { %9313 = vmatprep.subr.bf16.mxu0 %v12062_v24  ;;  %v12114_v21 = vld [vmem:[%s13234_s20 + $0xfe0] ss:$16 sps:$4 sm:$0xff]   ;;  %v12122_v24 = vld [vmem:[%s13234_s20 + $0xfc4] ss:$16 sps:$4 sm:$0xff]  }
 0x5b8   : > { %9273 = vmatpush2.bf16.msra.mxu1 %v12057_v62  ;;  %v12117_v62 = vld [vmem:[%s13234_s20 + $0xdc0] ss:$16 sps:$4 sm:$0xff]  }
 0x5b9   : > { %9314 = vmatpush2.bf16.msra.mxu0 %v12060_v5  ;;  %9324 = vmatprep.subr.bf16.mxu1 %v12065_v63  ;;  %v12125_v5 = vld [vmem:[%s13234_s20 + $0xda4] ss:$16 sps:$4 sm:$0xff]  }
 0x5ba   : > { %9365 = vmatprep.subr.bf16.mxu0 %v12068_v26  ;;  %v12128_v63 = vld [vmem:[%s13234_s20 + $0xfa4] ss:$16 sps:$4 sm:$0xff]   ;;  %v12126_v26 = vld [vmem:[%s13234_s20 + $0xfa0] ss:$16 sps:$4 sm:$0xff]  }
 0x5bb   : > { %9275 = vmatmul.mubr.bf16.vlgmr.msra.gmra.mxu1 %v13678_v39 }
 0x5bc   : > { %9316 = vmatmul.mubr.bf16.vlgmr.msra.gmra.mxu0 %v13681_v38  ;;  %9325 = vmatpush1.bf16.msra.mxu1 %v12063_v2  ;;  %v12129_v2 = vld [vmem:[%s13234_s20 + $0xd80] ss:$16 sps:$4 sm:$0xff]  }
 0x5bd   : > { %9356 = vmatprep.mubr.bf16.mxu1 %v13684_v7  ;;  %9366 = vmatpush1.bf16.msra.mxu0 %v12066_v48  ;;  %v12132_v48 = vld [vmem:[%s13234_s20 + $0xf80] ss:$16 sps:$4 sm:$0xff]  }
 0x5be   : > { %9397 = vmatprep.mubr.bf16.mxu0 %v13688_v35  ;;  %9326 = vmatprep.subr.bf16.mxu1 %v12071_v9  ;;  %v12137_v9 = vld [vmem:[%s13234_s20 + $0xd64] ss:$16 sps:$4 sm:$0xff]  }
 0x5bf   : > { %9367 = vmatprep.subr.bf16.mxu0 %v12074_v27  ;;  %v12140_v27 = vld [vmem:[%s13234_s20 + $0xf64] ss:$16 sps:$4 sm:$0xff]  }
 0x5c0   : > { %9327 = vmatpush1.bf16.msra.mxu1 %v12069_v23  ;;  %v12135_v23 = vld [vmem:[%s13234_s20 + $0xd60] ss:$16 sps:$4 sm:$0xff]  }
 0x5c1   : > { %9368 = vmatpush1.bf16.msra.mxu0 %v12072_v40  ;;  %9328 = vmatprep.subr.bf16.mxu1 %v12077_v59  ;;  %v12138_v40 = vld [vmem:[%s13234_s20 + $0xf60] ss:$16 sps:$4 sm:$0xff]   ;;  %v12143_v59 = vld [vmem:[%s13234_s20 + $0xd44] ss:$16 sps:$4 sm:$0xff]  }
 0x5c2   : > { %9369 = vmatprep.subr.bf16.mxu0 %v12080_v41  ;;  %v12146_v41 = vld [vmem:[%s13234_s20 + $0xf44] ss:$16 sps:$4 sm:$0xff]  }
 0x5c4   : > { %9329 = vmatpush1.bf16.msra.mxu1 %v12075_v42  ;;  %v12141_v42 = vld [vmem:[%s13234_s20 + $0xd40] ss:$16 sps:$4 sm:$0xff]  }
 0x5c5   : > { %9370 = vmatpush1.bf16.msra.mxu0 %v12078_v10  ;;  %9330 = vmatprep.subr.bf16.mxu1 %v12083_v44  ;;  %v12144_v10 = vld [vmem:[%s13234_s20 + $0xf40] ss:$16 sps:$4 sm:$0xff]   ;;  %v12149_v44 = vld [vmem:[%s13234_s20 + $0xd24] ss:$16 sps:$4 sm:$0xff]  }
 0x5c6   : > { %9371 = vmatprep.subr.bf16.mxu0 %v12086_v54  ;;  %v12152_v54 = vld [vmem:[%s13234_s20 + $0xf24] ss:$16 sps:$4 sm:$0xff]  }
 0x5c8   : > { %9331 = vmatpush1.bf16.msra.mxu1 %v12081_v49  ;;  %v12147_v49 = vld [vmem:[%s13234_s20 + $0xd20] ss:$16 sps:$4 sm:$0xff]  }
 0x5c9   : > { %9372 = vmatpush1.bf16.msra.mxu0 %v12084_v53  ;;  %9332 = vmatprep.subr.bf16.mxu1 %v12089_v55  ;;  %v12150_v53 = vld [vmem:[%s13234_s20 + $0xf20] ss:$16 sps:$4 sm:$0xff]   ;;  %v12155_v55 = vld [vmem:[%s13234_s20 + $0xd04] ss:$16 sps:$4 sm:$0xff]  }
 0x5ca   : > { %9373 = vmatprep.subr.bf16.mxu0 %v12092_v29  ;;  %v12158_v29 = vld [vmem:[%s13234_s20 + $0xf04] ss:$16 sps:$4 sm:$0xff]  }
 0x5cc   : > { %9333 = vmatpush1.bf16.msra.mxu1 %v12087_v58  ;;  %v12153_v58 = vld [vmem:[%s13234_s20 + $0xd00] ss:$16 sps:$4 sm:$0xff]  }
 0x5cd   : > { %9374 = vmatpush1.bf16.msra.mxu0 %v12090_v18  ;;  %9334 = vmatprep.subr.bf16.mxu1 %v12095_v60  ;;  %v12156_v18 = vld [vmem:[%s13234_s20 + $0xf00] ss:$16 sps:$4 sm:$0xff]   ;;  %v5964_v60 = vmax.f32 %v13622_v22, 0.0  ;;  %v12162_v22 = vld [vmem:[%s13234_s20 + $0x2e8] ss:$16 sps:$4 sm:$0xff]  }
 0x5ce   : > { %9375 = vmatprep.subr.bf16.mxu0 %v12098_v52  ;;  %v12161_v52 = vld [vmem:[%s13234_s20 + $0xec] ss:$16 sps:$4 sm:$0xff]  }
 0x5d0   : > { %9335 = vmatpush1.bf16.msra.mxu1 %v12093_v32  ;;  %v6496_v32 = vld [vmem:[%s13240_s13] sm:$0xf] }
 0x5d1   : > { %9376 = vmatpush1.bf16.msra.mxu0 %v12096_v6  ;;  %9336 = vmatprep.subr.bf16.mxu1 %v12101_v8  ;;  %v5966_v6 = vmax.f32 %v13626_v25, 0.0  ;;  %v12164_v8 = vld [vmem:[%s13234_s20 + $0x2ec] ss:$16 sps:$4 sm:$0xff]   ;;  %v6505_v25 = vrot.slane %v6496_v32, %v13262_v3 }
 0x5d2   : > { %9377 = vmatprep.subr.bf16.mxu0 %v12104_v11  ;;  %v12159_v11 = vld [vmem:[%s13234_s20 + $0xe8] ss:$16 sps:$4 sm:$0xff]  }
 0x5d4   : > { %9337 = vmatpush1.bf16.msra.mxu1 %v12099_v46  ;;  %v6501_v46 = vrot.slane %v6496_v32, %v13256_v0  ;;  %v12212_v32 = vld [vmem:[%s13234_s20 + $0x3ec] ss:$16 sps:$4 sm:$0xff]  }
 0x5d5   : > { %9378 = vmatpush1.bf16.msra.mxu0 %v12102_v12  ;;  %9338 = vmatprep.subr.bf16.mxu1 %v12107_v14  ;;  %v13758_v12 = vpack.c.bf16 %v5964_v60, %v5964_v60  ;;  %v13761_v14 = vpack.c.bf16 %v5966_v6, %v5966_v6  ;;  %v12204_v60 = vld [vmem:[%s13234_s20 + $0x208] ss:$16 sps:$4 sm:$0xff]  }
 0x5d6   : > { %9379 = vmatprep.subr.bf16.mxu0 %v12110_v16  ;;  %v12167_v16 = vld [vmem:[%s13234_s20 + $0xcc] ss:$16 sps:$4 sm:$0xff]   ;;  %v12207_v6 = vld [vmem:[%s13234_s20 + $0x1e8] ss:$16 sps:$4 sm:$0xff]  }
 0x5d8   : > { %9339 = vmatpush1.bf16.msra.mxu1 %v12105_v17 }
 0x5d9   : > { %9380 = vmatpush1.bf16.msra.mxu0 %v12108_v19  ;;  %9340 = vmatprep.subr.bf16.mxu1 %v12113_v30  ;;  %v12170_v19 = vld [vmem:[%s13234_s20 + $0x2cc] ss:$16 sps:$4 sm:$0xff]  }
 0x5da   : > { %9381 = vmatprep.subr.bf16.mxu0 %v12116_v31  ;;  %v12165_v31 = vld [vmem:[%s13234_s20 + $0xc8] ss:$16 sps:$4 sm:$0xff]  }
 0x5dc   : > { %9341 = vmatpush2.bf16.msra.mxu1 %v12111_v20 }
 0x5dd   : > { %9382 = vmatpush2.bf16.msra.mxu0 %v12114_v21  ;;  %9342 = vmatprep.subr.bf16.mxu1 %v12119_v28  ;;  %v12168_v21 = vld [vmem:[%s13234_s20 + $0x2c8] ss:$16 sps:$4 sm:$0xff]   ;;  %v12173_v28 = vld [vmem:[%s13234_s20 + $0xac] ss:$16 sps:$4 sm:$0xff]  }
 0x5de   : > { %9383 = vmatprep.subr.bf16.mxu0 %v12122_v24 }
 0x5e0   : > { %9343 = vmatpush2.bf16.msra.mxu1 %v12117_v62 }
 0x5e1   : > { %9384 = vmatpush2.bf16.msra.mxu0 %v12120_v57  ;;  %9344 = vmatprep.subr.bf16.mxu1 %v12125_v5  ;;  %v12176_v57 = vld [vmem:[%s13234_s20 + $0x2ac] ss:$16 sps:$4 sm:$0xff]  }
 0x5e2   : > { %9385 = vmatprep.subr.bf16.mxu0 %v12128_v63 }
 0x5e4   : > { %9345 = vmatpush2.bf16.msra.mxu1 %v12123_v50  ;;  %v12171_v50 = vld [vmem:[%s13234_s20 + $0xa8] ss:$16 sps:$4 sm:$0xff]  }
 0x5e5   : > { %9386 = vmatpush2.bf16.msra.mxu0 %v12126_v26  ;;  %9346 = vmatprep.subr.bf16.mxu1 %v12131_v34  ;;  %v12179_v34 = vld [vmem:[%s13234_s20 + $0x8c] ss:$16 sps:$4 sm:$0xff]  }
 0x5e6   : > { %9387 = vmatprep.subr.bf16.mxu0 %v12134_v56 }
 0x5e8   : > { %9347 = vmatpush2.bf16.msra.mxu1 %v12129_v2  ;;  %v12182_v2 = vld [vmem:[%s13234_s20 + $0x28c] ss:$16 sps:$4 sm:$0xff]  }
 0x5e9   : > { %9388 = vmatpush2.bf16.msra.mxu0 %v12132_v48  ;;  %9348 = vmatprep.subr.bf16.mxu1 %v12137_v9  ;;  %v12177_v48 = vld [vmem:[%s13234_s20 + $0x88] ss:$16 sps:$4 sm:$0xff]  }
 0x5ea   : > { %9389 = vmatprep.subr.bf16.mxu0 %v12140_v27  ;;  %v12180_v9 = vld [vmem:[%s13234_s20 + $0x288] ss:$16 sps:$4 sm:$0xff]   ;;  %v12185_v27 = vld [vmem:[%s13234_s20 + $0x6c] ss:$16 sps:$4 sm:$0xff]  }
 0x5ec   : > { %9349 = vmatpush2.bf16.msra.mxu1 %v12135_v23  ;;  %v12188_v23 = vld [vmem:[%s13234_s20 + $0x26c] ss:$16 sps:$4 sm:$0xff]  }
 0x5ed   : > { %9390 = vmatpush2.bf16.msra.mxu0 %v12138_v40  ;;  %9350 = vmatprep.subr.bf16.mxu1 %v12143_v59  ;;  %v12183_v40 = vld [vmem:[%s13234_s20 + $0x68] ss:$16 sps:$4 sm:$0xff]  }
 0x5ee   : > { %9391 = vmatprep.subr.bf16.mxu0 %v12146_v41  ;;  %v12186_v59 = vld [vmem:[%s13234_s20 + $0x268] ss:$16 sps:$4 sm:$0xff]   ;;  %v12191_v41 = vld [vmem:[%s13234_s20 + $0x4c] ss:$16 sps:$4 sm:$0xff]  }
 0x5f0   : > { %9351 = vmatpush2.bf16.msra.mxu1 %v12141_v42  ;;  %v12194_v42 = vld [vmem:[%s13234_s20 + $0x24c] ss:$16 sps:$4 sm:$0xff]  }
 0x5f1   : > { %9392 = vmatpush2.bf16.msra.mxu0 %v12144_v10  ;;  %9352 = vmatprep.subr.bf16.mxu1 %v12149_v44  ;;  %v12189_v10 = vld [vmem:[%s13234_s20 + $0x48] ss:$16 sps:$4 sm:$0xff]  }
 0x5f2   : > { %9393 = vmatprep.subr.bf16.mxu0 %v12152_v54  ;;  %v12192_v44 = vld [vmem:[%s13234_s20 + $0x248] ss:$16 sps:$4 sm:$0xff]   ;;  %v12197_v54 = vld [vmem:[%s13234_s20 + $0x2c] ss:$16 sps:$4 sm:$0xff]  }
 0x5f4   : > { %9353 = vmatpush2.bf16.msra.mxu1 %v12147_v49  ;;  %v12200_v49 = vld [vmem:[%s13234_s20 + $0x22c] ss:$16 sps:$4 sm:$0xff]  }
 0x5f5   : > { %9394 = vmatpush2.bf16.msra.mxu0 %v12150_v53  ;;  %9354 = vmatprep.subr.bf16.mxu1 %v12155_v55  ;;  %v12195_v53 = vld [vmem:[%s13234_s20 + $0x28] ss:$16 sps:$4 sm:$0xff]  }
 0x5f6   : > { %9395 = vmatprep.subr.bf16.mxu0 %v12158_v29  ;;  %v12198_v55 = vld [vmem:[%s13234_s20 + $0x228] ss:$16 sps:$4 sm:$0xff]   ;;  %v12203_v29 = vld [vmem:[%s13234_s20 + $0xc] ss:$16 sps:$4 sm:$0xff]  }
 0x5f8   : > { %9355 = vmatpush2.bf16.msra.mxu1 %v12153_v58  ;;  %v12206_v58 = vld [vmem:[%s13234_s20 + $0x20c] ss:$16 sps:$4 sm:$0xff]  }
 0x5f9   : > { %9396 = vmatpush2.bf16.msra.mxu0 %v12156_v18  ;;  %9406 = vmatprep.subr.bf16.mxu1 %v12161_v52  ;;  %v12201_v18 = vld [vmem:[%s13234_s20 + $0x8] ss:$16 sps:$4 sm:$0xff]   ;;  %v12209_v52 = vld [vmem:[%s13234_s20 + $0x1ec] ss:$16 sps:$4 sm:$0xff]  }
 0x5fa   : > { %9447 = vmatprep.subr.bf16.mxu0 %v12164_v8  ;;  %v12210_v8 = vld [vmem:[%s13234_s20 + $0x3e8] ss:$16 sps:$4 sm:$0xff]  }
 0x5fb   : > { %9357 = vmatmul.mubr.bf16.vlgmr.msra.gmra.mxu1 %v13758_v12  ;;  %v9112_v17 = vpop.f32.mrf.mxu1 }
 0x5fc   : > { %9398 = vmatmul.mubr.bf16.vlgmr.msra.gmra.mxu0 %v13761_v14  ;;  %v9113_v0 = vadd.f32 %v9112_v17, %v6501_v46  ;;  %v9153_v30 = vpop.f32.mrf.mxu0  ;;  %9407 = vmatpush1.bf16.msra.mxu1 %v12159_v11  ;;  %v12215_v11 = vld [vmem:[%s13234_s20 + $0x1cc] ss:$16 sps:$4 sm:$0xff]  }
 0x5fd   : > { %9438 = vmatprep.mubr.bf16.mxu1 %v13452_v45  ;;  %9448 = vmatpush1.bf16.msra.mxu0 %v12162_v22  ;;  %v9114_v20 = vpop.f32.mrf.mxu1  ;;  %v12218_v46 = vld [vmem:[%s13234_s20 + $0x3cc] ss:$16 sps:$4 sm:$0xff]   ;;  %v12213_v22 = vld [vmem:[%s13234_s20 + $0x1c8] ss:$16 sps:$4 sm:$0xff]  }
 0x5fe   : > { %v13772_v3 = vadd.f32 %v9153_v30, %v9113_v0  ;;  %9479 = vmatprep.mubr.bf16.mxu0 %v13457_v33  ;;  %v9115_v24 = vadd.f32 %v9114_v20, %v6505_v25  ;;  %v9155_v62 = vpop.f32.mrf.mxu0  ;;  %9408 = vmatprep.subr.bf16.mxu1 %v12167_v16  ;;  %v12174_v33 = vld [vmem:[%s13234_s20 + $0x2a8] ss:$16 sps:$4 sm:$0xff]   ;;  %v12221_v16 = vld [vmem:[%s13234_s20 + $0x1ac] ss:$16 sps:$4 sm:$0xff]  }
 0x5ff   : > { %9449 = vmatprep.subr.bf16.mxu0 %v12170_v19  ;;  %v9116_v5 = vpop.f32.mrf.mxu1  ;;  %v12216_v25 = vld [vmem:[%s13234_s20 + $0x3c8] ss:$16 sps:$4 sm:$0xff]   ;;  %v12224_v17 = vld [vmem:[%s13234_s20 + $0x3ac] ss:$16 sps:$4 sm:$0xff]  }
 0x600   : > { %v13776_v45 = vadd.f32 %v9155_v62, %v9115_v24  ;;  %v9157_v63 = vpop.f32.mrf.mxu0  ;;  %9409 = vmatpush1.bf16.msra.mxu1 %v12165_v31  ;;  %v12219_v19 = vld [vmem:[%s13234_s20 + $0x1a8] ss:$16 sps:$4 sm:$0xff]   ;;  %v12227_v30 = vld [vmem:[%s13234_s20 + $0x18c] ss:$16 sps:$4 sm:$0xff]  }
 0x601   : > { %9450 = vmatpush1.bf16.msra.mxu0 %v12168_v21  ;;  %v9117_v26 = vpop.f32.mrf.mxu1  ;;  %9410 = vmatprep.subr.bf16.mxu1 %v12173_v28  ;;  %v12222_v0 = vld [vmem:[%s13234_s20 + $0x3a8] ss:$16 sps:$4 sm:$0xff]   ;;  %v12230_v31 = vld [vmem:[%s13234_s20 + $0x38c] ss:$16 sps:$4 sm:$0xff]  }
 0x602   : > { %v9158_v56 = vpop.f32.mrf.mxu0  ;;  %9451 = vmatprep.subr.bf16.mxu0 %v12176_v57  ;;  %v12225_v20 = vld [vmem:[%s13234_s20 + $0x188] ss:$16 sps:$4 sm:$0xff]   ;;  %v12233_v28 = vld [vmem:[%s13234_s20 + $0x16c] ss:$16 sps:$4 sm:$0xff]  }
 0x603   : > { %v12228_v21 = vld [vmem:[%s13234_s20 + $0x388] ss:$16 sps:$4 sm:$0xff]   ;;  %v12236_v24 = vld [vmem:[%s13234_s20 + $0x36c] ss:$16 sps:$4 sm:$0xff]  }
 0x604   : > { %9411 = vmatpush1.bf16.msra.mxu1 %v12171_v50  ;;  %v12231_v62 = vld [vmem:[%s13234_s20 + $0x168] ss:$16 sps:$4 sm:$0xff]   ;;  %v12239_v5 = vld [vmem:[%s13234_s20 + $0x14c] ss:$16 sps:$4 sm:$0xff]  }
 0x605   : > { %9452 = vmatpush1.bf16.msra.mxu0 %v12174_v33  ;;  %9412 = vmatprep.subr.bf16.mxu1 %v12179_v34  ;;  %v12234_v57 = vld [vmem:[%s13234_s20 + $0x368] ss:$16 sps:$4 sm:$0xff]   ;;  %v12242_v63 = vld [vmem:[%s13234_s20 + $0x34c] ss:$16 sps:$4 sm:$0xff]  }
 0x606   : > { %9453 = vmatprep.subr.bf16.mxu0 %v12182_v2  ;;  %v12237_v50 = vld [vmem:[%s13234_s20 + $0x148] ss:$16 sps:$4 sm:$0xff]   ;;  %v12245_v33 = vld [vmem:[%s13234_s20 + $0x12c] ss:$16 sps:$4 sm:$0xff]  }
 0x607   : > { %v12240_v26 = vld [vmem:[%s13234_s20 + $0x348] ss:$16 sps:$4 sm:$0xff]   ;;  %v12248_v34 = vld [vmem:[%s13234_s20 + $0x32c] ss:$16 sps:$4 sm:$0xff]  }
 0x608   : > { %9413 = vmatpush1.bf16.msra.mxu1 %v12177_v48  ;;  %v12243_v56 = vld [vmem:[%s13234_s20 + $0x128] ss:$16 sps:$4 sm:$0xff]   ;;  %v12251_v48 = vld [vmem:[%s13234_s20 + $0x10c] ss:$16 sps:$4 sm:$0xff]  }
 0x609   : > { %9454 = vmatpush1.bf16.msra.mxu0 %v12180_v9  ;;  %9414 = vmatprep.subr.bf16.mxu1 %v12185_v27  ;;  %v12246_v2 = vld [vmem:[%s13234_s20 + $0x328] ss:$16 sps:$4 sm:$0xff]   ;;  %v12254_v9 = vld [vmem:[%s13234_s20 + $0x30c] ss:$16 sps:$4 sm:$0xff]  }
 0x60a   : > { %9455 = vmatprep.subr.bf16.mxu0 %v12188_v23  ;;  %v12249_v27 = vld [vmem:[%s13234_s20 + $0x108] ss:$16 sps:$4 sm:$0xff]  }
 0x60b   : > { %v12252_v23 = vld [vmem:[%s13234_s20 + $0x308] ss:$16 sps:$4 sm:$0xff]  }
 0x60c   : > { %9415 = vmatpush1.bf16.msra.mxu1 %v12183_v40  ;;  %v12257_v40 = vld [vmem:[%s13234_s20 + $0x4ec] ss:$16 sps:$4 sm:$0xff]  }
 0x60d   : > { %9456 = vmatpush1.bf16.msra.mxu0 %v12186_v59  ;;  %9416 = vmatprep.subr.bf16.mxu1 %v12191_v41  ;;  %v12260_v59 = vld [vmem:[%s13234_s20 + $0x6ec] ss:$16 sps:$4 sm:$0xff]   ;;  %v12255_v41 = vld [vmem:[%s13234_s20 + $0x4e8] ss:$16 sps:$4 sm:$0xff]  }
 0x60e   : > { %9457 = vmatprep.subr.bf16.mxu0 %v12194_v42  ;;  %v12258_v42 = vld [vmem:[%s13234_s20 + $0x6e8] ss:$16 sps:$4 sm:$0xff]  }
 0x610   : > { %9417 = vmatpush1.bf16.msra.mxu1 %v12189_v10  ;;  %v12263_v10 = vld [vmem:[%s13234_s20 + $0x4cc] ss:$16 sps:$4 sm:$0xff]  }
 0x611   : > { %9458 = vmatpush1.bf16.msra.mxu0 %v12192_v44  ;;  %9418 = vmatprep.subr.bf16.mxu1 %v12197_v54  ;;  %v12266_v54 = vld [vmem:[%s13234_s20 + $0x6cc] ss:$16 sps:$4 sm:$0xff]  }
 0x612   : > { %9459 = vmatprep.subr.bf16.mxu0 %v12200_v49 }
 0x614   : > { %9419 = vmatpush1.bf16.msra.mxu1 %v12195_v53 }
 0x615   : > { %9460 = vmatpush1.bf16.msra.mxu0 %v12198_v55  ;;  %9420 = vmatprep.subr.bf16.mxu1 %v12203_v29  ;;  %v12261_v55 = vld [vmem:[%s13234_s20 + $0x4c8] ss:$16 sps:$4 sm:$0xff]  }
 0x616   : > { %9461 = vmatprep.subr.bf16.mxu0 %v12206_v58  ;;  %v12264_v58 = vld [vmem:[%s13234_s20 + $0x6c8] ss:$16 sps:$4 sm:$0xff]  }
 0x618   : > { %9421 = vmatpush1.bf16.msra.mxu1 %v12201_v18  ;;  %v12269_v18 = vld [vmem:[%s13234_s20 + $0x4ac] ss:$16 sps:$4 sm:$0xff]  }
 0x619   : > { %9462 = vmatpush1.bf16.msra.mxu0 %v12204_v60  ;;  %9422 = vmatprep.subr.bf16.mxu1 %v12209_v52 }
 0x61a   : > { %9463 = vmatprep.subr.bf16.mxu0 %v12212_v32 }
 0x61c   : > { %9423 = vmatpush2.bf16.msra.mxu1 %v12207_v6  ;;  %v12267_v6 = vld [vmem:[%s13234_s20 + $0x4a8] ss:$16 sps:$4 sm:$0xff]  }
 0x61d   : > { %9464 = vmatpush2.bf16.msra.mxu0 %v12210_v8  ;;  %9424 = vmatprep.subr.bf16.mxu1 %v12215_v11 }
 0x61e   : > { %9465 = vmatprep.subr.bf16.mxu0 %v12218_v46  ;;  %v12278_v46 = vld [vmem:[%s13234_s20 + $0x68c] ss:$16 sps:$4 sm:$0xff]  }
 0x620   : > { %9425 = vmatpush2.bf16.msra.mxu1 %v12213_v22  ;;  %v12273_v22 = vld [vmem:[%s13234_s20 + $0x488] ss:$16 sps:$4 sm:$0xff]  }
 0x621   : > { %9466 = vmatpush2.bf16.msra.mxu0 %v12216_v25  ;;  %9426 = vmatprep.subr.bf16.mxu1 %v12221_v16  ;;  %v12276_v25 = vld [vmem:[%s13234_s20 + $0x688] ss:$16 sps:$4 sm:$0xff]   ;;  %v12281_v16 = vld [vmem:[%s13234_s20 + $0x46c] ss:$16 sps:$4 sm:$0xff]  }
 0x622   : > { %9467 = vmatprep.subr.bf16.mxu0 %v12224_v17  ;;  %v12284_v17 = vld [vmem:[%s13234_s20 + $0x66c] ss:$16 sps:$4 sm:$0xff]  }
 0x624   : > { %9427 = vmatpush2.bf16.msra.mxu1 %v12219_v19  ;;  %v12279_v19 = vld [vmem:[%s13234_s20 + $0x468] ss:$16 sps:$4 sm:$0xff]  }
 0x625   : > { %9468 = vmatpush2.bf16.msra.mxu0 %v12222_v0  ;;  %9428 = vmatprep.subr.bf16.mxu1 %v12227_v30  ;;  %v12282_v0 = vld [vmem:[%s13234_s20 + $0x668] ss:$16 sps:$4 sm:$0xff]   ;;  %v12287_v30 = vld [vmem:[%s13234_s20 + $0x44c] ss:$16 sps:$4 sm:$0xff]  }
 0x626   : > { %9469 = vmatprep.subr.bf16.mxu0 %v12230_v31  ;;  %v12290_v31 = vld [vmem:[%s13234_s20 + $0x64c] ss:$16 sps:$4 sm:$0xff]  }
 0x628   : > { %9429 = vmatpush2.bf16.msra.mxu1 %v12225_v20  ;;  %v12285_v20 = vld [vmem:[%s13234_s20 + $0x448] ss:$16 sps:$4 sm:$0xff]  }
 0x629   : > { %9470 = vmatpush2.bf16.msra.mxu0 %v12228_v21  ;;  %9430 = vmatprep.subr.bf16.mxu1 %v12233_v28  ;;  %v12288_v21 = vld [vmem:[%s13234_s20 + $0x648] ss:$16 sps:$4 sm:$0xff]   ;;  %v12293_v28 = vld [vmem:[%s13234_s20 + $0x42c] ss:$16 sps:$4 sm:$0xff]  }
 0x62a   : > { %9471 = vmatprep.subr.bf16.mxu0 %v12236_v24  ;;  %v12296_v24 = vld [vmem:[%s13234_s20 + $0x62c] ss:$16 sps:$4 sm:$0xff]  }
 0x62c   : > { %9431 = vmatpush2.bf16.msra.mxu1 %v12231_v62  ;;  %v12291_v62 = vld [vmem:[%s13234_s20 + $0x428] ss:$16 sps:$4 sm:$0xff]  }
 0x62d   : > { %9472 = vmatpush2.bf16.msra.mxu0 %v12234_v57  ;;  %9432 = vmatprep.subr.bf16.mxu1 %v12239_v5  ;;  %v12294_v57 = vld [vmem:[%s13234_s20 + $0x628] ss:$16 sps:$4 sm:$0xff]   ;;  %v12299_v5 = vld [vmem:[%s13234_s20 + $0x40c] ss:$16 sps:$4 sm:$0xff]  }
 0x62e   : > { %9473 = vmatprep.subr.bf16.mxu0 %v12242_v63  ;;  %v12302_v63 = vld [vmem:[%s13234_s20 + $0x60c] ss:$16 sps:$4 sm:$0xff]  }
 0x630   : > { %9433 = vmatpush2.bf16.msra.mxu1 %v12237_v50  ;;  %v12297_v50 = vld [vmem:[%s13234_s20 + $0x408] ss:$16 sps:$4 sm:$0xff]  }
 0x631   : > { %9474 = vmatpush2.bf16.msra.mxu0 %v12240_v26  ;;  %9434 = vmatprep.subr.bf16.mxu1 %v12245_v33  ;;  %v12300_v26 = vld [vmem:[%s13234_s20 + $0x608] ss:$16 sps:$4 sm:$0xff]   ;;  %v12305_v33 = vld [vmem:[%s13234_s20 + $0x5ec] ss:$16 sps:$4 sm:$0xff]  }
 0x632   : > { %9475 = vmatprep.subr.bf16.mxu0 %v12248_v34  ;;  %v12308_v34 = vld [vmem:[%s13234_s20 + $0x7ec] ss:$16 sps:$4 sm:$0xff]  }
 0x634   : > { %9435 = vmatpush2.bf16.msra.mxu1 %v12243_v56  ;;  %v12303_v56 = vld [vmem:[%s13234_s20 + $0x5e8] ss:$16 sps:$4 sm:$0xff]  }
 0x635   : > { %9476 = vmatpush2.bf16.msra.mxu0 %v12246_v2  ;;  %9436 = vmatprep.subr.bf16.mxu1 %v12251_v48  ;;  %v12306_v2 = vld [vmem:[%s13234_s20 + $0x7e8] ss:$16 sps:$4 sm:$0xff]   ;;  %v12311_v48 = vld [vmem:[%s13234_s20 + $0x5cc] ss:$16 sps:$4 sm:$0xff]  }
 0x636   : > { %9477 = vmatprep.subr.bf16.mxu0 %v12254_v9  ;;  %v12314_v9 = vld [vmem:[%s13234_s20 + $0x7cc] ss:$16 sps:$4 sm:$0xff]  }
 0x638   : > { %9437 = vmatpush2.bf16.msra.mxu1 %v12249_v27  ;;  %v12309_v27 = vld [vmem:[%s13234_s20 + $0x5c8] ss:$16 sps:$4 sm:$0xff]  }
 0x639   : > { %9478 = vmatpush2.bf16.msra.mxu0 %v12252_v23  ;;  %9488 = vmatprep.subr.bf16.mxu1 %v12257_v40  ;;  %v12312_v23 = vld [vmem:[%s13234_s20 + $0x7c8] ss:$16 sps:$4 sm:$0xff]   ;;  %v12317_v40 = vld [vmem:[%s13234_s20 + $0x5ac] ss:$16 sps:$4 sm:$0xff]  }
 0x63a   : > { %9529 = vmatprep.subr.bf16.mxu0 %v12260_v59  ;;  %v12320_v59 = vld [vmem:[%s13234_s20 + $0x7ac] ss:$16 sps:$4 sm:$0xff]  }
 0x63b   : > { %v9194_v44 = vpop.f32.mrf.mxu1  ;;  %9439 = vmatmul.mubr.bf16.vlgmr.msra.gmra.mxu1 %v13455_v47 }
 0x63c   : > { %v9195_v49 = vadd.f32 %v9194_v44, %v13772_v3  ;;  %v9235_v53 = vpop.f32.mrf.mxu0  ;;  %9480 = vmatmul.mubr.bf16.vlgmr.msra.gmra.mxu0 %v13461_v51  ;;  %9489 = vmatpush1.bf16.msra.mxu1 %v12255_v41  ;;  %v12272_v51 = vld [vmem:[%s13234_s20 + $0x6ac] ss:$16 sps:$4 sm:$0xff]   ;;  %v12315_v41 = vld [vmem:[%s13234_s20 + $0x5a8] ss:$16 sps:$4 sm:$0xff]  }
 0x63d   : > { %9520 = vmatprep.mubr.bf16.mxu1 %v13519_v13  ;;  %9530 = vmatpush1.bf16.msra.mxu0 %v12258_v42  ;;  %v9196_v29 = vpop.f32.mrf.mxu1  ;;  %v12318_v42 = vld [vmem:[%s13234_s20 + $0x7a8] ss:$16 sps:$4 sm:$0xff]   ;;  %v12326_v44 = vld [vmem:[%s13234_s20 + $0x78c] ss:$16 sps:$4 sm:$0xff]  }
 0x63e   : > { %v13845_v60 = vadd.f32 %v9235_v53, %v9195_v49  ;;  %9561 = vmatprep.mubr.bf16.mxu0 %v13522_v15  ;;  %v9197_v47 = vadd.f32 %v9196_v29, %v13776_v45  ;;  %v9237_v3 = vpop.f32.mrf.mxu0  ;;  %9490 = vmatprep.subr.bf16.mxu1 %v12263_v10  ;;  %v12270_v15 = vld [vmem:[%s13234_s20 + $0x6a8] ss:$16 sps:$4 sm:$0xff]   ;;  %v12275_v45 = vld [vmem:[%s13234_s20 + $0x48c] ss:$16 sps:$4 sm:$0xff]  }
 0x63f   : > { %v9198_v52 = vpop.f32.mrf.mxu1  ;;  %9531 = vmatprep.subr.bf16.mxu0 %v12266_v54  ;;  %v12323_v10 = vld [vmem:[%s13234_s20 + $0x58c] ss:$16 sps:$4 sm:$0xff]   ;;  %v12321_v54 = vld [vmem:[%s13234_s20 + $0x588] ss:$16 sps:$4 sm:$0xff]  }
 0x640   : > { %v13850_v13 = vadd.f32 %v9237_v3, %v9197_v47  ;;  %v9239_v32 = vpop.f32.mrf.mxu0  ;;  %9491 = vmatpush1.bf16.msra.mxu1 %v12261_v55  ;;  %v12324_v49 = vld [vmem:[%s13234_s20 + $0x788] ss:$16 sps:$4 sm:$0xff]   ;;  %v12329_v53 = vld [vmem:[%s13234_s20 + $0x56c] ss:$16 sps:$4 sm:$0xff]  }
 0x641   : > { %9532 = vmatpush1.bf16.msra.mxu0 %v12264_v58  ;;  %v9199_v8 = vpop.f32.mrf.mxu1  ;;  %9492 = vmatprep.subr.bf16.mxu1 %v12269_v18  ;;  %v12332_v55 = vld [vmem:[%s13234_s20 + $0x76c] ss:$16 sps:$4 sm:$0xff]   ;;  %v12327_v29 = vld [vmem:[%s13234_s20 + $0x568] ss:$16 sps:$4 sm:$0xff]  }
 0x642   : > { %v9240_v11 = vpop.f32.mrf.mxu0  ;;  %9533 = vmatprep.subr.bf16.mxu0 %v12272_v51  ;;  %v12330_v58 = vld [vmem:[%s13234_s20 + $0x768] ss:$16 sps:$4 sm:$0xff]   ;;  %v12335_v18 = vld [vmem:[%s13234_s20 + $0x54c] ss:$16 sps:$4 sm:$0xff]  }
 0x643   : > { %v12338_v47 = vld [vmem:[%s13234_s20 + $0x74c] ss:$16 sps:$4 sm:$0xff]   ;;  %v12333_v3 = vld [vmem:[%s13234_s20 + $0x548] ss:$16 sps:$4 sm:$0xff]  }
 0x644   : > { %9493 = vmatpush1.bf16.msra.mxu1 %v12267_v6  ;;  %v12336_v51 = vld [vmem:[%s13234_s20 + $0x748] ss:$16 sps:$4 sm:$0xff]   ;;  %v12341_v52 = vld [vmem:[%s13234_s20 + $0x52c] ss:$16 sps:$4 sm:$0xff]  }
 0x645   : > { %9534 = vmatpush1.bf16.msra.mxu0 %v12270_v15  ;;  %9494 = vmatprep.subr.bf16.mxu1 %v12275_v45  ;;  %v12344_v32 = vld [vmem:[%s13234_s20 + $0x72c] ss:$16 sps:$4 sm:$0xff]   ;;  %v12339_v6 = vld [vmem:[%s13234_s20 + $0x528] ss:$16 sps:$4 sm:$0xff]  }
 0x646   : > { %9535 = vmatprep.subr.bf16.mxu0 %v12278_v46  ;;  %v12342_v8 = vld [vmem:[%s13234_s20 + $0x728] ss:$16 sps:$4 sm:$0xff]   ;;  %v12347_v15 = vld [vmem:[%s13234_s20 + $0x50c] ss:$16 sps:$4 sm:$0xff]  }
 0x647   : > { %v12350_v45 = vld [vmem:[%s13234_s20 + $0x70c] ss:$16 sps:$4 sm:$0xff]   ;;  %v12345_v11 = vld [vmem:[%s13234_s20 + $0x508] ss:$16 sps:$4 sm:$0xff]  }
 0x648   : > { %9495 = vmatpush1.bf16.msra.mxu1 %v12273_v22  ;;  %v12348_v46 = vld [vmem:[%s13234_s20 + $0x708] ss:$16 sps:$4 sm:$0xff]   ;;  %v12353_v22 = vld [vmem:[%s13234_s20 + $0x8ec] ss:$16 sps:$4 sm:$0xff]  }
 0x649   : > { %9536 = vmatpush1.bf16.msra.mxu0 %v12276_v25  ;;  %9496 = vmatprep.subr.bf16.mxu1 %v12281_v16  ;;  %v12356_v25 = vld [vmem:[%s13234_s20 + $0xaec] ss:$16 sps:$4 sm:$0xff]   ;;  %v12351_v16 = vld [vmem:[%s13234_s20 + $0x8e8] ss:$16 sps:$4 sm:$0xff]  }
 0x64a   : > { %9537 = vmatprep.subr.bf16.mxu0 %v12284_v17  ;;  %v12354_v17 = vld [vmem:[%s13234_s20 + $0xae8] ss:$16 sps:$4 sm:$0xff]  }
 0x64c   : > { %9497 = vmatpush1.bf16.msra.mxu1 %v12279_v19  ;;  %v12359_v19 = vld [vmem:[%s13234_s20 + $0x8cc] ss:$16 sps:$4 sm:$0xff]  }
 0x64d   : > { %9538 = vmatpush1.bf16.msra.mxu0 %v12282_v0  ;;  %9498 = vmatprep.subr.bf16.mxu1 %v12287_v30  ;;  %v12362_v30 = vld [vmem:[%s13234_s20 + $0xacc] ss:$16 sps:$4 sm:$0xff]  }
 0x64e   : > { %9539 = vmatprep.subr.bf16.mxu0 %v12290_v31 }
 0x650   : > { %9499 = vmatpush1.bf16.msra.mxu1 %v12285_v20 }
 0x651   : > { %9540 = vmatpush1.bf16.msra.mxu0 %v12288_v21  ;;  %9500 = vmatprep.subr.bf16.mxu1 %v12293_v28  ;;  %v12357_v21 = vld [vmem:[%s13234_s20 + $0x8c8] ss:$16 sps:$4 sm:$0xff]  }
 0x652   : > { %9541 = vmatprep.subr.bf16.mxu0 %v12296_v24  ;;  %v12360_v24 = vld [vmem:[%s13234_s20 + $0xac8] ss:$16 sps:$4 sm:$0xff]  }
 0x654   : > { %9501 = vmatpush1.bf16.msra.mxu1 %v12291_v62  ;;  %v12365_v62 = vld [vmem:[%s13234_s20 + $0x8ac] ss:$16 sps:$4 sm:$0xff]  }
 0x655   : > { %9542 = vmatpush1.bf16.msra.mxu0 %v12294_v57  ;;  %9502 = vmatprep.subr.bf16.mxu1 %v12299_v5 }
 0x656   : > { %9543 = vmatprep.subr.bf16.mxu0 %v12302_v63 }
 0x658   : > { %9503 = vmatpush1.bf16.msra.mxu1 %v12297_v50  ;;  %v12363_v50 = vld [vmem:[%s13234_s20 + $0x8a8] ss:$16 sps:$4 sm:$0xff]  }
 0x659   : > { %9544 = vmatpush1.bf16.msra.mxu0 %v12300_v26  ;;  %9504 = vmatprep.subr.bf16.mxu1 %v12305_v33 }
 0x65a   : > { %9545 = vmatprep.subr.bf16.mxu0 %v12308_v34  ;;  %v12374_v34 = vld [vmem:[%s13234_s20 + $0xa8c] ss:$16 sps:$4 sm:$0xff]  }
 0x65c   : > { %9505 = vmatpush2.bf16.msra.mxu1 %v12303_v56  ;;  %v12369_v56 = vld [vmem:[%s13234_s20 + $0x888] ss:$16 sps:$4 sm:$0xff]  }
 0x65d   : > { %9546 = vmatpush2.bf16.msra.mxu0 %v12306_v2  ;;  %9506 = vmatprep.subr.bf16.mxu1 %v12311_v48  ;;  %v12372_v2 = vld [vmem:[%s13234_s20 + $0xa88] ss:$16 sps:$4 sm:$0xff]   ;;  %v12377_v48 = vld [vmem:[%s13234_s20 + $0x86c] ss:$16 sps:$4 sm:$0xff]  }
 0x65e   : > { %9547 = vmatprep.subr.bf16.mxu0 %v12314_v9  ;;  %v12380_v9 = vld [vmem:[%s13234_s20 + $0xa6c] ss:$16 sps:$4 sm:$0xff]  }
 0x660   : > { %9507 = vmatpush2.bf16.msra.mxu1 %v12309_v27  ;;  %v12375_v27 = vld [vmem:[%s13234_s20 + $0x868] ss:$16 sps:$4 sm:$0xff]  }
 0x661   : > { %9548 = vmatpush2.bf16.msra.mxu0 %v12312_v23  ;;  %9508 = vmatprep.subr.bf16.mxu1 %v12317_v40  ;;  %v12378_v23 = vld [vmem:[%s13234_s20 + $0xa68] ss:$16 sps:$4 sm:$0xff]   ;;  %v12383_v40 = vld [vmem:[%s13234_s20 + $0x84c] ss:$16 sps:$4 sm:$0xff]  }
 0x662   : > { %9549 = vmatprep.subr.bf16.mxu0 %v12320_v59  ;;  %v12386_v59 = vld [vmem:[%s13234_s20 + $0xa4c] ss:$16 sps:$4 sm:$0xff]  }
 0x664   : > { %9509 = vmatpush2.bf16.msra.mxu1 %v12315_v41  ;;  %v12381_v41 = vld [vmem:[%s13234_s20 + $0x848] ss:$16 sps:$4 sm:$0xff]  }
 0x665   : > { %9550 = vmatpush2.bf16.msra.mxu0 %v12318_v42  ;;  %9510 = vmatprep.subr.bf16.mxu1 %v12323_v10  ;;  %v12384_v42 = vld [vmem:[%s13234_s20 + $0xa48] ss:$16 sps:$4 sm:$0xff]   ;;  %v12389_v10 = vld [vmem:[%s13234_s20 + $0x82c] ss:$16 sps:$4 sm:$0xff]  }
 0x666   : > { %9551 = vmatprep.subr.bf16.mxu0 %v12326_v44  ;;  %v12392_v44 = vld [vmem:[%s13234_s20 + $0xa2c] ss:$16 sps:$4 sm:$0xff]  }
 0x668   : > { %9511 = vmatpush2.bf16.msra.mxu1 %v12321_v54  ;;  %v12387_v54 = vld [vmem:[%s13234_s20 + $0x828] ss:$16 sps:$4 sm:$0xff]  }
 0x669   : > { %9552 = vmatpush2.bf16.msra.mxu0 %v12324_v49  ;;  %9512 = vmatprep.subr.bf16.mxu1 %v12329_v53  ;;  %v12390_v49 = vld [vmem:[%s13234_s20 + $0xa28] ss:$16 sps:$4 sm:$0xff]   ;;  %v12395_v53 = vld [vmem:[%s13234_s20 + $0x80c] ss:$16 sps:$4 sm:$0xff]  }
 0x66a   : > { %9553 = vmatprep.subr.bf16.mxu0 %v12332_v55  ;;  %v12398_v55 = vld [vmem:[%s13234_s20 + $0xa0c] ss:$16 sps:$4 sm:$0xff]  }
 0x66c   : > { %9513 = vmatpush2.bf16.msra.mxu1 %v12327_v29  ;;  %v12393_v29 = vld [vmem:[%s13234_s20 + $0x808] ss:$16 sps:$4 sm:$0xff]  }
 0x66d   : > { %9554 = vmatpush2.bf16.msra.mxu0 %v12330_v58  ;;  %9514 = vmatprep.subr.bf16.mxu1 %v12335_v18  ;;  %v12396_v58 = vld [vmem:[%s13234_s20 + $0xa08] ss:$16 sps:$4 sm:$0xff]   ;;  %v12401_v18 = vld [vmem:[%s13234_s20 + $0x9ec] ss:$16 sps:$4 sm:$0xff]  }
 0x66e   : > { %9555 = vmatprep.subr.bf16.mxu0 %v12338_v47  ;;  %v12404_v47 = vld [vmem:[%s13234_s20 + $0xbec] ss:$16 sps:$4 sm:$0xff]  }
 0x670   : > { %9515 = vmatpush2.bf16.msra.mxu1 %v12333_v3  ;;  %v12399_v3 = vld [vmem:[%s13234_s20 + $0x9e8] ss:$16 sps:$4 sm:$0xff]  }
 0x671   : > { %9556 = vmatpush2.bf16.msra.mxu0 %v12336_v51  ;;  %9516 = vmatprep.subr.bf16.mxu1 %v12341_v52  ;;  %v12402_v51 = vld [vmem:[%s13234_s20 + $0xbe8] ss:$16 sps:$4 sm:$0xff]   ;;  %v12407_v52 = vld [vmem:[%s13234_s20 + $0x9cc] ss:$16 sps:$4 sm:$0xff]  }
 0x672   : > { %9557 = vmatprep.subr.bf16.mxu0 %v12344_v32  ;;  %v12410_v32 = vld [vmem:[%s13234_s20 + $0xbcc] ss:$16 sps:$4 sm:$0xff]  }
 0x674   : > { %9517 = vmatpush2.bf16.msra.mxu1 %v12339_v6  ;;  %v12405_v6 = vld [vmem:[%s13234_s20 + $0x9c8] ss:$16 sps:$4 sm:$0xff]  }
 0x675   : > { %9558 = vmatpush2.bf16.msra.mxu0 %v12342_v8  ;;  %9518 = vmatprep.subr.bf16.mxu1 %v12347_v15  ;;  %v12408_v8 = vld [vmem:[%s13234_s20 + $0xbc8] ss:$16 sps:$4 sm:$0xff]   ;;  %v12413_v15 = vld [vmem:[%s13234_s20 + $0x9ac] ss:$16 sps:$4 sm:$0xff]  }
 0x676   : > { %9559 = vmatprep.subr.bf16.mxu0 %v12350_v45  ;;  %v12416_v45 = vld [vmem:[%s13234_s20 + $0xbac] ss:$16 sps:$4 sm:$0xff]  }
 0x678   : > { %9519 = vmatpush2.bf16.msra.mxu1 %v12345_v11  ;;  %v12411_v11 = vld [vmem:[%s13234_s20 + $0x9a8] ss:$16 sps:$4 sm:$0xff]  }
 0x679   : > { %9560 = vmatpush2.bf16.msra.mxu0 %v12348_v46  ;;  %9570 = vmatprep.subr.bf16.mxu1 %v12353_v22  ;;  %v12414_v46 = vld [vmem:[%s13234_s20 + $0xba8] ss:$16 sps:$4 sm:$0xff]   ;;  %v12419_v22 = vld [vmem:[%s13234_s20 + $0x98c] ss:$16 sps:$4 sm:$0xff]  }
 0x67a   : > { %9611 = vmatprep.subr.bf16.mxu0 %v12356_v25  ;;  %v12422_v25 = vld [vmem:[%s13234_s20 + $0xb8c] ss:$16 sps:$4 sm:$0xff]  }
 0x67b   : > { %v9276_v0 = vpop.f32.mrf.mxu1  ;;  %9521 = vmatmul.mubr.bf16.vlgmr.msra.gmra.mxu1 %v13572_v43 }
 0x67c   : > { %v9277_v31 = vadd.f32 %v9276_v0, %v13845_v60  ;;  %v9317_v20 = vpop.f32.mrf.mxu0  ;;  %9562 = vmatmul.mubr.bf16.vlgmr.msra.gmra.mxu0 %v13577_v61  ;;  %9571 = vmatpush1.bf16.msra.mxu1 %v12351_v16  ;;  %v12368_v61 = vld [vmem:[%s13234_s20 + $0xaac] ss:$16 sps:$4 sm:$0xff]   ;;  %v12417_v16 = vld [vmem:[%s13234_s20 + $0x988] ss:$16 sps:$4 sm:$0xff]  }
 0x67d   : > { %9602 = vmatprep.mubr.bf16.mxu1 %v13574_v36  ;;  %9612 = vmatpush1.bf16.msra.mxu0 %v12354_v17  ;;  %v9278_v28 = vpop.f32.mrf.mxu1  ;;  %v12420_v17 = vld [vmem:[%s13234_s20 + $0xb88] ss:$16 sps:$4 sm:$0xff]   ;;  %v12428_v0 = vld [vmem:[%s13234_s20 + $0xb6c] ss:$16 sps:$4 sm:$0xff]  }
 0x67e   : > { %v13919_v57 = vadd.f32 %v9317_v20, %v9277_v31  ;;  %9643 = vmatprep.mubr.bf16.mxu0 %v13579_v37  ;;  %v9279_v43 = vadd.f32 %v9278_v28, %v13850_v13  ;;  %v9319_v60 = vpop.f32.mrf.mxu0  ;;  %9572 = vmatprep.subr.bf16.mxu1 %v12359_v19  ;;  %v12366_v37 = vld [vmem:[%s13234_s20 + $0xaa8] ss:$16 sps:$4 sm:$0xff]   ;;  %v12371_v13 = vld [vmem:[%s13234_s20 + $0x88c] ss:$16 sps:$4 sm:$0xff]  }
 0x67f   : > { %v9280_v5 = vpop.f32.mrf.mxu1  ;;  %9613 = vmatprep.subr.bf16.mxu0 %v12362_v30  ;;  %v12425_v19 = vld [vmem:[%s13234_s20 + $0x96c] ss:$16 sps:$4 sm:$0xff]   ;;  %v12423_v30 = vld [vmem:[%s13234_s20 + $0x968] ss:$16 sps:$4 sm:$0xff]  }
 0x680   : > { %v13924_v36 = vadd.f32 %v9319_v60, %v9279_v43  ;;  %v9321_v63 = vpop.f32.mrf.mxu0  ;;  %9573 = vmatpush1.bf16.msra.mxu1 %v12357_v21  ;;  %v12426_v31 = vld [vmem:[%s13234_s20 + $0xb68] ss:$16 sps:$4 sm:$0xff]   ;;  %v12431_v20 = vld [vmem:[%s13234_s20 + $0x94c] ss:$16 sps:$4 sm:$0xff]  }
 0x681   : > { %9614 = vmatpush1.bf16.msra.mxu0 %v12360_v24  ;;  %v9281_v26 = vpop.f32.mrf.mxu1  ;;  %9574 = vmatprep.subr.bf16.mxu1 %v12365_v62  ;;  %v12434_v21 = vld [vmem:[%s13234_s20 + $0xb4c] ss:$16 sps:$4 sm:$0xff]   ;;  %v12429_v28 = vld [vmem:[%s13234_s20 + $0x948] ss:$16 sps:$4 sm:$0xff]  }
 0x682   : > { %v9322_v33 = vpop.f32.mrf.mxu0  ;;  %9615 = vmatprep.subr.bf16.mxu0 %v12368_v61  ;;  %v12432_v24 = vld [vmem:[%s13234_s20 + $0xb48] ss:$16 sps:$4 sm:$0xff]   ;;  %v12437_v62 = vld [vmem:[%s13234_s20 + $0x92c] ss:$16 sps:$4 sm:$0xff]  }
 0x683   : > { %v12440_v43 = vld [vmem:[%s13234_s20 + $0xb2c] ss:$16 sps:$4 sm:$0xff]   ;;  %v12435_v60 = vld [vmem:[%s13234_s20 + $0x928] ss:$16 sps:$4 sm:$0xff]  }
 0x684   : > { %9575 = vmatpush1.bf16.msra.mxu1 %v12363_v50  ;;  %v12438_v61 = vld [vmem:[%s13234_s20 + $0xb28] ss:$16 sps:$4 sm:$0xff]   ;;  %v12443_v5 = vld [vmem:[%s13234_s20 + $0x90c] ss:$16 sps:$4 sm:$0xff]  }
 0x685   : > { %9616 = vmatpush1.bf16.msra.mxu0 %v12366_v37  ;;  %9576 = vmatprep.subr.bf16.mxu1 %v12371_v13  ;;  %v12446_v63 = vld [vmem:[%s13234_s20 + $0xb0c] ss:$16 sps:$4 sm:$0xff]   ;;  %v12441_v50 = vld [vmem:[%s13234_s20 + $0x908] ss:$16 sps:$4 sm:$0xff]  }
 0x686   : > { %9617 = vmatprep.subr.bf16.mxu0 %v12374_v34  ;;  %v12444_v26 = vld [vmem:[%s13234_s20 + $0xb08] ss:$16 sps:$4 sm:$0xff]   ;;  %v12449_v37 = vld [vmem:[%s13234_s20 + $0xcec] ss:$16 sps:$4 sm:$0xff]  }
 0x687   : > { %v12452_v13 = vld [vmem:[%s13234_s20 + $0xeec] ss:$16 sps:$4 sm:$0xff]   ;;  %v12447_v33 = vld [vmem:[%s13234_s20 + $0xce8] ss:$16 sps:$4 sm:$0xff]  }
 0x688   : > { %9577 = vmatpush1.bf16.msra.mxu1 %v12369_v56  ;;  %v12450_v34 = vld [vmem:[%s13234_s20 + $0xee8] ss:$16 sps:$4 sm:$0xff]   ;;  %v12455_v56 = vld [vmem:[%s13234_s20 + $0xccc] ss:$16 sps:$4 sm:$0xff]  }
 0x689   : > { %9618 = vmatpush1.bf16.msra.mxu0 %v12372_v2  ;;  %9578 = vmatprep.subr.bf16.mxu1 %v12377_v48  ;;  %v12458_v48 = vld [vmem:[%s13234_s20 + $0xecc] ss:$16 sps:$4 sm:$0xff]  }
 0x68a   : > { %9619 = vmatprep.subr.bf16.mxu0 %v12380_v9 }
 0x68c   : > { %9579 = vmatpush1.bf16.msra.mxu1 %v12375_v27 }
 0x68d   : > { %9620 = vmatpush1.bf16.msra.mxu0 %v12378_v23  ;;  %9580 = vmatprep.subr.bf16.mxu1 %v12383_v40  ;;  %v12453_v23 = vld [vmem:[%s13234_s20 + $0xcc8] ss:$16 sps:$4 sm:$0xff]  }
 0x68e   : > { %9621 = vmatprep.subr.bf16.mxu0 %v12386_v59  ;;  %v12456_v59 = vld [vmem:[%s13234_s20 + $0xec8] ss:$16 sps:$4 sm:$0xff]  }
 0x690   : > { %9581 = vmatpush1.bf16.msra.mxu1 %v12381_v41  ;;  %v12461_v41 = vld [vmem:[%s13234_s20 + $0xcac] ss:$16 sps:$4 sm:$0xff]  }
 0x691   : > { %9622 = vmatpush1.bf16.msra.mxu0 %v12384_v42  ;;  %9582 = vmatprep.subr.bf16.mxu1 %v12389_v10  ;;  %v12459_v10 = vld [vmem:[%s13234_s20 + $0xca8] ss:$16 sps:$4 sm:$0xff]  }
 0x692   : > { %9623 = vmatprep.subr.bf16.mxu0 %v12392_v44 }
 0x694   : > { %9583 = vmatpush1.bf16.msra.mxu1 %v12387_v54  ;;  %v12462_v54 = vld [vmem:[%s13234_s20 + $0xea8] ss:$16 sps:$4 sm:$0xff]  }
 0x695   : > { %9624 = vmatpush1.bf16.msra.mxu0 %v12390_v49  ;;  %9584 = vmatprep.subr.bf16.mxu1 %v12395_v53  ;;  %v12470_v53 = vld [vmem:[%s13234_s20 + $0xe8c] ss:$16 sps:$4 sm:$0xff]  }
 0x696   : > { %9625 = vmatprep.subr.bf16.mxu0 %v12398_v55  ;;  %v12465_v55 = vld [vmem:[%s13234_s20 + $0xc88] ss:$16 sps:$4 sm:$0xff]  }
 0x698   : > { %9585 = vmatpush1.bf16.msra.mxu1 %v12393_v29  ;;  %v12468_v29 = vld [vmem:[%s13234_s20 + $0xe88] ss:$16 sps:$4 sm:$0xff]  }
 0x699   : > { %9626 = vmatpush1.bf16.msra.mxu0 %v12396_v58  ;;  %9586 = vmatprep.subr.bf16.mxu1 %v12401_v18  ;;  %v12473_v58 = vld [vmem:[%s13234_s20 + $0xc6c] ss:$16 sps:$4 sm:$0xff]  }
 0x69a   : > { %9627 = vmatprep.subr.bf16.mxu0 %v12404_v47  ;;  %v12476_v18 = vld [vmem:[%s13234_s20 + $0xe6c] ss:$16 sps:$4 sm:$0xff]   ;;  %v12471_v47 = vld [vmem:[%s13234_s20 + $0xc68] ss:$16 sps:$4 sm:$0xff]  }
 0x69c   : > { %9587 = vmatpush2.bf16.msra.mxu1 %v12399_v3  ;;  %v12474_v3 = vld [vmem:[%s13234_s20 + $0xe68] ss:$16 sps:$4 sm:$0xff]  }
 0x69d   : > { %9628 = vmatpush2.bf16.msra.mxu0 %v12402_v51  ;;  %9588 = vmatprep.subr.bf16.mxu1 %v12407_v52  ;;  %v12479_v51 = vld [vmem:[%s13234_s20 + $0xc4c] ss:$16 sps:$4 sm:$0xff]  }
 0x69e   : > { %9629 = vmatprep.subr.bf16.mxu0 %v12410_v32  ;;  %v12482_v52 = vld [vmem:[%s13234_s20 + $0xe4c] ss:$16 sps:$4 sm:$0xff]   ;;  %v12477_v32 = vld [vmem:[%s13234_s20 + $0xc48] ss:$16 sps:$4 sm:$0xff]  }
 0x6a0   : > { %9589 = vmatpush2.bf16.msra.mxu1 %v12405_v6  ;;  %v12480_v6 = vld [vmem:[%s13234_s20 + $0xe48] ss:$16 sps:$4 sm:$0xff]  }
 0x6a1   : > { %9630 = vmatpush2.bf16.msra.mxu0 %v12408_v8  ;;  %9590 = vmatprep.subr.bf16.mxu1 %v12413_v15  ;;  %v12485_v8 = vld [vmem:[%s13234_s20 + $0xc2c] ss:$16 sps:$4 sm:$0xff]  }
 0x6a2   : > { %9631 = vmatprep.subr.bf16.mxu0 %v12416_v45  ;;  %v12488_v15 = vld [vmem:[%s13234_s20 + $0xe2c] ss:$16 sps:$4 sm:$0xff]   ;;  %v12483_v45 = vld [vmem:[%s13234_s20 + $0xc28] ss:$16 sps:$4 sm:$0xff]  }
 0x6a4   : > { %9591 = vmatpush2.bf16.msra.mxu1 %v12411_v11  ;;  %v12486_v11 = vld [vmem:[%s13234_s20 + $0xe28] ss:$16 sps:$4 sm:$0xff]  }
 0x6a5   : > { %9632 = vmatpush2.bf16.msra.mxu0 %v12414_v46  ;;  %9592 = vmatprep.subr.bf16.mxu1 %v12419_v22  ;;  %v12491_v46 = vld [vmem:[%s13234_s20 + $0xc0c] ss:$16 sps:$4 sm:$0xff]  }
 0x6a6   : > { %9633 = vmatprep.subr.bf16.mxu0 %v12422_v25  ;;  %v12494_v22 = vld [vmem:[%s13234_s20 + $0xe0c] ss:$16 sps:$4 sm:$0xff]   ;;  %v12489_v25 = vld [vmem:[%s13234_s20 + $0xc08] ss:$16 sps:$4 sm:$0xff]  }
 0x6a8   : > { %9593 = vmatpush2.bf16.msra.mxu1 %v12417_v16  ;;  %v12492_v16 = vld [vmem:[%s13234_s20 + $0xe08] ss:$16 sps:$4 sm:$0xff]  }
 0x6a9   : > { %9634 = vmatpush2.bf16.msra.mxu0 %v12420_v17  ;;  %9594 = vmatprep.subr.bf16.mxu1 %v12425_v19  ;;  %v12497_v17 = vld [vmem:[%s13234_s20 + $0xdec] ss:$16 sps:$4 sm:$0xff]  }
 0x6aa   : > { %9635 = vmatprep.subr.bf16.mxu0 %v12428_v0  ;;  %v12500_v19 = vld [vmem:[%s13234_s20 + $0xfec] ss:$16 sps:$4 sm:$0xff]   ;;  %v12495_v0 = vld [vmem:[%s13234_s20 + $0xde8] ss:$16 sps:$4 sm:$0xff]  }
 0x6ac   : > { %9595 = vmatpush2.bf16.msra.mxu1 %v12423_v30  ;;  %v12498_v30 = vld [vmem:[%s13234_s20 + $0xfe8] ss:$16 sps:$4 sm:$0xff]  }
 0x6ad   : > { %9636 = vmatpush2.bf16.msra.mxu0 %v12426_v31  ;;  %9596 = vmatprep.subr.bf16.mxu1 %v12431_v20  ;;  %v12503_v31 = vld [vmem:[%s13234_s20 + $0xdcc] ss:$16 sps:$4 sm:$0xff]  }
 0x6ae   : > { %9637 = vmatprep.subr.bf16.mxu0 %v12434_v21  ;;  %v12506_v20 = vld [vmem:[%s13234_s20 + $0xfcc] ss:$16 sps:$4 sm:$0xff]   ;;  %v12501_v21 = vld [vmem:[%s13234_s20 + $0xdc8] ss:$16 sps:$4 sm:$0xff]  }
 0x6b0   : > { %9597 = vmatpush2.bf16.msra.mxu1 %v12429_v28  ;;  %v12504_v28 = vld [vmem:[%s13234_s20 + $0xfc8] ss:$16 sps:$4 sm:$0xff]  }
 0x6b1   : > { %9638 = vmatpush2.bf16.msra.mxu0 %v12432_v24  ;;  %9598 = vmatprep.subr.bf16.mxu1 %v12437_v62  ;;  %v12509_v24 = vld [vmem:[%s13234_s20 + $0xdac] ss:$16 sps:$4 sm:$0xff]  }
 0x6b2   : > { %9639 = vmatprep.subr.bf16.mxu0 %v12440_v43  ;;  %v12512_v62 = vld [vmem:[%s13234_s20 + $0xfac] ss:$16 sps:$4 sm:$0xff]   ;;  %v12507_v43 = vld [vmem:[%s13234_s20 + $0xda8] ss:$16 sps:$4 sm:$0xff]  }
 0x6b4   : > { %9599 = vmatpush2.bf16.msra.mxu1 %v12435_v60  ;;  %v12510_v60 = vld [vmem:[%s13234_s20 + $0xfa8] ss:$16 sps:$4 sm:$0xff]  }
 0x6b5   : > { %9640 = vmatpush2.bf16.msra.mxu0 %v12438_v61  ;;  %9600 = vmatprep.subr.bf16.mxu1 %v12443_v5  ;;  %v12515_v61 = vld [vmem:[%s13234_s20 + $0xd8c] ss:$16 sps:$4 sm:$0xff]  }
 0x6b6   : > { %9641 = vmatprep.subr.bf16.mxu0 %v12446_v63  ;;  %v12518_v5 = vld [vmem:[%s13234_s20 + $0xf8c] ss:$16 sps:$4 sm:$0xff]   ;;  %v12513_v63 = vld [vmem:[%s13234_s20 + $0xd88] ss:$16 sps:$4 sm:$0xff]  }
 0x6b8   : > { %9601 = vmatpush2.bf16.msra.mxu1 %v12441_v50  ;;  %v12516_v50 = vld [vmem:[%s13234_s20 + $0xf88] ss:$16 sps:$4 sm:$0xff]  }
 0x6b9   : > { %9642 = vmatpush2.bf16.msra.mxu0 %v12444_v26  ;;  %9652 = vmatprep.subr.bf16.mxu1 %v12449_v37  ;;  %v12521_v26 = vld [vmem:[%s13234_s20 + $0xd6c] ss:$16 sps:$4 sm:$0xff]  }
 0x6ba   : > { %9693 = vmatprep.subr.bf16.mxu0 %v12452_v13  ;;  %v12524_v37 = vld [vmem:[%s13234_s20 + $0xf6c] ss:$16 sps:$4 sm:$0xff]   ;;  %v12519_v13 = vld [vmem:[%s13234_s20 + $0xd68] ss:$16 sps:$4 sm:$0xff]  }
 0x6bb   : > { %v9358_v2 = vpop.f32.mrf.mxu1  ;;  %9603 = vmatmul.mubr.bf16.vlgmr.msra.gmra.mxu1 %v13678_v39 }
 0x6bc   : > { %v9359_v9 = vadd.f32 %v9358_v2, %v13919_v57  ;;  %v9399_v27 = vpop.f32.mrf.mxu0  ;;  %9644 = vmatmul.mubr.bf16.vlgmr.msra.gmra.mxu0 %v13681_v38  ;;  %9653 = vmatpush1.bf16.msra.mxu1 %v12447_v33  ;;  %v12464_v38 = vld [vmem:[%s13234_s20 + $0xeac] ss:$16 sps:$4 sm:$0xff]   ;;  %v12522_v33 = vld [vmem:[%s13234_s20 + $0xf68] ss:$16 sps:$4 sm:$0xff]  }
 0x6bd   : > { %9684 = vmatprep.mubr.bf16.mxu1 %v13684_v7  ;;  %9694 = vmatpush1.bf16.msra.mxu0 %v12450_v34  ;;  %v13991_v40 = vpop.f32.mrf.mxu1  ;;  %v12527_v34 = vld [vmem:[%s13234_s20 + $0xd4c] ss:$16 sps:$4 sm:$0xff]   ;;  %v12525_v2 = vld [vmem:[%s13234_s20 + $0xd48] ss:$16 sps:$4 sm:$0xff]  }
 0x6be   : > { %v13995_v39 = vadd.f32 %v9399_v27, %v9359_v9  ;;  %9725 = vmatprep.mubr.bf16.mxu0 %v13688_v35  ;;  %v13998_v57 = vpop.f32.mrf.mxu0  ;;  %9654 = vmatprep.subr.bf16.mxu1 %v12455_v56  ;;  %v12467_v35 = vld [vmem:[%s13234_s20 + $0xc8c] ss:$16 sps:$4 sm:$0xff]  }
 0x6bf   : > { %v9362_v42 = vpop.f32.mrf.mxu1  ;;  %9695 = vmatprep.subr.bf16.mxu0 %v12458_v48  ;;  %v12530_v56 = vld [vmem:[%s13234_s20 + $0xf4c] ss:$16 sps:$4 sm:$0xff]   ;;  %v12528_v48 = vld [vmem:[%s13234_s20 + $0xf48] ss:$16 sps:$4 sm:$0xff]  }
 0x6c0   : > { %v9403_v7 = vpop.f32.mrf.mxu0  ;;  %9655 = vmatpush1.bf16.msra.mxu1 %v12453_v23  ;;  %v12533_v9 = vld [vmem:[%s13234_s20 + $0xd2c] ss:$16 sps:$4 sm:$0xff]   ;;  %v9361_v23 = vadd.f32 %v13991_v40, %v13924_v36  ;;  %v12575_v40 = vld [vmem:[%s13240_s13] sm:$0xf] }
 0x6c1   : > { %9696 = vmatpush1.bf16.msra.mxu0 %v12456_v59  ;;  %v9363_v44 = vpop.f32.mrf.mxu1  ;;  %9656 = vmatprep.subr.bf16.mxu1 %v12461_v41  ;;  %v12536_v27 = vld [vmem:[%s13234_s20 + $0xf2c] ss:$16 sps:$4 sm:$0xff]   ;;  %v12531_v59 = vld [vmem:[%s13234_s20 + $0xd28] ss:$16 sps:$4 sm:$0xff]  }
 0x6c2   : > { %v9404_v49 = vpop.f32.mrf.mxu0  ;;  %9697 = vmatprep.subr.bf16.mxu0 %v12464_v38  ;;  %v12534_v41 = vld [vmem:[%s13234_s20 + $0xf28] ss:$16 sps:$4 sm:$0xff]   ;;  %v12539_v38 = vld [vmem:[%s13234_s20 + $0xd0c] ss:$16 sps:$4 sm:$0xff]   ;;  %v9402_v7 = vadd.f32 %v13998_v57, %v9361_v23  ;;  %v6513_v57 = vrot.slane %v12575_v40, %v13265_v4 }
 0x6c3   : > { %v12542_v42 = vld [vmem:[%s13234_s20 + $0xf0c] ss:$16 sps:$4 sm:$0xff]   ;;  %v12540_v44 = vld [vmem:[%s13234_s20 + $0xf08] ss:$16 sps:$4 sm:$0xff]   ;;  %v12544_v49 = vld [vmem:[%s13242_s14 + $0x38] sm:$0xff]  }
 0x6c4   : > { %9657 = vmatpush1.bf16.msra.mxu1 %v12459_v10  ;;  %v12537_v10 = vld [vmem:[%s13234_s20 + $0xd08] ss:$16 sps:$4 sm:$0xff]   ;;  %v9735_v36 = vmax.f32 %v9402_v7, 0.0 }
 0x6c5   : > { %9698 = vmatpush1.bf16.msra.mxu0 %v12462_v54  ;;  %9658 = vmatprep.subr.bf16.mxu1 %v12467_v35  ;;  %v12543_v54 = vld [vmem:[%s13242_s14 + $0x78] sm:$0xff]   ;;  %v6509_v35 = vrot.slane %v12575_v40, %v13259_v1  ;;  %v12573_v7 = vld [vmem:[%s13242_s14 + $0xc0] sm:$0xff]  }
 0x6c6   : > { %9699 = vmatprep.subr.bf16.mxu0 %v12470_v53  ;;  %v12545_v53 = vld [vmem:[%s13242_s14 + $0x70] sm:$0xff]  }
 0x6c8   : > { %9659 = vmatpush1.bf16.msra.mxu1 %v12465_v55  ;;  %v9739_v55 = vpack.c.bf16 %v9735_v36, %v9735_v36 }
 0x6c9   : > { %9700 = vmatpush1.bf16.msra.mxu0 %v12468_v29  ;;  %9660 = vmatprep.subr.bf16.mxu1 %v12473_v58 }
 0x6ca   : > { %9701 = vmatprep.subr.bf16.mxu0 %v12476_v18 }
 0x6cc   : > { %9661 = vmatpush1.bf16.msra.mxu1 %v12471_v47  ;;  %v12546_v47 = vld [vmem:[%s13242_s14 + $0x30] sm:$0xff]  }
 0x6cd   : > { %9702 = vmatpush1.bf16.msra.mxu0 %v12474_v3  ;;  %9662 = vmatprep.subr.bf16.mxu1 %v12479_v51  ;;  %v12547_v3 = vld [vmem:[%s13242_s14 + $0x68] sm:$0xff]  }
 0x6ce   : > { %9703 = vmatprep.subr.bf16.mxu0 %v12482_v52 }
 0x6d0   : > { %9663 = vmatpush1.bf16.msra.mxu1 %v12477_v32 }
 0x6d1   : > { %9704 = vmatpush1.bf16.msra.mxu0 %v12480_v6  ;;  %9664 = vmatprep.subr.bf16.mxu1 %v12485_v8 }
 0x6d2   : > { %9705 = vmatprep.subr.bf16.mxu0 %v12488_v15  ;;  %v12549_v15 = vld [vmem:[%s13242_s14 + $0x60] sm:$0xff]  }
 0x6d4   : > { %9665 = vmatpush1.bf16.msra.mxu1 %v12483_v45 }
 0x6d5   : > { %9706 = vmatpush1.bf16.msra.mxu0 %v12486_v11  ;;  %9666 = vmatprep.subr.bf16.mxu1 %v12491_v46  ;;  %v12559_v11 = vld [vmem:[%s13242_s14 + $0xf8] sm:$0xff]  }
 0x6d6   : > { %9707 = vmatprep.subr.bf16.mxu0 %v12494_v22  ;;  %v12560_v46 = vld [vmem:[%s13242_s14 + $0xb8] sm:$0xff]   ;;  %v12561_v22 = vld [vmem:[%s13242_s14 + $0xf0] sm:$0xff]  }
 0x6d8   : > { %9667 = vmatpush1.bf16.msra.mxu1 %v12489_v25  ;;  %v12550_v25 = vld [vmem:[%s13242_s14 + $0x20] sm:$0xff]  }
 0x6d9   : > { %9708 = vmatpush1.bf16.msra.mxu0 %v12492_v16  ;;  %9668 = vmatprep.subr.bf16.mxu1 %v12497_v17  ;;  %v12551_v16 = vld [vmem:[%s13242_s14 + $0x58] sm:$0xff]   ;;  %v12562_v17 = vld [vmem:[%s13242_s14 + $0xb0] sm:$0xff]  }
 0x6da   : > { %9709 = vmatprep.subr.bf16.mxu0 %v12500_v19  ;;  %v12563_v19 = vld [vmem:[%s13242_s14 + $0xe8] sm:$0xff]  }
 0x6dc   : > { %9669 = vmatpush2.bf16.msra.mxu1 %v12495_v0  ;;  %v12552_v0 = vld [vmem:[%s13242_s14 + $0x18] sm:$0xff]  }
 0x6dd   : > { %9710 = vmatpush2.bf16.msra.mxu0 %v12498_v30  ;;  %9670 = vmatprep.subr.bf16.mxu1 %v12503_v31  ;;  %v12553_v30 = vld [vmem:[%s13242_s14 + $0x50] sm:$0xff]   ;;  %v12564_v31 = vld [vmem:[%s13242_s14 + $0xa8] sm:$0xff]  }
 0x6de   : > { %9711 = vmatprep.subr.bf16.mxu0 %v12506_v20  ;;  %v12565_v20 = vld [vmem:[%s13242_s14 + $0xe0] sm:$0xff]  }
 0x6e0   : > { %9671 = vmatpush2.bf16.msra.mxu1 %v12501_v21  ;;  %v12554_v21 = vld [vmem:[%s13242_s14 + $0x10] sm:$0xff]  }
 0x6e1   : > { %9712 = vmatpush2.bf16.msra.mxu0 %v12504_v28  ;;  %9672 = vmatprep.subr.bf16.mxu1 %v12509_v24  ;;  %v12555_v28 = vld [vmem:[%s13242_s14 + $0x48] sm:$0xff]   ;;  %v12566_v24 = vld [vmem:[%s13242_s14 + $0xa0] sm:$0xff]  }
 0x6e2   : > { %9713 = vmatprep.subr.bf16.mxu0 %v12512_v62  ;;  %v12567_v62 = vld [vmem:[%s13242_s14 + $0xd8] sm:$0xff]  }
 0x6e4   : > { %9673 = vmatpush2.bf16.msra.mxu1 %v12507_v43  ;;  %v12556_v43 = vld [vmem:[%s13242_s14 + $0x8] sm:$0xff]  }
 0x6e5   : > { %9714 = vmatpush2.bf16.msra.mxu0 %v12510_v60  ;;  %9674 = vmatprep.subr.bf16.mxu1 %v12515_v61  ;;  %v12557_v60 = vld [vmem:[%s13242_s14 + $0x40] sm:$0xff]   ;;  %v12568_v61 = vld [vmem:[%s13242_s14 + $0x98] sm:$0xff]  }
 0x6e6   : > { %9715 = vmatprep.subr.bf16.mxu0 %v12518_v5  ;;  %v12558_v5 = vld [vmem:[%s13242_s14] sm:$0xff]  }
 0x6e8   : > { %9675 = vmatpush2.bf16.msra.mxu1 %v12513_v63  ;;  %v9734_v63 = vmax.f32 %v13995_v39, 0.0 }
 0x6e9   : > { %9716 = vmatpush2.bf16.msra.mxu0 %v12516_v50  ;;  %9676 = vmatprep.subr.bf16.mxu1 %v12521_v26 }
 0x6ea   : > { %9717 = vmatprep.subr.bf16.mxu0 %v12524_v37  ;;  %v9738_v50 = vpack.c.bf16 %v9734_v63, %v9734_v63  ;;  %v12569_v37 = vld [vmem:[%s13242_s14 + $0xd0] sm:$0xff]  }
 0x6ec   : > { %9677 = vmatpush2.bf16.msra.mxu1 %v12519_v13 }
 0x6ed   : > { %9718 = vmatpush2.bf16.msra.mxu0 %v12522_v33  ;;  %9678 = vmatprep.subr.bf16.mxu1 %v12527_v34  ;;  %v12570_v34 = vld [vmem:[%s13242_s14 + $0x90] sm:$0xff]  }
 0x6ee   : > { %9719 = vmatprep.subr.bf16.mxu0 %v12530_v56 }
 0x6f0   : > { %9679 = vmatpush2.bf16.msra.mxu1 %v12525_v2 }
 0x6f1   : > { %9720 = vmatpush2.bf16.msra.mxu0 %v12528_v48  ;;  %9680 = vmatprep.subr.bf16.mxu1 %v12533_v9 }
 0x6f2   : > { %9721 = vmatprep.subr.bf16.mxu0 %v12536_v27  ;;  %v12571_v27 = vld [vmem:[%s13242_s14 + $0xc8] sm:$0xff]  }
 0x6f4   : > { %9681 = vmatpush2.bf16.msra.mxu1 %v12531_v59 }
 0x6f5   : > { %9722 = vmatpush2.bf16.msra.mxu0 %v12534_v41  ;;  %9682 = vmatprep.subr.bf16.mxu1 %v12539_v38  ;;  %v12572_v41 = vld [vmem:[%s13242_s14 + $0x88] sm:$0xff]  }
 0x6f6   : > { %9723 = vmatprep.subr.bf16.mxu0 %v12542_v42 }
 0x6f8   : > { %9683 = vmatpush2.bf16.msra.mxu1 %v12537_v10  ;;  %v12574_v10 = vld [vmem:[%s13242_s14 + $0x80] sm:$0xff]  }
 0x6f9   : > { %9724 = vmatpush2.bf16.msra.mxu0 %v12540_v44  ;;  %11526 = vmatprep.subr.bf16.mxu1 %v12543_v54 }
 0x6fa   : > { %11548 = vmatprep.subr.bf16.mxu0 %v12559_v11 }
 0x6fb   : > { %v9440_v29 = vpop.f32.mrf.mxu1  ;;  %9685 = vmatmul.mubr.bf16.vlgmr.msra.gmra.mxu1 %v13758_v12 }
 0x6fc   : > { %v9441_v58 = vadd.f32 %v9440_v29, %v6509_v35  ;;  %v9481_v18 = vpop.f32.mrf.mxu0  ;;  %9726 = vmatmul.mubr.bf16.vlgmr.msra.gmra.mxu0 %v13761_v14  ;;  %11527 = vmatpush3.bf16.msra.mxu1 %v12544_v49  ;;  %v12548_v14 = vld [vmem:[%s13242_s14 + $0x28] sm:$0xff]  }
 0x6fd   : > { %10030 = vmatprep.mubr.bf16.mxu1 %v9739_v55  ;;  %v9442_v1 = vpop.f32.mrf.mxu1  ;;  %11528 = vmatprep.subr.bf16.mxu1 %v12545_v53 }
 0x6fe   : > { %v9482_v4 = vadd.f32 %v9481_v18, %v9441_v58  ;;  %v9443_v51 = vadd.f32 %v9442_v1, %v6513_v57  ;;  %v9483_v52 = vpop.f32.mrf.mxu0  ;;  %11549 = vmatpush3.bf16.msra.mxu0 %v12560_v46 }
 0x6ff   : > { %v9444_v12 = vpop.f32.mrf.mxu1  ;;  %11550 = vmatprep.subr.bf16.mxu0 %v12561_v22 }
 0x700   : > { %v9484_v32 = vadd.f32 %v9483_v52, %v9443_v51  ;;  %v9485_v6 = vpop.f32.mrf.mxu0  ;;  %11529 = vmatpush3.bf16.msra.mxu1 %v12546_v47 }
 0x701   : > { %v9445_v8 = vpop.f32.mrf.mxu1  ;;  %11530 = vmatprep.subr.bf16.mxu1 %v12547_v3 }
 0x702   : > { %v9486_v45 = vpop.f32.mrf.mxu0  ;;  %11551 = vmatpush3.bf16.msra.mxu0 %v12562_v17 }
 0x703   : > { %11552 = vmatprep.subr.bf16.mxu0 %v12563_v19 }
 0x704   : > { %11531 = vmatpush3.bf16.msra.mxu1 %v12548_v14 }
 0x705   : > { %11532 = vmatprep.subr.bf16.mxu1 %v12549_v15 }
 0x706   : > { %11553 = vmatpush3.bf16.msra.mxu0 %v12564_v31 }
 0x707   : > { %11554 = vmatprep.subr.bf16.mxu0 %v12565_v20 }
 0x708   : > { %11533 = vmatpush3.bf16.msra.mxu1 %v12550_v25 }
 0x709   : > { %11534 = vmatprep.subr.bf16.mxu1 %v12551_v16 }
 0x70a   : > { %11555 = vmatpush3.bf16.msra.mxu0 %v12566_v24 }
 0x70b   : > { %11556 = vmatprep.subr.bf16.mxu0 %v12567_v62 }
 0x70c   : > { %11535 = vmatpush3.bf16.msra.mxu1 %v12552_v0 }
 0x70d   : > { %11536 = vmatprep.subr.bf16.mxu1 %v12553_v30 }
 0x70e   : > { %11557 = vmatpush3.bf16.msra.mxu0 %v12568_v61 }
 0x70f   : > { %11558 = vmatprep.subr.bf16.mxu0 %v12569_v37 }
 0x710   : > { %11537 = vmatpush3.bf16.msra.mxu1 %v12554_v21 }
 0x711   : > { %11538 = vmatprep.subr.bf16.mxu1 %v12555_v28 }
 0x712   : > { %11559 = vmatpush3.bf16.msra.mxu0 %v12570_v34 }
 0x713   : > { %11560 = vmatprep.subr.bf16.mxu0 %v12571_v27 }
 0x714   : > { %11539 = vmatpush3.bf16.msra.mxu1 %v12556_v43 }
 0x715   : > { %11540 = vmatprep.subr.bf16.mxu1 %v12557_v60 }
 0x716   : > { %11561 = vmatpush3.bf16.msra.mxu0 %v12572_v41 }
 0x717   : > { %11562 = vmatprep.subr.bf16.mxu0 %v12573_v7 }
 0x718   : > { %11541 = vmatpush3.bf16.msra.mxu1 %v12558_v5 }
 0x71a   : > { %11563 = vmatpush3.bf16.msra.mxu0 %v12574_v10 }
 0x71b   : > { %10031 = vmatmul.mubr.bf16.vlgmr.msra.gmra.mxu1 %v9738_v50 }
 0x73b   : > { %v9522_v26 = vpop.f32.mrf.mxu1 }
 0x73c   : > { %v9523_v13 = vadd.f32 %v9522_v26, %v9482_v4  ;;  %v9563_v33 = vpop.f32.mrf.mxu0 }
 0x73d   : > { %v9524_v56 = vpop.f32.mrf.mxu1 }
 0x73e   : > { %v9564_v2 = vadd.f32 %v9563_v33, %v9523_v13  ;;  %v9525_v48 = vadd.f32 %v9524_v56, %v9484_v32  ;;  %v9565_v9 = vpop.f32.mrf.mxu0 }
 0x73f   : > { %v9526_v39 = vpop.f32.mrf.mxu1 }
 0x740   : > { %v9566_v23 = vadd.f32 %v9565_v9, %v9525_v48  ;;  %v9567_v59 = vpop.f32.mrf.mxu0 }
 0x741   : > { %v9527_v38 = vpop.f32.mrf.mxu1 }
 0x742   : > { %v9568_v42 = vpop.f32.mrf.mxu0 }
 0x77b   : > { %v9604_v44 = vpop.f32.mrf.mxu1 }
 0x77c   : > { %v9605_v54 = vadd.f32 %v9604_v44, %v9564_v2  ;;  %v9645_v36 = vpop.f32.mrf.mxu0 }
 0x77d   : > { %v9606_v40 = vpop.f32.mrf.mxu1 }
 0x77e   : > { %v9646_v35 = vadd.f32 %v9645_v36, %v9605_v54  ;;  %v9647_v49 = vpop.f32.mrf.mxu0  ;;  %v9607_v58 = vadd.f32 %v9606_v40, %v9566_v23 }
 0x77f   : > { %v9608_v53 = vpop.f32.mrf.mxu1 }
 0x780   : > { %v9649_v57 = vpop.f32.mrf.mxu0  ;;  %v9648_v47 = vadd.f32 %v9647_v49, %v9607_v58 }
 0x781   : > { %v9609_v55 = vpop.f32.mrf.mxu1 }
 0x782   : > { %v9650_v29 = vpop.f32.mrf.mxu0 }
 0x7bb   : > { %v9686_v18 = vpop.f32.mrf.mxu1 }
 0x7bc   : > { %v9687_v1 = vadd.f32 %v9686_v18, %v9646_v35  ;;  %v9727_v3 = vpop.f32.mrf.mxu0 }
 0x7bd   : > { %v9688_v4 = vpop.f32.mrf.mxu1 }
 0x7be   : > { %v9728_v51 = vadd.f32 %v9727_v3, %v9687_v1  ;;  %v9689_v52 = vadd.f32 %v9688_v4, %v9648_v47  ;;  %v9729_v12 = vpop.f32.mrf.mxu0 }
 0x7bf   : > { %v9690_v32 = vpop.f32.mrf.mxu1 }
 0x7c0   : > { %v9730_v6 = vadd.f32 %v9729_v12, %v9689_v52  ;;  %v9731_v14 = vpop.f32.mrf.mxu0  ;;  %v9736_v8 = vmax.f32 %v9728_v51, 0.0 }
 0x7c1   : > { %v9691_v15 = vpop.f32.mrf.mxu1 }
 0x7c2   : > { %v9737_v45 = vmax.f32 %v9730_v6, 0.0  ;;  %v9732_v11 = vpop.f32.mrf.mxu0  ;;  %v9740_v22 = vpack.c.bf16 %v9736_v8, %v9736_v8 }
 0x7c4   : > { %v9741_v46 = vpack.c.bf16 %v9737_v45, %v9737_v45 }
 0x7c6   : > { %10070 = vmatprep.mubr.bf16.mxu0 %v9741_v46 }
 0x7c7   : > { %10071 = vmatmul.mubr.bf16.vlgmr.msra.gmra.mxu0 %v9740_v22 }
 0x7db   : > { %v11542_v25 = vpop.f32.mrf.mxu1 }
 0x7dd   : > { %v11543_v16 = vpop.f32.mrf.mxu1 }
 0x7de   : > { %v11544_v17 = vadd.f32 %v11543_v16, %v11542_v25 }
 0x7df   : > { %v11545_v19 = vpop.f32.mrf.mxu1 }
 0x7e1   : > { %v11546_v0 = vpop.f32.mrf.mxu1 }
 0x887   : > { %v11564_v30 = vpop.f32.mrf.mxu0 }
 0x889   : > { %v11565_v31 = vpop.f32.mrf.mxu0 }
 0x88a   : > { %v11566_v20 = vadd.f32 %v11565_v31, %v11564_v30 }
 0x88b   : > { %v11567_v21 = vpop.f32.mrf.mxu0 }
 0x88c   : > { %v10073_v28 = vadd.f32 %v11566_v20, %v11544_v17 }
 0x88d   : > { %v11568_v24 = vpop.f32.mrf.mxu0 }
 0x88e   : > { %10078 = vst [vmem:[%s605_s15] sm:$0x3] %v10073_v28 }
 0x88f PF: > { %s14182_s24 = sld [smem:[#allocation25_spill]]  ;;  %s14185_s21 = smov %s12888_s22 }
 0x890   : > { %s14183_s25 = sld [smem:[#allocation24_spill]] }
 0x891   : > { %s14184_s23 = sld [smem:[#allocation26_spill]] }
 0x895   : > { %p29_p13 = scmp.ge.s32.totalorder %s14182_s24, 4  }
 0x896   : > { %s14186_s22 = smov %s14183_s25 }
 0x897   :  { %31 = sbr.rel (!%p29_p13) target bundleno = 16 (0x10), region = 161 }
 0x89c   :  { %10098 = vsyncpa [#allocation3], 1 }
 0x89d   :  { %10100 = vsyncpa [#allocation3 + $0x1], 1 }
 0x89e   :  { %10101 = vsyncpa [#allocation5], 1 }
 0x89f   :  { %10102 = vsyncpa [#allocation8], 1 }
 0x8a0   :  { %10103 = vsyncpa [#allocation11], 1 }
 0x8a1   :  { %10104 = vsyncpa [#allocation14], 1 }
 0x8a2   :  { %10106 = vsyncpa [#allocation14 + $0x1], 1 }
 0x8a3   :  { %10107 = vsyncpa [#allocation17], 1 }
 0x8a4   :  { %10109 = vsyncpa [#allocation17 + $0x1], 1 }

</bundles_post_ra>
